<compile_context>
chip_gen: v7x
topology: tpu7x:2x2x1
jax: 0.10.0
libtpu: 0.0.40
codegen_flags: <defaults>
</compile_context>

<pallas_src>
import functools

import jax
import jax.numpy as jnp
from jax.experimental import pallas as pl
from jax.experimental.pallas import tpu as pltpu


# ---------------------------------------------------------------------------
# Fused per-band kernel.
#   x_ref  : (1, H+2, W, Cin)     bf16  zero-row-padded input image (resident)
#   wt_ref : (Cin, 4*Cout)        bf16  deconv weights, columns ordered (a,b,co)
#   bt_ref : (1, 4*Cout)          f32   deconv bias tiled over the 4 taps
#   wc_ref : (3, 3, Cout, Cout)   bf16  3x3 conv weights (ky, kx, ci, co)
#   bc_ref : (1, Cout)            f32   conv bias
#   o_ref  : (1, tb, Wp, Cout)    f32   output row band (tb = 2*ti rows)
#   pad_ref: (tb+2, Wp+16, Cout)  bf16  band + 1px halo; interior cols [8, 8+Wp)
# ---------------------------------------------------------------------------
def _upconv_band_kernel(x_ref, wt_ref, bt_ref, wc_ref, bc_ref, o_ref, pad_ref):
    _, _, W, Cin = x_ref.shape
    _, tb, Wp, Cout = o_ref.shape
    ti = tb // 2
    r = pl.program_id(1)
    nb = pl.num_programs(1)

    # ---- ConvTranspose2d(k=2, s=2) + ReLU on the band (+1-row halo each side).
    # Padded-input rows [r*ti, r*ti + ti + 2) == original rows [r*ti-1, (r+1)*ti+1).
    xs = x_ref[0, pl.ds(r * ti, ti + 2), :, :]                   # (ti+2, W, Cin)
    y = jnp.dot(xs.reshape((ti + 2) * W, Cin), wt_ref[...],
                preferred_element_type=jnp.float32)              # 1 MXU matmul/band
    y = jnp.maximum(y + bt_ref[...], 0.0)                        # f32 VPU epilogue
    y3 = y.reshape(ti + 2, W, 4 * Cout)

    # Interleave the 4 (a, b) taps into deconv rows (2*(ti+2), Wp, Cout).
    d00 = y3[:, :, 0 * Cout:1 * Cout]                            # (a=0, b=0)
    d01 = y3[:, :, 1 * Cout:2 * Cout]                            # (a=0, b=1)
    d10 = y3[:, :, 2 * Cout:3 * Cout]                            # (a=1, b=0)
    d11 = y3[:, :, 3 * Cout:4 * Cout]                            # (a=1, b=1)
    row_a0 = jnp.stack([d00, d01], axis=2).reshape(ti + 2, Wp, Cout)
    row_a1 = jnp.stack([d10, d11], axis=2).reshape(ti + 2, Wp, Cout)
    band = jnp.stack([row_a0, row_a1], axis=1).reshape(2 * ti + 4, Wp, Cout)

    # Scratch rows [0, tb+2) hold deconv rows [2*r*ti - 1, 2*(r+1)*ti + 1).
    # Interior store starts at column 8 -> sublane-aligned, unmasked vst.
    pad_ref[0:tb + 2, 8:8 + Wp, :] = band[1:tb + 3, :, :].astype(jnp.bfloat16)

    # Conv zero padding: guard columns every step (cheap, O(rows)); halo rows
    # only at the image top/bottom (zero-padded input rows would otherwise
    # leave relu(bias) where the conv expects zero padding).
    zero_cols = jnp.zeros((tb + 2, 8, Cout), jnp.bfloat16)
    pad_ref[:, 0:8, :] = zero_cols
    pad_ref[:, 8 + Wp:16 + Wp, :] = zero_cols

    @pl.when(r == 0)
    def _():
        pad_ref[0, :, :] = jnp.zeros((Wp + 16, Cout), jnp.bfloat16)

    @pl.when(r == nb - 1)
    def _():
        pad_ref[tb + 1, :, :] = jnp.zeros((Wp + 16, Cout), jnp.bfloat16)

    # ---- Conv2d(3x3, stride=1, pad=1) + ReLU: 9 shifted bf16 MXU matmuls,
    # f32 accumulation; bias broadcast hoisted (single broadcast per band).
    acc = jnp.broadcast_to(bc_ref[...], (tb * Wp, Cout)).astype(jnp.float32)
    for ky in range(3):
        for kx in range(3):
            s = pad_ref[ky:ky + tb, kx + 7:kx + 7 + Wp, :]
            acc = acc + jnp.dot(s.reshape(tb * Wp, Cout), wc_ref[ky, kx],
                                preferred_element_type=jnp.float32)
    o_ref[0] = jnp.maximum(acc, 0.0).reshape(tb, Wp, Cout).astype(o_ref.dtype)


# ---------------------------------------------------------------------------
# Parameter construction (mirrors nn.Module __init__ shapes), pre-packed into
# kernel-friendly layouts (bf16 weights, f32 biases).
# ---------------------------------------------------------------------------
def init_upconv_params(key, in_ch, out_ch):
    k0, k1, k2, k3 = jax.random.split(key, 4)
    wt_torch = jax.random.normal(k0, (in_ch, out_ch, 2, 2), jnp.float32) * 0.1
    bt = jax.random.normal(k1, (out_ch,), jnp.float32) * 0.1
    wc_torch = jax.random.normal(k2, (out_ch, out_ch, 3, 3), jnp.float32) * 0.1
    bc = jax.random.normal(k3, (out_ch,), jnp.float32) * 0.1
    # (in, out, 2, 2) -> (in, a, b, out) -> (in, 4*out); columns ordered (a,b,co)
    wt_packed = jnp.transpose(wt_torch, (0, 2, 3, 1)).reshape(in_ch, 4 * out_ch)
    bt_packed = jnp.tile(bt.reshape(1, out_ch), (1, 4))          # (1, 4*out)
    wc_packed = jnp.transpose(wc_torch, (2, 3, 1, 0))            # (ky, kx, ci, co)
    return {
        "wt": wt_packed.astype(jnp.bfloat16),
        "bt": bt_packed.astype(jnp.float32),
        "wc": wc_packed.astype(jnp.bfloat16),
        "bc": bc.reshape(1, out_ch).astype(jnp.float32),
        # torch layouts kept (f32) for the pure-JAX reference check
        "wt_torch": wt_torch, "bt_raw": bt, "wc_torch": wc_torch, "bc_raw": bc,
    }


# ---------------------------------------------------------------------------
# NHWC-native forward (kernel + cheap channel-last pad/concat glue).
# ---------------------------------------------------------------------------
@functools.partial(jax.jit, static_argnames=("row_tile",))
def upconv_forward_nhwc(x1, x2, wt, bt, wc, bc, *, row_tile=8):
    N, H, W, Cin = x1.shape
    Cout = wc.shape[-1]
    Hp, Wp = 2 * H, 2 * W
    ti = min(row_tile, H)
    assert H % ti == 0, "input height must be divisible by the row tile"
    nb = H // ti
    tb = 2 * ti

    # bf16 MXU input; 1 zero halo row each side so every band reads a uniform
    # (ti + 2)-row slab (boundary halo rows are re-zeroed in-kernel).
    x1p = jnp.pad(x1.astype(jnp.bfloat16), ((0, 0), (1, 1), (0, 0), (0, 0)))

    # Explicit VMEM budget: block sizes + double buffering + 3x headroom,
    # clamped to the v7x 64 MiB per-TC ceiling.
    vmem_bytes = (2 * (H + 2) * W * Cin * 2            # resident input (bf16)
                  + 2 * tb * Wp * Cout * 4             # output band (f32)
                  + (tb + 2) * (Wp + 16) * Cout * 2    # halo scratch (bf16)
                  + 2 * (Cin * 4 * Cout + 9 * Cout * Cout) * 2
                  + 2 * 5 * Cout * 4)
    vmem_limit = int(min(64 * 2**20, max(16 * 2**20, 3 * vmem_bytes)))

    y = pl.pallas_call(
        _upconv_band_kernel,
        out_shape=jax.ShapeDtypeStruct((N, Hp, Wp, Cout), jnp.float32),
        grid=(N, nb),
        in_specs=[
            pl.BlockSpec((1, H + 2, W, Cin), lambda n, r: (n, 0, 0, 0)),
            pl.BlockSpec((Cin, 4 * Cout), lambda n, r: (0, 0)),
            pl.BlockSpec((1, 4 * Cout), lambda n, r: (0, 0)),
            pl.BlockSpec((3, 3, Cout, Cout), lambda n, r: (0, 0, 0, 0)),
            pl.BlockSpec((1, Cout), lambda n, r: (0, 0)),
        ],
        out_specs=pl.BlockSpec((1, tb, Wp, Cout), lambda n, r: (n, r, 0, 0)),
        scratch_shapes=[pltpu.VMEM((tb + 2, Wp + 16, Cout), jnp.bfloat16)],
        compiler_params=pltpu.CompilerParams(
            dimension_semantics=("parallel", "parallel"),
            vmem_limit_bytes=vmem_limit),
    )(x1p, wt, bt, wc, bc)

    # F.pad to x2 spatial size + channel concat.  NHWC keeps this glue cheap
    # (channel axis last -> pure copy).  Assumes diffY/diffX >= 0.
    diffY = x2.shape[1] - Hp
    diffX = x2.shape[2] - Wp
    y = jnp.pad(y, ((0, 0), (diffY // 2, diffY - diffY // 2),
                    (diffX // 2, diffX - diffX // 2), (0, 0)))
    return jnp.concatenate([x2, y.astype(x2.dtype)], axis=-1)


# ---------------------------------------------------------------------------
# PyTorch-facing NCHW wrapper (matches the module's forward signature).
# TODO(synk): keep the surrounding model NHWC to drop these transposes.
# ---------------------------------------------------------------------------
@functools.partial(jax.jit, static_argnames=("row_tile",))
def upconv_forward(x1_nchw, x2_nchw, wt, bt, wc, bc, *, row_tile=8):
    x1 = jnp.transpose(x1_nchw, (0, 2, 3, 1))
    x2 = jnp.transpose(x2_nchw, (0, 2, 3, 1))
    out = upconv_forward_nhwc(x1, x2, wt, bt, wc, bc, row_tile=row_tile)
    return jnp.transpose(out, (0, 3, 1, 2))


# ---------------------------------------------------------------------------
# Pure-JAX reference (mirrors the PyTorch module).  It quantizes at the same
# points as the kernel (bf16 x1/weights, bf16 deconv activation) so the only
# remaining difference is f32 accumulation order -> tight tolerance is valid.
# ---------------------------------------------------------------------------
def upconv_reference(x1, x2, wt_torch, bt, wc_torch, bc):
    N, Cin, H, W = x1.shape
    Cout = wt_torch.shape[1]
    hp = jax.lax.Precision.HIGHEST
    q = lambda a: a.astype(jnp.bfloat16).astype(jnp.float32)
    x1q, wtq, wcq = q(x1), q(wt_torch), q(wc_torch)
    # ConvTranspose2d(k=2,s=2): out[n,co,2i+a,2j+b] = sum_ci x[n,ci,i,j]*W[ci,co,a,b]
    up = jnp.einsum('ncij,cdab->ndiajb', x1q, wtq, precision=hp)
    up = up.reshape(N, Cout, 2 * H, 2 * W) + bt[None, :, None, None]
    up = q(jnp.maximum(up, 0.0))                     # kernel scratch is bf16
    # Conv2d(3x3, pad=1), cross-correlation
    upp = jnp.pad(up, ((0, 0), (0, 0), (1, 1), (1, 1)))
    out = jnp.zeros((N, Cout, 2 * H, 2 * W), jnp.float32) + bc[None, :, None, None]
    for ky in range(3):
        for kx in range(3):
            out = out + jnp.einsum('ncij,dc->ndij',
                                   upp[:, :, ky:ky + 2 * H, kx:kx + 2 * W],
                                   wcq[:, :, ky, kx], precision=hp)
    out = jnp.maximum(out, 0.0)
    diffY = x2.shape[2] - out.shape[2]
    diffX = x2.shape[3] - out.shape[3]
    out = jnp.pad(out, ((0, 0), (0, 0),
                        (diffY // 2, diffY - diffY // 2),
                        (diffX // 2, diffX - diffX // 2)))
    return jnp.concatenate([x2, out], axis=1)


if __name__ == "__main__":
    key = jax.random.PRNGKey(0)
    k_params, k_x1, k_x2 = jax.random.split(key, 3)

    in_ch, out_ch = 8, 4
    N, H, W = 2, 16, 16            # x1 spatial; x2 spatial = (2H, 2W)

    params = init_upconv_params(k_params, in_ch, out_ch)
    x1 = jax.random.normal(k_x1, (N, in_ch, H, W), jnp.float32)
    x2 = jax.random.normal(k_x2, (N, out_ch, 2 * H, 2 * W), jnp.float32)

    out = upconv_forward(x1, x2, params["wt"], params["bt"],
                         params["wc"], params["bc"], row_tile=8)   # 2 row bands
    out = jax.block_until_ready(out)
    assert out.shape == (N, 2 * out_ch, 2 * H, 2 * W), out.shape

    ref = upconv_reference(x1, x2, params["wt_torch"], params["bt_raw"],
                           params["wc_torch"], params["bc_raw"])
    ref = jax.block_until_ready(ref)
    max_err = float(jnp.max(jnp.abs(out - ref)))
    assert jnp.allclose(out, ref, rtol=1e-2, atol=1e-2), max_err

    print("KERNEL_OK")
</pallas_src>

<mosaic_0001>
module attributes {stable_mosaic.version = 11 : i64} {
  func.func @_upconv_band_kernel(%arg0: i32, %arg1: i32, %arg2: memref<1x18x16x8xbf16, #tpu.memory_space<vmem>>, %arg3: memref<8x16xbf16, #tpu.memory_space<vmem>>, %arg4: memref<1x16xf32, #tpu.memory_space<vmem>>, %arg5: memref<3x3x4x4xbf16, #tpu.memory_space<vmem>>, %arg6: memref<1x4xf32, #tpu.memory_space<vmem>>, %arg7: memref<1x16x32x4xf32, #tpu.memory_space<vmem>>, %arg8: memref<18x48x4xbf16, #tpu.memory_space<vmem>>) attributes {dimension_semantics = [#tpu.dimension_semantics<parallel>, #tpu.dimension_semantics<parallel>], iteration_bounds = array<i64: 2, 2>, scalar_prefetch = 0 : i64, scratch_operands = 1 : i64, tpu.core_type = #tpu.core_type<tc>, window_params = [{transform_indices = @transform_0, window_bounds = array<i64: 1, 18, 16, 8>}, {pipeline_mode = #tpu.pipeline_mode<synchronous>, transform_indices = @transform_1, window_bounds = array<i64: 8, 16>}, {pipeline_mode = #tpu.pipeline_mode<synchronous>, transform_indices = @transform_2, window_bounds = array<i64: 1, 16>}, {pipeline_mode = #tpu.pipeline_mode<synchronous>, transform_indices = @transform_3, window_bounds = array<i64: 3, 3, 4, 4>}, {pipeline_mode = #tpu.pipeline_mode<synchronous>, transform_indices = @transform_4, window_bounds = array<i64: 1, 4>}, {transform_indices = @transform_5, window_bounds = array<i64: 1, 16, 32, 4>}]} {
    %c8_i32 = arith.constant 8 : i32
    %0 = arith.muli %arg1, %c8_i32 : i32
    %c0 = arith.constant 0 : index
    %1 = arith.index_cast %0 : i32 to index
    %c0_0 = arith.constant 0 : index
    %c0_1 = arith.constant 0 : index
    %2 = vector.load %arg2[%c0, %1, %c0_0, %c0_1] : memref<1x18x16x8xbf16, #tpu.memory_space<vmem>>, vector<1x10x16x8xbf16>
    %3 = vector.shape_cast %2 : vector<1x10x16x8xbf16> to vector<10x16x8xbf16>
    %4 = vector.shape_cast %3 : vector<10x16x8xbf16> to vector<160x8xbf16>
    %c0_2 = arith.constant 0 : index
    %c0_3 = arith.constant 0 : index
    %5 = vector.load %arg3[%c0_2, %c0_3] : memref<8x16xbf16, #tpu.memory_space<vmem>>, vector<8x16xbf16>
    %cst = arith.constant dense<0.000000e+00> : vector<160x16xf32>
    %6 = tpu.matmul %4, %5, %cst {dimension_numbers = #tpu.dot_dimension_numbers<[1], [0], [0], [1], [0, 0, 1, 1], [], []>} : vector<160x8xbf16>, vector<8x16xbf16>, vector<160x16xf32> -> vector<160x16xf32>
    %c0_4 = arith.constant 0 : index
    %c0_5 = arith.constant 0 : index
    %7 = vector.load %arg4[%c0_4, %c0_5] : memref<1x16xf32, #tpu.memory_space<vmem>>, vector<1x16xf32>
    %8 = vector.broadcast %7 : vector<1x16xf32> to vector<160x16xf32>
    %9 = arith.addf %6, %8 : vector<160x16xf32>
    %cst_6 = arith.constant 0.000000e+00 : f32
    %10 = vector.broadcast %cst_6 : f32 to vector<160x16xf32>
    %11 = arith.maximumf %9, %10 : vector<160x16xf32>
    %12 = vector.shape_cast %11 : vector<160x16xf32> to vector<10x16x16xf32>
    %13 = vector.extract_strided_slice %12 {offsets = [0, 0, 0], sizes = [10, 16, 4], strides = [1, 1, 1]} : vector<10x16x16xf32> to vector<10x16x4xf32>
    %14 = vector.extract_strided_slice %12 {offsets = [0, 0, 4], sizes = [10, 16, 4], strides = [1, 1, 1]} : vector<10x16x16xf32> to vector<10x16x4xf32>
    %15 = vector.extract_strided_slice %12 {offsets = [0, 0, 8], sizes = [10, 16, 4], strides = [1, 1, 1]} : vector<10x16x16xf32> to vector<10x16x4xf32>
    %16 = vector.extract_strided_slice %12 {offsets = [0, 0, 12], sizes = [10, 16, 4], strides = [1, 1, 1]} : vector<10x16x16xf32> to vector<10x16x4xf32>
    %17 = vector.shape_cast %13 : vector<10x16x4xf32> to vector<10x16x1x4xf32>
    %18 = vector.shape_cast %14 : vector<10x16x4xf32> to vector<10x16x1x4xf32>
    %19 = tpu.concatenate %17, %18 in 2 : vector<10x16x1x4xf32>, vector<10x16x1x4xf32> -> vector<10x16x2x4xf32>
    %20 = vector.shape_cast %19 : vector<10x16x2x4xf32> to vector<10x32x4xf32>
    %21 = vector.shape_cast %15 : vector<10x16x4xf32> to vector<10x16x1x4xf32>
    %22 = vector.shape_cast %16 : vector<10x16x4xf32> to vector<10x16x1x4xf32>
    %23 = tpu.concatenate %21, %22 in 2 : vector<10x16x1x4xf32>, vector<10x16x1x4xf32> -> vector<10x16x2x4xf32>
    %24 = vector.shape_cast %23 : vector<10x16x2x4xf32> to vector<10x32x4xf32>
    %25 = vector.shape_cast %20 : vector<10x32x4xf32> to vector<10x1x32x4xf32>
    %26 = vector.shape_cast %24 : vector<10x32x4xf32> to vector<10x1x32x4xf32>
    %27 = tpu.concatenate %25, %26 in 1 : vector<10x1x32x4xf32>, vector<10x1x32x4xf32> -> vector<10x2x32x4xf32>
    %28 = vector.shape_cast %27 : vector<10x2x32x4xf32> to vector<20x32x4xf32>
    %29 = vector.extract_strided_slice %28 {offsets = [1, 0, 0], sizes = [18, 32, 4], strides = [1, 1, 1]} : vector<20x32x4xf32> to vector<18x32x4xf32>
    %30 = arith.truncf %29 : vector<18x32x4xf32> to vector<18x32x4xbf16>
    %c0_7 = arith.constant 0 : index
    %c8 = arith.constant 8 : index
    %c0_8 = arith.constant 0 : index
    %31 = vector.load %arg8[%c0_7, %c8, %c0_8] : memref<18x48x4xbf16, #tpu.memory_space<vmem>>, vector<18x32x4xbf16>
    tpu.vector_store %arg8[%c0_7, %c8, %c0_8], %30 {strides = array<i32>} : memref<18x48x4xbf16, #tpu.memory_space<vmem>>, vector<18x32x4xbf16>,
    %cst_9 = arith.constant 0.000000e+00 : bf16
    %32 = vector.broadcast %cst_9 : bf16 to vector<18x8x4xbf16>
    %c0_10 = arith.constant 0 : index
    %c0_11 = arith.constant 0 : index
    %c0_12 = arith.constant 0 : index
    %33 = vector.load %arg8[%c0_10, %c0_11, %c0_12] : memref<18x48x4xbf16, #tpu.memory_space<vmem>>, vector<18x8x4xbf16>
    tpu.vector_store %arg8[%c0_10, %c0_11, %c0_12], %32 {strides = array<i32>} : memref<18x48x4xbf16, #tpu.memory_space<vmem>>, vector<18x8x4xbf16>,
    %c0_13 = arith.constant 0 : index
    %c40 = arith.constant 40 : index
    %c0_14 = arith.constant 0 : index
    %34 = vector.load %arg8[%c0_13, %c40, %c0_14] : memref<18x48x4xbf16, #tpu.memory_space<vmem>>, vector<18x8x4xbf16>
    tpu.vector_store %arg8[%c0_13, %c40, %c0_14], %32 {strides = array<i32>} : memref<18x48x4xbf16, #tpu.memory_space<vmem>>, vector<18x8x4xbf16>,
    %c0_i32 = arith.constant 0 : i32
    %35 = arith.cmpi eq, %arg1, %c0_i32 : i32
    %36 = arith.extui %35 : i1 to i32
    %c0_i32_15 = arith.constant 0 : i32
    %37 = arith.cmpi ne, %36, %c0_i32_15 : i32
    scf.if %37 {
      %cst_92 = arith.constant 0.000000e+00 : bf16
      %104 = vector.broadcast %cst_92 : bf16 to vector<48x4xbf16>
      %c0_93 = arith.constant 0 : index
      %c0_94 = arith.constant 0 : index
      %c0_95 = arith.constant 0 : index
      %105 = vector.load %arg8[%c0_93, %c0_94, %c0_95] : memref<18x48x4xbf16, #tpu.memory_space<vmem>>, vector<1x48x4xbf16>
      %106 = vector.shape_cast %105 : vector<1x48x4xbf16> to vector<48x4xbf16>
      %107 = vector.shape_cast %104 : vector<48x4xbf16> to vector<1x48x4xbf16>
      tpu.vector_store %arg8[%c0_93, %c0_94, %c0_95], %107 {strides = array<i32>} : memref<18x48x4xbf16, #tpu.memory_space<vmem>>, vector<1x48x4xbf16>,
    } else {
    }
    %c1_i32 = arith.constant 1 : i32
    %38 = arith.cmpi eq, %arg1, %c1_i32 : i32
    %39 = arith.extui %38 : i1 to i32
    %c0_i32_16 = arith.constant 0 : i32
    %40 = arith.cmpi ne, %39, %c0_i32_16 : i32
    scf.if %40 {
      %cst_92 = arith.constant 0.000000e+00 : bf16
      %104 = vector.broadcast %cst_92 : bf16 to vector<48x4xbf16>
      %c17 = arith.constant 17 : index
      %c0_93 = arith.constant 0 : index
      %c0_94 = arith.constant 0 : index
      %105 = vector.load %arg8[%c17, %c0_93, %c0_94] : memref<18x48x4xbf16, #tpu.memory_space<vmem>>, vector<1x48x4xbf16>
      %106 = vector.shape_cast %105 : vector<1x48x4xbf16> to vector<48x4xbf16>
      %107 = vector.shape_cast %104 : vector<48x4xbf16> to vector<1x48x4xbf16>
      tpu.vector_store %arg8[%c17, %c0_93, %c0_94], %107 {strides = array<i32>} : memref<18x48x4xbf16, #tpu.memory_space<vmem>>, vector<1x48x4xbf16>,
    } else {
    }
    %c0_17 = arith.constant 0 : index
    %c0_18 = arith.constant 0 : index
    %41 = vector.load %arg6[%c0_17, %c0_18] : memref<1x4xf32, #tpu.memory_space<vmem>>, vector<1x4xf32>
    %42 = vector.shape_cast %41 : vector<1x4xf32> to vector<1x4xf32>
    %43 = vector.broadcast %42 : vector<1x4xf32> to vector<512x4xf32>
    %c0_19 = arith.constant 0 : index
    %c7 = arith.constant 7 : index
    %c0_20 = arith.constant 0 : index
    %44 = vector.load %arg8[%c0_19, %c7, %c0_20] : memref<18x48x4xbf16, #tpu.memory_space<vmem>>, vector<16x32x4xbf16>
    %45 = vector.shape_cast %44 : vector<16x32x4xbf16> to vector<512x4xbf16>
    %c0_21 = arith.constant 0 : index
    %c0_22 = arith.constant 0 : index
    %c0_23 = arith.constant 0 : index
    %c0_24 = arith.constant 0 : index
    %46 = vector.load %arg5[%c0_21, %c0_22, %c0_23, %c0_24] : memref<3x3x4x4xbf16, #tpu.memory_space<vmem>>, vector<1x1x4x4xbf16>
    %47 = vector.shape_cast %46 : vector<1x1x4x4xbf16> to vector<4x4xbf16>
    %cst_25 = arith.constant dense<0.000000e+00> : vector<512x4xf32>
    %48 = tpu.matmul %45, %47, %cst_25 {dimension_numbers = #tpu.dot_dimension_numbers<[1], [0], [0], [1], [0, 0, 1, 1], [], []>} : vector<512x4xbf16>, vector<4x4xbf16>, vector<512x4xf32> -> vector<512x4xf32>
    %49 = arith.addf %43, %48 : vector<512x4xf32>
    %c0_26 = arith.constant 0 : index
    %c8_27 = arith.constant 8 : index
    %c0_28 = arith.constant 0 : index
    %50 = vector.load %arg8[%c0_26, %c8_27, %c0_28] : memref<18x48x4xbf16, #tpu.memory_space<vmem>>, vector<16x32x4xbf16>
    %51 = vector.shape_cast %50 : vector<16x32x4xbf16> to vector<512x4xbf16>
    %c0_29 = arith.constant 0 : index
    %c1 = arith.constant 1 : index
    %c0_30 = arith.constant 0 : index
    %c0_31 = arith.constant 0 : index
    %52 = vector.load %arg5[%c0_29, %c1, %c0_30, %c0_31] : memref<3x3x4x4xbf16, #tpu.memory_space<vmem>>, vector<1x1x4x4xbf16>
    %53 = vector.shape_cast %52 : vector<1x1x4x4xbf16> to vector<4x4xbf16>
    %cst_32 = arith.constant dense<0.000000e+00> : vector<512x4xf32>
    %54 = tpu.matmul %51, %53, %cst_32 {dimension_numbers = #tpu.dot_dimension_numbers<[1], [0], [0], [1], [0, 0, 1, 1], [], []>} : vector<512x4xbf16>, vector<4x4xbf16>, vector<512x4xf32> -> vector<512x4xf32>
    %55 = arith.addf %49, %54 : vector<512x4xf32>
    %c0_33 = arith.constant 0 : index
    %c9 = arith.constant 9 : index
    %c0_34 = arith.constant 0 : index
    %56 = vector.load %arg8[%c0_33, %c9, %c0_34] : memref<18x48x4xbf16, #tpu.memory_space<vmem>>, vector<16x32x4xbf16>
    %57 = vector.shape_cast %56 : vector<16x32x4xbf16> to vector<512x4xbf16>
    %c0_35 = arith.constant 0 : index
    %c2 = arith.constant 2 : index
    %c0_36 = arith.constant 0 : index
    %c0_37 = arith.constant 0 : index
    %58 = vector.load %arg5[%c0_35, %c2, %c0_36, %c0_37] : memref<3x3x4x4xbf16, #tpu.memory_space<vmem>>, vector<1x1x4x4xbf16>
    %59 = vector.shape_cast %58 : vector<1x1x4x4xbf16> to vector<4x4xbf16>
    %cst_38 = arith.constant dense<0.000000e+00> : vector<512x4xf32>
    %60 = tpu.matmul %57, %59, %cst_38 {dimension_numbers = #tpu.dot_dimension_numbers<[1], [0], [0], [1], [0, 0, 1, 1], [], []>} : vector<512x4xbf16>, vector<4x4xbf16>, vector<512x4xf32> -> vector<512x4xf32>
    %61 = arith.addf %55, %60 : vector<512x4xf32>
    %c1_39 = arith.constant 1 : index
    %c7_40 = arith.constant 7 : index
    %c0_41 = arith.constant 0 : index
    %62 = vector.load %arg8[%c1_39, %c7_40, %c0_41] : memref<18x48x4xbf16, #tpu.memory_space<vmem>>, vector<16x32x4xbf16>
    %63 = vector.shape_cast %62 : vector<16x32x4xbf16> to vector<512x4xbf16>
    %c1_42 = arith.constant 1 : index
    %c0_43 = arith.constant 0 : index
    %c0_44 = arith.constant 0 : index
    %c0_45 = arith.constant 0 : index
    %64 = vector.load %arg5[%c1_42, %c0_43, %c0_44, %c0_45] : memref<3x3x4x4xbf16, #tpu.memory_space<vmem>>, vector<1x1x4x4xbf16>
    %65 = vector.shape_cast %64 : vector<1x1x4x4xbf16> to vector<4x4xbf16>
    %cst_46 = arith.constant dense<0.000000e+00> : vector<512x4xf32>
    %66 = tpu.matmul %63, %65, %cst_46 {dimension_numbers = #tpu.dot_dimension_numbers<[1], [0], [0], [1], [0, 0, 1, 1], [], []>} : vector<512x4xbf16>, vector<4x4xbf16>, vector<512x4xf32> -> vector<512x4xf32>
    %67 = arith.addf %61, %66 : vector<512x4xf32>
    %c1_47 = arith.constant 1 : index
    %c8_48 = arith.constant 8 : index
    %c0_49 = arith.constant 0 : index
    %68 = vector.load %arg8[%c1_47, %c8_48, %c0_49] : memref<18x48x4xbf16, #tpu.memory_space<vmem>>, vector<16x32x4xbf16>
    %69 = vector.shape_cast %68 : vector<16x32x4xbf16> to vector<512x4xbf16>
    %c1_50 = arith.constant 1 : index
    %c1_51 = arith.constant 1 : index
    %c0_52 = arith.constant 0 : index
    %c0_53 = arith.constant 0 : index
    %70 = vector.load %arg5[%c1_50, %c1_51, %c0_52, %c0_53] : memref<3x3x4x4xbf16, #tpu.memory_space<vmem>>, vector<1x1x4x4xbf16>
    %71 = vector.shape_cast %70 : vector<1x1x4x4xbf16> to vector<4x4xbf16>
    %cst_54 = arith.constant dense<0.000000e+00> : vector<512x4xf32>
    %72 = tpu.matmul %69, %71, %cst_54 {dimension_numbers = #tpu.dot_dimension_numbers<[1], [0], [0], [1], [0, 0, 1, 1], [], []>} : vector<512x4xbf16>, vector<4x4xbf16>, vector<512x4xf32> -> vector<512x4xf32>
    %73 = arith.addf %67, %72 : vector<512x4xf32>
    %c1_55 = arith.constant 1 : index
    %c9_56 = arith.constant 9 : index
    %c0_57 = arith.constant 0 : index
    %74 = vector.load %arg8[%c1_55, %c9_56, %c0_57] : memref<18x48x4xbf16, #tpu.memory_space<vmem>>, vector<16x32x4xbf16>
    %75 = vector.shape_cast %74 : vector<16x32x4xbf16> to vector<512x4xbf16>
    %c1_58 = arith.constant 1 : index
    %c2_59 = arith.constant 2 : index
    %c0_60 = arith.constant 0 : index
    %c0_61 = arith.constant 0 : index
    %76 = vector.load %arg5[%c1_58, %c2_59, %c0_60, %c0_61] : memref<3x3x4x4xbf16, #tpu.memory_space<vmem>>, vector<1x1x4x4xbf16>
    %77 = vector.shape_cast %76 : vector<1x1x4x4xbf16> to vector<4x4xbf16>
    %cst_62 = arith.constant dense<0.000000e+00> : vector<512x4xf32>
    %78 = tpu.matmul %75, %77, %cst_62 {dimension_numbers = #tpu.dot_dimension_numbers<[1], [0], [0], [1], [0, 0, 1, 1], [], []>} : vector<512x4xbf16>, vector<4x4xbf16>, vector<512x4xf32> -> vector<512x4xf32>
    %79 = arith.addf %73, %78 : vector<512x4xf32>
    %c2_63 = arith.constant 2 : index
    %c7_64 = arith.constant 7 : index
    %c0_65 = arith.constant 0 : index
    %80 = vector.load %arg8[%c2_63, %c7_64, %c0_65] : memref<18x48x4xbf16, #tpu.memory_space<vmem>>, vector<16x32x4xbf16>
    %81 = vector.shape_cast %80 : vector<16x32x4xbf16> to vector<512x4xbf16>
    %c2_66 = arith.constant 2 : index
    %c0_67 = arith.constant 0 : index
    %c0_68 = arith.constant 0 : index
    %c0_69 = arith.constant 0 : index
    %82 = vector.load %arg5[%c2_66, %c0_67, %c0_68, %c0_69] : memref<3x3x4x4xbf16, #tpu.memory_space<vmem>>, vector<1x1x4x4xbf16>
    %83 = vector.shape_cast %82 : vector<1x1x4x4xbf16> to vector<4x4xbf16>
    %cst_70 = arith.constant dense<0.000000e+00> : vector<512x4xf32>
    %84 = tpu.matmul %81, %83, %cst_70 {dimension_numbers = #tpu.dot_dimension_numbers<[1], [0], [0], [1], [0, 0, 1, 1], [], []>} : vector<512x4xbf16>, vector<4x4xbf16>, vector<512x4xf32> -> vector<512x4xf32>
    %85 = arith.addf %79, %84 : vector<512x4xf32>
    %c2_71 = arith.constant 2 : index
    %c8_72 = arith.constant 8 : index
    %c0_73 = arith.constant 0 : index
    %86 = vector.load %arg8[%c2_71, %c8_72, %c0_73] : memref<18x48x4xbf16, #tpu.memory_space<vmem>>, vector<16x32x4xbf16>
    %87 = vector.shape_cast %86 : vector<16x32x4xbf16> to vector<512x4xbf16>
    %c2_74 = arith.constant 2 : index
    %c1_75 = arith.constant 1 : index
    %c0_76 = arith.constant 0 : index
    %c0_77 = arith.constant 0 : index
    %88 = vector.load %arg5[%c2_74, %c1_75, %c0_76, %c0_77] : memref<3x3x4x4xbf16, #tpu.memory_space<vmem>>, vector<1x1x4x4xbf16>
    %89 = vector.shape_cast %88 : vector<1x1x4x4xbf16> to vector<4x4xbf16>
    %cst_78 = arith.constant dense<0.000000e+00> : vector<512x4xf32>
    %90 = tpu.matmul %87, %89, %cst_78 {dimension_numbers = #tpu.dot_dimension_numbers<[1], [0], [0], [1], [0, 0, 1, 1], [], []>} : vector<512x4xbf16>, vector<4x4xbf16>, vector<512x4xf32> -> vector<512x4xf32>
    %91 = arith.addf %85, %90 : vector<512x4xf32>
    %c2_79 = arith.constant 2 : index
    %c9_80 = arith.constant 9 : index
    %c0_81 = arith.constant 0 : index
    %92 = vector.load %arg8[%c2_79, %c9_80, %c0_81] : memref<18x48x4xbf16, #tpu.memory_space<vmem>>, vector<16x32x4xbf16>
    %93 = vector.shape_cast %92 : vector<16x32x4xbf16> to vector<512x4xbf16>
    %c2_82 = arith.constant 2 : index
    %c2_83 = arith.constant 2 : index
    %c0_84 = arith.constant 0 : index
    %c0_85 = arith.constant 0 : index
    %94 = vector.load %arg5[%c2_82, %c2_83, %c0_84, %c0_85] : memref<3x3x4x4xbf16, #tpu.memory_space<vmem>>, vector<1x1x4x4xbf16>
    %95 = vector.shape_cast %94 : vector<1x1x4x4xbf16> to vector<4x4xbf16>
    %cst_86 = arith.constant dense<0.000000e+00> : vector<512x4xf32>
    %96 = tpu.matmul %93, %95, %cst_86 {dimension_numbers = #tpu.dot_dimension_numbers<[1], [0], [0], [1], [0, 0, 1, 1], [], []>} : vector<512x4xbf16>, vector<4x4xbf16>, vector<512x4xf32> -> vector<512x4xf32>
    %97 = arith.addf %91, %96 : vector<512x4xf32>
    %cst_87 = arith.constant 0.000000e+00 : f32
    %98 = vector.broadcast %cst_87 : f32 to vector<512x4xf32>
    %99 = arith.maximumf %97, %98 : vector<512x4xf32>
    %100 = vector.shape_cast %99 : vector<512x4xf32> to vector<16x32x4xf32>
    %c0_88 = arith.constant 0 : index
    %c0_89 = arith.constant 0 : index
    %c0_90 = arith.constant 0 : index
    %c0_91 = arith.constant 0 : index
    %101 = vector.load %arg7[%c0_88, %c0_89, %c0_90, %c0_91] : memref<1x16x32x4xf32, #tpu.memory_space<vmem>>, vector<1x16x32x4xf32>
    %102 = vector.shape_cast %101 : vector<1x16x32x4xf32> to vector<16x32x4xf32>
    %103 = vector.shape_cast %100 : vector<16x32x4xf32> to vector<1x16x32x4xf32>
    tpu.vector_store %arg7[%c0_88, %c0_89, %c0_90, %c0_91], %103 {strides = array<i32>} : memref<1x16x32x4xf32, #tpu.memory_space<vmem>>, vector<1x16x32x4xf32>,
    return
  }
  func.func @transform_0(%arg0: i32, %arg1: i32) -> (i32, i32, i32, i32) {
    %c0_i32 = arith.constant 0 : i32
    %c0_i32_0 = arith.constant 0 : i32
    %c0_i32_1 = arith.constant 0 : i32
    %c0_i32_2 = arith.constant 0 : i32
    return %arg0, %c0_i32, %c0_i32_0, %c0_i32_1 : i32, i32, i32, i32
  }
  func.func @transform_1(%arg0: i32, %arg1: i32) -> (i32, i32) {
    %c0_i32 = arith.constant 0 : i32
    %c0_i32_0 = arith.constant 0 : i32
    %c0_i32_1 = arith.constant 0 : i32
    return %c0_i32, %c0_i32_0 : i32, i32
  }
  func.func @transform_2(%arg0: i32, %arg1: i32) -> (i32, i32) {
    %c0_i32 = arith.constant 0 : i32
    %c0_i32_0 = arith.constant 0 : i32
    %c0_i32_1 = arith.constant 0 : i32
    return %c0_i32, %c0_i32_0 : i32, i32
  }
  func.func @transform_3(%arg0: i32, %arg1: i32) -> (i32, i32, i32, i32) {
    %c0_i32 = arith.constant 0 : i32
    %c0_i32_0 = arith.constant 0 : i32
    %c0_i32_1 = arith.constant 0 : i32
    %c0_i32_2 = arith.constant 0 : i32
    %c0_i32_3 = arith.constant 0 : i32
    return %c0_i32, %c0_i32_0, %c0_i32_1, %c0_i32_2 : i32, i32, i32, i32
  }
  func.func @transform_4(%arg0: i32, %arg1: i32) -> (i32, i32) {
    %c0_i32 = arith.constant 0 : i32
    %c0_i32_0 = arith.constant 0 : i32
    %c0_i32_1 = arith.constant 0 : i32
    return %c0_i32, %c0_i32_0 : i32, i32
  }
  func.func @transform_5(%arg0: i32, %arg1: i32) -> (i32, i32, i32, i32) {
    %c0_i32 = arith.constant 0 : i32
    %c0_i32_0 = arith.constant 0 : i32
    %c0_i32_1 = arith.constant 0 : i32
    return %arg0, %arg1, %c0_i32, %c0_i32_0 : i32, i32, i32, i32
  }
}

</mosaic_0001>

<bundles_post_ra>
// kernel: upconv_forward_nhwc.1
= control target key start
LH: loop header
LB: loop body
LE: loop exit
PB: predicated region body
PF: predicated region fallthrough
CT: control target
= control target key end

     0   :  { %s14252_s18 = smov 0   ;;  %s14254_s19 = smov 0   ;;  %s18801_s0 = inlined_call_operand.vmem [shape: bf16[2,18,16,8], index: 0, kind: input, shape index: {}]   ;;  %s18802_s1 = inlined_call_operand.vmem [shape: bf16[8,16], index: 1, kind: input, shape index: {}]   ;;  %s18803_s2 = inlined_call_operand.vmem [shape: f32[1,16], index: 2, kind: input, shape index: {}]   ;;  %s18804_s3 = inlined_call_operand.vmem [shape: bf16[3,3,4,4], index: 3, kind: input, shape index: {}]   ;;  %s18805_s4 = inlined_call_operand.vmem [shape: f32[1,4], index: 4, kind: input, shape index: {}]   ;;  %s18806_s5 = inlined_call_operand.vmem [shape: f32[2,32,32,4], index: 5, kind: output, shape index: {}]  }
   0x1   :  { %s14256_s20 = smov 0   ;;  %s14258_s21 = smov 0  }
   0x2   :  { %s14260_s22 = smov 0  }
   0x3 LB: > { %s24_s23 = sadd.s32 1, %s14205_s20  ;;  %s27_s24 = sadd.s32 1, %s14209_s21  ;;  %s14213_s22 = sphi %s14260_s22, %s15_s22   ;;  %s14209_s21 = sphi %s14258_s21, %s19614_s21   ;;  %s14205_s20 = sphi %s14256_s20, %s19613_s20   ;;  %s14201_s19 = sphi %s14254_s19, %s19612_s19   ;;  %s14197_s18 = sphi %s14252_s18, %s19611_s18  }
   0x4   : > { %p25_p0 = scmp.ge.s32.totalorder %s24_s23, 2  ;;  %p12176_p1 = scmp.ge.s32.totalorder %s14213_s22, 1 }
   0x5   : > { %p201_p2 = scmp.lt.s32.totalorder %s14213_s22, 5 }
   0x6   : > { %s19616_s23 = smov (%p25_p0, %s24_s23), 0  ;;  %s19618_s24 = smov (!%p25_p0, %s27_s24), %s14209_s21 }
   0x7   : > { %p202_p3 = pnand %p12176_p1, %p201_p2  ;;  %p29_p4 = scmp.ge.s32.totalorder %s19618_s24, 2 }
   0x9   : > { %s19620_s24 = smov (%p29_p4, %s19618_s24), 0  ;;  %205 = sbr.rel (%p202_p3) target bundleno = 1887 (0x75f), region = 40 }
  0x10   : > { %v275_v0 = vld [vmem:[%s18802_s1] sm:$0xf]  ;;  %vm364_vm0 = vcmask 1043456   ;;  %p234_p5 = scmp.lt.s32.totalorder %s14201_s19, 1  ;;  %s12178_s27 = sshll.u32 %s14197_s18, 4  ;;  %vm333_vm1 = vcmask 64512   ;;  %v524_v14 = vlaneseq }
  0x11   : > { %14011 = vmatprep.subr.msk.bf16.mxu0 %vm364_vm0, %v275_v0  ;;  %v366_v1 = vsel %vm364_vm0, %v275_v0, 0  ;;  %p242_p6 = scmp.lt.s32.totalorder %s12178_s27, 31  ;;  %s12508_s28 = sshll.u32 %s14197_s18, 6  ;;  %v14215_v12 = vmov 1966171168   ;;  %vm4867_vm2 = vcmask 31748  }
  0x12   : > { %12818 = vmatpush3.bf16.msra.mxu0 %v366_v1  ;;  %s19622_s19 = smov (!%p234_p5, %s14201_s19), 1  ;;  %v522_v13 = vunpack.c.l.s4 %v14215_v12  ;;  %v14309_v16 = vshrl.u32 %v524_v14, 7  ;;  %v14314_v17 = vld [vmem:[%s18803_s2] ss:$0 sm:$0xff]  ;;  %vm4871_vm3 = vcmask 27648   ;;  %vm2583_vm4 = vcmask 1040384  }
  0x13   : > { %s19624_s27 = smov (!%p242_p6, %s12178_s27), 31  ;;  %s14022_s29 = smul.u32 144, %s19622_s19  ;;  %vm4869_vm5 = vcmask 31744  }
  0x14   : > { %s12180_s30 = sshll.u32 %s19622_s19, 7  ;;  %s12179_s6 = sshll.u32 %s19624_s27, 2  ;;  %v523_v15 = vunpack.c.0.s8 %v522_v13  ;;  %v14330_v30 = vsub.s32 0, %v14309_v16 }
  0x15   : > { %s238_s9 = scalar_lea.vmem %s18801_s0, %s14022_s29  ;;  %s246_s10 = sadd.s32 %s12180_s30, %s12179_s6 }
  0x16   : > { %s12181_s11 = sshll.u32 %s246_s10, 3  ;;  %s254_s12 = scalar_lea.vmem %s238_s9, %s12508_s28  ;;  %v14318_v20 = vsub.s32 %v523_v15, %v14309_v16 }
  0x17   : > { %s14297_s15 = scalar_lea.vmem %s18806_s5, %s12181_s11  ;;  %v14070_v2 = vld [vmem:[%s254_s12] sm:$0xff]   ;;  %v14071_v3 = vld [vmem:[%s254_s12 + $0x8] sm:$0xff]   ;;  %v14072_v4 = vld [vmem:[%s254_s12 + $0x10] sm:$0xff]   ;;  %s14216_s19 = smov 124  }
  0x18   : > { %12819 = vmatprep.mubr.msk.bf16.mxu0 %vm333_vm1, %v14070_v2  ;;  %v14073_v5 = vld [vmem:[%s254_s12 + $0x18] sm:$0xff]   ;;  %v14074_v6 = vld [vmem:[%s254_s12 + $0x20] sm:$0xff]   ;;  %v14075_v7 = vld [vmem:[%s254_s12 + $0x28] sm:$0xff]   ;;  %s14219_s27 = smov 120   ;;  %p12206_p7 = scmp.ne.s32.totalorder %s14197_s18, 0 }
  0x19   : > { %12820 = vmatmul.mubr.msk.bf16.vlgmr.msra.gmra.mrb[0].mxu0 %vm333_vm1, %v14071_v3  ;;  %v14076_v8 = vld [vmem:[%s254_s12 + $0x30] sm:$0xff]   ;;  %v14077_v9 = vld [vmem:[%s254_s12 + $0x38] sm:$0xff]   ;;  %v14078_v10 = vld [vmem:[%s254_s12 + $0x40] sm:$0xff]  }
  0x1a   : > { %12823 = vmatprep.mubr.msk.bf16.mxu0 %vm333_vm1, %v14072_v4  ;;  %v14079_v11 = vld [vmem:[%s254_s12 + $0x48] sm:$0xff]  }
  0x21   : > { %12824 = vmatmul.mubr.msk.bf16.gmra.mrb[4].mxu0 %vm333_vm1, %v14073_v5 }
  0x22   : > { %12827 = vmatprep.mubr.msk.bf16.mxu0 %vm333_vm1, %v14074_v6 }
  0x29   : > { %12828 = vmatmul.mubr.msk.bf16.gmra.mrb[8].mxu0 %vm333_vm1, %v14075_v7 }
  0x2a   : > { %12831 = vmatprep.mubr.msk.bf16.mxu0 %vm333_vm1, %v14076_v8 }
  0x31   : > { %12832 = vmatmul.mubr.msk.bf16.gmra.mrb[12].mxu0 %vm333_vm1, %v14077_v9 }
  0x32   : > { %12835 = vmatprep.mubr.msk.bf16.mxu0 %vm333_vm1, %v14078_v10 }
  0x39   : > { %12836 = vmatmul.mubr.msk.bf16.gmra.mrb[16].mxu0 %vm333_vm1, %v14079_v11 }
  0xec   : > { %v12821_v18 = vpop.f32.mrb[0].mxu0 }
  0xed   : > { %v411_v19 = vadd.f32 %v12821_v18, %v14314_v17  ;;  %v14320_v21 = vpop.f32.mrb[1].mxu0 }
  0xee   : > { %19089 = vst [vmem:[#allocation3_spill] sm:$0xff] %v14320_v21  ;;  %v12822_v22 = vpop.f32.mrb[2].mxu0 }
  0xef   : > { %v483_v23 = vmax.f32 %v411_v19, 0.0  ;;  %v14322_v24 = vpop.f32.mrb[3].mxu0  ;;  %v414_v28 = vadd.f32 %v12822_v22, %v14314_v17 }
  0xf0   : > { %19090 = vst [vmem:[#allocation4_spill] sm:$0xff] %v14322_v24 }
  0xf1   : > { %v556_v25 = vrot.slane %v483_v23, %v14318_v20  ;;  %v549_v26 = vcombine.high %v483_v23, %v483_v23  ;;  %v484_v36 = vmax.f32 %v414_v28, 0.0 }
  0xf3   : > { %v564_v27 = vcombine.high %v556_v25, %v556_v25  ;;  %v14327_v29 = vrot.slane %v556_v25, %v14318_v20  ;;  %v563_v34 = vrot.slane %v549_v26, %v14318_v20  ;;  %v605_v41 = vrot.slane %v484_v36, %v14318_v20 }
  0xf4   : > { %v12825_v31 = vpop.f32.mrb[4].mxu0  ;;  %v598_v55 = vcombine.high %v484_v36, %v484_v36 }
  0xf5   : > { %v418_v32 = vpop.f32.mrb[5].mxu0  ;;  %v14336_v35 = vrot.slane %v564_v27, %v14318_v20  ;;  %v1578_v38 = vrot.slane %v14327_v29, %v14330_v30  ;;  %v14344_v39 = vcombine.high %v14327_v29, %v14327_v29  ;;  %v565_v40 = vcombine.high %v563_v34, %v563_v34 }
  0xf6   : > { %v14332_v33 = vpop.f32.mrb[6].mxu0  ;;  %v14355_v44 = vrot.slane %v563_v34, %v14318_v20  ;;  %v613_v49 = vcombine.high %v605_v41, %v605_v41  ;;  %v14375_v53 = vrot.slane %v605_v41, %v14318_v20  ;;  %v427_v60 = vadd.f32 %v12825_v31, %v14314_v17 }
  0xf7   : > { %v14338_v37 = vpop.f32.mrb[7].mxu0  ;;  %2151 = vrot.lane.b32.xlu0 %v1578_v38, %s14216_s19  ;;  %v1586_v42 = vrot.slane %v14344_v39, %v14330_v30  ;;  %v14352_v43 = vcombine.high %v14336_v35, %v14336_v35  ;;  %v1582_v45 = vrot.slane %v14336_v35, %v14330_v30  ;;  %v14370_v51 = vrot.slane %v565_v40, %v14318_v20 }
  0xf8   : > { %v1594_v54 = vrot.slane %v14355_v44, %v14330_v30  ;;  %v14382_v56 = vrot.slane %v613_v49, %v14318_v20  ;;  %v1610_v58 = vrot.slane %v14375_v53, %v14330_v30  ;;  %v14390_v59 = vcombine.high %v14355_v44, %v14355_v44 }
  0xf9   : > { %2155 = vrot.lane.b32.xlu1 %v1586_v42, %s14216_s19  ;;  %v1590_v50 = vrot.slane %v14352_v43, %v14330_v30  ;;  %v1598_v57 = vrot.slane %v14370_v51, %v14330_v30  ;;  %v612_v61 = vrot.slane %v598_v55, %v14318_v20  ;;  %v14400_v63 = vcombine.high %v14370_v51, %v14370_v51 }
  0xfa   : > { %v1614_v62 = vrot.slane %v14382_v56, %v14330_v30  ;;  %v1602_v0 = vrot.slane %v14390_v59, %v14330_v30  ;;  %v14406_v1 = vcombine.high %v14375_v53, %v14375_v53  ;;  %v487_v2 = vmax.f32 %v427_v60, 0.0 }
  0xfb   : > { %2153 = vrot.lane.b32.xlu0 %v1582_v45, %s14216_s19  ;;  %v614_v3 = vcombine.high %v612_v61, %v612_v61  ;;  %v1606_v4 = vrot.slane %v14400_v63, %v14330_v30  ;;  %v419_v5 = vadd.f32 %v14314_v17, %v418_v32  ;;  %v14415_v6 = vcombine.high %v14382_v56, %v14382_v56 }
  0xfc   : > { %v14359_v46 = vpop.f32.mrb[8].mxu0  ;;  %v14418_v7 = vrot.slane %v612_v61, %v14318_v20  ;;  %v1618_v8 = vrot.slane %v14406_v1, %v14330_v30  ;;  %v752_v9 = vrot.slane %v487_v2, %v14318_v20  ;;  %v745_v28 = vcombine.high %v487_v2, %v487_v2 }
  0xfd   : > { %v14362_v47 = vpop.f32.mrb[9].mxu0  ;;  %2157 = vrot.lane.b32.xlu1 %v1590_v50, %s14216_s19  ;;  %v485_v10 = vmax.f32 %v419_v5, 0.0  ;;  %v1622_v11 = vrot.slane %v14415_v6, %v14330_v30  ;;  %v14428_v12 = vrot.slane %v614_v3, %v14318_v20  ;;  %v430_v32 = vadd.f32 %v14332_v33, %v14314_v17 }
  0xfe   : > { %v14365_v48 = vpop.f32.mrb[10].mxu0  ;;  %v1626_v13 = vrot.slane %v14418_v7, %v14330_v30  ;;  %v14434_v14 = vcombine.high %v14418_v7, %v14418_v7  ;;  %v760_v15 = vcombine.high %v752_v9, %v752_v9  ;;  %v14438_v18 = vrot.slane %v752_v9, %v14318_v20 }
  0xff   : > { %v14372_v52 = vpop.f32.mrb[11].mxu0  ;;  %2159 = vrot.lane.b32.xlu0 %v1594_v54, %s14216_s19  ;;  %v654_v19 = vrot.slane %v485_v10, %v14318_v20  ;;  %v1630_v22 = vrot.slane %v14428_v12, %v14330_v30  ;;  %v14446_v23 = vcombine.high %v14428_v12, %v14428_v12  ;;  %v759_v33 = vrot.slane %v745_v28, %v14318_v20 }
 0x100   : > { %v1634_v25 = vrot.slane %v14434_v14, %v14330_v30  ;;  %v14451_v26 = vrot.slane %v760_v15, %v14318_v20  ;;  %v1706_v27 = vrot.slane %v14438_v18, %v14330_v30  ;;  %v14478_v49 = vmax.f32 %v430_v32, 0.0 }
 0x101   : > { %2161 = vrot.lane.b32.xlu1 %v1598_v57, %s14216_s19  ;;  %v662_v31 = vcombine.high %v654_v19, %v654_v19  ;;  %v1638_v34 = vrot.slane %v14446_v23, %v14330_v30  ;;  %v14462_v36 = vrot.slane %v654_v19, %v14318_v20  ;;  %v14486_v55 = vcombine.high %v14438_v18, %v14438_v18 }
 0x102   : > { %v1710_v40 = vrot.slane %v14451_v26, %v14330_v30  ;;  %v761_v57 = vcombine.high %v759_v33, %v759_v33  ;;  %v14496_v61 = vcombine.high %v14451_v26, %v14451_v26  ;;  %v422_v2 = vadd.f32 %v14314_v17, %v14338_v37 }
 0x103   : > { %2167 = vrot.lane.b32.xlu0 %v1610_v58, %s14216_s19  ;;  %v14476_v45 = vrot.slane %v662_v31, %v14318_v20  ;;  %v1642_v54 = vrot.slane %v14462_v36, %v14330_v30  ;;  %v801_v58 = vrot.slane %v14478_v49, %v14318_v20  ;;  %v647_v3 = vcombine.high %v485_v10, %v485_v10 }
 0x104   : > { %v14464_v38 = vpop.f32.mrb[12].mxu0  ;;  %v1718_v5 = vrot.slane %v14496_v61, %v14330_v30 }
 0x105   : > { %2169 = vrot.lane.b32.xlu1 %v1614_v62, %s14216_s19  ;;  %v14469_v41 = vpop.f32.mrb[13].mxu0  ;;  %v1646_v60 = vrot.slane %v14476_v45, %v14330_v30  ;;  %v14499_v62 = vrot.slane %v759_v33, %v14318_v20  ;;  %v14513_v9 = vrot.slane %v801_v58, %v14318_v20  ;;  %v661_v37 = vrot.slane %v647_v3, %v14318_v20 }
 0x106   : > { %v14472_v42 = vpop.f32.mrb[14].mxu0  ;;  %v14559_v32 = vcombine.high %v14476_v45, %v14476_v45 }
 0x107   : > { %2163 = vrot.lane.b32.xlu0 %v1602_v0, %s14216_s19  ;;  %v14480_v50 = vpop.f32.mrb[15].mxu0  ;;  %v1714_v0 = vrot.slane %v14486_v55, %v14330_v30  ;;  %19091 = vst [vmem:[#allocation5_spill] sm:$0xff] %v14513_v9  ;;  %v1738_v19 = vrot.slane %v14513_v9, %v14330_v30  ;;  %v663_v28 = vcombine.high %v661_v37, %v661_v37 }
 0x109   : > { %2165 = vrot.lane.b32.xlu1 %v1606_v4, %s14216_s19  ;;  %v809_v4 = vcombine.high %v801_v58, %v801_v58 }
 0x10b   : > { %2171 = vrot.lane.b32.xlu0 %v1618_v8, %s14216_s19  ;;  %v14510_v8 = vrot.slane %v761_v57, %v14318_v20  ;;  %v14523_v10 = vrot.slane %v809_v4, %v14318_v20  ;;  %v14589_v57 = vrot.slane %v663_v28, %v14318_v20 }
 0x10d   : > { %2173 = vrot.lane.b32.xlu1 %v1622_v11, %s14216_s19  ;;  %v1722_v11 = vrot.slane %v14499_v62, %v14330_v30  ;;  %19092 = vst [vmem:[#allocation6_spill] sm:$0xff] %v14523_v10  ;;  %v1726_v15 = vrot.slane %v14510_v8, %v14330_v30  ;;  %v1742_v31 = vrot.slane %v14523_v10, %v14330_v30 }
 0x10e   : > { %v1662_v3 = vrot.slane %v14589_v57, %v14330_v30  ;;  %v14632_v28 = vcombine.high %v14523_v10, %v14523_v10 }
 0x10f   : > { %2175 = vrot.lane.b32.xlu0 %v1626_v13, %s14216_s19  ;;  %v14518_v13 = vmax.f32 %v422_v2, 0.0 }
 0x110   : > { %19096 = vst [vmem:[#allocation10_spill] sm:$0xff] %v14632_v28 }
 0x111   : > { %2177 = vrot.lane.b32.xlu1 %v1630_v22, %s14216_s19  ;;  %v14531_v22 = vcombine.high %v14462_v36, %v14462_v36 }
 0x113   : > { %2179 = vrot.lane.b32.xlu0 %v1634_v25, %s14216_s19  ;;  %v14217_v25 = vmov 0  }
 0x114   : > { %4942 = vst.msk [vmem:[#allocation2 + $0x10] sm:$0xf0] %vm4867_vm2, %v14217_v25  ;;  %4943 = vst.msk [vmem:[#allocation2 + $0x28] sm:$0xf0] %vm4867_vm2, %v14217_v25 }
 0x115   : > { %2181 = vrot.lane.b32.xlu1 %v1638_v34, %s14216_s19  ;;  %4944 = vst.msk [vmem:[#allocation2 + $0x40] sm:$0xf0] %vm4867_vm2, %v14217_v25  ;;  %4945 = vst.msk [vmem:[#allocation2 + $0x58] sm:$0xf0] %vm4867_vm2, %v14217_v25  ;;  %v14562_v34 = vrot.slane %v661_v37, %v14318_v20  ;;  %v14618_v37 = vcombine.high %v14510_v8, %v14510_v8 }
 0x116   : > { %4946 = vst.msk [vmem:[#allocation2 + $0x70] sm:$0xf0] %vm4867_vm2, %v14217_v25  ;;  %4947 = vst.msk [vmem:[#allocation2 + $0x88] sm:$0xf0] %vm4867_vm2, %v14217_v25 }
 0x117   : > { %2215 = vrot.lane.b32.xlu0 %v1706_v27, %s14216_s19  ;;  %4948 = vst.msk [vmem:[#allocation2 + $0xa0] sm:$0xf0] %vm4867_vm2, %v14217_v25  ;;  %4949 = vst.msk [vmem:[#allocation2 + $0xb8] sm:$0xf0] %vm4867_vm2, %v14217_v25  ;;  %v703_v27 = vrot.slane %v14518_v13, %v14318_v20 }
 0x118   : > { %4950 = vst.msk [vmem:[#allocation2 + $0xd0] sm:$0xf0] %vm4867_vm2, %v14217_v25  ;;  %4951 = vst.msk [vmem:[#allocation2 + $0xe8] sm:$0xf0] %vm4867_vm2, %v14217_v25 }
 0x119   : > { %2217 = vrot.lane.b32.xlu1 %v1710_v40, %s14216_s19  ;;  %4952 = vst.msk [vmem:[#allocation2 + $0x100] sm:$0xf0] %vm4867_vm2, %v14217_v25  ;;  %4953 = vst.msk [vmem:[#allocation2 + $0x118] sm:$0xf0] %vm4867_vm2, %v14217_v25  ;;  %v1650_v40 = vrot.slane %v14531_v22, %v14330_v30  ;;  %v711_v33 = vcombine.high %v703_v27, %v703_v27  ;;  %v14592_v58 = vrot.slane %v703_v27, %v14318_v20 }
 0x11a   : > { %4954 = vst.msk [vmem:[#allocation2 + $0x130] sm:$0xf0] %vm4867_vm2, %v14217_v25  ;;  %4955 = vst.msk [vmem:[#allocation2 + $0x148] sm:$0xf0] %vm4867_vm2, %v14217_v25  ;;  %v1734_v27 = vrot.slane %v14618_v37, %v14330_v30 }
 0x11b   : > { %2183 = vrot.lane.b32.xlu0 %v1642_v54, %s14216_s19  ;;  %4956 = vst.msk [vmem:[#allocation2 + $0x160] sm:$0xf0] %vm4867_vm2, %v14217_v25  ;;  %4957 = vst.msk [vmem:[#allocation2 + $0x178] sm:$0xf0] %vm4867_vm2, %v14217_v25  ;;  %v1654_v54 = vrot.slane %v14559_v32, %v14330_v30  ;;  %v14601_v2 = vrot.slane %v711_v33, %v14318_v20  ;;  %v1674_v4 = vrot.slane %v14592_v58, %v14330_v30 }
 0x11c   : > { %4958 = vst.msk [vmem:[#allocation2 + $0x190] sm:$0xf0] %vm4867_vm2, %v14217_v25  ;;  %4959 = vst.msk [vmem:[#allocation2 + $0x1a8] sm:$0xf0] %vm4867_vm2, %v14217_v25  ;;  %v696_v33 = vcombine.high %v14518_v13, %v14518_v13 }
 0x11d   : > { %2185 = vrot.lane.b32.xlu1 %v1646_v60, %s14216_s19  ;;  %4924 = vst.msk [vmem:[#allocation2] sm:$0xf] %vm4871_vm3, %v14217_v25  ;;  %4925 = vst.msk [vmem:[#allocation2 + $0x18] sm:$0xf] %vm4871_vm3, %v14217_v25  ;;  %v1658_v60 = vrot.slane %v14562_v34, %v14330_v30 }
 0x11e   : > { %4926 = vst.msk [vmem:[#allocation2 + $0x30] sm:$0xf] %vm4871_vm3, %v14217_v25  ;;  %4927 = vst.msk [vmem:[#allocation2 + $0x48] sm:$0xf] %vm4871_vm3, %v14217_v25 }
 0x11f   : > { %2219 = vrot.lane.b32.xlu0 %v1714_v0, %s14216_s19  ;;  %4928 = vst.msk [vmem:[#allocation2 + $0x60] sm:$0xf] %vm4871_vm3, %v14217_v25  ;;  %4929 = vst.msk [vmem:[#allocation2 + $0x78] sm:$0xf] %vm4871_vm3, %v14217_v25  ;;  %v794_v0 = vcombine.high %v14478_v49, %v14478_v49  ;;  %v1678_v49 = vrot.slane %v14601_v2, %v14330_v30 }
 0x120   : > { %4930 = vst.msk [vmem:[#allocation2 + $0x90] sm:$0xf] %vm4871_vm3, %v14217_v25  ;;  %4931 = vst.msk [vmem:[#allocation2 + $0xa8] sm:$0xf] %vm4871_vm3, %v14217_v25 }
 0x121   : > { %2221 = vrot.lane.b32.xlu1 %v1718_v5, %s14216_s19  ;;  %4932 = vst.msk [vmem:[#allocation2 + $0xc0] sm:$0xf] %vm4871_vm3, %v14217_v25  ;;  %4933 = vst.msk [vmem:[#allocation2 + $0xd8] sm:$0xf] %vm4871_vm3, %v14217_v25  ;;  %v14609_v5 = vcombine.high %v14499_v62, %v14499_v62 }
 0x122   : > { %4934 = vst.msk [vmem:[#allocation2 + $0xf0] sm:$0xf] %vm4871_vm3, %v14217_v25  ;;  %4935 = vst.msk [vmem:[#allocation2 + $0x108] sm:$0xf] %vm4871_vm3, %v14217_v25 }
 0x123   : > { %2223 = vrot.lane.b32.xlu0 %v1722_v11, %s14216_s19  ;;  %4936 = vst.msk [vmem:[#allocation2 + $0x120] sm:$0xf] %vm4871_vm3, %v14217_v25  ;;  %4937 = vst.msk [vmem:[#allocation2 + $0x138] sm:$0xf] %vm4871_vm3, %v14217_v25  ;;  %v808_v11 = vrot.slane %v794_v0, %v14318_v20 }
 0x124   : > { %4938 = vst.msk [vmem:[#allocation2 + $0x150] sm:$0xf] %vm4871_vm3, %v14217_v25  ;;  %4939 = vst.msk [vmem:[#allocation2 + $0x168] sm:$0xf] %vm4871_vm3, %v14217_v25 }
 0x125   : > { %2225 = vrot.lane.b32.xlu1 %v1726_v15, %s14216_s19  ;;  %4940 = vst.msk [vmem:[#allocation2 + $0x180] sm:$0xf] %vm4871_vm3, %v14217_v25  ;;  %4941 = vst.msk [vmem:[#allocation2 + $0x198] sm:$0xf] %vm4871_vm3, %v14217_v25  ;;  %v1730_v15 = vrot.slane %v14609_v5, %v14330_v30  ;;  %v810_v25 = vcombine.high %v808_v11, %v808_v11 }
 0x126   : > { %19093 = vst [vmem:[#allocation7_spill] sm:$0xff] %v14592_v58  ;;  %19094 = vst [vmem:[#allocation8_spill] sm:$0xff] %v14601_v2 }
 0x127   : > { %2231 = vrot.lane.b32.xlu0 %v1738_v19, %s14216_s19  ;;  %v14624_v19 = vcombine.high %v14513_v9, %v14513_v9 }
 0x129   : > { %2233 = vrot.lane.b32.xlu1 %v1742_v31, %s14216_s19  ;;  %19095 = vst [vmem:[#allocation9_spill] sm:$0xff] %v14624_v19  ;;  %v14635_v31 = vrot.slane %v808_v11, %v14318_v20  ;;  %v14661_v11 = vcombine.high %v14589_v57, %v14589_v57 }
 0x12b   : > { %2187 = vrot.lane.b32.xlu0 %v1650_v40, %s14216_s19  ;;  %19097 = vst [vmem:[#allocation11_spill] sm:$0xff] %v14635_v31  ;;  %v1746_v40 = vrot.slane %v14624_v19, %v14330_v30  ;;  %v1754_v0 = vrot.slane %v14635_v31, %v14330_v30  ;;  %19100 = vst [vmem:[#allocation14_spill] sm:$0xff] %v14661_v11  ;;  %v14697_v21 = vcombine.high %v14635_v31, %v14635_v31 }
 0x12d   : > { %2189 = vrot.lane.b32.xlu1 %v1654_v54, %s14216_s19  ;;  %v1750_v54 = vrot.slane %v14632_v28, %v14330_v30  ;;  %19105 = vst [vmem:[#allocation19_spill] sm:$0xff] %v14697_v21 }
 0x12f   : > { %2191 = vrot.lane.b32.xlu0 %v1658_v60, %s14216_s19  ;;  %v14646_v60 = vrot.slane %v810_v25, %v14318_v20  ;;  %v443_v25 = vadd.f32 %v14359_v46, %v14314_v17 }
 0x131   : > { %2193 = vrot.lane.b32.xlu1 %v1662_v3, %s14216_s19  ;;  %19098 = vst [vmem:[#allocation12_spill] sm:$0xff] %v14646_v60  ;;  %v14652_v3 = vcombine.high %v14562_v34, %v14562_v34  ;;  %v1758_v13 = vrot.slane %v14646_v60, %v14330_v30 }
 0x133   : > { %2199 = vrot.lane.b32.xlu0 %v1674_v4, %s14216_s19  ;;  %19099 = vst [vmem:[#allocation13_spill] sm:$0xff] %v14652_v3  ;;  %v710_v4 = vrot.slane %v696_v33, %v14318_v20  ;;  %v14677_v33 = vcombine.high %v14601_v2, %v14601_v2 }
 0x135   : > { %2201 = vrot.lane.b32.xlu1 %v1678_v49, %s14216_s19  ;;  %v1666_v49 = vrot.slane %v14652_v3, %v14330_v30  ;;  %19102 = vst [vmem:[#allocation16_spill] sm:$0xff] %v14677_v33  ;;  %v1686_v46 = vrot.slane %v14677_v33, %v14330_v30 }
 0x137   : > { %2227 = vrot.lane.b32.xlu0 %v1730_v15, %s14216_s19  ;;  %v14667_v15 = vcombine.high %v14592_v58, %v14592_v58 }
 0x139   : > { %2229 = vrot.lane.b32.xlu1 %v1734_v27, %s14216_s19  ;;  %19101 = vst [vmem:[#allocation15_spill] sm:$0xff] %v14667_v15  ;;  %v712_v27 = vcombine.high %v710_v4, %v710_v4 }
 0x13b   : > { %2235 = vrot.lane.b32.xlu0 %v1746_v40, %s14216_s19  ;;  %v1670_v40 = vrot.slane %v14661_v11, %v14330_v30  ;;  %v14691_v24 = vrot.slane %v712_v27, %v14318_v20  ;;  %v14706_v27 = vcombine.high %v14646_v60, %v14646_v60 }
 0x13d   : > { %2237 = vrot.lane.b32.xlu1 %v1750_v54, %s14216_s19  ;;  %v14680_v54 = vrot.slane %v710_v4, %v14318_v20  ;;  %19104 = vst [vmem:[#allocation18_spill] sm:$0xff] %v14691_v24  ;;  %19106 = vst [vmem:[#allocation20_spill] sm:$0xff] %v14706_v27 }
 0x13f   : > { %2239 = vrot.lane.b32.xlu0 %v1754_v0, %s14216_s19  ;;  %19103 = vst [vmem:[#allocation17_spill] sm:$0xff] %v14680_v54  ;;  %v1682_v0 = vrot.slane %v14667_v15, %v14330_v30  ;;  %v1690_v4 = vrot.slane %v14680_v54, %v14330_v30  ;;  %v14712_v58 = vcombine.high %v14680_v54, %v14680_v54 }
 0x141   : > { %2241 = vrot.lane.b32.xlu1 %v1758_v13, %s14216_s19  ;;  %v491_v13 = vmax.f32 %v443_v25, 0.0  ;;  %19107 = vst [vmem:[#allocation21_spill] sm:$0xff] %v14712_v58  ;;  %v1698_v54 = vrot.slane %v14712_v58, %v14330_v30 }
 0x143   : > { %2195 = vrot.lane.b32.xlu0 %v1666_v49, %s14216_s19  ;;  %v435_v49 = vadd.f32 %v14314_v17, %v14362_v47  ;;  %v948_v25 = vrot.slane %v491_v13, %v14318_v20  ;;  %v1694_v47 = vrot.slane %v14691_v24, %v14330_v30 }
 0x145   : > { %2197 = vrot.lane.b32.xlu1 %v1670_v40, %s14216_s19  ;;  %v489_v40 = vmax.f32 %v435_v49, 0.0  ;;  %v956_v15 = vcombine.high %v948_v25, %v948_v25 }
 0x147   : > { %2203 = vrot.lane.b32.xlu0 %v1682_v0, %s14216_s19  ;;  %v1762_v0 = vrot.slane %v14697_v21, %v14330_v30  ;;  %v850_v49 = vrot.slane %v489_v40, %v14318_v20  ;;  %v14724_v21 = vcombine.high %v14691_v24, %v14691_v24  ;;  %v14729_v2 = vrot.slane %v956_v15, %v14318_v20  ;;  %v14742_v15 = vpop.f32.mrb[16].mxu0 }
 0x148   : > { %19112 = vst [vmem:[#allocation26_spill] sm:$0xff] %v14742_v15 }
 0x149   : > { %2205 = vrot.lane.b32.xlu1 %v1686_v46, %s14216_s19  ;;  %v14716_v46 = vrot.slane %v948_v25, %v14318_v20  ;;  %19109 = vst [vmem:[#allocation23_spill] sm:$0xff] %v14724_v21  ;;  %19110 = vst [vmem:[#allocation24_spill] sm:$0xff] %v14729_v2  ;;  %v1702_v24 = vrot.slane %v14724_v21, %v14330_v30  ;;  %v14740_v58 = vrot.slane %v850_v49, %v14318_v20 }
 0x14b   : > { %2207 = vrot.lane.b32.xlu0 %v1690_v4, %s14216_s19  ;;  %19108 = vst [vmem:[#allocation22_spill] sm:$0xff] %v14716_v46  ;;  %v1766_v4 = vrot.slane %v14706_v27, %v14330_v30  ;;  %v1834_v25 = vrot.slane %v14716_v46, %v14330_v30  ;;  %v446_v27 = vadd.f32 %v14365_v48, %v14314_v17  ;;  %19111 = vst [vmem:[#allocation25_spill] sm:$0xff] %v14740_v58 }
 0x14c   : > { %v14762_v31 = vcombine.high %v14716_v46, %v14716_v46 }
 0x14d   : > { %2209 = vrot.lane.b32.xlu1 %v1694_v47, %s14216_s19  ;;  %v941_v47 = vcombine.high %v491_v13, %v491_v13 }
 0x14e   : > { %19117 = vst [vmem:[#allocation31_spill] sm:$0xff] %v14762_v31  ;;  %v1842_v46 = vrot.slane %v14762_v31, %v14330_v30 }
 0x14f   : > { %2243 = vrot.lane.b32.xlu0 %v1762_v0, %s14216_s19  ;;  %v858_v0 = vcombine.high %v850_v49, %v850_v49  ;;  %v955_v48 = vrot.slane %v941_v47, %v14318_v20  ;;  %v492_v49 = vmax.f32 %v446_v27, 0.0  ;;  %v14771_v27 = vcombine.high %v14729_v2, %v14729_v2 }
 0x151   : > { %2245 = vrot.lane.b32.xlu1 %v1766_v4, %s14216_s19  ;;  %v14747_v4 = vpop.f32.mrb[17].mxu0  ;;  %v14754_v21 = vrot.slane %v858_v0, %v14318_v20  ;;  %v997_v47 = vrot.slane %v492_v49, %v14318_v20  ;;  %19118 = vst [vmem:[#allocation32_spill] sm:$0xff] %v14771_v27 }
 0x152   : > { %19113 = vst [vmem:[#allocation27_spill] sm:$0xff] %v14747_v4  ;;  %v14750_v13 = vpop.f32.mrb[18].mxu0  ;;  %v1846_v4 = vrot.slane %v14771_v27, %v14330_v30 }
 0x153   : > { %2211 = vrot.lane.b32.xlu0 %v1698_v54, %s14216_s19  ;;  %v1838_v54 = vrot.slane %v14729_v2, %v14330_v30  ;;  %19114 = vst [vmem:[#allocation28_spill] sm:$0xff] %v14750_v13  ;;  %19115 = vst [vmem:[#allocation29_spill] sm:$0xff] %v14754_v21  ;;  %v14756_v33 = vpop.f32.mrb[19].mxu0  ;;  %v1774_v0 = vrot.slane %v14754_v21, %v14330_v30  ;;  %v1005_v13 = vcombine.high %v997_v47, %v997_v47 }
 0x154   : > { %19116 = vst [vmem:[#allocation30_spill] sm:$0xff] %v14756_v33  ;;  %v14774_v33 = vrot.slane %v955_v48, %v14318_v20 }
 0x155   : > { %2213 = vrot.lane.b32.xlu1 %v1702_v24, %s14216_s19  ;;  %v1770_v24 = vrot.slane %v14740_v58, %v14330_v30 }
 0x156   : > { %19119 = vst [vmem:[#allocation33_spill] sm:$0xff] %v14774_v33  ;;  %v1850_v31 = vrot.slane %v14774_v33, %v14330_v30  ;;  %v14846_v15 = vcombine.high %v14774_v33, %v14774_v33 }
 0x157   : > { %2279 = vrot.lane.b32.xlu0 %v1834_v25, %s14216_s19  ;;  %v957_v25 = vcombine.high %v955_v48, %v955_v48  ;;  %v14788_v48 = vrot.slane %v997_v47, %v14318_v20 }
 0x158   : > { %19125 = vst [vmem:[#allocation39_spill] sm:$0xff] %v14846_v15  ;;  %v1858_v33 = vrot.slane %v14846_v15, %v14330_v30 }
 0x159   : > { %2281 = vrot.lane.b32.xlu1 %v1838_v54, %s14216_s19  ;;  %v438_v54 = vadd.f32 %v14314_v17, %v14372_v52  ;;  %v14785_v2 = vrot.slane %v957_v25, %v14318_v20  ;;  %19121 = vst [vmem:[#allocation35_spill] sm:$0xff] %v14788_v48  ;;  %v1866_v47 = vrot.slane %v14788_v48, %v14330_v30 }
 0x15b   : > { %2247 = vrot.lane.b32.xlu0 %v1770_v24, %s14216_s19  ;;  %v843_v24 = vcombine.high %v489_v40, %v489_v40  ;;  %19120 = vst [vmem:[#allocation34_spill] sm:$0xff] %v14785_v2  ;;  %v14796_v40 = vrot.slane %v1005_v13, %v14318_v20  ;;  %v1854_v25 = vrot.slane %v14785_v2, %v14330_v30 }
 0x15c   : > { %v14855_v28 = vcombine.high %v14785_v2, %v14785_v2 }
 0x15d   : > { %2249 = vrot.lane.b32.xlu1 %v1774_v0, %s14216_s19  ;;  %v857_v52 = vrot.slane %v843_v24, %v14318_v20  ;;  %v14806_v0 = vcombine.high %v14740_v58, %v14740_v58  ;;  %v1870_v13 = vrot.slane %v14796_v40, %v14330_v30 }
 0x15e   : > { %v1862_v15 = vrot.slane %v14855_v28, %v14330_v30 }
 0x15f   : > { %2283 = vrot.lane.b32.xlu0 %v1842_v46, %s14216_s19  ;;  %v14798_v46 = vmax.f32 %v438_v54, 0.0  ;;  %19122 = vst [vmem:[#allocation36_spill] sm:$0xff] %v14806_v0  ;;  %v14816_v54 = vcombine.high %v14754_v21, %v14754_v21  ;;  %v14819_v24 = vrot.slane %v857_v52, %v14318_v20 }
 0x161   : > { %2285 = vrot.lane.b32.xlu1 %v1846_v4, %s14216_s19  ;;  %v899_v4 = vrot.slane %v14798_v46, %v14318_v20  ;;  %19123 = vst [vmem:[#allocation37_spill] sm:$0xff] %v14816_v54  ;;  %v1782_v9 = vrot.slane %v14816_v54, %v14330_v30  ;;  %v1786_v19 = vrot.slane %v14819_v24, %v14330_v30 }
 0x163   : > { %2287 = vrot.lane.b32.xlu0 %v1850_v31, %s14216_s19  ;;  %v859_v31 = vcombine.high %v857_v52, %v857_v52  ;;  %v14831_v21 = vrot.slane %v899_v4, %v14318_v20 }
 0x165   : > { %2289 = vrot.lane.b32.xlu1 %v1854_v25, %s14216_s19  ;;  %v1778_v25 = vrot.slane %v14806_v0, %v14330_v30  ;;  %v14828_v60 = vrot.slane %v859_v31, %v14318_v20  ;;  %19124 = vst [vmem:[#allocation38_spill] sm:$0xff] %v14831_v21 }
 0x167   : > { %2295 = vrot.lane.b32.xlu0 %v1866_v47, %s14216_s19  ;;  %v907_v47 = vcombine.high %v899_v4, %v899_v4  ;;  %v1790_v31 = vrot.slane %v14828_v60, %v14330_v30  ;;  %v1802_v4 = vrot.slane %v14831_v21, %v14330_v30 }
 0x169   : > { %v2152_v58 = vpop.permute.xlu0 %2151  ;;  %2297 = vrot.lane.b32.xlu1 %v1870_v13, %s14216_s19  ;;  %v990_v13 = vcombine.high %v492_v49, %v492_v49 }
 0x16b   : > { %2251 = vrot.lane.b32.xlu0 %v1778_v25, %s14216_s19  ;;  %v2156_v27 = vpop.permute.xlu1 %2155  ;;  %v14838_v25 = vrot.slane %v907_v47, %v14318_v20  ;;  %v1004_v49 = vrot.slane %v990_v13, %v14318_v20 }
 0x16d   : > { %v2154_v52 = vpop.permute.xlu0 %2153  ;;  %2253 = vrot.lane.b32.xlu1 %v1782_v9, %s14216_s19  ;;  %v14218_v9 = vmov 1983009808   ;;  %v1806_v10 = vrot.slane %v14838_v25, %v14330_v30  ;;  %v14872_v2 = vrot.slane %v1004_v49, %v14318_v20 }
 0x16f   : > { %2255 = vrot.lane.b32.xlu0 %v1786_v19, %s14216_s19  ;;  %v2158_v0 = vpop.permute.xlu1 %2157  ;;  %v3393_v19 = vunpack.c.l.s4 %v14218_v9  ;;  %v1006_v9 = vcombine.high %v1004_v49, %v1004_v49 }
 0x171   : > { %v2160_v54 = vpop.permute.xlu0 %2159  ;;  %2257 = vrot.lane.b32.xlu1 %v1790_v31, %s14216_s19  ;;  %v14863_v31 = vcombine.high %v14788_v48, %v14788_v48  ;;  %v3394_v13 = vunpack.c.0.s8 %v3393_v19  ;;  %v14878_v48 = vcombine.high %v14796_v40, %v14796_v40 }
 0x173   : > { %2263 = vrot.lane.b32.xlu0 %v1802_v4, %s14216_s19  ;;  %v2162_v47 = vpop.permute.xlu1 %2161  ;;  %v14868_v4 = vsel %vm2583_vm4, %v14352_v43, %v2158_v0  ;;  %v14886_v43 = vsel %vm2583_vm4, %v14336_v35, %v2154_v52  ;;  %v1874_v19 = vrot.slane %v14863_v31, %v14330_v30  ;;  %v14901_v35 = vsel %vm2583_vm4, %v14327_v29, %v2152_v58 }
 0x174   : > { %19126 = vst [vmem:[#allocation40_spill] sm:$0xff] %v14868_v4  ;;  %19128 = vst [vmem:[#allocation42_spill] sm:$0xff] %v14886_v43  ;;  %v3458_v52 = vcombine.low %v14901_v35, %v14886_v43  ;;  %v1878_v29 = vrot.slane %v14878_v48, %v14330_v30  ;;  %v14918_v58 = vrot.slane %v1006_v9, %v14318_v20 }
 0x175   : > { %v14857_v11 = vpop.permute.xlu0 %2167  ;;  %2265 = vrot.lane.b32.xlu1 %v1806_v10, %s14216_s19  ;;  %v14882_v10 = vsel %vm2583_vm4, %v14344_v39, %v2156_v27  ;;  %v892_v39 = vcombine.high %v14798_v46, %v14798_v46  ;;  %19130 = vst [vmem:[#allocation44_spill] sm:$0xff] %v14901_v35  ;;  %v14904_v27 = vsub.s32 %v3394_v13, %v14309_v16 }
 0x176   : > { %19127 = vst [vmem:[#allocation41_spill] sm:$0xff] %v14882_v10  ;;  %v3459_v49 = vcombine.low %v14882_v10, %v14868_v4  ;;  %v14932_v13 = vcombine.high %v14819_v24, %v14819_v24 }
 0x177   : > { %2291 = vrot.lane.b32.xlu0 %v1858_v33, %s14216_s19  ;;  %v2170_v3 = vpop.permute.xlu1 %2169  ;;  %v14890_v33 = vsel %vm2583_vm4, %v14370_v51, %v2162_v47  ;;  %v14908_v51 = vsel %vm2583_vm4, %v14355_v44, %v2160_v54  ;;  %v1882_v47 = vrot.slane %v14872_v2, %v14330_v30 }
 0x178   : > { %19129 = vst [vmem:[#allocation43_spill] sm:$0xff] %v14890_v33  ;;  %19131 = vst [vmem:[#allocation45_spill] sm:$0xff] %v14908_v51 }
 0x179   : > { %v2164_v0 = vpop.permute.xlu0 %2163  ;;  %2293 = vrot.lane.b32.xlu1 %v1862_v15, %s14216_s19  ;;  %v3475_v15 = vcombine.low %v14908_v51, %v14890_v33 }
 0x17a   : > { %v14922_v16 = vsel %vm2583_vm4, %v14390_v59, %v2164_v0  ;;  %v906_v59 = vrot.slane %v892_v39, %v14318_v20  ;;  %v3466_v0 = vrot.slane %v3458_v52, %v14904_v27  ;;  %v1794_v39 = vrot.slane %v14932_v13, %v14330_v30 }
 0x17b   : > { %2299 = vrot.lane.b32.xlu0 %v1874_v19, %s14216_s19  ;;  %v2166_v46 = vpop.permute.xlu1 %2165  ;;  %19132 = vst [vmem:[#allocation46_spill] sm:$0xff] %v14922_v16  ;;  %v3473_v19 = vrot.slane %v3459_v49, %v14904_v27  ;;  %v459_v52 = vadd.f32 %v14464_v38, %v14314_v17  ;;  %v14976_v38 = vsel %vm2583_vm4, %v14382_v56, %v2170_v3 }
 0x17c   : > { %v14926_v44 = vsel %vm2583_vm4, %v14400_v63, %v2166_v46  ;;  %v14942_v63 = vcombine.high %v14828_v60, %v14828_v60  ;;  %v3483_v46 = vrot.slane %v3475_v15, %v14904_v27  ;;  %v908_v15 = vcombine.high %v906_v59, %v906_v59  ;;  %19136 = vst [vmem:[#allocation50_spill] sm:$0xff] %v14976_v38 }
 0x17d   : > { %19133 = vst [vmem:[#allocation47_spill] sm:$0xff] %v14926_v44  ;;  %v2172_v54 = vpop.permute.xlu0 %2171  ;;  %v3476_v9 = vcombine.low %v14922_v16, %v14926_v44  ;;  %2301 = vrot.lane.b32.xlu1 %v1878_v29, %s14216_s19  ;;  %v1886_v44 = vrot.slane %v14918_v58, %v14330_v30  ;;  %v14953_v29 = vcombine.high %v14831_v21, %v14831_v21  ;;  %v14992_v56 = vmax.f32 %v459_v52, 0.0 }
 0x17e   : > { %v14964_v4 = vrot.slane %v906_v59, %v14318_v20  ;;  %v451_v3 = vadd.f32 %v14314_v17, %v14469_v41 }
 0x17f   : > { %2303 = vrot.lane.b32.xlu0 %v1882_v47, %s14216_s19  ;;  %v3490_v33 = vrot.slane %v3476_v9, %v14904_v27  ;;  %v2174_v49 = vpop.permute.xlu1 %2173  ;;  %v3474_v47 = vcombine.low %v3466_v0, %v3473_v19  ;;  %v1810_v59 = vrot.slane %v14953_v29, %v14330_v30 }
 0x180   : > { %v14960_v9 = vsel %vm2583_vm4, %v14415_v6, %v2174_v49  ;;  %19135 = vst [vmem:[#allocation49_spill] sm:$0xff] %v14964_v4  ;;  %v14980_v6 = vsel %vm2583_vm4, %v14406_v1, %v2172_v54  ;;  %v14997_v1 = vsel %vm2583_vm4, %v14375_v53, %v14857_v11  ;;  %v1818_v49 = vrot.slane %v14964_v4, %v14330_v30 }
 0x181   : > { %v2176_v16 = vpop.permute.xlu0 %2175  ;;  %v3491_v51 = vcombine.low %v3483_v46, %v3490_v33  ;;  %2305 = vrot.lane.b32.xlu1 %v1886_v44, %s14216_s19  ;;  %19134 = vst [vmem:[#allocation48_spill] sm:$0xff] %v14960_v9  ;;  %v1798_v33 = vrot.slane %v14942_v63, %v14330_v30  ;;  %v14972_v44 = vcombine.high %v14838_v25, %v14838_v25  ;;  %19137 = vst [vmem:[#allocation51_spill] sm:$0xff] %v14980_v6 }
 0x182   : > { %v3493_v46 = vcombine.low %v14980_v6, %v14960_v9  ;;  %19139 = vst [vmem:[#allocation53_spill] sm:$0xff] %v14997_v1 }
 0x183   : > { %2259 = vrot.lane.b32.xlu0 %v1794_v39, %s14216_s19  ;;  %v14966_v10 = vpack.c.bf16 %v3491_v51, %v3474_v47  ;;  %v2178_v43 = vpop.permute.xlu1 %2177  ;;  %v15030_v39 = vcombine.high %v14872_v2, %v14872_v2 }
 0x184   : > { %v14984_v51 = vsel %vm2583_vm4, %v14428_v12, %v2178_v43  ;;  %v15001_v12 = vsel %vm2583_vm4, %v14418_v7, %v2176_v16  ;;  %v3492_v43 = vcombine.low %v14997_v1, %v14976_v38  ;;  %v1814_v7 = vrot.slane %v14972_v44, %v14330_v30 }
 0x185   : > { %19138 = vst [vmem:[#allocation52_spill] sm:$0xff] %v14984_v51  ;;  %v2180_v19 = vpop.permute.xlu0 %2179  ;;  %v4762_v0 = vrot.slane %v14966_v10, 4  ;;  %2261 = vrot.lane.b32.xlu1 %v1798_v33, %s14216_s19  ;;  %19140 = vst [vmem:[#allocation54_spill] sm:$0xff] %v15001_v12  ;;  %v15007_v10 = vrot.slane %v908_v15, %v14318_v20  ;;  %v3509_v53 = vcombine.low %v15001_v12, %v14984_v51 }
 0x186   : > { %v15018_v16 = vsel %vm2583_vm4, %v14434_v14, %v2180_v19  ;;  %19143 = vst [vmem:[#allocation57_spill] sm:$0xff] %v15030_v39  ;;  %v3507_v47 = vrot.slane %v3493_v46, %v14904_v27  ;;  %v1144_v14 = vrot.slane %v14992_v56, %v14318_v20  ;;  %v3500_v33 = vrot.slane %v3492_v43, %v14904_v27 }
 0x187   : > { %2267 = vrot.lane.b32.xlu0 %v1810_v59, %s14216_s19  ;;  %4873 = vst.msk [vmem:[#allocation2 + $0x18] sm:$0xf0] %vm4867_vm2, %v4762_v0  ;;  %v2182_v11 = vpop.permute.xlu1 %2181  ;;  %19141 = vst [vmem:[#allocation55_spill] sm:$0xff] %v15018_v16  ;;  %v1822_v15 = vrot.slane %v15007_v10, %v14330_v30  ;;  %v3517_v19 = vrot.slane %v3509_v53, %v14904_v27 }
 0x188   : > { %v15022_v41 = vsel %vm2583_vm4, %v14446_v23, %v2182_v11  ;;  %v15038_v23 = vmax.f32 %v451_v3, 0.0  ;;  %v15050_v11 = vcombine.high %v14918_v58, %v14918_v58  ;;  %v1890_v3 = vrot.slane %v15030_v39, %v14330_v30 }
 0x189   : > { %19142 = vst [vmem:[#allocation56_spill] sm:$0xff] %v15022_v41  ;;  %v15024_v54 = vpop.permute.xlu0 %2215  ;;  %v3510_v52 = vcombine.low %v15018_v16, %v15022_v41  ;;  %2269 = vrot.lane.b32.xlu1 %v1814_v7, %s14216_s19  ;;  %v3508_v43 = vcombine.low %v3500_v33, %v3507_v47  ;;  %v1152_v53 = vcombine.high %v1144_v14, %v1144_v14 }
 0x18a   : > { %19144 = vst [vmem:[#allocation58_spill] sm:$0xff] %v15050_v11  ;;  %v1046_v51 = vrot.slane %v15038_v23, %v14318_v20  ;;  %v1894_v9 = vrot.slane %v15050_v11, %v14330_v30  ;;  %v15073_v47 = vcombine.high %v15007_v10, %v15007_v10 }
 0x18b   : > { %2271 = vrot.lane.b32.xlu0 %v1818_v49, %s14216_s19  ;;  %v3524_v59 = vrot.slane %v3510_v52, %v14904_v27  ;;  %v15046_v46 = vpop.permute.xlu1 %2217  ;;  %v15058_v49 = vcombine.high %v14964_v4, %v14964_v4  ;;  %v15062_v52 = vrot.slane %v1144_v14, %v14318_v20 }
 0x18c   : > { %19147 = vst [vmem:[#allocation61_spill] sm:$0xff] %v15073_v47 }
 0x18d   : > { %v15052_v7 = vpop.permute.xlu0 %2183  ;;  %19145 = vst [vmem:[#allocation59_spill] sm:$0xff] %v15058_v49  ;;  %v3525_v41 = vcombine.low %v3517_v19, %v3524_v59  ;;  %2273 = vrot.lane.b32.xlu1 %v1822_v15, %s14216_s19  ;;  %19146 = vst [vmem:[#allocation60_spill] sm:$0xff] %v15062_v52  ;;  %v1826_v14 = vrot.slane %v15058_v49, %v14330_v30  ;;  %v462_v19 = vadd.f32 %v14472_v42, %v14314_v17 }
 0x18e   : > { %v1962_v59 = vrot.slane %v15062_v52, %v14330_v30  ;;  %v15096_v42 = vrot.slane %v1046_v51, %v14318_v20 }
 0x18f   : > { %2307 = vrot.lane.b32.xlu0 %v1890_v3, %s14216_s19  ;;  %v4689_v16 = vpack.c.bf16 %v3525_v41, %v3508_v43  ;;  %v15067_v12 = vpop.permute.xlu1 %2185  ;;  %v15080_v41 = vrot.slane %v1152_v53, %v14318_v20  ;;  %v1054_v43 = vcombine.high %v1046_v51, %v1046_v51  ;;  %v15106_v6 = vmax.f32 %v462_v19, 0.0 }
 0x190   : > { %19149 = vst [vmem:[#allocation63_spill] sm:$0xff] %v15096_v42  ;;  %v1898_v51 = vrot.slane %v15096_v42, %v14330_v30 }
 0x191   : > { %v15075_v33 = vpop.permute.xlu0 %2219  ;;  %v4763_v15 = vrot.slane %v4689_v16, 4  ;;  %19148 = vst [vmem:[#allocation62_spill] sm:$0xff] %v15080_v41  ;;  %2309 = vrot.lane.b32.xlu1 %v1894_v9, %s14216_s19  ;;  %v1137_v16 = vcombine.high %v14992_v56, %v14992_v56  ;;  %v1830_v9 = vrot.slane %v15073_v47, %v14330_v30  ;;  %v15126_v1 = vcombine.high %v15080_v41, %v15080_v41 }
 0x192   : > { %v1039_v47 = vcombine.high %v15038_v23, %v15038_v23 }
 0x193   : > { %2275 = vrot.lane.b32.xlu0 %v1826_v14, %s14216_s19  ;;  %v4764_v3 = vsel %vm364_vm0, %v4762_v0, %v4763_v15  ;;  %4875 = vst.msk [vmem:[#allocation2 + $0x28] sm:$0xf] %vm4871_vm3, %v4763_v15  ;;  %v2222_v53 = vpop.permute.xlu1 %2221  ;;  %v1966_v0 = vrot.slane %v15080_v41, %v14330_v30  ;;  %v1151_v56 = vrot.slane %v1137_v16, %v14318_v20  ;;  %19152 = vst [vmem:[#allocation66_spill] sm:$0xff] %v15126_v1 }
 0x194   : > { %4874 = vst.msk [vmem:[#allocation2 + $0x20] sm:$0xff] %vm4869_vm5, %v4764_v3  ;;  %v15104_v15 = vrot.slane %v1054_v43, %v14318_v20  ;;  %v1193_v16 = vrot.slane %v15106_v6, %v14318_v20  ;;  %v1053_v23 = vrot.slane %v1039_v47, %v14318_v20 }
 0x195   : > { %v2224_v14 = vpop.permute.xlu0 %2223  ;;  %2277 = vrot.lane.b32.xlu1 %v1830_v9, %s14216_s19  ;;  %v15114_v9 = vcombine.high %v15062_v52, %v15062_v52  ;;  %v15129_v35 = vrot.slane %v1151_v56, %v14318_v20 }
 0x196   : > { %19150 = vst [vmem:[#allocation64_spill] sm:$0xff] %v15104_v15  ;;  %v1902_v43 = vrot.slane %v15104_v15, %v14330_v30  ;;  %v1201_v41 = vcombine.high %v1193_v16, %v1193_v16 }
 0x197   : > { %2343 = vrot.lane.b32.xlu0 %v1962_v59, %s14216_s19  ;;  %v2226_v38 = vpop.permute.xlu1 %2225  ;;  %19151 = vst [vmem:[#allocation65_spill] sm:$0xff] %v15114_v9  ;;  %v1153_v59 = vcombine.high %v1151_v56, %v1151_v56  ;;  %v1974_v56 = vrot.slane %v15126_v1, %v14330_v30 }
 0x199   : > { %v15108_v3 = vpop.permute.xlu0 %2231  ;;  %2345 = vrot.lane.b32.xlu1 %v1966_v0, %s14216_s19  ;;  %v1970_v0 = vrot.slane %v15114_v9, %v14330_v30  ;;  %v15146_v4 = vrot.slane %v1153_v59, %v14318_v20  ;;  %v15149_v9 = vrot.slane %v1193_v16, %v14318_v20 }
 0x19b   : > { %2311 = vrot.lane.b32.xlu0 %v1898_v51, %s14216_s19  ;;  %v15120_v19 = vpop.permute.xlu1 %2233  ;;  %v454_v51 = vadd.f32 %v14314_v17, %v14480_v50  ;;  %19153 = vst [vmem:[#allocation67_spill] sm:$0xff] %v15149_v9  ;;  %v1978_v17 = vrot.slane %v15129_v35, %v14330_v30  ;;  %v1982_v16 = vrot.slane %v15146_v4, %v14330_v30 }
 0x19c   : > { %v1994_v21 = vrot.slane %v15149_v9, %v14330_v30 }
 0x19d   : > { %v15131_v52 = vpop.permute.xlu0 %2187  ;;  %2313 = vrot.lane.b32.xlu1 %v1902_v43, %s14216_s19  ;;  %v15156_v50 = vmax.f32 %v454_v51, 0.0  ;;  %v15173_v51 = vcombine.high %v15096_v42, %v15096_v42 }
 0x19f   : > { %2347 = vrot.lane.b32.xlu0 %v1970_v0, %s14216_s19  ;;  %v15141_v49 = vpop.permute.xlu1 %2189  ;;  %v15161_v0 = vrot.slane %v1201_v41, %v14318_v20  ;;  %v1095_v47 = vrot.slane %v15156_v50, %v14318_v20  ;;  %v15180_v41 = vsel %vm2583_vm4, %v14496_v61, %v2222_v53  ;;  %v15197_v61 = vsel %vm2583_vm4, %v14451_v26, %v15046_v46 }
 0x1a0   : > { %19155 = vst [vmem:[#allocation69_spill] sm:$0xff] %v15180_v41  ;;  %19156 = vst [vmem:[#allocation70_spill] sm:$0xff] %v15197_v61  ;;  %v15206_v53 = vsel %vm2583_vm4, %v14510_v8, %v2226_v38  ;;  %v1906_v39 = vrot.slane %v15173_v51, %v14330_v30  ;;  %v15216_v26 = vsel %vm2583_vm4, %v14438_v18, %v15024_v54 }
 0x1a1   : > { %v15151_v43 = vpop.permute.xlu0 %2191  ;;  %2349 = vrot.lane.b32.xlu1 %v1974_v56, %s14216_s19  ;;  %19154 = vst [vmem:[#allocation68_spill] sm:$0xff] %v15161_v0  ;;  %v1055_v56 = vcombine.high %v1053_v23, %v1053_v23  ;;  %v1998_v42 = vrot.slane %v15161_v0, %v14330_v30  ;;  %19158 = vst [vmem:[#allocation72_spill] sm:$0xff] %v15206_v53  ;;  %v15220_v46 = vsel %vm2583_vm4, %v14499_v62, %v2224_v14 }
 0x1a2   : > { %19159 = vst [vmem:[#allocation73_spill] sm:$0xff] %v15216_v26  ;;  %19160 = vst [vmem:[#allocation74_spill] sm:$0xff] %v15220_v46  ;;  %v3730_v8 = vcombine.low %v15216_v26, %v15197_v61  ;;  %v3747_v38 = vcombine.low %v15220_v46, %v15206_v53  ;;  %v15233_v54 = vrot.slane %v1095_v47, %v14318_v20 }
 0x1a3   : > { %2351 = vrot.lane.b32.xlu0 %v1978_v17, %s14216_s19  ;;  %v15163_v59 = vpop.permute.xlu1 %2193  ;;  %v15184_v17 = vrot.slane %v1053_v23, %v14318_v20  ;;  %v15230_v18 = vrot.slane %v1055_v56, %v14318_v20 }
 0x1a4   : > { %19161 = vst [vmem:[#allocation75_spill] sm:$0xff] %v15233_v54 }
 0x1a5   : > { %v15167_v1 = vpop.permute.xlu0 %2199  ;;  %2353 = vrot.lane.b32.xlu1 %v1982_v16, %s14216_s19  ;;  %v15192_v16 = vcombine.high %v15104_v15, %v15104_v15  ;;  %v1914_v53 = vrot.slane %v15184_v17, %v14330_v30 }
 0x1a7   : > { %2359 = vrot.lane.b32.xlu0 %v1994_v21, %s14216_s19  ;;  %v15186_v11 = vpop.permute.xlu1 %2201  ;;  %v15202_v21 = vsel %vm2583_vm4, %v14486_v55, %v15075_v33  ;;  %v1103_v55 = vcombine.high %v1095_v47, %v1095_v47 }
 0x1a8   : > { %19157 = vst [vmem:[#allocation71_spill] sm:$0xff] %v15202_v21  ;;  %v3731_v15 = vcombine.low %v15202_v21, %v15180_v41 }
 0x1a9   : > { %v2228_v23 = vpop.permute.xlu0 %2227  ;;  %2361 = vrot.lane.b32.xlu1 %v1998_v42, %s14216_s19  ;;  %v1910_v42 = vrot.slane %v15192_v16, %v14330_v30  ;;  %v15254_v47 = vrot.slane %v1103_v55, %v14318_v20  ;;  %v15268_v55 = vcombine.high %v15129_v35, %v15129_v35 }
 0x1aa   : > { %v15237_v62 = vsel %vm2583_vm4, %v14609_v5, %v2228_v23  ;;  %v3745_v46 = vrot.slane %v3731_v15, %v14904_v27  ;;  %v1186_v5 = vcombine.high %v15106_v6, %v15106_v6  ;;  %v3755_v23 = vrot.slane %v3747_v38, %v14904_v27 }
 0x1ab   : > { %2315 = vrot.lane.b32.xlu0 %v1906_v39, %s14216_s19  ;;  %v2230_v33 = vpop.permute.xlu1 %2229  ;;  %19162 = vst [vmem:[#allocation76_spill] sm:$0xff] %v15237_v62  ;;  %19164 = vst [vmem:[#allocation78_spill] sm:$0xff] %v15254_v47  ;;  %v1930_v6 = vrot.slane %v15233_v54, %v14330_v30  ;;  %v1088_v38 = vcombine.high %v15156_v50, %v15156_v50  ;;  %v15290_v50 = vcombine.high %v15149_v9, %v15149_v9 }
 0x1ac   : > { %v15241_v39 = vsel %vm2583_vm4, %v14618_v37, %v2230_v33  ;;  %v3738_v37 = vrot.slane %v3730_v8, %v14904_v27  ;;  %v1200_v8 = vrot.slane %v1186_v5, %v14318_v20  ;;  %v15305_v5 = vsel %vm2583_vm4, %v14589_v57, %v15163_v59 }
 0x1ad   : > { %19163 = vst [vmem:[#allocation77_spill] sm:$0xff] %v15241_v39  ;;  %v15243_v14 = vpop.permute.xlu0 %2235  ;;  %v3748_v56 = vcombine.low %v15237_v62, %v15241_v39  ;;  %2317 = vrot.lane.b32.xlu1 %v1910_v42, %s14216_s19  ;;  %v1918_v39 = vrot.slane %v15230_v18, %v14330_v30  ;;  %19166 = vst [vmem:[#allocation80_spill] sm:$0xff] %v15290_v50  ;;  %v15322_v57 = vsel %vm2583_vm4, %v14562_v34, %v15151_v43  ;;  %v19174_v43 = vld [vmem:[#allocation13_spill] sm:$0xff] }
 0x1ae   : > { %19169 = vst [vmem:[#allocation83_spill] sm:$0xff] %v15305_v5  ;;  %19171 = vst [vmem:[#allocation85_spill] sm:$0xff] %v15322_v57  ;;  %v15336_v34 = vcombine.high %v15161_v0, %v15161_v0 }
 0x1af   : > { %2319 = vrot.lane.b32.xlu0 %v1914_v53, %s14216_s19  ;;  %v3762_v33 = vrot.slane %v3748_v56, %v14904_v27  ;;  %v2238_v15 = vpop.permute.xlu1 %2237  ;;  %v3746_v53 = vcombine.low %v3738_v37, %v3745_v46  ;;  %v15277_v56 = vsel %vm2583_vm4, %v14559_v32, %v15141_v49  ;;  %v1934_v46 = vrot.slane %v15254_v47, %v14330_v30 }
 0x1b0   : > { %19165 = vst [vmem:[#allocation79_spill] sm:$0xff] %v15277_v56  ;;  %v15295_v32 = vsel %vm2583_vm4, %v14476_v45, %v15067_v12  ;;  %v15300_v49 = vsel %vm2583_vm4, %v14531_v22, %v15131_v52  ;;  %v1202_v12 = vcombine.high %v1200_v8, %v1200_v8  ;;  %v1102_v22 = vrot.slane %v1088_v38, %v14318_v20  ;;  %v19176_v38 = vld [vmem:[#allocation14_spill] sm:$0xff] }
 0x1b1   : > { %v15262_v62 = vpop.permute.xlu0 %2239  ;;  %v3763_v42 = vcombine.low %v3755_v23, %v3762_v33  ;;  %2321 = vrot.lane.b32.xlu1 %v1918_v39, %s14216_s19  ;;  %v15286_v39 = vcombine.high %v15146_v4, %v15146_v4  ;;  %19167 = vst [vmem:[#allocation81_spill] sm:$0xff] %v15295_v32  ;;  %19168 = vst [vmem:[#allocation82_spill] sm:$0xff] %v15300_v49  ;;  %v1986_v23 = vrot.slane %v15268_v55, %v14330_v30 }
 0x1b2   : > { %v3595_v33 = vcombine.low %v15300_v49, %v15277_v56  ;;  %v15317_v52 = vsel %vm2583_vm4, %v14462_v36, %v15052_v7  ;;  %19172 = vst [vmem:[#allocation86_spill] sm:$0xff] %v15336_v34  ;;  %v15339_v7 = vrot.slane %v1200_v8, %v14318_v20  ;;  %v15356_v8 = vrot.slane %v1202_v12, %v14318_v20 }
 0x1b3   : > { %2327 = vrot.lane.b32.xlu0 %v1930_v6, %s14216_s19  ;;  %v15280_v41 = vpack.c.bf16 %v3763_v42, %v3746_v53  ;;  %v2242_v21 = vpop.permute.xlu1 %2241  ;;  %19170 = vst [vmem:[#allocation84_spill] sm:$0xff] %v15317_v52  ;;  %v3594_v59 = vcombine.low %v15317_v52, %v15295_v32  ;;  %v3611_v6 = vcombine.low %v15322_v57, %v15305_v5  ;;  %v19194_v52 = vld [vmem:[#allocation5_spill] sm:$0xff] }
 0x1b4   : > { %v1990_v36 = vrot.slane %v15286_v39, %v14330_v30  ;;  %19173 = vst [vmem:[#allocation87_spill] sm:$0xff] %v15339_v7  ;;  %v3609_v61 = vrot.slane %v3595_v33, %v14904_v27  ;;  %19178 = vst [vmem:[#allocation88_spill] sm:$0xff] %v15356_v8  ;;  %v2006_v33 = vrot.slane %v15336_v34, %v14330_v30 }
 0x1b5   : > { %v2196_v37 = vpop.permute.xlu0 %2195  ;;  %v18871_v45 = vrot.slane %v15280_v41, 4  ;;  %2329 = vrot.lane.b32.xlu1 %v1934_v46, %s14216_s19  ;;  %v15368_v12 = vcombine.high %v15184_v17, %v15184_v17  ;;  %v2014_v56 = vrot.slane %v15356_v8, %v14330_v30  ;;  %v15419_v32 = vcombine.high %v15254_v47, %v15254_v47 }
 0x1b6   : > { %v15343_v42 = vsel %vm2583_vm4, %v19174_v43, %v2196_v37  ;;  %v1104_v37 = vcombine.high %v1102_v22, %v1102_v22  ;;  %v3619_v43 = vrot.slane %v3611_v6, %v14904_v27  ;;  %v19182_v6 = vld [vmem:[#allocation10_spill] sm:$0xff] }
 0x1b7   : > { %2355 = vrot.lane.b32.xlu0 %v1986_v23, %s14216_s19  ;;  %4885 = vst.msk [vmem:[#allocation2 + $0x78] sm:$0xf0] %vm4867_vm2, %v18871_v45  ;;  %v2198_v53 = vpop.permute.xlu1 %2197  ;;  %19175 = vst [vmem:[#allocation13_spill] sm:$0xff] %v15343_v42  ;;  %v2002_v45 = vrot.slane %v15290_v50, %v14330_v30  ;;  %v1922_v49 = vrot.slane %v15368_v12, %v14330_v30  ;;  %v19237_v50 = vld [vmem:[#allocation24_spill] sm:$0xff] }
 0x1b8   : > { %v15347_v46 = vsel %vm2583_vm4, %v19176_v38, %v2198_v53  ;;  %v3602_v53 = vrot.slane %v3594_v59, %v14904_v27  ;;  %19179 = vst [vmem:[#allocation89_spill] sm:$0xff] %v15368_v12 }
 0x1b9   : > { %19177 = vst [vmem:[#allocation14_spill] sm:$0xff] %v15347_v46  ;;  %v2204_v23 = vpop.permute.xlu0 %2203  ;;  %v3612_v26 = vcombine.low %v15343_v42, %v15347_v46  ;;  %2357 = vrot.lane.b32.xlu1 %v1990_v36, %s14216_s19  ;;  %v2010_v36 = vrot.slane %v15339_v7, %v14330_v30  ;;  %v15379_v42 = vsel %vm2583_vm4, %v19182_v6, %v2238_v15  ;;  %v19189_v6 = vld [vmem:[#allocation9_spill] sm:$0xff] }
 0x1ba   : > { %v3610_v59 = vcombine.low %v3602_v53, %v3609_v61  ;;  %19183 = vst [vmem:[#allocation10_spill] sm:$0xff] %v15379_v42  ;;  %v19185_v61 = vld [vmem:[#allocation6_spill] sm:$0xff]  ;;  %v15397_v15 = vcombine.high %v15233_v54, %v15233_v54  ;;  %v19196_v54 = vld [vmem:[#allocation11_spill] sm:$0xff] }
 0x1bb   : > { %2363 = vrot.lane.b32.xlu0 %v2002_v45, %s14216_s19  ;;  %v3626_v38 = vrot.slane %v3612_v26, %v14904_v27  ;;  %v2206_v5 = vpop.permute.xlu1 %2205  ;;  %v15371_v45 = vrot.slane %v1102_v22, %v14318_v20  ;;  %v15375_v26 = vrot.slane %v1104_v37, %v14318_v20  ;;  %v15386_v22 = vcombine.high %v15230_v18, %v15230_v18 }
 0x1bc   : > { %v15391_v53 = vsel %vm2583_vm4, %v19185_v61, %v15120_v19  ;;  %19187 = vst [vmem:[#allocation93_spill] sm:$0xff] %v15397_v15  ;;  %v15409_v19 = vsel %vm2583_vm4, %v19189_v6, %v15243_v14  ;;  %v15437_v47 = vsel %vm2583_vm4, %v19196_v54, %v15262_v62  ;;  %v19200_v6 = vld [vmem:[#allocation8_spill] sm:$0xff] }
 0x1bd   : > { %v2208_v57 = vpop.permute.xlu0 %2207  ;;  %19180 = vst [vmem:[#allocation90_spill] sm:$0xff] %v15371_v45  ;;  %v3627_v46 = vcombine.low %v3619_v43, %v3626_v38  ;;  %2365 = vrot.lane.b32.xlu1 %v2006_v33, %s14216_s19  ;;  %19181 = vst [vmem:[#allocation91_spill] sm:$0xff] %v15375_v26  ;;  %v15402_v38 = vld [vmem:[%s18803_s2] ss:$0 sm:$0xff]  ;;  %v19188_v33 = vld [vmem:[#allocation26_spill] sm:$0xff]  ;;  %v3765_v14 = vcombine.low %v15409_v19, %v15379_v42  ;;  %v15449_v42 = vsel %vm2583_vm4, %v19200_v6, %v15186_v11 }
 0x1be   : > { %19184 = vst [vmem:[#allocation92_spill] sm:$0xff] %v15386_v22  ;;  %19186 = vst [vmem:[#allocation6_spill] sm:$0xff] %v15391_v53  ;;  %v19207_v6 = vld [vmem:[#allocation19_spill] sm:$0xff] }
 0x1bf   : > { %2367 = vrot.lane.b32.xlu0 %v2010_v36, %s14216_s19  ;;  %v15393_v37 = vpack.c.bf16 %v3627_v46, %v3610_v59  ;;  %v2210_v43 = vpop.permute.xlu1 %2209  ;;  %v475_v36 = vadd.f32 %v15402_v38, %v19188_v33  ;;  %19190 = vst [vmem:[#allocation26_spill] sm:$0xff] %v15409_v19  ;;  %v19191_v46 = vld [vmem:[#allocation12_spill] sm:$0xff]  ;;  %v15424_v33 = vsel %vm2583_vm4, %v19194_v52, %v15108_v3  ;;  %19197 = vst [vmem:[#allocation11_spill] sm:$0xff] %v15437_v47 }
 0x1c0   : > { %v15413_v59 = vsel %vm2583_vm4, %v19191_v46, %v2242_v21  ;;  %19193 = vst [vmem:[#allocation12_spill] sm:$0xff] %v15419_v32  ;;  %19195 = vst [vmem:[#allocation5_spill] sm:$0xff] %v15424_v33  ;;  %v1946_v21 = vrot.slane %v15371_v45, %v14330_v30  ;;  %v3764_v46 = vcombine.low %v15424_v33, %v15391_v53  ;;  %v19198_v3 = vld [vmem:[#allocation16_spill] sm:$0xff]  ;;  %v19205_v33 = vld [vmem:[#allocation18_spill] sm:$0xff] }
 0x1c1   : > { %19192 = vst [vmem:[#allocation9_spill] sm:$0xff] %v15413_v59  ;;  %v2244_v61 = vpop.permute.xlu0 %2243  ;;  %2369 = vrot.lane.b32.xlu1 %v2014_v56, %s14216_s19  ;;  %v15441_v52 = vsel %vm2583_vm4, %v19198_v3, %v2206_v5  ;;  %v1926_v56 = vrot.slane %v15386_v22, %v14330_v30  ;;  %19201 = vst [vmem:[#allocation8_spill] sm:$0xff] %v15449_v42  ;;  %v3781_v19 = vcombine.low %v15437_v47, %v15413_v59  ;;  %v19203_v3 = vld [vmem:[#allocation15_spill] sm:$0xff]  ;;  %v19209_v47 = vld [vmem:[#allocation20_spill] sm:$0xff] }
 0x1c2   : > { %19199 = vst [vmem:[#allocation16_spill] sm:$0xff] %v15441_v52  ;;  %v19202_v54 = vrot.slane %v15393_v37, 4  ;;  %v1938_v5 = vrot.slane %v15397_v15, %v14330_v30  ;;  %v15462_v53 = vsel %vm2583_vm4, %v19203_v3, %v2204_v23  ;;  %v15466_v11 = vsel %vm2583_vm4, %v19205_v33, %v2210_v43  ;;  %v19211_v33 = vld [vmem:[#allocation7_spill] sm:$0xff] }
 0x1c3   : > { %2323 = vrot.lane.b32.xlu0 %v1922_v49, %s14216_s19  ;;  %v2246_v62 = vpop.permute.xlu1 %2245  ;;  %v15458_v49 = vmax.f32 %v475_v36, 0.0  ;;  %19204 = vst [vmem:[#allocation15_spill] sm:$0xff] %v15462_v53  ;;  %19206 = vst [vmem:[#allocation18_spill] sm:$0xff] %v15466_v11  ;;  %v15470_v59 = vsel %vm2583_vm4, %v19207_v6, %v2244_v61  ;;  %v3779_v36 = vrot.slane %v3765_v14, %v14904_v27  ;;  %v19215_v3 = vld [vmem:[#allocation27_spill] sm:$0xff] }
 0x1c4   : > { %4879 = vst.msk [vmem:[#allocation2 + $0x48] sm:$0xf0] %vm4867_vm2, %v19202_v54  ;;  %19208 = vst [vmem:[#allocation19_spill] sm:$0xff] %v15470_v59  ;;  %v15474_v54 = vsel %vm2583_vm4, %v19209_v47, %v2246_v62  ;;  %v3629_v15 = vcombine.low %v15462_v53, %v15441_v52  ;;  %v1942_v43 = vrot.slane %v15419_v32, %v14330_v30  ;;  %v19213_v62 = vld [vmem:[#allocation17_spill] sm:$0xff] }
 0x1c5   : > { %19210 = vst [vmem:[#allocation20_spill] sm:$0xff] %v15474_v54  ;;  %v2212_v9 = vpop.permute.xlu0 %2211  ;;  %v3782_v23 = vcombine.low %v15470_v59, %v15474_v54  ;;  %2325 = vrot.lane.b32.xlu1 %v1926_v56, %s14216_s19  ;;  %v3772_v61 = vrot.slane %v3764_v46, %v14904_v27  ;;  %v15488_v47 = vsel %vm2583_vm4, %v19211_v33, %v15167_v1  ;;  %v19216_v59 = vld [vmem:[#allocation21_spill] sm:$0xff] }
 0x1c6   : > { %19212 = vst [vmem:[#allocation7_spill] sm:$0xff] %v15488_v47  ;;  %v15492_v14 = vsel %vm2583_vm4, %v19213_v62, %v2208_v57  ;;  %v467_v6 = vadd.f32 %v15402_v38, %v19215_v3  ;;  %v3628_v56 = vcombine.low %v15488_v47, %v15449_v42  ;;  %v3789_v54 = vrot.slane %v3781_v19, %v14904_v27  ;;  %v19218_v62 = vld [vmem:[#allocation23_spill] sm:$0xff] }
 0x1c7   : > { %19214 = vst [vmem:[#allocation17_spill] sm:$0xff] %v15492_v14  ;;  %2331 = vrot.lane.b32.xlu0 %v1938_v5, %s14216_s19  ;;  %v3645_v46 = vcombine.low %v15492_v14, %v15466_v11  ;;  %v3796_v1 = vrot.slane %v3782_v23, %v14904_v27  ;;  %v2214_v33 = vpop.permute.xlu1 %2213  ;;  %v15505_v57 = vsel %vm2583_vm4, %v19216_v59, %v2212_v9 }
 0x1c8   : > { %19217 = vst [vmem:[#allocation27_spill] sm:$0xff] %v15505_v57  ;;  %v15509_v5 = vsel %vm2583_vm4, %v19218_v62, %v2214_v33  ;;  %v1340_v3 = vrot.slane %v15458_v49, %v14318_v20  ;;  %v15517_v19 = vcombine.high %v15339_v7, %v15339_v7  ;;  %v3780_v11 = vcombine.low %v3772_v61, %v3779_v36 }
 0x1c9   : > { %19219 = vst [vmem:[#allocation21_spill] sm:$0xff] %v15509_v5  ;;  %v15513_v52 = vpop.permute.xlu0 %2279  ;;  %v3643_v23 = vrot.slane %v3629_v15, %v14904_v27  ;;  %v3797_v14 = vcombine.low %v3789_v54, %v3796_v1  ;;  %v3646_v9 = vcombine.low %v15505_v57, %v15509_v5  ;;  %2333 = vrot.lane.b32.xlu1 %v1942_v43, %s14216_s19  ;;  %v15523_v59 = vmax.f32 %v467_v6, 0.0 }
 0x1ca   : > { %19220 = vst [vmem:[#allocation23_spill] sm:$0xff] %v15517_v19  ;;  %v1950_v33 = vrot.slane %v15375_v26, %v14330_v30  ;;  %v15530_v62 = vcombine.high %v15356_v8, %v15356_v8  ;;  %v3636_v36 = vrot.slane %v3628_v56, %v14904_v27  ;;  %v3653_v15 = vrot.slane %v3645_v46, %v14904_v27 }
 0x1cb   : > { %2335 = vrot.lane.b32.xlu0 %v1946_v21, %s14216_s19  ;;  %v4697_v54 = vpack.c.bf16 %v3797_v14, %v3780_v11  ;;  %v3660_v61 = vrot.slane %v3646_v9, %v14904_v27  ;;  %v15535_v1 = vpop.permute.xlu1 %2281  ;;  %v2018_v21 = vrot.slane %v15517_v19, %v14330_v30  ;;  %v15543_v6 = vcombine.high %v15371_v45, %v15371_v45 }
 0x1cc   : > { %19221 = vst [vmem:[#allocation94_spill] sm:$0xff] %v15530_v62  ;;  %v3644_v5 = vcombine.low %v3636_v36, %v3643_v23  ;;  %v1348_v56 = vcombine.high %v1340_v3, %v1340_v3  ;;  %v15547_v11 = vrot.slane %v1340_v3, %v14318_v20  ;;  %v15552_v14 = vcombine.high %v15375_v26, %v15375_v26 }
 0x1cd   : > { %v15537_v43 = vpop.permute.xlu0 %2247  ;;  %19222 = vst [vmem:[#allocation95_spill] sm:$0xff] %v15543_v6  ;;  %v4775_v57 = vrot.slane %v4697_v54, 4  ;;  %v3661_v53 = vcombine.low %v3653_v15, %v3660_v61  ;;  %2337 = vrot.lane.b32.xlu1 %v1950_v33, %s14216_s19  ;;  %v19225_v46 = vrot.slane %v15280_v41, 4  ;;  %v1242_v36 = vrot.slane %v15523_v59, %v14318_v20 }
 0x1ce   : > { %19223 = vst [vmem:[#allocation96_spill] sm:$0xff] %v15547_v11  ;;  %19224 = vst [vmem:[#allocation97_spill] sm:$0xff] %v15552_v14  ;;  %v2022_v3 = vrot.slane %v15530_v62, %v14330_v30  ;;  %v1954_v41 = vrot.slane %v15543_v6, %v14330_v30  ;;  %v15570_v61 = vrot.slane %v1348_v56, %v14318_v20 }
 0x1cf   : > { %2371 = vrot.lane.b32.xlu0 %v2018_v21, %s14216_s19  ;;  %v4776_v9 = vsel %vm364_vm0, %v19225_v46, %v4775_v57  ;;  %4887 = vst.msk [vmem:[#allocation2 + $0x88] sm:$0xf] %vm4871_vm3, %v4775_v57  ;;  %v4693_v23 = vpack.c.bf16 %v3661_v53, %v3644_v5  ;;  %v15560_v33 = vpop.permute.xlu1 %2249  ;;  %v1958_v53 = vrot.slane %v15552_v14, %v14330_v30  ;;  %v19227_v5 = vrot.slane %v15393_v37, 4 }
 0x1d0   : > { %4886 = vst.msk [vmem:[#allocation2 + $0x80] sm:$0xff] %vm4869_vm5, %v4776_v9  ;;  %19226 = vst [vmem:[#allocation98_spill] sm:$0xff] %v15570_v61  ;;  %v2090_v57 = vrot.slane %v15547_v11, %v14330_v30  ;;  %v1333_v56 = vcombine.high %v15458_v49, %v15458_v49  ;;  %v1250_v46 = vcombine.high %v1242_v36, %v1242_v36  ;;  %v19228_v9 = vld [vmem:[#allocation28_spill] sm:$0xff] }
 0x1d1   : > { %v15565_v15 = vpop.permute.xlu0 %2283  ;;  %v4769_v54 = vrot.slane %v4693_v23, 4  ;;  %2373 = vrot.lane.b32.xlu1 %v2022_v3, %s14216_s19  ;;  %v478_v23 = vadd.f32 %v15402_v38, %v19228_v9  ;;  %v2094_v37 = vrot.slane %v15570_v61, %v14330_v30  ;;  %v15618_v47 = vcombine.high %v15570_v61, %v15570_v61 }
 0x1d2   : > { %v1347_v49 = vrot.slane %v1333_v56, %v14318_v20  ;;  %v1235_v61 = vcombine.high %v15523_v59, %v15523_v59 }
 0x1d3   : > { %2339 = vrot.lane.b32.xlu0 %v1954_v41, %s14216_s19  ;;  %v4770_v21 = vsel %vm364_vm0, %v19227_v5, %v4769_v54  ;;  %4881 = vst.msk [vmem:[#allocation2 + $0x58] sm:$0xf] %vm4871_vm3, %v4769_v54  ;;  %v2286_v3 = vpop.permute.xlu1 %2285  ;;  %v15588_v41 = vrot.slane %v1242_v36, %v14318_v20  ;;  %v15596_v54 = vrot.slane %v1250_v46, %v14318_v20  ;;  %v15598_v5 = vmax.f32 %v478_v23, 0.0 }
 0x1d4   : > { %4880 = vst.msk [vmem:[#allocation2 + $0x50] sm:$0xff] %vm4869_vm5, %v4770_v21  ;;  %19232 = vst [vmem:[#allocation101_spill] sm:$0xff] %v15618_v47  ;;  %v2102_v19 = vrot.slane %v15618_v47, %v14330_v30  ;;  %v1249_v59 = vrot.slane %v1235_v61, %v14318_v20  ;;  %v19235_v61 = vld [vmem:[#allocation32_spill] sm:$0xff] }
 0x1d5   : > { %19229 = vst [vmem:[#allocation28_spill] sm:$0xff] %v15588_v41  ;;  %v2288_v42 = vpop.permute.xlu0 %2287  ;;  %2341 = vrot.lane.b32.xlu1 %v1958_v53, %s14216_s19  ;;  %19230 = vst [vmem:[#allocation99_spill] sm:$0xff] %v15596_v54  ;;  %v2026_v36 = vrot.slane %v15588_v41, %v14330_v30  ;;  %v15606_v53 = vcombine.high %v15547_v11, %v15547_v11  ;;  %v1389_v56 = vrot.slane %v15598_v5, %v14318_v20 }
 0x1d6   : > { %v2030_v23 = vrot.slane %v15596_v54, %v14330_v30  ;;  %v15621_v11 = vrot.slane %v1347_v49, %v14318_v20  ;;  %v15674_v7 = vrot.slane %v1249_v59, %v14318_v20 }
 0x1d7   : > { %2407 = vrot.lane.b32.xlu0 %v2090_v57, %s14216_s19  ;;  %v2290_v9 = vpop.permute.xlu1 %2289  ;;  %19231 = vst [vmem:[#allocation100_spill] sm:$0xff] %v15606_v53  ;;  %v1349_v57 = vcombine.high %v1347_v49, %v1347_v49  ;;  %v1397_v49 = vcombine.high %v1389_v56, %v1389_v56 }
 0x1d9   : > { %v15600_v21 = vpop.permute.xlu0 %2295  ;;  %2409 = vrot.lane.b32.xlu1 %v2094_v37, %s14216_s19  ;;  %v2098_v37 = vrot.slane %v15606_v53, %v14330_v30  ;;  %v15632_v45 = vrot.slane %v1349_v57, %v14318_v20  ;;  %v15641_v53 = vrot.slane %v1389_v56, %v14318_v20 }
 0x1db   : > { %2375 = vrot.lane.b32.xlu0 %v2026_v36, %s14216_s19  ;;  %v15612_v46 = vpop.permute.xlu1 %2297  ;;  %v19233_v36 = vld [vmem:[#allocation30_spill] sm:$0xff]  ;;  %v2110_v56 = vrot.slane %v15632_v45, %v14330_v30  ;;  %v2122_v32 = vrot.slane %v15641_v53, %v14330_v30 }
 0x1dc   : > { %v470_v6 = vadd.f32 %v15402_v38, %v19233_v36  ;;  %v15653_v36 = vrot.slane %v1397_v49, %v14318_v20  ;;  %v15670_v49 = vsel %vm2583_vm4, %v19235_v61, %v2286_v3  ;;  %v15687_v3 = vsel %vm2583_vm4, %v19237_v50, %v15535_v1  ;;  %v19243_v50 = vld [vmem:[#allocation22_spill] sm:$0xff] }
 0x1dd   : > { %v15623_v14 = vpop.permute.xlu0 %2251  ;;  %2377 = vrot.lane.b32.xlu1 %v2030_v23, %s14216_s19  ;;  %19236 = vst [vmem:[#allocation32_spill] sm:$0xff] %v15670_v49  ;;  %19238 = vst [vmem:[#allocation24_spill] sm:$0xff] %v15687_v3  ;;  %v15706_v1 = vsel %vm2583_vm4, %v19243_v50, %v15513_v52 }
 0x1de   : > { %v15648_v57 = vmax.f32 %v470_v6, 0.0  ;;  %19244 = vst [vmem:[#allocation22_spill] sm:$0xff] %v15706_v1 }
 0x1df   : > { %2411 = vrot.lane.b32.xlu0 %v2098_v37, %s14216_s19  ;;  %v15636_v62 = vpop.permute.xlu1 %2253  ;;  %v2106_v37 = vrot.slane %v15621_v11, %v14330_v30 }
 0x1e0   : > { %v1291_v6 = vrot.slane %v15648_v57, %v14318_v20 }
 0x1e1   : > { %v15643_v23 = vpop.permute.xlu0 %2255  ;;  %2413 = vrot.lane.b32.xlu1 %v2102_v19, %s14216_s19  ;;  %v15663_v19 = vcombine.high %v15588_v41, %v15588_v41  ;;  %v2126_v41 = vrot.slane %v15653_v36, %v14330_v30 }
 0x1e2   : > { %v15723_v50 = vrot.slane %v1291_v6, %v14318_v20 }
 0x1e3   : > { %2415 = vrot.lane.b32.xlu0 %v2106_v37, %s14216_s19  ;;  %v2258_v47 = vpop.permute.xlu1 %2257  ;;  %19234 = vst [vmem:[#allocation30_spill] sm:$0xff] %v15663_v19  ;;  %v1251_v37 = vcombine.high %v1249_v59, %v1249_v59  ;;  %v19241_v59 = vld [vmem:[#allocation34_spill] sm:$0xff]  ;;  %v2034_v22 = vrot.slane %v15663_v19, %v14330_v30 }
 0x1e4   : > { %v15696_v0 = vsel %vm2583_vm4, %v19241_v59, %v2290_v9  ;;  %v4002_v59 = vcombine.low %v15706_v1, %v15687_v3  ;;  %19247 = vst [vmem:[#allocation102_spill] sm:$0xff] %v15723_v50 }
 0x1e5   : > { %v15657_v26 = vpop.permute.xlu0 %2263  ;;  %2417 = vrot.lane.b32.xlu1 %v2110_v56, %s14216_s19  ;;  %v15682_v56 = vcombine.high %v15596_v54, %v15596_v54  ;;  %19242 = vst [vmem:[#allocation34_spill] sm:$0xff] %v15696_v0  ;;  %v15714_v9 = vrot.slane %v1251_v37, %v14318_v20 }
 0x1e7   : > { %2423 = vrot.lane.b32.xlu0 %v2122_v32, %s14216_s19  ;;  %v15676_v8 = vpop.permute.xlu1 %2265  ;;  %v19239_v32 = vld [vmem:[#allocation31_spill] sm:$0xff]  ;;  %v2038_v52 = vrot.slane %v15682_v56, %v14330_v30 }
 0x1e8   : > { %v15692_v61 = vsel %vm2583_vm4, %v19239_v32, %v15565_v15  ;;  %v1299_v15 = vcombine.high %v1291_v6, %v1291_v6  ;;  %v19245_v32 = vld [vmem:[#allocation33_spill] sm:$0xff] }
 0x1e9   : > { %19240 = vst [vmem:[#allocation31_spill] sm:$0xff] %v15692_v61  ;;  %v2292_v34 = vpop.permute.xlu0 %2291  ;;  %v4003_v54 = vcombine.low %v15692_v61, %v15670_v49  ;;  %2425 = vrot.lane.b32.xlu1 %v2126_v41, %s14216_s19  ;;  %v15710_v12 = vsel %vm2583_vm4, %v19245_v32, %v2288_v42  ;;  %v19248_v42 = vld [vmem:[#allocation39_spill] sm:$0xff] }
 0x1ea   : > { %19246 = vst [vmem:[#allocation33_spill] sm:$0xff] %v15710_v12  ;;  %v4019_v41 = vcombine.low %v15710_v12, %v15696_v0  ;;  %v15727_v32 = vsel %vm2583_vm4, %v19248_v42, %v2292_v34  ;;  %v2042_v0 = vrot.slane %v15674_v7, %v14330_v30  ;;  %v15742_v6 = vrot.slane %v1299_v15, %v14318_v20 }
 0x1eb   : > { %2379 = vrot.lane.b32.xlu0 %v2034_v22, %s14216_s19  ;;  %v2294_v49 = vpop.permute.xlu1 %2293  ;;  %19249 = vst [vmem:[#allocation39_spill] sm:$0xff] %v15727_v32  ;;  %v4017_v12 = vrot.slane %v4003_v54, %v14904_v27  ;;  %v2046_v54 = vrot.slane %v15714_v9, %v14330_v30  ;;  %v15756_v15 = vcombine.high %v15621_v11, %v15621_v11 }
 0x1ec   : > { %v15731_v22 = vsel %vm2583_vm4, %v14855_v28, %v2294_v49  ;;  %v4010_v28 = vrot.slane %v4002_v59, %v14904_v27  ;;  %v4027_v34 = vrot.slane %v4019_v41, %v14904_v27  ;;  %v2062_v19 = vrot.slane %v15742_v6, %v14330_v30 }
 0x1ed   : > { %19250 = vst [vmem:[#allocation103_spill] sm:$0xff] %v15731_v22  ;;  %v15733_v37 = vpop.permute.xlu0 %2299  ;;  %v4020_v61 = vcombine.low %v15727_v32, %v15731_v22  ;;  %2381 = vrot.lane.b32.xlu1 %v2038_v52, %s14216_s19  ;;  %v2058_v52 = vrot.slane %v15723_v50, %v14330_v30 }
 0x1ee   : > { %v4018_v59 = vcombine.low %v4010_v28, %v4017_v12  ;;  %v15777_v12 = vcombine.high %v15674_v7, %v15674_v7  ;;  %v19253_v28 = vld [vmem:[#allocation29_spill] sm:$0xff] }
 0x1ef   : > { %2383 = vrot.lane.b32.xlu0 %v2042_v0, %s14216_s19  ;;  %v4034_v49 = vrot.slane %v4020_v61, %v14904_v27  ;;  %v2302_v42 = vpop.permute.xlu1 %2301  ;;  %v1284_v0 = vcombine.high %v15648_v57, %v15648_v57  ;;  %v19251_v61 = vld [vmem:[#allocation37_spill] sm:$0xff]  ;;  %v15773_v57 = vcombine.high %v15632_v45, %v15632_v45 }
 0x1f0   : > { %v15764_v22 = vsel %vm2583_vm4, %v19251_v61, %v15636_v62  ;;  %v15782_v62 = vsel %vm2583_vm4, %v19253_v28, %v15560_v33  ;;  %v19258_v28 = vld [vmem:[#allocation25_spill] sm:$0xff] }
 0x1f1   : > { %v15750_v3 = vpop.permute.xlu0 %2303  ;;  %v4035_v41 = vcombine.low %v4027_v34, %v4034_v49  ;;  %2385 = vrot.lane.b32.xlu1 %v2046_v54, %s14216_s19  ;;  %19252 = vst [vmem:[#allocation37_spill] sm:$0xff] %v15764_v22  ;;  %19254 = vst [vmem:[#allocation29_spill] sm:$0xff] %v15782_v62  ;;  %v19255_v34 = vld [vmem:[#allocation36_spill] sm:$0xff]  ;;  %v15791_v54 = vsel %vm2583_vm4, %v14828_v60, %v2258_v47  ;;  %v15805_v60 = vsel %vm2583_vm4, %v19258_v28, %v15537_v43 }
 0x1f2   : > { %v15787_v49 = vsel %vm2583_vm4, %v19255_v34, %v15623_v14  ;;  %19257 = vst [vmem:[#allocation104_spill] sm:$0xff] %v15791_v54  ;;  %v1382_v14 = vcombine.high %v15598_v5, %v15598_v5  ;;  %19259 = vst [vmem:[#allocation25_spill] sm:$0xff] %v15805_v60  ;;  %v15810_v47 = vsel %vm2583_vm4, %v14819_v24, %v15643_v23 }
 0x1f3   : > { %2391 = vrot.lane.b32.xlu0 %v2058_v52, %s14216_s19  ;;  %v15767_v32 = vpack.c.bf16 %v4035_v41, %v4018_v59  ;;  %v2306_v1 = vpop.permute.xlu1 %2305  ;;  %19256 = vst [vmem:[#allocation36_spill] sm:$0xff] %v15787_v49  ;;  %v2114_v59 = vrot.slane %v15756_v15, %v14330_v30  ;;  %v1298_v41 = vrot.slane %v1284_v0, %v14318_v20  ;;  %19260 = vst [vmem:[#allocation105_spill] sm:$0xff] %v15810_v47 }
 0x1f4   : > { %v3867_v61 = vcombine.low %v15787_v49, %v15764_v22  ;;  %v3866_v0 = vcombine.low %v15805_v60, %v15782_v62  ;;  %v2118_v43 = vrot.slane %v15773_v57, %v14330_v30  ;;  %v15824_v24 = vcombine.high %v15714_v9, %v15714_v9 }
 0x1f5   : > { %v2260_v52 = vpop.permute.xlu0 %2259  ;;  %v18931_v33 = vrot.slane %v15767_v32, 4  ;;  %2393 = vrot.lane.b32.xlu1 %v2062_v19, %s14216_s19  ;;  %v3883_v19 = vcombine.low %v15810_v47, %v15791_v54  ;;  %v2050_v28 = vrot.slane %v15777_v12, %v14330_v30  ;;  %v1300_v54 = vcombine.high %v1298_v41, %v1298_v41 }
 0x1f6   : > { %v15828_v23 = vsel %vm2583_vm4, %v14932_v13, %v2260_v52  ;;  %v3881_v47 = vrot.slane %v3867_v61, %v14904_v27  ;;  %v19263_v13 = vld [vmem:[#allocation3_spill] sm:$0xff]  ;;  %v15847_v52 = vrot.slane %v1298_v41, %v14318_v20  ;;  %v3874_v49 = vrot.slane %v3866_v0, %v14904_v27 }
 0x1f7   : > { %2419 = vrot.lane.b32.xlu0 %v2114_v59, %s14216_s19  ;;  %4897 = vst.msk [vmem:[#allocation2 + $0xd8] sm:$0xf0] %vm4867_vm2, %v18931_v33  ;;  %v2262_v5 = vpop.permute.xlu1 %2261  ;;  %19261 = vst [vmem:[#allocation106_spill] sm:$0xff] %v15828_v23  ;;  %v15838_v33 = vcombine.high %v15723_v50, %v15723_v50  ;;  %v3891_v61 = vrot.slane %v3883_v19, %v14904_v27  ;;  %v15865_v62 = vrot.slane %v1300_v54, %v14318_v20 }
 0x1f8   : > { %v15832_v34 = vsel %vm2583_vm4, %v14942_v63, %v2262_v5  ;;  %v403_v63 = vadd.f32 %v15402_v38, %v19263_v13  ;;  %v15852_v5 = vcombine.high %v15742_v6, %v15742_v6  ;;  %v15860_v13 = vrot.slane %v1382_v14, %v14318_v20 }
 0x1f9   : > { %19262 = vst [vmem:[#allocation107_spill] sm:$0xff] %v15832_v34  ;;  %v2268_v59 = vpop.permute.xlu0 %2267  ;;  %v3884_v22 = vcombine.low %v15828_v23, %v15832_v34  ;;  %2421 = vrot.lane.b32.xlu1 %v2118_v43, %s14216_s19  ;;  %v2054_v43 = vrot.slane %v15824_v24, %v14330_v30  ;;  %v3882_v60 = vcombine.low %v3874_v49, %v3881_v47 }
 0x1fa   : > { %v15868_v19 = vmax.f32 %v403_v63, 0.0  ;;  %v15878_v14 = vsel %vm2583_vm4, %v14796_v40, %v15612_v46  ;;  %v2070_v49 = vrot.slane %v15852_v5, %v14330_v30  ;;  %v15886_v47 = vcombine.high %v15847_v52, %v15847_v52 }
 0x1fb   : > { %2387 = vrot.lane.b32.xlu0 %v2050_v28, %s14216_s19  ;;  %v3898_v34 = vrot.slane %v3884_v22, %v14904_v27  ;;  %v2270_v23 = vpop.permute.xlu1 %2269  ;;  %v2066_v28 = vrot.slane %v15838_v33, %v14330_v30  ;;  %v15872_v22 = vsel %vm2583_vm4, %v14878_v48, %v2302_v42  ;;  %19265 = vst [vmem:[#allocation108_spill] sm:$0xff] %v15878_v14 }
 0x1fc   : > { %19264 = vst [vmem:[#allocation3_spill] sm:$0xff] %v15872_v22  ;;  %v1398_v48 = vcombine.high %v15860_v13, %v15860_v13  ;;  %v15893_v42 = vsel %vm2583_vm4, %v14863_v31, %v15733_v37  ;;  %v15897_v40 = vsel %vm2583_vm4, %v14918_v58, %v2306_v1  ;;  %v2078_v31 = vrot.slane %v15865_v62, %v14330_v30 }
 0x1fd   : > { %v2272_v41 = vpop.permute.xlu0 %2271  ;;  %v3899_v0 = vcombine.low %v3891_v61, %v3898_v34  ;;  %2389 = vrot.lane.b32.xlu1 %v2054_v43, %s14216_s19  ;;  %19266 = vst [vmem:[#allocation109_spill] sm:$0xff] %v15893_v42  ;;  %19267 = vst [vmem:[#allocation110_spill] sm:$0xff] %v15897_v40  ;;  %v19268_v34 = vld [vmem:[#allocation35_spill] sm:$0xff]  ;;  %v4037_v61 = vcombine.low %v15893_v42, %v15872_v22  ;;  %v15917_v1 = vsel %vm2583_vm4, %v14872_v2, %v15750_v3 }
 0x1fe   : > { %v15904_v63 = vsel %vm2583_vm4, %v19268_v34, %v15600_v21  ;;  %19270 = vst [vmem:[#allocation111_spill] sm:$0xff] %v15917_v1  ;;  %v15921_v21 = vsel %vm2583_vm4, %v14972_v44, %v2270_v23  ;;  %v15926_v37 = vcombine.high %v15865_v62, %v15865_v62  ;;  %v2082_v44 = vrot.slane %v15886_v47, %v14330_v30 }
 0x1ff   : > { %2395 = vrot.lane.b32.xlu0 %v2066_v28, %s14216_s19  ;;  %v15880_v50 = vpack.c.bf16 %v3899_v0, %v3882_v60  ;;  %v2274_v54 = vpop.permute.xlu1 %2273  ;;  %v2074_v60 = vrot.slane %v15847_v52, %v14330_v30  ;;  %19269 = vst [vmem:[#allocation35_spill] sm:$0xff] %v15904_v63  ;;  %v4036_v58 = vcombine.low %v15904_v63, %v15878_v14  ;;  %19271 = vst [vmem:[#allocation112_spill] sm:$0xff] %v15921_v21 }
 0x200   : > { %v15931_v28 = vsel %vm2583_vm4, %v14838_v25, %v15676_v8  ;;  %v4053_v0 = vcombine.low %v15917_v1, %v15897_v40  ;;  %v15942_v3 = vcombine.high %v15641_v53, %v15641_v53  ;;  %v15946_v23 = vsel %vm2583_vm4, %v14953_v29, %v2268_v59  ;;  %v19275_v8 = vld [vmem:[#allocation57_spill] sm:$0xff] }
 0x201   : > { %v2308_v46 = vpop.permute.xlu0 %2307  ;;  %v18941_v43 = vrot.slane %v15880_v50, 4  ;;  %2397 = vrot.lane.b32.xlu1 %v2070_v49, %s14216_s19  ;;  %19272 = vst [vmem:[#allocation113_spill] sm:$0xff] %v15931_v28  ;;  %19273 = vst [vmem:[#allocation114_spill] sm:$0xff] %v15946_v23  ;;  %v15950_v25 = vsel %vm2583_vm4, %v15007_v10, %v2274_v54  ;;  %v4051_v40 = vrot.slane %v4037_v61, %v14904_v27  ;;  %v19279_v54 = vld [vmem:[#allocation38_spill] sm:$0xff]  ;;  %v19281_v61 = vld [vmem:[#allocation49_spill] sm:$0xff] }
 0x202   : > { %19274 = vst [vmem:[#allocation115_spill] sm:$0xff] %v15950_v25  ;;  %v15954_v49 = vsel %vm2583_vm4, %v19275_v8, %v2308_v46  ;;  %v3901_v1 = vcombine.low %v15946_v23, %v15921_v21  ;;  %v15968_v10 = vcombine.high %v15653_v36, %v15653_v36  ;;  %v4044_v59 = vrot.slane %v4036_v58, %v14904_v27 }
 0x203   : > { %2399 = vrot.lane.b32.xlu0 %v2074_v60, %s14216_s19  ;;  %4891 = vst.msk [vmem:[#allocation2 + $0xa8] sm:$0xf0] %vm4867_vm2, %v18941_v43  ;;  %v2310_v2 = vpop.permute.xlu1 %2309  ;;  %19276 = vst [vmem:[#allocation57_spill] sm:$0xff] %v15954_v49  ;;  %v19277_v60 = vld [vmem:[#allocation58_spill] sm:$0xff]  ;;  %v15974_v46 = vsel %vm2583_vm4, %v19279_v54, %v15657_v26 }
 0x204   : > { %v15958_v34 = vsel %vm2583_vm4, %v19277_v60, %v2310_v2  ;;  %19280 = vst [vmem:[#allocation38_spill] sm:$0xff] %v15974_v46  ;;  %v15978_v2 = vsel %vm2583_vm4, %v19281_v61, %v2272_v41  ;;  %v3900_v8 = vcombine.low %v15974_v46, %v15931_v28  ;;  %v4061_v60 = vrot.slane %v4053_v0, %v14904_v27  ;;  %v19283_v61 = vld [vmem:[#allocation59_spill] sm:$0xff] }
 0x205   : > { %19278 = vst [vmem:[#allocation58_spill] sm:$0xff] %v15958_v34  ;;  %v2276_v43 = vpop.permute.xlu0 %2275  ;;  %v4054_v29 = vcombine.low %v15954_v49, %v15958_v34  ;;  %2401 = vrot.lane.b32.xlu1 %v2078_v31, %s14216_s19  ;;  %19282 = vst [vmem:[#allocation49_spill] sm:$0xff] %v15978_v2  ;;  %v2086_v31 = vrot.slane %v15926_v37, %v14330_v30  ;;  %v3917_v58 = vcombine.low %v15978_v2, %v15950_v25  ;;  %v19285_v34 = vld [vmem:[#allocation61_spill] sm:$0xff] }
 0x206   : > { %v15991_v41 = vrot.slane %v15860_v13, %v14318_v20  ;;  %v2130_v0 = vrot.slane %v15942_v3, %v14330_v30  ;;  %v4052_v42 = vcombine.low %v4044_v59, %v4051_v40  ;;  %v3908_v40 = vrot.slane %v3900_v8, %v14904_v27 }
 0x207   : > { %2403 = vrot.lane.b32.xlu0 %v2082_v44, %s14216_s19  ;;  %v4068_v26 = vrot.slane %v4054_v29, %v14904_v27  ;;  %v2278_v54 = vpop.permute.xlu1 %2277  ;;  %v15995_v44 = vsel %vm2583_vm4, %v19283_v61, %v2276_v43  ;;  %v3915_v29 = vrot.slane %v3901_v1, %v14904_v27  ;;  %v527_v43 = vrot.slane %v15868_v19, %v14318_v20 }
 0x208   : > { %19284 = vst [vmem:[#allocation59_spill] sm:$0xff] %v15995_v44  ;;  %v15999_v49 = vsel %vm2583_vm4, %v19285_v34, %v2278_v54  ;;  %v16012_v34 = vrot.slane %v1398_v48, %v14318_v20  ;;  %v2134_v54 = vrot.slane %v15968_v10, %v14330_v30  ;;  %v3925_v1 = vrot.slane %v3917_v58, %v14904_v27 }
 0x209   : > { %19286 = vst [vmem:[#allocation61_spill] sm:$0xff] %v15999_v49  ;;  %v16001_v22 = vpop.permute.xlu0 %2343  ;;  %v4069_v14 = vcombine.low %v4061_v60, %v4068_v26  ;;  %v3918_v13 = vcombine.low %v15995_v44, %v15999_v49  ;;  %2405 = vrot.lane.b32.xlu1 %v2086_v31, %s14216_s19  ;;  %v2138_v48 = vrot.slane %v15991_v41, %v14330_v30  ;;  %v19287_v8 = vrot.slane %v15767_v32, 4 }
 0x20a   : > { %v16028_v61 = vcombine.high %v15991_v41, %v15991_v41 }
 0x20b   : > { %2427 = vrot.lane.b32.xlu0 %v2130_v0, %s14216_s19  ;;  %v4705_v59 = vpack.c.bf16 %v4069_v14, %v4052_v42  ;;  %v3932_v60 = vrot.slane %v3918_v13, %v14904_v27  ;;  %v16020_v26 = vpop.permute.xlu1 %2345  ;;  %v3916_v0 = vcombine.low %v3908_v40, %v3915_v29  ;;  %v2728_v14 = vcombine.high %v15868_v19, %v15868_v19  ;;  %v19289_v40 = vld [vmem:[#allocation4_spill] sm:$0xff] }
 0x20c   : > { %v2736_v42 = vcombine.high %v527_v43, %v527_v43  ;;  %v2142_v29 = vrot.slane %v16012_v34, %v14330_v30  ;;  %v16047_v19 = vrot.slane %v527_v43, %v14318_v20 }
 0x20d   : > { %v16022_v31 = vpop.permute.xlu0 %2311  ;;  %v4787_v63 = vrot.slane %v4705_v59, 4  ;;  %v3933_v49 = vcombine.low %v3925_v1, %v3932_v60  ;;  %2429 = vrot.lane.b32.xlu1 %v2134_v54, %s14216_s19  ;;  %v16044_v54 = vcombine.high %v16012_v34, %v16012_v34  ;;  %v406_v1 = vadd.f32 %v15402_v38, %v19289_v40 }
 0x20e   : > { %19288 = vst [vmem:[#allocation116_spill] sm:$0xff] %v16047_v19  ;;  %v2735_v59 = vrot.slane %v2728_v14, %v14318_v20  ;;  %v16060_v43 = vrot.slane %v2736_v42, %v14318_v20  ;;  %v19291_v60 = vrot.slane %v15880_v50, 4  ;;  %v16073_v14 = vcombine.high %v16047_v19, %v16047_v19 }
 0x20f   : > { %2431 = vrot.lane.b32.xlu0 %v2138_v48, %s14216_s19  ;;  %v4788_v58 = vsel %vm364_vm0, %v19287_v8, %v4787_v63  ;;  %4899 = vst.msk [vmem:[#allocation2 + $0xe8] sm:$0xf] %vm4871_vm3, %v4787_v63  ;;  %v4701_v13 = vpack.c.bf16 %v3933_v49, %v3916_v0  ;;  %v16038_v44 = vpop.permute.xlu1 %2313  ;;  %v2146_v63 = vrot.slane %v16028_v61, %v14330_v30  ;;  %v482_v42 = vmax.f32 %v406_v1, 0.0 }
 0x210   : > { %4898 = vst.msk [vmem:[#allocation2 + $0xe0] sm:$0xff] %vm4869_vm5, %v4788_v58  ;;  %19290 = vst [vmem:[#allocation4_spill] sm:$0xff] %v16060_v43  ;;  %v2150_v8 = vrot.slane %v16044_v54, %v14330_v30  ;;  %v2817_v58 = vrot.slane %v16047_v19, %v14330_v30  ;;  %v2737_v50 = vcombine.high %v2735_v59, %v2735_v59 }
 0x211   : > { %v16050_v32 = vpop.permute.xlu0 %2347  ;;  %v4781_v49 = vrot.slane %v4701_v13, 4  ;;  %2433 = vrot.lane.b32.xlu1 %v2142_v29, %s14216_s19  ;;  %19292 = vst [vmem:[#allocation117_spill] sm:$0xff] %v16073_v14  ;;  %v2821_v29 = vrot.slane %v16060_v43, %v14330_v30 }
 0x212   : > { %v16093_v1 = vrot.slane %v2737_v50, %v14318_v20  ;;  %v2763_v50 = vcombine.high %v482_v42, %v482_v42 }
 0x213   : > { %2435 = vrot.lane.b32.xlu0 %v2146_v63, %s14216_s19  ;;  %v4782_v48 = vsel %vm364_vm0, %v19291_v60, %v4781_v49  ;;  %4893 = vst.msk [vmem:[#allocation2 + $0xb8] sm:$0xf] %vm4871_vm3, %v4781_v49  ;;  %v2350_v0 = vpop.permute.xlu1 %2349  ;;  %v16081_v63 = vcombine.high %v16060_v43, %v16060_v43  ;;  %v16084_v49 = vrot.slane %v2735_v59, %v14318_v20 }
 0x214   : > { %4892 = vst.msk [vmem:[#allocation2 + $0xb0] sm:$0xff] %vm4869_vm5, %v4782_v48  ;;  %v2825_v60 = vrot.slane %v16073_v14, %v14330_v30  ;;  %19295 = vst [vmem:[#allocation120_spill] sm:$0xff] %v16093_v1  ;;  %v541_v48 = vrot.slane %v482_v42, %v14318_v20  ;;  %v2837_v21 = vrot.slane %v16093_v1, %v14330_v30 }
 0x215   : > { %v2352_v38 = vpop.permute.xlu0 %2351  ;;  %2437 = vrot.lane.b32.xlu1 %v2150_v8, %s14216_s19  ;;  %19293 = vst [vmem:[#allocation118_spill] sm:$0xff] %v16081_v63  ;;  %19294 = vst [vmem:[#allocation119_spill] sm:$0xff] %v16084_v49  ;;  %v2829_v59 = vrot.slane %v16081_v63, %v14330_v30  ;;  %v2833_v25 = vrot.slane %v16084_v49, %v14330_v30  ;;  %v16114_v23 = vcombine.high %v16093_v1, %v16093_v1 }
 0x216   : > { %v16117_v28 = vrot.slane %v541_v48, %v14318_v20 }
 0x217   : > { %2878 = vrot.lane.b32.xlu0 %v2817_v58, %s14216_s19  ;;  %v2354_v13 = vpop.permute.xlu1 %2353  ;;  %19297 = vst [vmem:[#allocation122_spill] sm:$0xff] %v16114_v23  ;;  %v2845_v1 = vrot.slane %v16114_v23, %v14330_v30 }
 0x218   : > { %19298 = vst [vmem:[#allocation123_spill] sm:$0xff] %v16117_v28  ;;  %v2849_v63 = vrot.slane %v16117_v28, %v14330_v30 }
 0x219   : > { %v16086_v40 = vpop.permute.xlu0 %2359  ;;  %2880 = vrot.lane.b32.xlu1 %v2821_v29, %s14216_s19  ;;  %v16106_v29 = vcombine.high %v16084_v49, %v16084_v49 }
 0x21b   : > { %2882 = vrot.lane.b32.xlu0 %v2825_v60, %s14216_s19  ;;  %v16096_v8 = vpop.permute.xlu1 %2361  ;;  %19296 = vst [vmem:[#allocation121_spill] sm:$0xff] %v16106_v29  ;;  %v2771_v60 = vcombine.high %v541_v48, %v541_v48 }
 0x21d   : > { %v16100_v58 = vpop.permute.xlu0 %2315  ;;  %2884 = vrot.lane.b32.xlu1 %v2829_v59, %s14216_s19  ;;  %v2841_v59 = vrot.slane %v16106_v29, %v14330_v30  ;;  %v16127_v42 = vrot.slane %v2771_v60, %v14318_v20  ;;  %v16137_v29 = vcombine.high %v16117_v28, %v16117_v28 }
 0x21f   : > { %2886 = vrot.lane.b32.xlu0 %v2833_v25, %s14216_s19  ;;  %v2318_v2 = vpop.permute.xlu1 %2317  ;;  %v2770_v25 = vrot.slane %v2763_v50, %v14318_v20  ;;  %19299 = vst [vmem:[#allocation124_spill] sm:$0xff] %v16127_v42  ;;  %v19300_v50 = vld [vmem:[#allocation66_spill] sm:$0xff]  ;;  %v2853_v14 = vrot.slane %v16127_v42, %v14330_v30  ;;  %v16154_v28 = vcombine.high %v16127_v42, %v16127_v42 }
 0x220   : > { %v16142_v60 = vsel %vm2583_vm4, %v19300_v50, %v2350_v0  ;;  %v19304_v0 = vld [vmem:[#allocation65_spill] sm:$0xff]  ;;  %v2857_v19 = vrot.slane %v16137_v29, %v14330_v30 }
 0x221   : > { %v16119_v46 = vpop.permute.xlu0 %2319  ;;  %2888 = vrot.lane.b32.xlu1 %v2837_v21, %s14216_s19  ;;  %v2772_v21 = vcombine.high %v2770_v25, %v2770_v25  ;;  %19301 = vst [vmem:[#allocation66_spill] sm:$0xff] %v16142_v60 }
 0x223   : > { %2890 = vrot.lane.b32.xlu0 %v2841_v59, %s14216_s19  ;;  %v2322_v49 = vpop.permute.xlu1 %2321  ;;  %v16146_v59 = vrot.slane %v2770_v25, %v14318_v20  ;;  %v16168_v25 = vsel %vm2583_vm4, %v15146_v4, %v2354_v13  ;;  %v16185_v4 = vsel %vm2583_vm4, %v15129_v35, %v2352_v38 }
 0x224   : > { %19306 = vst [vmem:[#allocation125_spill] sm:$0xff] %v16168_v25  ;;  %19309 = vst [vmem:[#allocation126_spill] sm:$0xff] %v16185_v4 }
 0x225   : > { %v16131_v48 = vpop.permute.xlu0 %2327  ;;  %2892 = vrot.lane.b32.xlu1 %v2845_v1, %s14216_s19  ;;  %v19302_v1 = vld [vmem:[#allocation62_spill] sm:$0xff] }
 0x226   : > { %v16159_v43 = vsel %vm2583_vm4, %v19302_v1, %v16020_v26  ;;  %v16176_v26 = vrot.slane %v2772_v21, %v14318_v20  ;;  %v19307_v1 = vld [vmem:[#allocation60_spill] sm:$0xff]  ;;  %v2861_v20 = vrot.slane %v16154_v28, %v14330_v30  ;;  %v16206_v21 = vcombine.high %v16146_v59, %v16146_v59 }
 0x227   : > { %2894 = vrot.lane.b32.xlu0 %v2849_v63, %s14216_s19  ;;  %v16148_v23 = vpop.permute.xlu1 %2329  ;;  %19303 = vst [vmem:[#allocation62_spill] sm:$0xff] %v16159_v43  ;;  %v16164_v63 = vsel %vm2583_vm4, %v19304_v0, %v16050_v32  ;;  %v16181_v32 = vsel %vm2583_vm4, %v19307_v1, %v16001_v22 }
 0x228   : > { %19305 = vst [vmem:[#allocation65_spill] sm:$0xff] %v16164_v63  ;;  %v4275_v42 = vcombine.low %v16164_v63, %v16142_v60  ;;  %19308 = vst [vmem:[#allocation60_spill] sm:$0xff] %v16181_v32  ;;  %v4274_v13 = vcombine.low %v16181_v32, %v16159_v43  ;;  %v19312_v63 = vld [vmem:[#allocation64_spill] sm:$0xff] }
 0x229   : > { %v2356_v50 = vpop.permute.xlu0 %2355  ;;  %2896 = vrot.lane.b32.xlu1 %v2853_v14, %s14216_s19  ;;  %v4291_v14 = vcombine.low %v16185_v4, %v16168_v25  ;;  %v16237_v43 = vsel %vm2583_vm4, %v19312_v63, %v16038_v44  ;;  %v19314_v44 = vld [vmem:[#allocation63_spill] sm:$0xff] }
 0x22a   : > { %v16196_v22 = vsel %vm2583_vm4, %v15268_v55, %v2356_v50  ;;  %v4289_v1 = vrot.slane %v4275_v42, %v14904_v27  ;;  %v2869_v55 = vrot.slane %v16176_v26, %v14330_v30  ;;  %v16220_v42 = vcombine.high %v16176_v26, %v16176_v26 }
 0x22b   : > { %2898 = vrot.lane.b32.xlu0 %v2857_v19, %s14216_s19  ;;  %v2358_v0 = vpop.permute.xlu1 %2357  ;;  %19310 = vst [vmem:[#allocation127_spill] sm:$0xff] %v16196_v22  ;;  %v2865_v19 = vrot.slane %v16146_v59, %v14330_v30  ;;  %v4299_v50 = vrot.slane %v4291_v14, %v14904_v27  ;;  %v16255_v63 = vsel %vm2583_vm4, %v19314_v44, %v16022_v31 }
 0x22c   : > { %v16200_v35 = vsel %vm2583_vm4, %v15286_v39, %v2358_v0  ;;  %v4282_v39 = vrot.slane %v4274_v13, %v14904_v27  ;;  %v16227_v13 = vsel %vm2583_vm4, %v15192_v16, %v2318_v2  ;;  %v16246_v16 = vsel %vm2583_vm4, %v15230_v18, %v2322_v49  ;;  %v19316_v18 = vld [vmem:[#allocation44_spill] sm:$0xff] }
 0x22d   : > { %19311 = vst [vmem:[#allocation128_spill] sm:$0xff] %v16200_v35  ;;  %v2364_v38 = vpop.permute.xlu0 %2363  ;;  %v4292_v25 = vcombine.low %v16196_v22, %v16200_v35  ;;  %2900 = vrot.lane.b32.xlu1 %v2861_v20, %s14216_s19  ;;  %v2873_v20 = vrot.slane %v16206_v21, %v14330_v30  ;;  %v2877_v22 = vrot.slane %v16220_v42, %v14330_v30  ;;  %19313 = vst [vmem:[#allocation64_spill] sm:$0xff] %v16246_v16 }
 0x22e   : > { %v4290_v35 = vcombine.low %v4282_v39, %v4289_v1  ;;  %v16242_v1 = vsel %vm2583_vm4, %v15173_v51, %v16100_v58  ;;  %v16260_v51 = vsel %vm2583_vm4, %v15184_v17, %v16119_v46  ;;  %v4138_v49 = vcombine.low %v16255_v63, %v16237_v43  ;;  %v19319_v17 = vld [vmem:[#allocation92_spill] sm:$0xff] }
 0x22f   : > { %2902 = vrot.lane.b32.xlu0 %v2865_v19, %s14216_s19  ;;  %v4306_v0 = vrot.slane %v4292_v25, %v14904_v27  ;;  %v2366_v4 = vpop.permute.xlu1 %2365  ;;  %19315 = vst [vmem:[#allocation63_spill] sm:$0xff] %v16260_v51  ;;  %v4155_v58 = vcombine.low %v16260_v51, %v16246_v16 }
 0x231   : > { %v2368_v60 = vpop.permute.xlu0 %2367  ;;  %v4307_v19 = vcombine.low %v4299_v50, %v4306_v0  ;;  %2904 = vrot.lane.b32.xlu1 %v2869_v55, %s14216_s19  ;;  %v4163_v44 = vrot.slane %v4155_v58, %v14904_v27 }
 0x233   : > { %2906 = vrot.lane.b32.xlu0 %v2873_v20, %s14216_s19  ;;  %v16230_v25 = vpack.c.bf16 %v4307_v19, %v4290_v35  ;;  %v2370_v14 = vpop.permute.xlu1 %2369  ;;  %v4139_v35 = vcombine.low %v16242_v1, %v16227_v13  ;;  %v19321_v20 = vld [vmem:[#allocation42_spill] sm:$0xff]  ;;  %v4146_v19 = vrot.slane %v4138_v49, %v14904_v27  ;;  %v19326_v49 = vld [vmem:[#allocation80_spill] sm:$0xff] }
 0x234   : > { %v16298_v58 = vsel %vm2583_vm4, %v19326_v49, %v2364_v38  ;;  %v19338_v49 = vld [vmem:[#allocation93_spill] sm:$0xff] }
 0x235   : > { %v2324_v2 = vpop.permute.xlu0 %2323  ;;  %v18975_v30 = vrot.slane %v16230_v25, 4  ;;  %2908 = vrot.lane.b32.xlu1 %v2877_v22, %s14216_s19  ;;  %v19317_v22 = vld [vmem:[#allocation89_spill] sm:$0xff]  ;;  %v4153_v50 = vrot.slane %v4139_v35, %v14904_v27  ;;  %v19324_v35 = vld [vmem:[#allocation68_spill] sm:$0xff] }
 0x236   : > { %v16273_v55 = vsel %vm2583_vm4, %v19317_v22, %v2324_v2 }
 0x237   : > { %3118 = vrot.lane.b32.xlu0 %v19316_v18, %s14219_s27  ;;  %4909 = vst.msk [vmem:[#allocation2 + $0x138] sm:$0xf0] %vm4867_vm2, %v18975_v30  ;;  %v2326_v31 = vpop.permute.xlu1 %2325  ;;  %19318 = vst [vmem:[#allocation44_spill] sm:$0xff] %v16273_v55  ;;  %v4154_v30 = vcombine.low %v4146_v19, %v4153_v50  ;;  %v19330_v19 = vld [vmem:[#allocation67_spill] sm:$0xff] }
 0x238   : > { %v16277_v46 = vsel %vm2583_vm4, %v19319_v17, %v2326_v31  ;;  %v19322_v17 = vld [vmem:[#allocation86_spill] sm:$0xff] }
 0x239   : > { %19320 = vst [vmem:[#allocation89_spill] sm:$0xff] %v16277_v46  ;;  %v2332_v39 = vpop.permute.xlu0 %2331  ;;  %v4156_v0 = vcombine.low %v16273_v55, %v16277_v46  ;;  %3120 = vrot.lane.b32.xlu1 %v19321_v20, %s14219_s27  ;;  %v16289_v32 = vsel %vm2583_vm4, %v19322_v17, %v2366_v4  ;;  %v16294_v46 = vsel %vm2583_vm4, %v19324_v35, %v16096_v8  ;;  %19327 = vst [vmem:[#allocation86_spill] sm:$0xff] %v16298_v58  ;;  %v19336_v17 = vld [vmem:[#allocation78_spill] sm:$0xff] }
 0x23a   : > { %19323 = vst [vmem:[#allocation92_spill] sm:$0xff] %v16289_v32  ;;  %19325 = vst [vmem:[#allocation42_spill] sm:$0xff] %v16294_v46  ;;  %v16307_v4 = vsel %vm2583_vm4, %v19330_v19, %v16086_v40  ;;  %v4309_v8 = vcombine.low %v16298_v58, %v16289_v32  ;;  %v16324_v40 = vsel %vm2583_vm4, %v19336_v17, %v16148_v23  ;;  %v19344_v23 = vld [vmem:[#allocation94_spill] sm:$0xff] }
 0x23b   : > { %v4170_v2 = vrot.slane %v4156_v0, %v14904_v27  ;;  %v2334_v18 = vpop.permute.xlu1 %2333  ;;  %v19328_v0 = vld [vmem:[#allocation88_spill] sm:$0xff]  ;;  %19331 = vst [vmem:[#allocation80_spill] sm:$0xff] %v16307_v4 }
 0x23c   : > { %v16302_v16 = vsel %vm2583_vm4, %v19328_v0, %v2370_v14  ;;  %v16331_v0 = vsel %vm2583_vm4, %v19338_v49, %v2332_v39  ;;  %v19346_v49 = vld [vmem:[#allocation75_spill] sm:$0xff] }
 0x23d   : > { %v2336_v22 = vpop.permute.xlu0 %2335  ;;  %v4171_v31 = vcombine.low %v4163_v44, %v4170_v2  ;;  %19329 = vst [vmem:[#allocation68_spill] sm:$0xff] %v16302_v16  ;;  %v19332_v2 = vld [vmem:[#allocation87_spill] sm:$0xff] }
 0x23e   : > { %v16315_v38 = vsel %vm2583_vm4, %v19332_v2, %v2368_v60  ;;  %19337 = vst [vmem:[#allocation87_spill] sm:$0xff] %v16324_v40  ;;  %v19340_v60 = vld [vmem:[#allocation91_spill] sm:$0xff] }
 0x23f   : > { %v4708_v20 = vpack.c.bf16 %v4171_v31, %v4154_v30  ;;  %v2338_v55 = vpop.permute.xlu1 %2337  ;;  %v4308_v30 = vcombine.low %v16307_v4, %v16294_v46  ;;  %19333 = vst [vmem:[#allocation88_spill] sm:$0xff] %v16315_v38  ;;  %v19334_v31 = vld [vmem:[#allocation12_spill] sm:$0xff]  ;;  %v4325_v35 = vcombine.low %v16315_v38, %v16302_v16  ;;  %v4323_v16 = vrot.slane %v4309_v8, %v14904_v27 }
 0x240   : > { %v16319_v14 = vsel %vm2583_vm4, %v19334_v31, %v2334_v18  ;;  %19339 = vst [vmem:[#allocation12_spill] sm:$0xff] %v16331_v0  ;;  %v16335_v19 = vsel %vm2583_vm4, %v19340_v60, %v2338_v55  ;;  %v19342_v18 = vld [vmem:[#allocation23_spill] sm:$0xff]  ;;  %v19348_v60 = vld [vmem:[#allocation90_spill] sm:$0xff] }
 0x241   : > { %v2372_v50 = vpop.permute.xlu0 %2371  ;;  %v4792_v44 = vrot.slane %v4708_v20, 4  ;;  %19335 = vst [vmem:[#allocation67_spill] sm:$0xff] %v16319_v14  ;;  %19341 = vst [vmem:[#allocation78_spill] sm:$0xff] %v16335_v19  ;;  %v4173_v38 = vcombine.low %v16331_v0, %v16319_v14  ;;  %v4316_v55 = vrot.slane %v4308_v30, %v14904_v27 }
 0x242   : > { %v16339_v2 = vsel %vm2583_vm4, %v19342_v18, %v2372_v50  ;;  %v16354_v50 = vsel %vm2583_vm4, %v19346_v49, %v16131_v48  ;;  %v4333_v18 = vrot.slane %v4325_v35, %v14904_v27  ;;  %v19352_v48 = vld [vmem:[#allocation97_spill] sm:$0xff] }
 0x243   : > { %4903 = vst.msk [vmem:[#allocation2 + $0x108] sm:$0xf0] %vm4867_vm2, %v4792_v44  ;;  %v2374_v20 = vpop.permute.xlu1 %2373  ;;  %19343 = vst [vmem:[#allocation93_spill] sm:$0xff] %v16339_v2  ;;  %v4172_v8 = vcombine.low %v16354_v50, %v16324_v40  ;;  %v4187_v58 = vrot.slane %v4173_v38, %v14904_v27 }
 0x244   : > { %v16343_v31 = vsel %vm2583_vm4, %v19344_v23, %v2374_v20  ;;  %19347 = vst [vmem:[#allocation23_spill] sm:$0xff] %v16354_v50  ;;  %v16358_v20 = vsel %vm2583_vm4, %v19348_v60, %v2336_v22  ;;  %v4324_v60 = vcombine.low %v4316_v55, %v4323_v16  ;;  %v19354_v16 = vrot.slane %v16230_v25, 4 }
 0x245   : > { %19345 = vst [vmem:[#allocation91_spill] sm:$0xff] %v16343_v31  ;;  %v2340_v17 = vpop.permute.xlu0 %2339  ;;  %v4326_v39 = vcombine.low %v16339_v2, %v16343_v31  ;;  %19349 = vst [vmem:[#allocation94_spill] sm:$0xff] %v16358_v20  ;;  %v4189_v23 = vcombine.low %v16358_v20, %v16335_v19  ;;  %v19350_v2 = vld [vmem:[#allocation95_spill] sm:$0xff]  ;;  %v4180_v4 = vrot.slane %v4172_v8, %v14904_v27 }
 0x246   : > { %v16368_v32 = vsel %vm2583_vm4, %v19350_v2, %v2340_v17 }
 0x247   : > { %v4340_v31 = vrot.slane %v4326_v39, %v14904_v27  ;;  %v2342_v30 = vpop.permute.xlu1 %2341  ;;  %19351 = vst [vmem:[#allocation75_spill] sm:$0xff] %v16368_v32  ;;  %v4197_v39 = vrot.slane %v4189_v23, %v14904_v27  ;;  %v4188_v14 = vcombine.low %v4180_v4, %v4187_v58 }
 0x248   : > { %v16372_v49 = vsel %vm2583_vm4, %v19352_v48, %v2342_v30 }
 0x249   : > { %19353 = vst [vmem:[#allocation90_spill] sm:$0xff] %v16372_v49  ;;  %v2408_v22 = vpop.permute.xlu0 %2407  ;;  %v4341_v46 = vcombine.low %v4333_v18, %v4340_v31  ;;  %v4190_v35 = vcombine.low %v16368_v32, %v16372_v49  ;;  %v19358_v32 = vld [vmem:[#allocation96_spill] sm:$0xff] }
 0x24a   : > { %v2712_v0 = vsel %vm2583_vm4, %v19358_v32, %v2408_v22 }
 0x24b   : > { %v4713_v19 = vpack.c.bf16 %v4341_v46, %v4324_v60  ;;  %v4204_v2 = vrot.slane %v4190_v35, %v14904_v27  ;;  %v2410_v17 = vpop.permute.xlu1 %2409 }
 0x24d   : > { %v2376_v20 = vpop.permute.xlu0 %2375  ;;  %v4799_v30 = vrot.slane %v4713_v19, 4  ;;  %v4205_v48 = vcombine.low %v4197_v39, %v4204_v2 }
 0x24f   : > { %v4800_v38 = vsel %vm364_vm0, %v19354_v16, %v4799_v30  ;;  %4911 = vst.msk [vmem:[#allocation2 + $0x148] sm:$0xf] %vm4871_vm3, %v4799_v30  ;;  %v4709_v31 = vpack.c.bf16 %v4205_v48, %v4188_v14  ;;  %v2378_v55 = vpop.permute.xlu1 %2377  ;;  %v19355_v30 = vld [vmem:[#allocation101_spill] sm:$0xff] }
 0x250   : > { %4910 = vst.msk [vmem:[#allocation2 + $0x140] sm:$0xff] %vm4869_vm5, %v4800_v38 }
 0x251   : > { %v2412_v8 = vpop.permute.xlu0 %2411  ;;  %v4793_v18 = vrot.slane %v4709_v31, 4  ;;  %v19357_v31 = vld [vmem:[#allocation100_spill] sm:$0xff] }
 0x253   : > { %v4794_v46 = vsel %vm364_vm0, %v4792_v44, %v4793_v18  ;;  %4905 = vst.msk [vmem:[#allocation2 + $0x118] sm:$0xf] %vm4871_vm3, %v4793_v18  ;;  %v2414_v23 = vpop.permute.xlu1 %2413  ;;  %v19356_v44 = vld [vmem:[#allocation98_spill] sm:$0xff]  ;;  %v2714_v18 = vsel %vm2583_vm4, %v19357_v31, %v2412_v8 }
 0x254   : > { %4904 = vst.msk [vmem:[#allocation2 + $0x110] sm:$0xff] %vm4869_vm5, %v4794_v46  ;;  %v2715_v48 = vsel %vm2583_vm4, %v19355_v30, %v2414_v23  ;;  %v2713_v16 = vsel %vm2583_vm4, %v19356_v44, %v2410_v17  ;;  %v19359_v17 = vld [vmem:[#allocation99_spill] sm:$0xff] }
 0x255   : > { %v2416_v58 = vpop.permute.xlu0 %2415  ;;  %v4547_v40 = vcombine.low %v2714_v18, %v2715_v48  ;;  %v4546_v50 = vcombine.low %v2712_v0, %v2713_v16  ;;  %v16410_v30 = vsel %vm2583_vm4, %v19359_v17, %v2378_v55 }
 0x256   : > { %v2716_v51 = vsel %vm2583_vm4, %v15621_v11, %v2416_v58 }
 0x257   : > { %v2418_v4 = vpop.permute.xlu1 %2417  ;;  %v4561_v22 = vrot.slane %v4547_v40, %v14904_v27  ;;  %v4554_v58 = vrot.slane %v4546_v50, %v14904_v27 }
 0x258   : > { %v2717_v46 = vsel %vm2583_vm4, %v15632_v45, %v2418_v4  ;;  %v19360_v45 = vld [vmem:[#allocation30_spill] sm:$0xff] }
 0x259   : > { %v16388_v25 = vpop.permute.xlu0 %2423  ;;  %v4563_v8 = vcombine.low %v2716_v51, %v2717_v46 }
 0x25b   : > { %v16390_v19 = vpop.permute.xlu1 %2425 }
 0x25d   : > { %v2380_v60 = vpop.permute.xlu0 %2379 }
 0x25e   : > { %v16414_v4 = vsel %vm2583_vm4, %v19360_v45, %v2380_v60  ;;  %v19361_v60 = vld [vmem:[#allocation28_spill] sm:$0xff] }
 0x25f   : > { %v2382_v14 = vpop.permute.xlu1 %2381 }
 0x260   : > { %v16406_v23 = vsel %vm2583_vm4, %v15682_v56, %v2382_v14  ;;  %v16430_v14 = vsel %vm2583_vm4, %v19361_v60, %v2376_v20 }
 0x261   : > { %v2384_v35 = vpop.permute.xlu0 %2383  ;;  %v4411_v51 = vcombine.low %v16414_v4, %v16406_v23 }
 0x263   : > { %v2386_v39 = vpop.permute.xlu1 %2385  ;;  %v4425_v48 = vrot.slane %v4411_v51, %v14904_v27 }
 0x264   : > { %v16418_v32 = vsel %vm2583_vm4, %v15714_v9, %v2386_v39  ;;  %v16434_v9 = vsel %vm2583_vm4, %v15674_v7, %v2384_v35  ;;  %v4562_v35 = vcombine.low %v4554_v58, %v4561_v22 }
 0x265   : > { %v2392_v2 = vpop.permute.xlu0 %2391  ;;  %v4427_v40 = vcombine.low %v16434_v9, %v16418_v32 }
 0x267   : > { %v2394_v38 = vpop.permute.xlu1 %2393  ;;  %v4435_v46 = vrot.slane %v4427_v40, %v14904_v27 }
 0x268   : > { %v16468_v51 = vsel %vm2583_vm4, %v15742_v6, %v2394_v38 }
 0x269   : > { %v2420_v49 = vpop.permute.xlu0 %2419 }
 0x26a   : > { %v2718_v11 = vsel %vm2583_vm4, %v15756_v15, %v2420_v49  ;;  %v4410_v15 = vcombine.low %v16430_v14, %v16410_v30 }
 0x26b   : > { %v2422_v44 = vpop.permute.xlu1 %2421 }
 0x26c   : > { %v2719_v56 = vsel %vm2583_vm4, %v15773_v57, %v2422_v44  ;;  %v4571_v57 = vrot.slane %v4563_v8, %v14904_v27  ;;  %v4418_v18 = vrot.slane %v4410_v15, %v14904_v27 }
 0x26d   : > { %v2388_v0 = vpop.permute.xlu0 %2387  ;;  %v4564_v55 = vcombine.low %v2718_v11, %v2719_v56 }
 0x26e   : > { %v16444_v50 = vsel %vm2583_vm4, %v15777_v12, %v2388_v0 }
 0x26f   : > { %v4578_v49 = vrot.slane %v4564_v55, %v14904_v27  ;;  %v2390_v39 = vpop.permute.xlu1 %2389 }
 0x270   : > { %v16448_v20 = vsel %vm2583_vm4, %v15824_v24, %v2390_v39  ;;  %v4426_v24 = vcombine.low %v4418_v18, %v4425_v48 }
 0x271   : > { %v2396_v7 = vpop.permute.xlu0 %2395  ;;  %v4579_v16 = vcombine.low %v4571_v57, %v4578_v49  ;;  %v4428_v31 = vcombine.low %v16444_v50, %v16448_v20  ;;  %v19362_v57 = vld [vmem:[#allocation102_spill] sm:$0xff] }
 0x272   : > { %v16472_v55 = vsel %vm2583_vm4, %v15838_v33, %v2396_v7  ;;  %v16482_v40 = vsel %vm2583_vm4, %v19362_v57, %v2392_v2 }
 0x273   : > { %v16455_v17 = vpack.c.bf16 %v4579_v16, %v4562_v35  ;;  %v4442_v12 = vrot.slane %v4428_v31, %v14904_v27  ;;  %v2398_v8 = vpop.permute.xlu1 %2397  ;;  %v4444_v33 = vcombine.low %v16482_v40, %v16468_v51 }
 0x274   : > { %v16461_v56 = vsel %vm2583_vm4, %v15852_v5, %v2398_v8 }
 0x275   : > { %v2400_v44 = vpop.permute.xlu0 %2399  ;;  %v4810_v45 = vrot.slane %v16455_v17, 4  ;;  %v4443_v11 = vcombine.low %v4435_v46, %v4442_v12  ;;  %v4445_v15 = vcombine.low %v16472_v55, %v16461_v56  ;;  %v4452_v35 = vrot.slane %v4444_v33, %v14904_v27  ;;  %v19370_v17 = vld [vmem:[#allocation120_spill] sm:$0xff] }
 0x276   : > { %v16486_v6 = vsel %vm2583_vm4, %v15847_v52, %v2400_v44  ;;  %v2721_v44 = vsel %vm2583_vm4, %v15653_v36, %v16390_v19 }
 0x277   : > { %4921 = vst.msk [vmem:[#allocation2 + $0x198] sm:$0xf0] %vm4867_vm2, %v4810_v45  ;;  %v4716_v0 = vpack.c.bf16 %v4443_v11, %v4426_v24  ;;  %v2402_v22 = vpop.permute.xlu1 %2401  ;;  %v4459_v52 = vrot.slane %v4445_v15, %v14904_v27  ;;  %v2720_v15 = vsel %vm2583_vm4, %v15641_v53, %v16388_v25 }
 0x278   : > { %v16476_v58 = vsel %vm2583_vm4, %v15865_v62, %v2402_v22  ;;  %v4580_v57 = vcombine.low %v2720_v15, %v2721_v44  ;;  %v19367_v44 = vld [vmem:[#allocation40_spill] sm:$0xff]  ;;  %v19369_v15 = vld [vmem:[#allocation119_spill] sm:$0xff] }
 0x279   : > { %v2404_v5 = vpop.permute.xlu0 %2403  ;;  %v4804_v60 = vrot.slane %v4716_v0, 4  ;;  %v4461_v62 = vcombine.low %v16486_v6, %v16476_v58 }
 0x27a   : > { %v16495_v49 = vsel %vm2583_vm4, %v15886_v47, %v2404_v5  ;;  %v4460_v47 = vcombine.low %v4452_v35, %v4459_v52 }
 0x27b   : > { %4915 = vst.msk [vmem:[#allocation2 + $0x168] sm:$0xf0] %vm4867_vm2, %v4804_v60  ;;  %v2406_v38 = vpop.permute.xlu1 %2405  ;;  %v4469_v48 = vrot.slane %v4461_v62, %v14904_v27 }
 0x27c   : > { %v16499_v2 = vsel %vm2583_vm4, %v15926_v37, %v2406_v38 }
 0x27d   : > { %v2428_v39 = vpop.permute.xlu0 %2427  ;;  %v4462_v7 = vcombine.low %v16495_v49, %v16499_v2 }
 0x27e   : > { %v2722_v24 = vsel %vm2583_vm4, %v15942_v3, %v2428_v39 }
 0x27f   : > { %v4476_v16 = vrot.slane %v4462_v7, %v14904_v27  ;;  %v2430_v31 = vpop.permute.xlu1 %2429 }
 0x280   : > { %v2723_v37 = vsel %vm2583_vm4, %v15968_v10, %v2430_v31  ;;  %v19365_v31 = vld [vmem:[#allocation41_spill] sm:$0xff] }
 0x281   : > { %v2432_v18 = vpop.permute.xlu0 %2431  ;;  %v4477_v46 = vcombine.low %v4469_v48, %v4476_v16  ;;  %v4581_v5 = vcombine.low %v2722_v24, %v2723_v37 }
 0x282   : > { %v2724_v10 = vsel %vm2583_vm4, %v15991_v41, %v2432_v18  ;;  %v19363_v41 = vld [vmem:[#allocation116_spill] sm:$0xff] }
 0x283   : > { %v4717_v12 = vpack.c.bf16 %v4477_v46, %v4460_v47  ;;  %v2434_v8 = vpop.permute.xlu1 %2433  ;;  %v4595_v53 = vrot.slane %v4581_v5, %v14904_v27 }
 0x284   : > { %v2725_v11 = vsel %vm2583_vm4, %v16012_v34, %v2434_v8 }
 0x285   : > { %v2436_v0 = vpop.permute.xlu0 %2435  ;;  %v4805_v22 = vrot.slane %v4717_v12, 4  ;;  %v4597_v36 = vcombine.low %v2724_v10, %v2725_v11  ;;  %v19366_v12 = vld [vmem:[#allocation117_spill] sm:$0xff] }
 0x286   : > { %v2726_v34 = vsel %vm2583_vm4, %v16028_v61, %v2436_v0  ;;  %v19364_v61 = vld [vmem:[#allocation4_spill] sm:$0xff]  ;;  %v19368_v0 = vld [vmem:[#allocation118_spill] sm:$0xff] }
 0x287   : > { %v4806_v33 = vsel %vm364_vm0, %v4804_v60, %v4805_v22  ;;  %4917 = vst.msk [vmem:[#allocation2 + $0x178] sm:$0xf] %vm4871_vm3, %v4805_v22  ;;  %v2438_v3 = vpop.permute.xlu1 %2437  ;;  %v4588_v60 = vrot.slane %v4580_v57, %v14904_v27  ;;  %v4605_v39 = vrot.slane %v4597_v36, %v14904_v27  ;;  %v19371_v36 = vld [vmem:[#allocation123_spill] sm:$0xff] }
 0x288   : > { %4916 = vst.msk [vmem:[#allocation2 + $0x170] sm:$0xff] %vm4869_vm5, %v4806_v33  ;;  %v2727_v19 = vsel %vm2583_vm4, %v16044_v54, %v2438_v3 }
 0x289   : > { %v2879_v62 = vpop.permute.xlu0 %2878  ;;  %v4598_v25 = vcombine.low %v2726_v34, %v2727_v19  ;;  %v4596_v48 = vcombine.low %v4588_v60, %v4595_v53  ;;  %v19372_v19 = vld [vmem:[#allocation124_spill] sm:$0xff]  ;;  %v19374_v60 = vld [vmem:[#allocation122_spill] sm:$0xff] }
 0x28a   : > { %v2926_v38 = vsel %vm2583_vm4, %v19363_v41, %v2879_v62 }
 0x28b   : > { %3086 = vrot.lane.b32.xlu0 %v2926_v38, %s14219_s27  ;;  %v4612_v52 = vrot.slane %v4598_v25, %v14904_v27  ;;  %v2881_v7 = vpop.permute.xlu1 %2880  ;;  %v19373_v25 = vld [vmem:[#allocation121_spill] sm:$0xff] }
 0x28c   : > { %v2927_v35 = vsel %vm2583_vm4, %v19364_v61, %v2881_v7 }
 0x28d   : > { %v2883_v54 = vpop.permute.xlu0 %2882  ;;  %v4613_v16 = vcombine.low %v4605_v39, %v4612_v52  ;;  %3088 = vrot.lane.b32.xlu1 %v2927_v35, %s14219_s27 }
 0x28e   : > { %v2928_v8 = vsel %vm2583_vm4, %v19366_v12, %v2883_v54  ;;  %v19383_v12 = vld [vmem:[#allocation54_spill] sm:$0xff] }
 0x28f   : > { %3122 = vrot.lane.b32.xlu0 %v19365_v31, %s14219_s27  ;;  %v4721_v18 = vpack.c.bf16 %v4613_v16, %v4596_v48  ;;  %v2885_v47 = vpop.permute.xlu1 %2884 }
 0x290   : > { %v2929_v22 = vsel %vm2583_vm4, %v19368_v0, %v2885_v47  ;;  %v19379_v47 = vld [vmem:[#allocation53_spill] sm:$0xff] }
 0x291   : > { %v2887_v46 = vpop.permute.xlu0 %2886  ;;  %v4811_v37 = vrot.slane %v4721_v18, 4  ;;  %3124 = vrot.lane.b32.xlu1 %v19367_v44, %s14219_s27  ;;  %v19376_v18 = vld [vmem:[#allocation43_spill] sm:$0xff]  ;;  %v19388_v0 = vld [vmem:[#allocation81_spill] sm:$0xff] }
 0x292   : > { %v2930_v10 = vsel %vm2583_vm4, %v19369_v15, %v2887_v46  ;;  %v19380_v46 = vld [vmem:[#allocation50_spill] sm:$0xff]  ;;  %v19385_v44 = vld [vmem:[#allocation55_spill] sm:$0xff]  ;;  %v19391_v15 = vld [vmem:[#allocation85_spill] sm:$0xff] }
 0x293   : > { %3090 = vrot.lane.b32.xlu0 %v2928_v8, %s14219_s27  ;;  %v4812_v24 = vsel %vm364_vm0, %v4810_v45, %v4811_v37  ;;  %4923 = vst.msk [vmem:[#allocation2 + $0x1a8] sm:$0xf] %vm4871_vm3, %v4811_v37  ;;  %v2889_v11 = vpop.permute.xlu1 %2888  ;;  %v19382_v37 = vld [vmem:[#allocation48_spill] sm:$0xff] }
 0x294   : > { %4922 = vst.msk [vmem:[#allocation2 + $0x1a0] sm:$0xff] %vm4869_vm5, %v4812_v24  ;;  %v2931_v45 = vsel %vm2583_vm4, %v19370_v17, %v2889_v11  ;;  %v19384_v8 = vld [vmem:[#allocation52_spill] sm:$0xff]  ;;  %v19394_v17 = vld [vmem:[#allocation14_spill] sm:$0xff] }
 0x295   : > { %v2891_v5 = vpop.permute.xlu0 %2890  ;;  %3092 = vrot.lane.b32.xlu1 %v2929_v22, %s14219_s27  ;;  %v19386_v24 = vld [vmem:[#allocation56_spill] sm:$0xff]  ;;  %v19389_v22 = vld [vmem:[#allocation82_spill] sm:$0xff] }
 0x296   : > { %v2932_v41 = vsel %vm2583_vm4, %v19373_v25, %v2891_v5  ;;  %v19387_v11 = vld [vmem:[#allocation84_spill] sm:$0xff]  ;;  %v19390_v5 = vld [vmem:[#allocation79_spill] sm:$0xff]  ;;  %v19403_v25 = vld [vmem:[#allocation73_spill] sm:$0xff] }
 0x297   : > { %3094 = vrot.lane.b32.xlu0 %v2930_v10, %s14219_s27  ;;  %v2893_v57 = vpop.permute.xlu1 %2892  ;;  %v19392_v10 = vld [vmem:[#allocation83_spill] sm:$0xff] }
 0x298   : > { %v2933_v39 = vsel %vm2583_vm4, %v19374_v60, %v2893_v57  ;;  %v19393_v57 = vld [vmem:[#allocation13_spill] sm:$0xff] }
 0x299   : > { %v2895_v33 = vpop.permute.xlu0 %2894  ;;  %3096 = vrot.lane.b32.xlu1 %v2931_v45, %s14219_s27  ;;  %v19395_v45 = vld [vmem:[#allocation7_spill] sm:$0xff]  ;;  %v19406_v60 = vld [vmem:[#allocation69_spill] sm:$0xff] }
 0x29a   : > { %v2934_v3 = vsel %vm2583_vm4, %v19371_v36, %v2895_v33  ;;  %v19396_v33 = vld [vmem:[#allocation8_spill] sm:$0xff]  ;;  %v19397_v36 = vld [vmem:[#allocation15_spill] sm:$0xff] }
 0x29b   : > { %3102 = vrot.lane.b32.xlu0 %v2934_v3, %s14219_s27  ;;  %v2897_v34 = vpop.permute.xlu1 %2896  ;;  %v19398_v3 = vld [vmem:[#allocation16_spill] sm:$0xff] }
 0x29c   : > { %v2935_v62 = vsel %vm2583_vm4, %v19372_v19, %v2897_v34  ;;  %v19399_v34 = vld [vmem:[#allocation17_spill] sm:$0xff]  ;;  %v19400_v19 = vld [vmem:[#allocation18_spill] sm:$0xff] }
 0x29d   : > { %v2899_v53 = vpop.permute.xlu0 %2898  ;;  %3104 = vrot.lane.b32.xlu1 %v2935_v62, %s14219_s27  ;;  %v19401_v62 = vld [vmem:[#allocation27_spill] sm:$0xff] }
 0x29e   : > { %v2936_v7 = vsel %vm2583_vm4, %v16137_v29, %v2899_v53  ;;  %v19402_v53 = vld [vmem:[#allocation21_spill] sm:$0xff] }
 0x29f   : > { %3098 = vrot.lane.b32.xlu0 %v2932_v41, %s14219_s27  ;;  %v2901_v38 = vpop.permute.xlu1 %2900  ;;  %v19404_v41 = vld [vmem:[#allocation70_spill] sm:$0xff] }
 0x2a0   : > { %v2937_v35 = vsel %vm2583_vm4, %v16154_v28, %v2901_v38  ;;  %v19405_v38 = vld [vmem:[#allocation71_spill] sm:$0xff] }
 0x2a1   : > { %v2903_v52 = vpop.permute.xlu0 %2902  ;;  %3100 = vrot.lane.b32.xlu1 %v2933_v39, %s14219_s27  ;;  %v19407_v39 = vld [vmem:[#allocation74_spill] sm:$0xff] }
 0x2a2   : > { %v2938_v54 = vsel %vm2583_vm4, %v16146_v59, %v2903_v52  ;;  %v19375_v59 = vld [vmem:[#allocation45_spill] sm:$0xff]  ;;  %v19408_v52 = vld [vmem:[#allocation72_spill] sm:$0xff] }
 0x2a3   : > { %3106 = vrot.lane.b32.xlu0 %v2936_v7, %s14219_s27  ;;  %v2905_v61 = vpop.permute.xlu1 %2904  ;;  %v19409_v7 = vld [vmem:[#allocation76_spill] sm:$0xff] }
 0x2a4   : > { %v2939_v16 = vsel %vm2583_vm4, %v16176_v26, %v2905_v61  ;;  %v19377_v26 = vld [vmem:[#allocation46_spill] sm:$0xff]  ;;  %v19410_v61 = vld [vmem:[#allocation77_spill] sm:$0xff] }
 0x2a5   : > { %3108 = vrot.lane.b32.xlu1 %v2937_v35, %s14219_s27  ;;  %v2907_v48 = vpop.permute.xlu0 %2906  ;;  %v19411_v35 = vld [vmem:[#allocation5_spill] sm:$0xff] }
 0x2a6   : > { %v2940_v29 = vsel %vm2583_vm4, %v16206_v21, %v2907_v48  ;;  %v19378_v21 = vld [vmem:[#allocation47_spill] sm:$0xff]  ;;  %v19412_v48 = vld [vmem:[#allocation6_spill] sm:$0xff] }
 0x2a7   : > { %3110 = vrot.lane.b32.xlu0 %v2938_v54, %s14219_s27  ;;  %v2909_v31 = vpop.permute.xlu1 %2908 }
 0x2a8   : > { %v2941_v28 = vsel %vm2583_vm4, %v16220_v42, %v2909_v31  ;;  %v19381_v42 = vld [vmem:[#allocation51_spill] sm:$0xff] }
 0x2a9   : > { %3112 = vrot.lane.b32.xlu1 %v2939_v16, %s14219_s27  ;;  %v16663_v54 = vpop.permute.xlu0 %3118  ;;  %v19413_v16 = vld [vmem:[#allocation26_spill] sm:$0xff] }
 0x2ab   : > { %3114 = vrot.lane.b32.xlu0 %v2940_v29, %s14219_s27  ;;  %v16669_v29 = vpop.permute.xlu1 %3120 }
 0x2ad   : > { %3116 = vrot.lane.b32.xlu1 %v2941_v28, %s14219_s27  ;;  %v19414_v28 = vld [vmem:[#allocation10_spill] sm:$0xff] }
 0x2af   : > { %3126 = vrot.lane.b32.xlu0 %v19375_v59, %s14219_s27  ;;  %v19415_v59 = vld [vmem:[#allocation11_spill] sm:$0xff] }
 0x2b1   : > { %3128 = vrot.lane.b32.xlu1 %v19376_v18, %s14219_s27 }
 0x2b3   : > { %3130 = vrot.lane.b32.xlu0 %v19377_v26, %s14219_s27 }
 0x2b5   : > { %3132 = vrot.lane.b32.xlu1 %v19378_v21, %s14219_s27  ;;  %v19416_v21 = vld [vmem:[#allocation9_spill] sm:$0xff] }
 0x2b7   : > { %3134 = vrot.lane.b32.xlu0 %v19379_v47, %s14219_s27  ;;  %v19417_v47 = vld [vmem:[#allocation19_spill] sm:$0xff] }
 0x2b9   : > { %3136 = vrot.lane.b32.xlu1 %v19380_v46, %s14219_s27 }
 0x2bb   : > { %3138 = vrot.lane.b32.xlu0 %v19381_v42, %s14219_s27 }
 0x2bd   : > { %3140 = vrot.lane.b32.xlu1 %v19382_v37, %s14219_s27  ;;  %v19418_v37 = vld [vmem:[#allocation20_spill] sm:$0xff] }
 0x2bf   : > { %3142 = vrot.lane.b32.xlu0 %v19383_v12, %s14219_s27  ;;  %v19419_v12 = vld [vmem:[#allocation25_spill] sm:$0xff] }
 0x2c1   : > { %3144 = vrot.lane.b32.xlu1 %v19384_v8, %s14219_s27 }
 0x2c3   : > { %3146 = vrot.lane.b32.xlu0 %v19385_v44, %s14219_s27 }
 0x2c5   : > { %3148 = vrot.lane.b32.xlu1 %v19386_v24, %s14219_s27  ;;  %v19420_v24 = vld [vmem:[#allocation29_spill] sm:$0xff] }
 0x2c7   : > { %3150 = vrot.lane.b32.xlu0 %v19387_v11, %s14219_s27  ;;  %v19421_v11 = vld [vmem:[#allocation36_spill] sm:$0xff] }
 0x2c9   : > { %3152 = vrot.lane.b32.xlu1 %v19388_v0, %s14219_s27 }
 0x2cb   : > { %3154 = vrot.lane.b32.xlu0 %v19389_v22, %s14219_s27 }
 0x2cd   : > { %3156 = vrot.lane.b32.xlu1 %v19390_v5, %s14219_s27  ;;  %v19422_v5 = vld [vmem:[#allocation37_spill] sm:$0xff] }
 0x2cf   : > { %3158 = vrot.lane.b32.xlu0 %v19391_v15, %s14219_s27  ;;  %v19423_v15 = vld [vmem:[#allocation105_spill] sm:$0xff] }
 0x2d1   : > { %3160 = vrot.lane.b32.xlu1 %v19392_v10, %s14219_s27 }
 0x2d3   : > { %3162 = vrot.lane.b32.xlu0 %v19393_v57, %s14219_s27 }
 0x2d5   : > { %3164 = vrot.lane.b32.xlu1 %v19394_v17, %s14219_s27 }
 0x2d7   : > { %3166 = vrot.lane.b32.xlu0 %v19395_v45, %s14219_s27  ;;  %v19424_v45 = vld [vmem:[#allocation104_spill] sm:$0xff] }
 0x2d9   : > { %3168 = vrot.lane.b32.xlu1 %v19396_v33, %s14219_s27 }
 0x2db   : > { %3170 = vrot.lane.b32.xlu0 %v19397_v36, %s14219_s27 }
 0x2dd   : > { %3172 = vrot.lane.b32.xlu1 %v19398_v3, %s14219_s27  ;;  %v19425_v3 = vld [vmem:[#allocation106_spill] sm:$0xff] }
 0x2df   : > { %3174 = vrot.lane.b32.xlu0 %v19399_v34, %s14219_s27 }
 0x2e1   : > { %3176 = vrot.lane.b32.xlu1 %v19400_v19, %s14219_s27 }
 0x2e3   : > { %3178 = vrot.lane.b32.xlu0 %v19401_v62, %s14219_s27 }
 0x2e5   : > { %3180 = vrot.lane.b32.xlu1 %v19402_v53, %s14219_s27 }
 0x2e7   : > { %3182 = vrot.lane.b32.xlu0 %v19403_v25, %s14219_s27  ;;  %v19426_v25 = vld [vmem:[#allocation107_spill] sm:$0xff] }
 0x2e9   : > { %3184 = vrot.lane.b32.xlu1 %v19404_v41, %s14219_s27 }
 0x2eb   : > { %3186 = vrot.lane.b32.xlu0 %v19405_v38, %s14219_s27 }
 0x2ed   : > { %3188 = vrot.lane.b32.xlu1 %v19406_v60, %s14219_s27 }
 0x2ef   : > { %3190 = vrot.lane.b32.xlu0 %v19407_v39, %s14219_s27  ;;  %v19427_v39 = vld [vmem:[#allocation38_spill] sm:$0xff] }
 0x2f1   : > { %3192 = vrot.lane.b32.xlu1 %v19408_v52, %s14219_s27 }
 0x2f3   : > { %3194 = vrot.lane.b32.xlu0 %v19409_v7, %s14219_s27 }
 0x2f5   : > { %3196 = vrot.lane.b32.xlu1 %v19410_v61, %s14219_s27 }
 0x2f7   : > { %3198 = vrot.lane.b32.xlu0 %v19411_v35, %s14219_s27 }
 0x2f9   : > { %3200 = vrot.lane.b32.xlu1 %v19412_v48, %s14219_s27  ;;  %v19428_v48 = vld [vmem:[#allocation113_spill] sm:$0xff] }
 0x2fb   : > { %3202 = vrot.lane.b32.xlu0 %v19413_v16, %s14219_s27 }
 0x2fd   : > { %v3087_v31 = vpop.permute.xlu0 %3086  ;;  %3204 = vrot.lane.b32.xlu1 %v19414_v28, %s14219_s27 }
 0x2ff   : > { %3206 = vrot.lane.b32.xlu0 %v19415_v59, %s14219_s27  ;;  %v3089_v18 = vpop.permute.xlu1 %3088 }
 0x300   : > { %v3390_v33 = vcombine.low %v3087_v31, %v3089_v18  ;;  %v19429_v31 = vld [vmem:[#allocation114_spill] sm:$0xff] }
 0x301   : > { %v16675_v26 = vpop.permute.xlu0 %3122  ;;  %3208 = vrot.lane.b32.xlu1 %v19416_v21, %s14219_s27 }
 0x302   : > { %v3398_v41 = vrot.slane %v3390_v33, %v14904_v27 }
 0x303   : > { %3210 = vrot.lane.b32.xlu0 %v19417_v47, %s14219_s27  ;;  %v16681_v46 = vpop.permute.xlu1 %3124  ;;  %v19430_v47 = vld [vmem:[#allocation112_spill] sm:$0xff] }
 0x305   : > { %v3091_v42 = vpop.permute.xlu0 %3090  ;;  %3212 = vrot.lane.b32.xlu1 %v19418_v37, %s14219_s27 }
 0x307   : > { %3214 = vrot.lane.b32.xlu0 %v19419_v12, %s14219_s27  ;;  %v3093_v8 = vpop.permute.xlu1 %3092  ;;  %v19431_v12 = vld [vmem:[#allocation49_spill] sm:$0xff] }
 0x308   : > { %v3391_v57 = vcombine.low %v3091_v42, %v3093_v8 }
 0x309   : > { %v3095_v44 = vpop.permute.xlu0 %3094  ;;  %3216 = vrot.lane.b32.xlu1 %v19420_v24, %s14219_s27 }
 0x30a   : > { %v3405_v19 = vrot.slane %v3391_v57, %v14904_v27 }
 0x30b   : > { %3218 = vrot.lane.b32.xlu0 %v19421_v11, %s14219_s27  ;;  %v3097_v0 = vpop.permute.xlu1 %3096 }
 0x30c   : > { %v3407_v36 = vcombine.low %v3095_v44, %v3097_v0  ;;  %v3406_v7 = vcombine.low %v3398_v41, %v3405_v19  ;;  %v19432_v0 = vld [vmem:[#allocation115_spill] sm:$0xff] }
 0x30d   : > { %v3103_v22 = vpop.permute.xlu0 %3102  ;;  %3220 = vrot.lane.b32.xlu1 %v19422_v5, %s14219_s27 }
 0x30e   : > { %v3415_v38 = vrot.slane %v3407_v36, %v14904_v27 }
 0x30f   : > { %3222 = vrot.lane.b32.xlu0 %v19423_v15, %s14219_s27  ;;  %v3105_v10 = vpop.permute.xlu1 %3104 }
 0x310   : > { %v3424_v42 = vcombine.low %v3103_v22, %v3105_v10  ;;  %v19433_v10 = vld [vmem:[#allocation59_spill] sm:$0xff] }
 0x311   : > { %v3099_v17 = vpop.permute.xlu0 %3098  ;;  %3224 = vrot.lane.b32.xlu1 %v19424_v45, %s14219_s27 }
 0x312   : > { %v3432_v5 = vrot.slane %v3424_v42, %v14904_v27  ;;  %v19440_v42 = vld [vmem:[#allocation34_spill] sm:$0xff] }
 0x313   : > { %3226 = vrot.lane.b32.xlu0 %v19425_v3, %s14219_s27  ;;  %v3101_v34 = vpop.permute.xlu1 %3100  ;;  %v19434_v3 = vld [vmem:[#allocation61_spill] sm:$0xff] }
 0x314   : > { %v3408_v62 = vcombine.low %v3099_v17, %v3101_v34  ;;  %v3527_v17 = vcombine.low %v16675_v26, %v16681_v46  ;;  %v3526_v34 = vcombine.low %v16663_v54, %v16669_v29  ;;  %v19436_v46 = vld [vmem:[#allocation24_spill] sm:$0xff] }
 0x315   : > { %v3107_v53 = vpop.permute.xlu0 %3106  ;;  %3228 = vrot.lane.b32.xlu1 %v19426_v25, %s14219_s27 }
 0x316   : > { %v3422_v60 = vrot.slane %v3408_v62, %v14904_v27  ;;  %v3541_v41 = vrot.slane %v3527_v17, %v14904_v27  ;;  %v19444_v17 = vld [vmem:[#allocation108_spill] sm:$0xff] }
 0x317   : > { %3230 = vrot.lane.b32.xlu0 %v19427_v39, %s14219_s27  ;;  %v3109_v52 = vpop.permute.xlu1 %3108  ;;  %v3534_v39 = vrot.slane %v3526_v34, %v14904_v27 }
 0x318   : > { %v3423_v61 = vcombine.low %v3415_v38, %v3422_v60  ;;  %v3425_v18 = vcombine.low %v3107_v53, %v3109_v52  ;;  %v19435_v53 = vld [vmem:[#allocation22_spill] sm:$0xff] }
 0x319   : > { %v3111_v35 = vpop.permute.xlu0 %3110  ;;  %3232 = vrot.lane.b32.xlu1 %v19428_v48, %s14219_s27 }
 0x31a   : > { %v4686_v16 = vpack.c.bf16 %v3423_v61, %v3406_v7  ;;  %v3439_v44 = vrot.slane %v3425_v18, %v14904_v27  ;;  %v19437_v7 = vld [vmem:[#allocation31_spill] sm:$0xff] }
 0x31b   : > { %3234 = vrot.lane.b32.xlu0 %v19429_v31, %s14219_s27  ;;  %v3113_v28 = vpop.permute.xlu1 %3112  ;;  %v19438_v31 = vld [vmem:[#allocation32_spill] sm:$0xff] }
 0x31c   : > { %v4759_v59 = vrot.slane %v4686_v16, 4  ;;  %v3441_v37 = vcombine.low %v3111_v35, %v3113_v28  ;;  %v3440_v45 = vcombine.low %v3432_v5, %v3439_v44  ;;  %v3542_v35 = vcombine.low %v3534_v39, %v3541_v41  ;;  %v19443_v5 = vld [vmem:[#allocation35_spill] sm:$0xff]  ;;  %v19448_v39 = vld [vmem:[#allocation110_spill] sm:$0xff] }
 0x31d   : > { %v3115_v21 = vpop.permute.xlu0 %3114  ;;  %3236 = vrot.lane.b32.xlu1 %v19430_v47, %s14219_s27 }
 0x31e   : > { %4868 = vst.msk [vmem:[#allocation2] sm:$0xf0] %vm4867_vm2, %v4759_v59  ;;  %v3449_v15 = vrot.slane %v3441_v37, %v14904_v27  ;;  %v19441_v37 = vld [vmem:[#allocation39_spill] sm:$0xff] }
 0x31f   : > { %3238 = vrot.lane.b32.xlu0 %v19431_v12, %s14219_s27  ;;  %v3117_v8 = vpop.permute.xlu1 %3116 }
 0x320   : > { %v3442_v24 = vcombine.low %v3115_v21, %v3117_v8 }
 0x321   : > { %v3127_v11 = vpop.permute.xlu0 %3126  ;;  %3240 = vrot.lane.b32.xlu1 %v19432_v0, %s14219_s27 }
 0x322   : > { %v3456_v22 = vrot.slane %v3442_v24, %v14904_v27  ;;  %v19442_v24 = vld [vmem:[#allocation103_spill] sm:$0xff] }
 0x323   : > { %3242 = vrot.lane.b32.xlu0 %v19433_v10, %s14219_s27  ;;  %v3129_v57 = vpop.permute.xlu1 %3128 }
 0x324   : > { %v3457_v33 = vcombine.low %v3449_v15, %v3456_v22  ;;  %v3543_v62 = vcombine.low %v3127_v11, %v3129_v57 }
 0x325   : > { %v3131_v36 = vpop.permute.xlu0 %3130  ;;  %3244 = vrot.lane.b32.xlu1 %v19434_v3, %s14219_s27  ;;  %v19445_v3 = vld [vmem:[#allocation109_spill] sm:$0xff] }
 0x326   : > { %v4687_v19 = vpack.c.bf16 %v3457_v33, %v3440_v45  ;;  %v3551_v54 = vrot.slane %v3543_v62, %v14904_v27 }
 0x327   : > { %3246 = vrot.lane.b32.xlu0 %v19435_v53, %s14219_s27  ;;  %v3133_v25 = vpop.permute.xlu1 %3132 }
 0x328   : > { %v4760_v38 = vrot.slane %v4687_v19, 4  ;;  %v3544_v60 = vcombine.low %v3131_v36, %v3133_v25  ;;  %v19446_v25 = vld [vmem:[#allocation3_spill] sm:$0xff] }
 0x329   : > { %v3135_v26 = vpop.permute.xlu0 %3134  ;;  %3248 = vrot.lane.b32.xlu1 %v19436_v46, %s14219_s27 }
 0x32a   : > { %v4761_v52 = vsel %vm364_vm0, %v4759_v59, %v4760_v38  ;;  %4872 = vst.msk [vmem:[#allocation2 + $0x10] sm:$0xf] %vm4871_vm3, %v4760_v38  ;;  %v3558_v29 = vrot.slane %v3544_v60, %v14904_v27  ;;  %v19439_v59 = vld [vmem:[#allocation33_spill] sm:$0xff]  ;;  %v19447_v38 = vld [vmem:[#allocation111_spill] sm:$0xff] }
 0x32b   : > { %3250 = vrot.lane.b32.xlu0 %v19437_v7, %s14219_s27  ;;  %4870 = vst.msk [vmem:[#allocation2 + $0x8] sm:$0xff] %vm4869_vm5, %v4761_v52  ;;  %v3137_v61 = vpop.permute.xlu1 %3136 }
 0x32c   : > { %v3559_v48 = vcombine.low %v3551_v54, %v3558_v29  ;;  %v3560_v11 = vcombine.low %v3135_v26, %v3137_v61  ;;  %v19449_v54 = vld [vmem:[#allocation57_spill] sm:$0xff] }
 0x32d   : > { %v3139_v16 = vpop.permute.xlu0 %3138  ;;  %3252 = vrot.lane.b32.xlu1 %v19438_v31, %s14219_s27 }
 0x32e   : > { %v4690_v28 = vpack.c.bf16 %v3559_v48, %v3542_v35  ;;  %v3568_v45 = vrot.slane %v3560_v11, %v14904_v27  ;;  %v19450_v35 = vld [vmem:[#allocation58_spill] sm:$0xff] }
 0x32f   : > { %3254 = vrot.lane.b32.xlu0 %v19439_v59, %s14219_s27  ;;  %v3141_v18 = vpop.permute.xlu1 %3140 }
 0x330   : > { %v4765_v21 = vrot.slane %v4690_v28, 4  ;;  %v3561_v8 = vcombine.low %v3139_v16, %v3141_v18 }
 0x331   : > { %v3143_v47 = vpop.permute.xlu0 %3142  ;;  %3256 = vrot.lane.b32.xlu1 %v19440_v42, %s14219_s27 }
 0x332   : > { %4876 = vst.msk [vmem:[#allocation2 + $0x30] sm:$0xf0] %vm4867_vm2, %v4765_v21  ;;  %v3575_v22 = vrot.slane %v3561_v8, %v14904_v27 }
 0x333   : > { %3258 = vrot.lane.b32.xlu0 %v19441_v37, %s14219_s27  ;;  %v3145_v12 = vpop.permute.xlu1 %3144 }
 0x334   : > { %v3577_v0 = vcombine.low %v3143_v47, %v3145_v12  ;;  %v3576_v19 = vcombine.low %v3568_v45, %v3575_v22  ;;  %v19455_v45 = vld [vmem:[#allocation23_spill] sm:$0xff] }
 0x335   : > { %v3147_v44 = vpop.permute.xlu0 %3146  ;;  %3260 = vrot.lane.b32.xlu1 %v19442_v24, %s14219_s27  ;;  %v19451_v24 = vld [vmem:[#allocation63_spill] sm:$0xff] }
 0x336   : > { %v3585_v33 = vrot.slane %v3577_v0, %v14904_v27 }
 0x337   : > { %3262 = vrot.lane.b32.xlu0 %v19443_v5, %s14219_s27  ;;  %v3149_v15 = vpop.permute.xlu1 %3148  ;;  %v19452_v5 = vld [vmem:[#allocation64_spill] sm:$0xff] }
 0x338   : > { %v3578_v10 = vcombine.low %v3147_v44, %v3149_v15 }
 0x339   : > { %v3151_v57 = vpop.permute.xlu0 %3150  ;;  %3264 = vrot.lane.b32.xlu1 %v19444_v17, %s14219_s27 }
 0x33a   : > { %v3592_v36 = vrot.slane %v3578_v10, %v14904_v27 }
 0x33b   : > { %3266 = vrot.lane.b32.xlu0 %v19445_v3, %s14219_s27  ;;  %v3153_v34 = vpop.permute.xlu1 %3152 }
 0x33c   : > { %v3593_v62 = vcombine.low %v3585_v33, %v3592_v36  ;;  %v3662_v48 = vcombine.low %v3151_v57, %v3153_v34 }
 0x33d   : > { %v3155_v53 = vpop.permute.xlu0 %3154  ;;  %3268 = vrot.lane.b32.xlu1 %v19446_v25, %s14219_s27 }
 0x33e   : > { %v4691_v41 = vpack.c.bf16 %v3593_v62, %v3576_v19  ;;  %v19456_v19 = vld [vmem:[#allocation87_spill] sm:$0xff] }
 0x33f   : > { %3270 = vrot.lane.b32.xlu0 %v19447_v38, %s14219_s27  ;;  %v3157_v60 = vpop.permute.xlu1 %3156 }
 0x340   : > { %v4766_v26 = vrot.slane %v4691_v41, 4  ;;  %v3663_v7 = vcombine.low %v3155_v53, %v3157_v60  ;;  %v19457_v41 = vld [vmem:[#allocation12_spill] sm:$0xff] }
 0x341   : > { %v3159_v46 = vpop.permute.xlu0 %3158  ;;  %3272 = vrot.lane.b32.xlu1 %v19448_v39, %s14219_s27  ;;  %v19458_v39 = vld [vmem:[#allocation67_spill] sm:$0xff] }
 0x342   : > { %v4767_v52 = vsel %vm364_vm0, %v4765_v21, %v4766_v26  ;;  %4878 = vst.msk [vmem:[#allocation2 + $0x40] sm:$0xf] %vm4871_vm3, %v4766_v26  ;;  %v3677_v28 = vrot.slane %v3663_v7, %v14904_v27  ;;  %v3670_v21 = vrot.slane %v3662_v48, %v14904_v27 }
 0x343   : > { %3274 = vrot.lane.b32.xlu0 %v19449_v54, %s14219_s27  ;;  %4877 = vst.msk [vmem:[#allocation2 + $0x38] sm:$0xff] %vm4869_vm5, %v4767_v52  ;;  %v3161_v29 = vpop.permute.xlu1 %3160  ;;  %v19459_v54 = vld [vmem:[#allocation94_spill] sm:$0xff] }
 0x344   : > { %v3679_v16 = vcombine.low %v3159_v46, %v3161_v29  ;;  %v3678_v12 = vcombine.low %v3670_v21, %v3677_v28 }
 0x345   : > { %v3163_v61 = vpop.permute.xlu0 %3162  ;;  %3276 = vrot.lane.b32.xlu1 %v19450_v35, %s14219_s27  ;;  %v19460_v35 = vld [vmem:[#allocation78_spill] sm:$0xff] }
 0x346   : > { %v3687_v47 = vrot.slane %v3679_v16, %v14904_v27  ;;  %v19461_v16 = vld [vmem:[#allocation75_spill] sm:$0xff] }
 0x347   : > { %3278 = vrot.lane.b32.xlu0 %v16255_v63, %s14219_s27  ;;  %v3165_v31 = vpop.permute.xlu1 %3164 }
 0x348   : > { %v3680_v59 = vcombine.low %v3163_v61, %v3165_v31 }
 0x349   : > { %v3167_v18 = vpop.permute.xlu0 %3166  ;;  %3280 = vrot.lane.b32.xlu1 %v16237_v43, %s14219_s27 }
 0x34a   : > { %v3694_v42 = vrot.slane %v3680_v59, %v14904_v27 }
 0x34b   : > { %3282 = vrot.lane.b32.xlu0 %v16242_v1, %s14219_s27  ;;  %v3169_v37 = vpop.permute.xlu1 %3168  ;;  %v19453_v1 = vld [vmem:[#allocation44_spill] sm:$0xff] }
 0x34c   : > { %v3695_v63 = vcombine.low %v3687_v47, %v3694_v42  ;;  %v3696_v57 = vcombine.low %v3167_v18, %v3169_v37  ;;  %v19462_v18 = vld [vmem:[#allocation90_spill] sm:$0xff]  ;;  %v19463_v42 = vld [vmem:[#allocation60_spill] sm:$0xff] }
 0x34d   : > { %v3171_v8 = vpop.permute.xlu0 %3170  ;;  %3284 = vrot.lane.b32.xlu1 %v16227_v13, %s14219_s27  ;;  %v19454_v13 = vld [vmem:[#allocation89_spill] sm:$0xff] }
 0x34e   : > { %v4694_v44 = vpack.c.bf16 %v3695_v63, %v3678_v12  ;;  %v3704_v62 = vrot.slane %v3696_v57, %v14904_v27  ;;  %v19467_v57 = vld [vmem:[#allocation126_spill] sm:$0xff] }
 0x34f   : > { %3286 = vrot.lane.b32.xlu0 %v19451_v24, %s14219_s27  ;;  %v3173_v43 = vpop.permute.xlu1 %3172 }
 0x350   : > { %v4771_v11 = vrot.slane %v4694_v44, 4  ;;  %v3697_v22 = vcombine.low %v3171_v8, %v3173_v43  ;;  %v19464_v44 = vld [vmem:[#allocation62_spill] sm:$0xff] }
 0x351   : > { %v3175_v0 = vpop.permute.xlu0 %3174  ;;  %3288 = vrot.lane.b32.xlu1 %v19452_v5, %s14219_s27 }
 0x352   : > { %4882 = vst.msk [vmem:[#allocation2 + $0x60] sm:$0xf0] %vm4867_vm2, %v4771_v11  ;;  %v3711_v36 = vrot.slane %v3697_v22, %v14904_v27 }
 0x353   : > { %3290 = vrot.lane.b32.xlu0 %v19453_v1, %s14219_s27  ;;  %v3177_v15 = vpop.permute.xlu1 %3176 }
 0x354   : > { %v3713_v17 = vcombine.low %v3175_v0, %v3177_v15  ;;  %v3712_v60 = vcombine.low %v3704_v62, %v3711_v36  ;;  %v19465_v0 = vld [vmem:[#allocation65_spill] sm:$0xff] }
 0x355   : > { %v3179_v10 = vpop.permute.xlu0 %3178  ;;  %3292 = vrot.lane.b32.xlu1 %v19454_v13, %s14219_s27  ;;  %v19468_v36 = vld [vmem:[#allocation125_spill] sm:$0xff] }
 0x356   : > { %v3721_v53 = vrot.slane %v3713_v17, %v14904_v27 }
 0x357   : > { %3294 = vrot.lane.b32.xlu0 %v19455_v45, %s14219_s27  ;;  %v3181_v33 = vpop.permute.xlu1 %3180 }
 0x358   : > { %v3714_v3 = vcombine.low %v3179_v10, %v3181_v33  ;;  %v19466_v10 = vld [vmem:[#allocation66_spill] sm:$0xff] }
 0x359   : > { %v3183_v34 = vpop.permute.xlu0 %3182  ;;  %3296 = vrot.lane.b32.xlu1 %v19456_v19, %s14219_s27 }
 0x35a   : > { %v3728_v25 = vrot.slane %v3714_v3, %v14904_v27  ;;  %v19469_v3 = vld [vmem:[#allocation127_spill] sm:$0xff] }
 0x35b   : > { %3298 = vrot.lane.b32.xlu0 %v19457_v41, %s14219_s27  ;;  %v3185_v38 = vpop.permute.xlu1 %3184 }
 0x35c   : > { %v3729_v26 = vcombine.low %v3721_v53, %v3728_v25  ;;  %v3798_v21 = vcombine.low %v3183_v34, %v3185_v38  ;;  %v19470_v53 = vld [vmem:[#allocation128_spill] sm:$0xff] }
 0x35d   : > { %v3187_v46 = vpop.permute.xlu0 %3186  ;;  %3300 = vrot.lane.b32.xlu1 %v19458_v39, %s14219_s27  ;;  %v19471_v38 = vld [vmem:[#allocation80_spill] sm:$0xff] }
 0x35e   : > { %v4695_v52 = vpack.c.bf16 %v3729_v26, %v3712_v60  ;;  %v3806_v24 = vrot.slane %v3798_v21, %v14904_v27 }
 0x35f   : > { %3302 = vrot.lane.b32.xlu0 %v19459_v54, %s14219_s27  ;;  %v3189_v29 = vpop.permute.xlu1 %3188 }
 0x360   : > { %v4772_v7 = vrot.slane %v4695_v52, 4  ;;  %v3799_v28 = vcombine.low %v3187_v46, %v3189_v29  ;;  %v19472_v52 = vld [vmem:[#allocation42_spill] sm:$0xff] }
 0x361   : > { %v3191_v61 = vpop.permute.xlu0 %3190  ;;  %3304 = vrot.lane.b32.xlu1 %v19460_v35, %s14219_s27 }
 0x362   : > { %v4773_v48 = vsel %vm364_vm0, %v4771_v11, %v4772_v7  ;;  %4884 = vst.msk [vmem:[#allocation2 + $0x70] sm:$0xf] %vm4871_vm3, %v4772_v7  ;;  %v3813_v12 = vrot.slane %v3799_v28, %v14904_v27  ;;  %v19474_v28 = vld [vmem:[#allocation92_spill] sm:$0xff] }
 0x363   : > { %3306 = vrot.lane.b32.xlu0 %v19461_v16, %s14219_s27  ;;  %4883 = vst.msk [vmem:[#allocation2 + $0x68] sm:$0xff] %vm4869_vm5, %v4773_v48  ;;  %v3193_v31 = vpop.permute.xlu1 %3192 }
 0x364   : > { %v3815_v47 = vcombine.low %v3191_v61, %v3193_v31  ;;  %v3814_v1 = vcombine.low %v3806_v24, %v3813_v12  ;;  %v19473_v61 = vld [vmem:[#allocation86_spill] sm:$0xff] }
 0x365   : > { %v3195_v59 = vpop.permute.xlu0 %3194  ;;  %3308 = vrot.lane.b32.xlu1 %v19462_v18, %s14219_s27  ;;  %v19475_v18 = vld [vmem:[#allocation88_spill] sm:$0xff] }
 0x366   : > { %v3823_v43 = vrot.slane %v3815_v47, %v14904_v27 }
 0x367   : > { %3310 = vrot.lane.b32.xlu0 %v19463_v42, %s14219_s27  ;;  %v3197_v37 = vpop.permute.xlu1 %3196 }
 0x368   : > { %v3816_v63 = vcombine.low %v3195_v59, %v3197_v37  ;;  %v19476_v37 = vld [vmem:[#allocation68_spill] sm:$0xff] }
 0x369   : > { %v3199_v8 = vpop.permute.xlu0 %3198  ;;  %3312 = vrot.lane.b32.xlu1 %v19464_v44, %s14219_s27 }
 0x36a   : > { %v3830_v11 = vrot.slane %v3816_v63, %v14904_v27  ;;  %v19477_v63 = vld [vmem:[#allocation93_spill] sm:$0xff] }
 0x36b   : > { %3314 = vrot.lane.b32.xlu0 %v19465_v0, %s14219_s27  ;;  %v3201_v5 = vpop.permute.xlu1 %3200 }
 0x36c   : > { %v3831_v15 = vcombine.low %v3823_v43, %v3830_v11  ;;  %v3832_v25 = vcombine.low %v3199_v8, %v3201_v5  ;;  %v19478_v43 = vld [vmem:[#allocation91_spill] sm:$0xff] }
 0x36d   : > { %v3203_v22 = vpop.permute.xlu0 %3202  ;;  %3316 = vrot.lane.b32.xlu1 %v19466_v10, %s14219_s27 }
 0x36e   : > { %v4698_v13 = vpack.c.bf16 %v3831_v15, %v3814_v1  ;;  %v3840_v54 = vrot.slane %v3832_v25, %v14904_v27 }
 0x36f   : > { %3318 = vrot.lane.b32.xlu0 %v19467_v57, %s14219_s27  ;;  %v3205_v17 = vpop.permute.xlu1 %3204 }
 0x370   : > { %v4777_v45 = vrot.slane %v4698_v13, 4  ;;  %v3833_v19 = vcombine.low %v3203_v22, %v3205_v17 }
 0x371   : > { %v3207_v33 = vpop.permute.xlu0 %3206  ;;  %3320 = vrot.lane.b32.xlu1 %v19468_v36, %s14219_s27 }
 0x372   : > { %4888 = vst.msk [vmem:[#allocation2 + $0x90] sm:$0xf0] %vm4867_vm2, %v4777_v45  ;;  %v3847_v26 = vrot.slane %v3833_v19, %v14904_v27 }
 0x373   : > { %3322 = vrot.lane.b32.xlu0 %v19469_v3, %s14219_s27  ;;  %v3209_v34 = vpop.permute.xlu1 %3208 }
 0x374   : > { %v3849_v41 = vcombine.low %v3207_v33, %v3209_v34  ;;  %v3848_v48 = vcombine.low %v3840_v54, %v3847_v26 }
 0x375   : > { %v3211_v62 = vpop.permute.xlu0 %3210  ;;  %3324 = vrot.lane.b32.xlu1 %v19470_v53, %s14219_s27 }
 0x376   : > { %v3857_v29 = vrot.slane %v3849_v41, %v14904_v27 }
 0x377   : > { %3326 = vrot.lane.b32.xlu0 %v19471_v38, %s14219_s27  ;;  %v3213_v60 = vpop.permute.xlu1 %3212 }
 0x378   : > { %v3850_v46 = vcombine.low %v3211_v62, %v3213_v60 }
 0x379   : > { %v3215_v39 = vpop.permute.xlu0 %3214  ;;  %3328 = vrot.lane.b32.xlu1 %v19472_v52, %s14219_s27 }
 0x37a   : > { %v3864_v7 = vrot.slane %v3850_v46, %v14904_v27 }
 0x37b   : > { %3330 = vrot.lane.b32.xlu0 %v19473_v61, %s14219_s27  ;;  %v3217_v35 = vpop.permute.xlu1 %3216 }
 0x37c   : > { %v3865_v16 = vcombine.low %v3857_v29, %v3864_v7  ;;  %v3934_v11 = vcombine.low %v3215_v39, %v3217_v35 }
 0x37d   : > { %v3219_v31 = vpop.permute.xlu0 %3218  ;;  %3332 = vrot.lane.b32.xlu1 %v19474_v28, %s14219_s27 }
 0x37e   : > { %v4699_v59 = vpack.c.bf16 %v3865_v16, %v3848_v48  ;;  %v3942_v10 = vrot.slane %v3934_v11, %v14904_v27 }
 0x37f   : > { %3334 = vrot.lane.b32.xlu0 %v19475_v18, %s14219_s27  ;;  %v3221_v21 = vpop.permute.xlu1 %3220 }
 0x380   : > { %v4778_v47 = vrot.slane %v4699_v59, 4  ;;  %v3935_v44 = vcombine.low %v3219_v31, %v3221_v21 }
 0x381   : > { %v3223_v42 = vpop.permute.xlu0 %3222  ;;  %3336 = vrot.lane.b32.xlu1 %v19476_v37, %s14219_s27 }
 0x382   : > { %v4779_v12 = vsel %vm364_vm0, %v4777_v45, %v4778_v47  ;;  %4890 = vst.msk [vmem:[#allocation2 + $0xa0] sm:$0xf] %vm4871_vm3, %v4778_v47  ;;  %v3949_v1 = vrot.slane %v3935_v44, %v14904_v27 }
 0x383   : > { %3338 = vrot.lane.b32.xlu0 %v19477_v63, %s14219_s27  ;;  %4889 = vst.msk [vmem:[#allocation2 + $0x98] sm:$0xff] %vm4869_vm5, %v4779_v12  ;;  %v3225_v8 = vpop.permute.xlu1 %3224 }
 0x384   : > { %v3951_v0 = vcombine.low %v3223_v42, %v3225_v8  ;;  %v3950_v45 = vcombine.low %v3942_v10, %v3949_v1 }
 0x385   : > { %v3227_v24 = vpop.permute.xlu0 %3226  ;;  %3340 = vrot.lane.b32.xlu1 %v19478_v43, %s14219_s27 }
 0x386   : > { %v3959_v13 = vrot.slane %v3951_v0, %v14904_v27 }
 0x387   : > { %3342 = vrot.lane.b32.xlu0 %v16430_v14, %s14219_s27  ;;  %v3229_v5 = vpop.permute.xlu1 %3228 }
 0x388   : > { %v3952_v15 = vcombine.low %v3227_v24, %v3229_v5 }
 0x389   : > { %v3231_v22 = vpop.permute.xlu0 %3230  ;;  %3344 = vrot.lane.b32.xlu1 %v16410_v30, %s14219_s27 }
 0x38a   : > { %v3966_v57 = vrot.slane %v3952_v15, %v14904_v27 }
 0x38b   : > { %3346 = vrot.lane.b32.xlu0 %v16414_v4, %s14219_s27  ;;  %v3233_v17 = vpop.permute.xlu1 %3232 }
 0x38c   : > { %v3967_v14 = vcombine.low %v3959_v13, %v3966_v57 }
 0x38d   : > { %v3235_v33 = vpop.permute.xlu0 %3234  ;;  %3348 = vrot.lane.b32.xlu1 %v16406_v23, %s14219_s27  ;;  %v3968_v23 = vcombine.low %v3231_v22, %v3233_v17 }
 0x38e   : > { %v4702_v36 = vpack.c.bf16 %v3967_v14, %v3950_v45 }
 0x38f   : > { %3350 = vrot.lane.b32.xlu0 %v16434_v9, %s14219_s27  ;;  %v3237_v30 = vpop.permute.xlu1 %3236 }
 0x390   : > { %v4783_v3 = vrot.slane %v4702_v36, 4  ;;  %v3969_v19 = vcombine.low %v3235_v33, %v3237_v30 }
 0x391   : > { %v3239_v34 = vpop.permute.xlu0 %3238  ;;  %3352 = vrot.lane.b32.xlu1 %v16418_v32, %s14219_s27 }
 0x392   : > { %4894 = vst.msk [vmem:[#allocation2 + $0xc0] sm:$0xf0] %vm4867_vm2, %v4783_v3  ;;  %v3983_v25 = vrot.slane %v3969_v19, %v14904_v27 }
 0x393   : > { %3354 = vrot.lane.b32.xlu0 %v16444_v50, %s14219_s27  ;;  %v3241_v4 = vpop.permute.xlu1 %3240  ;;  %v3976_v50 = vrot.slane %v3968_v23, %v14904_v27 }
 0x394   : > { %v3985_v53 = vcombine.low %v3239_v34, %v3241_v4 }
 0x395   : > { %v3243_v62 = vpop.permute.xlu0 %3242  ;;  %3356 = vrot.lane.b32.xlu1 %v16448_v20, %s14219_s27  ;;  %v3984_v26 = vcombine.low %v3976_v50, %v3983_v25 }
 0x396   : > { %v3993_v38 = vrot.slane %v3985_v53, %v14904_v27 }
 0x397   : > { %3358 = vrot.lane.b32.xlu0 %v16482_v40, %s14219_s27  ;;  %v3245_v9 = vpop.permute.xlu1 %3244 }
 0x398   : > { %v3986_v32 = vcombine.low %v3243_v62, %v3245_v9 }
 0x399   : > { %v3247_v41 = vpop.permute.xlu0 %3246  ;;  %3360 = vrot.lane.b32.xlu1 %v16468_v51, %s14219_s27 }
 0x39a   : > { %v4000_v60 = vrot.slane %v3986_v32, %v14904_v27 }
 0x39b   : > { %3362 = vrot.lane.b32.xlu0 %v16472_v55, %s14219_s27  ;;  %v3249_v20 = vpop.permute.xlu1 %3248 }
 0x39c   : > { %v4001_v40 = vcombine.low %v3993_v38, %v4000_v60 }
 0x39d   : > { %v3251_v46 = vpop.permute.xlu0 %3250  ;;  %3364 = vrot.lane.b32.xlu1 %v16461_v56, %s14219_s27 }
 0x39e   : > { %v4703_v39 = vpack.c.bf16 %v4001_v40, %v3984_v26 }
 0x39f   : > { %3366 = vrot.lane.b32.xlu0 %v16486_v6, %s14219_s27  ;;  %v3253_v51 = vpop.permute.xlu1 %3252  ;;  %v4070_v6 = vcombine.low %v3247_v41, %v3249_v20 }
 0x3a0   : > { %v4784_v52 = vrot.slane %v4703_v39, 4  ;;  %v4071_v55 = vcombine.low %v3251_v46, %v3253_v51 }
 0x3a1   : > { %v3255_v54 = vpop.permute.xlu0 %3254  ;;  %3368 = vrot.lane.b32.xlu1 %v16476_v58, %s14219_s27  ;;  %v4078_v31 = vrot.slane %v4070_v6, %v14904_v27 }
 0x3a2   : > { %v4785_v29 = vsel %vm364_vm0, %v4783_v3, %v4784_v52  ;;  %4896 = vst.msk [vmem:[#allocation2 + $0xd0] sm:$0xf] %vm4871_vm3, %v4784_v52  ;;  %v4085_v58 = vrot.slane %v4071_v55, %v14904_v27 }
 0x3a3   : > { %3370 = vrot.lane.b32.xlu0 %v16495_v49, %s14219_s27  ;;  %4895 = vst.msk [vmem:[#allocation2 + $0xc8] sm:$0xff] %vm4869_vm5, %v4785_v29  ;;  %v3257_v56 = vpop.permute.xlu1 %3256 }
 0x3a4   : > { %v4087_v61 = vcombine.low %v3255_v54, %v3257_v56  ;;  %v4086_v18 = vcombine.low %v4078_v31, %v4085_v58 }
 0x3a5   : > { %v3259_v7 = vpop.permute.xlu0 %3258  ;;  %3372 = vrot.lane.b32.xlu1 %v16499_v2, %s14219_s27 }
 0x3a6   : > { %v4095_v28 = vrot.slane %v4087_v61, %v14904_v27 }
 0x3a7   : > { %v3261_v35 = vpop.permute.xlu1 %3260 }
 0x3a8   : > { %v4088_v48 = vcombine.low %v3259_v7, %v3261_v35 }
 0x3a9   : > { %v3263_v16 = vpop.permute.xlu0 %3262 }
 0x3aa   : > { %v4102_v49 = vrot.slane %v4088_v48, %v14904_v27 }
 0x3ab   : > { %v3265_v59 = vpop.permute.xlu1 %3264 }
 0x3ac   : > { %v4103_v21 = vcombine.low %v4095_v28, %v4102_v49  ;;  %v4104_v24 = vcombine.low %v3263_v16, %v3265_v59 }
 0x3ad   : > { %v3267_v47 = vpop.permute.xlu0 %3266 }
 0x3ae   : > { %v4706_v42 = vpack.c.bf16 %v4103_v21, %v4086_v18  ;;  %v4112_v15 = vrot.slane %v4104_v24, %v14904_v27 }
 0x3af   : > { %v3269_v37 = vpop.permute.xlu1 %3268 }
 0x3b0   : > { %v4789_v2 = vrot.slane %v4706_v42, 4  ;;  %v4105_v8 = vcombine.low %v3267_v47, %v3269_v37 }
 0x3b1   : > { %v3271_v12 = vpop.permute.xlu0 %3270 }
 0x3b2   : > { %4900 = vst.msk [vmem:[#allocation2 + $0xf0] sm:$0xf0] %vm4867_vm2, %v4789_v2  ;;  %v4119_v0 = vrot.slane %v4105_v8, %v14904_v27 }
 0x3b3   : > { %v3273_v63 = vpop.permute.xlu1 %3272 }
 0x3b4   : > { %v4121_v43 = vcombine.low %v3271_v12, %v3273_v63  ;;  %v4120_v57 = vcombine.low %v4112_v15, %v4119_v0 }
 0x3b5   : > { %v3275_v44 = vpop.permute.xlu0 %3274 }
 0x3b6   : > { %v4129_v22 = vrot.slane %v4121_v43, %v14904_v27 }
 0x3b7   : > { %v3277_v11 = vpop.permute.xlu1 %3276 }
 0x3b8   : > { %v4122_v5 = vcombine.low %v3275_v44, %v3277_v11 }
 0x3b9   : > { %v3279_v1 = vpop.permute.xlu0 %3278 }
 0x3ba   : > { %v4136_v10 = vrot.slane %v4122_v5, %v14904_v27 }
 0x3bb   : > { %v3281_v13 = vpop.permute.xlu1 %3280 }
 0x3bc   : > { %v4137_v17 = vcombine.low %v4129_v22, %v4136_v10  ;;  %v4206_v62 = vcombine.low %v3279_v1, %v3281_v13 }
 0x3bd   : > { %v3283_v45 = vpop.permute.xlu0 %3282 }
 0x3be   : > { %v4707_v14 = vpack.c.bf16 %v4137_v17, %v4120_v57  ;;  %v4214_v41 = vrot.slane %v4206_v62, %v14904_v27 }
 0x3bf   : > { %v3285_v33 = vpop.permute.xlu1 %3284 }
 0x3c0   : > { %v4790_v36 = vrot.slane %v4707_v14, 4  ;;  %v4207_v4 = vcombine.low %v3283_v45, %v3285_v33 }
 0x3c1   : > { %v3287_v30 = vpop.permute.xlu0 %3286 }
 0x3c2   : > { %v4791_v3 = vsel %vm364_vm0, %v4789_v2, %v4790_v36  ;;  %4902 = vst.msk [vmem:[#allocation2 + $0x100] sm:$0xf] %vm4871_vm3, %v4790_v36  ;;  %v4221_v9 = vrot.slane %v4207_v4, %v14904_v27 }
 0x3c3   : > { %4901 = vst.msk [vmem:[#allocation2 + $0xf8] sm:$0xff] %vm4869_vm5, %v4791_v3  ;;  %v3289_v34 = vpop.permute.xlu1 %3288 }
 0x3c4   : > { %v4223_v23 = vcombine.low %v3287_v30, %v3289_v34  ;;  %v4222_v20 = vcombine.low %v4214_v41, %v4221_v9 }
 0x3c5   : > { %v3291_v19 = vpop.permute.xlu0 %3290 }
 0x3c6   : > { %v4231_v50 = vrot.slane %v4223_v23, %v14904_v27 }
 0x3c7   : > { %v3293_v53 = vpop.permute.xlu1 %3292 }
 0x3c8   : > { %v4224_v25 = vcombine.low %v3291_v19, %v3293_v53 }
 0x3c9   : > { %v3295_v32 = vpop.permute.xlu0 %3294 }
 0x3ca   : > { %v4238_v38 = vrot.slane %v4224_v25, %v14904_v27 }
 0x3cb   : > { %v3297_v60 = vpop.permute.xlu1 %3296 }
 0x3cc   : > { %v4239_v26 = vcombine.low %v4231_v50, %v4238_v38  ;;  %v4240_v55 = vcombine.low %v3295_v32, %v3297_v60 }
 0x3cd   : > { %v3299_v40 = vpop.permute.xlu0 %3298 }
 0x3ce   : > { %v4710_v46 = vpack.c.bf16 %v4239_v26, %v4222_v20  ;;  %v4248_v48 = vrot.slane %v4240_v55, %v14904_v27 }
 0x3cf   : > { %v3301_v39 = vpop.permute.xlu1 %3300 }
 0x3d0   : > { %v4795_v51 = vrot.slane %v4710_v46, 4  ;;  %v4241_v29 = vcombine.low %v3299_v40, %v3301_v39 }
 0x3d1   : > { %v3303_v52 = vpop.permute.xlu0 %3302 }
 0x3d2   : > { %4906 = vst.msk [vmem:[#allocation2 + $0x120] sm:$0xf0] %vm4867_vm2, %v4795_v51  ;;  %v4255_v61 = vrot.slane %v4241_v29, %v14904_v27 }
 0x3d3   : > { %v3305_v54 = vpop.permute.xlu1 %3304 }
 0x3d4   : > { %v4257_v7 = vcombine.low %v3303_v52, %v3305_v54  ;;  %v4256_v49 = vcombine.low %v4248_v48, %v4255_v61 }
 0x3d5   : > { %v3307_v56 = vpop.permute.xlu0 %3306 }
 0x3d6   : > { %v4265_v16 = vrot.slane %v4257_v7, %v14904_v27 }
 0x3d7   : > { %v3309_v6 = vpop.permute.xlu1 %3308 }
 0x3d8   : > { %v4258_v35 = vcombine.low %v3307_v56, %v3309_v6 }
 0x3d9   : > { %v3311_v58 = vpop.permute.xlu0 %3310 }
 0x3da   : > { %v4272_v31 = vrot.slane %v4258_v35, %v14904_v27 }
 0x3db   : > { %v3313_v28 = vpop.permute.xlu1 %3312 }
 0x3dc   : > { %v4273_v59 = vcombine.low %v4265_v16, %v4272_v31  ;;  %v4342_v44 = vcombine.low %v3311_v58, %v3313_v28 }
 0x3dd   : > { %v3315_v18 = vpop.permute.xlu0 %3314 }
 0x3de   : > { %v4711_v21 = vpack.c.bf16 %v4273_v59, %v4256_v49  ;;  %v4350_v1 = vrot.slane %v4342_v44, %v14904_v27 }
 0x3df   : > { %v3317_v47 = vpop.permute.xlu1 %3316 }
 0x3e0   : > { %v4796_v42 = vrot.slane %v4711_v21, 4  ;;  %v4343_v63 = vcombine.low %v3315_v18, %v3317_v47 }
 0x3e1   : > { %v3319_v37 = vpop.permute.xlu0 %3318 }
 0x3e2   : > { %v4797_v2 = vsel %vm364_vm0, %v4795_v51, %v4796_v42  ;;  %4908 = vst.msk [vmem:[#allocation2 + $0x130] sm:$0xf] %vm4871_vm3, %v4796_v42  ;;  %v4357_v11 = vrot.slane %v4343_v63, %v14904_v27 }
 0x3e3   : > { %4907 = vst.msk [vmem:[#allocation2 + $0x128] sm:$0xff] %vm4869_vm5, %v4797_v2  ;;  %v3321_v12 = vpop.permute.xlu1 %3320 }
 0x3e4   : > { %v4359_v24 = vcombine.low %v3319_v37, %v3321_v12  ;;  %v4358_v13 = vcombine.low %v4350_v1, %v4357_v11 }
 0x3e5   : > { %v3323_v8 = vpop.permute.xlu0 %3322 }
 0x3e6   : > { %v4367_v15 = vrot.slane %v4359_v24, %v14904_v27 }
 0x3e7   : > { %v3325_v43 = vpop.permute.xlu1 %3324 }
 0x3e8   : > { %v4360_v0 = vcombine.low %v3323_v8, %v3325_v43 }
 0x3e9   : > { %v3327_v5 = vpop.permute.xlu0 %3326 }
 0x3ea   : > { %v4374_v22 = vrot.slane %v4360_v0, %v14904_v27 }
 0x3eb   : > { %v3329_v10 = vpop.permute.xlu1 %3328 }
 0x3ec   : > { %v4375_v57 = vcombine.low %v4367_v15, %v4374_v22  ;;  %v4376_v4 = vcombine.low %v3327_v5, %v3329_v10 }
 0x3ed   : > { %v3331_v17 = vpop.permute.xlu0 %3330 }
 0x3ee   : > { %v4714_v45 = vpack.c.bf16 %v4375_v57, %v4358_v13  ;;  %v4384_v25 = vrot.slane %v4376_v4, %v14904_v27  ;;  %v14220_v57 = vmov (!%p12206_p7), 0  }
 0x3ef   : > { %v3333_v14 = vpop.permute.xlu1 %3332  ;;  %4964 = vst.msk [vmem:[#allocation2] sm:$0xff] (!%p12206_p7), %vm4869_vm5, %v14220_v57  ;;  %4965 = vst.msk [vmem:[#allocation2 + $0x8] sm:$0xff] (!%p12206_p7), %vm4869_vm5, %v14220_v57 }
 0x3f0   : > { %v4801_v33 = vrot.slane %v4714_v45, 4  ;;  %v4377_v3 = vcombine.low %v3331_v17, %v3333_v14  ;;  %4966 = vst.msk [vmem:[#allocation2 + $0x10] sm:$0xff] (!%p12206_p7), %vm4869_vm5, %v14220_v57 }
 0x3f1   : > { %v3335_v36 = vpop.permute.xlu0 %3334 }
 0x3f2   : > { %4912 = vst.msk [vmem:[#allocation2 + $0x150] sm:$0xf0] %vm4867_vm2, %v4801_v33  ;;  %v4391_v23 = vrot.slane %v4377_v3, %v14904_v27 }
 0x3f3   : > { %v3337_v30 = vpop.permute.xlu1 %3336 }
 0x3f4   : > { %v4393_v19 = vcombine.low %v3335_v36, %v3337_v30  ;;  %v4392_v38 = vcombine.low %v4384_v25, %v4391_v23 }
 0x3f5   : > { %v3339_v34 = vpop.permute.xlu0 %3338 }
 0x3f6   : > { %v4401_v32 = vrot.slane %v4393_v19, %v14904_v27 }
 0x3f7   : > { %v3341_v62 = vpop.permute.xlu1 %3340 }
 0x3f8   : > { %v4394_v53 = vcombine.low %v3339_v34, %v3341_v62 }
 0x3f9   : > { %v3343_v9 = vpop.permute.xlu0 %3342 }
 0x3fa   : > { %v4408_v41 = vrot.slane %v4394_v53, %v14904_v27 }
 0x3fb   : > { %v3345_v50 = vpop.permute.xlu1 %3344 }
 0x3fc   : > { %v4409_v60 = vcombine.low %v4401_v32, %v4408_v41  ;;  %v4478_v56 = vcombine.low %v3343_v9, %v3345_v50 }
 0x3fd   : > { %v3347_v20 = vpop.permute.xlu0 %3346 }
 0x3fe   : > { %v4715_v26 = vpack.c.bf16 %v4409_v60, %v4392_v38  ;;  %v4486_v58 = vrot.slane %v4478_v56, %v14904_v27 }
 0x3ff   : > { %v3349_v40 = vpop.permute.xlu1 %3348 }
 0x400   : > { %v4802_v46 = vrot.slane %v4715_v26, 4  ;;  %v4479_v54 = vcombine.low %v3347_v20, %v3349_v40 }
 0x401   : > { %v3351_v39 = vpop.permute.xlu0 %3350 }
 0x402   : > { %v4803_v51 = vsel %vm364_vm0, %v4801_v33, %v4802_v46  ;;  %4914 = vst.msk [vmem:[#allocation2 + $0x160] sm:$0xf] %vm4871_vm3, %v4802_v46  ;;  %v4493_v6 = vrot.slane %v4479_v54, %v14904_v27 }
 0x403   : > { %4913 = vst.msk [vmem:[#allocation2 + $0x158] sm:$0xff] %vm4869_vm5, %v4803_v51  ;;  %v3353_v52 = vpop.permute.xlu1 %3352 }
 0x404   : > { %v4495_v55 = vcombine.low %v3351_v39, %v3353_v52  ;;  %v4494_v28 = vcombine.low %v4486_v58, %v4493_v6 }
 0x405   : > { %v3355_v29 = vpop.permute.xlu0 %3354 }
 0x406   : > { %v4503_v48 = vrot.slane %v4495_v55, %v14904_v27 }
 0x407   : > { %v3357_v7 = vpop.permute.xlu1 %3356 }
 0x408   : > { %v4496_v61 = vcombine.low %v3355_v29, %v3357_v7 }
 0x409   : > { %v3359_v35 = vpop.permute.xlu0 %3358 }
 0x40a   : > { %v4510_v16 = vrot.slane %v4496_v61, %v14904_v27 }
 0x40b   : > { %v3361_v31 = vpop.permute.xlu1 %3360 }
 0x40c   : > { %v4511_v49 = vcombine.low %v4503_v48, %v4510_v16  ;;  %v4512_v12 = vcombine.low %v3359_v35, %v3361_v31 }
 0x40d   : > { %v3363_v59 = vpop.permute.xlu0 %3362 }
 0x40e   : > { %v4718_v18 = vpack.c.bf16 %v4511_v49, %v4494_v28  ;;  %v4520_v11 = vrot.slane %v4512_v12, %v14904_v27 }
 0x40f   : > { %v3365_v21 = vpop.permute.xlu1 %3364 }
 0x410   : > { %v4807_v47 = vrot.slane %v4718_v18, 4  ;;  %v4513_v2 = vcombine.low %v3363_v59, %v3365_v21 }
 0x411   : > { %v3367_v42 = vpop.permute.xlu0 %3366 }
 0x412   : > { %4918 = vst.msk [vmem:[#allocation2 + $0x180] sm:$0xf0] %vm4867_vm2, %v4807_v47  ;;  %v4527_v24 = vrot.slane %v4513_v2, %v14904_v27 }
 0x413   : > { %v3369_v37 = vpop.permute.xlu1 %3368 }
 0x414   : > { %v4529_v63 = vcombine.low %v3367_v42, %v3369_v37  ;;  %v4528_v1 = vcombine.low %v4520_v11, %v4527_v24 }
 0x415   : > { %v3371_v8 = vpop.permute.xlu0 %3370 }
 0x416   : > { %v4537_v0 = vrot.slane %v4529_v63, %v14904_v27 }
 0x417   : > { %v3373_v44 = vpop.permute.xlu1 %3372 }
 0x418   : > { %v4530_v43 = vcombine.low %v3371_v8, %v3373_v44 }
 0x41a   : > { %v4544_v5 = vrot.slane %v4530_v43, %v14904_v27 }
 0x41c   : > { %v4545_v15 = vcombine.low %v4537_v0, %v4544_v5 }
 0x41d   : > { %4963 = sbr.rel (%p12206_p7) target bundleno = 1060 (0x424), region = 44 }
 0x41e   : > { %v4719_v22 = vpack.c.bf16 %v4545_v15, %v4528_v1 }
 0x420   : > { %v4808_v10 = vrot.slane %v4719_v22, 4 }
 0x422   : > { %v4809_v13 = vsel %vm364_vm0, %v4807_v47, %v4808_v10  ;;  %4920 = vst.msk [vmem:[#allocation2 + $0x190] sm:$0xf] %vm4871_vm3, %v4808_v10 }
 0x423   : > { %4919 = vst.msk [vmem:[#allocation2 + $0x188] sm:$0xff] %vm4869_vm5, %v4809_v13 }
 0x424 PF: > { %p12207_p8 = scmp.ne.s32.totalorder %s14197_s18, 1 }
 0x425   : > { %v14221_v27 = vmov (!%p12207_p8), 0  }
 0x426   : > { %4970 = sbr.rel (%p12207_p8) target bundleno = 1069 (0x42d), region = 48  ;;  %4972 = vst.msk [vmem:[#allocation2 + $0x198] sm:$0xff] (!%p12207_p8), %vm4869_vm5, %v14221_v27  ;;  %4973 = vst.msk [vmem:[#allocation2 + $0x1a0] sm:$0xff] (!%p12207_p8), %vm4869_vm5, %v14221_v27 }
 0x427   : > { %4974 = vst.msk [vmem:[#allocation2 + $0x1a8] sm:$0xff] (!%p12207_p8), %vm4869_vm5, %v14221_v27 }
 0x42d PF: > { %vm5544_vm6 = vcmask 1041408   ;;  %v12340_v17 = vld [vmem:[%s18804_s3 + $0x8] sm:$0x3]  ;;  %v16968_v45 = vld [vmem:[#allocation2 + $0x98] sm:$0xff]  ;;  %v16970_v14 = vld [vmem:[#allocation2 + $0x90] sm:$0xf0] }
 0x42e   : > { %14017 = vmatprep.subr.msk.bf16.mxu1 %vm5544_vm6, %v12340_v17  ;;  %v16974_v33 = vsel %vm5544_vm6, %v12340_v17, 0  ;;  %v8314_v36 = vrot.slane %v16970_v14, 4  ;;  %v5447_v30 = vld [vmem:[%s18804_s3] sm:$0x3]  ;;  %v8315_v3 = vrot.slane %v16968_v45, 4  ;;  %v16987_v23 = vld [vmem:[#allocation2 + $0x8] sm:$0xff] }
 0x42f   : > { %13434 = vmatpush3.bf16.msra.mxu1 %v16974_v33  ;;  %14012 = vmatprep.subr.msk.bf16.mxu0 %vm5544_vm6, %v5447_v30  ;;  %v7324_v34 = vld [vmem:[#allocation2 + $0xa0] sm:$0xf]  ;;  %v5546_v4 = vsel %vm5544_vm6, %v5447_v30, 0  ;;  %v12373_v62 = vld [vmem:[%s18804_s3 + $0xa] sm:$0x3]  ;;  %v16994_v60 = vld [vmem:[#allocation2 + $0xb0] sm:$0xff] }
 0x430   : > { %v8317_v19 = vrot.slane %v7324_v34, 4  ;;  %12840 = vmatpush3.bf16.msra.mxu0 %v5546_v4  ;;  %v8316_v53 = vsel %vm364_vm0, %v8314_v36, %v8315_v3  ;;  %14018 = vmatprep.subr.msk.bf16.mxu1 %vm5544_vm6, %v12373_v62  ;;  %v9274_v9 = vsel %vm5544_vm6, %v12373_v62, 0  ;;  %v4982_v25 = vld [vmem:[#allocation2] sm:$0xf8]  ;;  %v4984_v38 = vld [vmem:[#allocation2 + $0x10] sm:$0xf] }
 0x431   : > { %13125 = vmatprep.mubr.msk.bf16.mxu1 %vm4869_vm5, %v8316_v53  ;;  %v5032_v41 = vshrl.u32 %v4982_v25, 16  ;;  %v5035_v50 = vshll.u32 %v4982_v25, 16  ;;  %v18998_v20 = vshrl.u32 %v16987_v23, 16  ;;  %v18997_v26 = vshll.u32 %v16987_v23, 16  ;;  %v8231_v39 = vld [vmem:[#allocation2 + $0xa8] sm:$0xf0] }
 0x432   : > { %v8318_v32 = vsel %vm364_vm0, %v8315_v3, %v8317_v19  ;;  %v5049_v40 = vshrl.u32 %v4984_v38, 16  ;;  %v5052_v46 = vshll.u32 %v4984_v38, 16  ;;  %v7327_v54 = vld [vmem:[#allocation2 + $0xb8] sm:$0xf]  ;;  %vm5030_vm7 = vsmask.f32 4352 }
 0x433   : > { %13126 = vmatmul.mubr.msk.bf16.vlgmr.msra.gmra.mrb[0].mxu1 %vm4869_vm5, %v8318_v32  ;;  %v5034_v51 = vrot.slane %v5032_v41, 3  ;;  %v5037_v52 = vrot.slane %v5035_v50, 4  ;;  %v5042_v29 = vrot.slane %v18998_v20, 3  ;;  %v5045_v56 = vrot.slane %v18997_v26, 4  ;;  %v4985_v6 = vld [vmem:[#allocation2 + $0x18] sm:$0xf8] }
 0x434   : > { %13170 = vmatpush3.bf16.msra.mxu1 %v9274_v9  ;;  %v5051_v55 = vrot.slane %v5049_v40, 3  ;;  %v5054_v7 = vrot.slane %v5052_v46, 4  ;;  %v8319_v35 = vrot.slane %v8231_v39, 4  ;;  %v8320_v58 = vrot.slane %v16994_v60, 4  ;;  %v17004_v48 = vld [vmem:[#allocation2 + $0x20] sm:$0xff]  ;;  %v17014_v24 = vld [vmem:[#allocation2 + $0xc8] sm:$0xff] }
 0x435   : > { %v5038_v61 = vor.u32 %v5037_v52, %v5034_v51  ;;  %v5046_v16 = vor.u32 %v5045_v56, %v5042_v29  ;;  %v4987_v28 = vld [vmem:[#allocation2 + $0x28] sm:$0xf]  ;;  %v8322_v59 = vrot.slane %v7327_v54, 4  ;;  %v5058_v18 = vshrl.u32 %v4985_v6, 16  ;;  %v8232_v2 = vld [vmem:[#allocation2 + $0xc0] sm:$0xf0] }
 0x436   : > { %v5055_v31 = vor.u32 %v5054_v7, %v5051_v55  ;;  %v8321_v49 = vsel %vm364_vm0, %v8319_v35, %v8320_v58  ;;  %v5061_v42 = vshll.u32 %v4985_v6, 16  ;;  %v5066_v37 = vshrl.u32 %v17004_v48, 16  ;;  %v7330_v5 = vld [vmem:[#allocation2 + $0xd0] sm:$0xf]  ;;  %v17023_v17 = vld [vmem:[#allocation2 + $0x38] sm:$0xff]  ;;  %v17037_v46 = vld [vmem:[#allocation2 + $0xe0] sm:$0xff] }
 0x437   : > { %v5047_v21 = vsel %vm5030_vm7, %v5038_v61, %v5046_v16  ;;  %13129 = vmatprep.mubr.msk.bf16.mxu1 %vm4869_vm5, %v8321_v49  ;;  %v8323_v12 = vsel %vm364_vm0, %v8320_v58, %v8322_v59  ;;  %v5060_v63 = vrot.slane %v5058_v18, 3  ;;  %v5069_v8 = vshll.u32 %v17004_v48, 16  ;;  %v4988_v10 = vld [vmem:[#allocation2 + $0x30] sm:$0xf8]  ;;  %v4990_v30 = vld [vmem:[#allocation2 + $0x40] sm:$0xf] }
 0x438   : > { %v5056_v47 = vsel %vm5030_vm7, %v5046_v16, %v5055_v31  ;;  %12841 = vmatprep.mubr.msk.bf16.mxu0 %vm4869_vm5, %v5047_v21  ;;  %v5075_v44 = vshrl.u32 %v4987_v28, 16  ;;  %v5063_v43 = vrot.slane %v5061_v42, 4  ;;  %v5068_v11 = vrot.slane %v5066_v37, 3  ;;  %v8233_v32 = vld [vmem:[#allocation2 + $0xd8] sm:$0xf0]  ;;  %v17045_v7 = vld [vmem:[#allocation2 + $0x50] sm:$0xff] }
 0x439   : > { %12842 = vmatmul.mubr.msk.bf16.vlgmr.msra.gmra.mrb[20].mxu0 %vm4869_vm5, %v5056_v47  ;;  %v5078_v0 = vshll.u32 %v4987_v28, 16  ;;  %v5071_v1 = vrot.slane %v5069_v8, 4  ;;  %v8324_v22 = vrot.slane %v8232_v2, 4  ;;  %v8325_v27 = vrot.slane %v17014_v24, 4  ;;  %v7333_v55 = vld [vmem:[#allocation2 + $0xe8] sm:$0xf] }
 0x43a   : > { %v5077_v15 = vrot.slane %v5075_v44, 3  ;;  %v5064_v13 = vor.u32 %v5063_v43, %v5060_v63  ;;  %v8327_v4 = vrot.slane %v7330_v5, 4  ;;  %v5084_v19 = vshrl.u32 %v4988_v10, 16  ;;  %v4991_v16 = vld [vmem:[#allocation2 + $0x48] sm:$0xf8] }
 0x43b   : > { %13130 = vmatmul.mubr.msk.bf16.gmra.mrb[4].mxu1 %vm4869_vm5, %v8323_v12  ;;  %v5080_v57 = vrot.slane %v5078_v0, 4  ;;  %v17025_v36 = vor.u32 %v5071_v1, %v5068_v11  ;;  %v8326_v34 = vsel %vm364_vm0, %v8324_v22, %v8325_v27  ;;  %v5087_v53 = vshll.u32 %v4988_v10, 16  ;;  %v17053_v31 = vld [vmem:[%s18804_s3 + $0x2] sm:$0x3]  ;;  %v4993_v28 = vld [vmem:[#allocation2 + $0x58] sm:$0xf] }
 0x43c   : > { %13133 = vmatprep.mubr.msk.bf16.mxu1 %vm4869_vm5, %v8326_v34  ;;  %v19014_v9 = vshrl.u32 %v17023_v17, 16  ;;  %v19013_v25 = vshll.u32 %v17023_v17, 16  ;;  %v8328_v50 = vsel %vm364_vm0, %v8325_v27, %v8327_v4  ;;  %v5086_v38 = vrot.slane %v5084_v19, 3  ;;  %14013 = vmatprep.subr.msk.bf16.mxu0 %vm5544_vm6, %v17053_v31  ;;  %v17067_v0 = vld [vmem:[#allocation2 + $0xf8] sm:$0xff]  ;;  %v8234_v5 = vld [vmem:[#allocation2 + $0xf0] sm:$0xf0] }
 0x43d   : > { %v5081_v3 = vor.u32 %v5080_v57, %v5077_v15  ;;  %v5073_v62 = vsel %vm5030_vm7, %v5064_v13, %v17025_v36  ;;  %v5101_v40 = vshrl.u32 %v4990_v30, 16  ;;  %v5089_v39 = vrot.slane %v5087_v53, 4  ;;  %v7336_v27 = vld [vmem:[#allocation2 + $0x100] sm:$0xf] }
 0x43e   : > { %12845 = vmatprep.mubr.msk.bf16.mxu0 %vm4869_vm5, %v5073_v62  ;;  %v5094_v51 = vrot.slane %v19014_v9, 3  ;;  %v5097_v52 = vrot.slane %v19013_v25, 4  ;;  %v5104_v54 = vshll.u32 %v4990_v30, 16  ;;  %v8329_v56 = vrot.slane %v8233_v32, 4  ;;  %v4994_v19 = vld [vmem:[#allocation2 + $0x60] sm:$0xf8] }
 0x43f   : > { %v5082_v41 = vsel %vm5030_vm7, %v17025_v36, %v5081_v3  ;;  %v5103_v29 = vrot.slane %v5101_v40, 3  ;;  %v5090_v6 = vor.u32 %v5089_v39, %v5086_v38  ;;  %v8330_v58 = vrot.slane %v17037_v46, 4  ;;  %v17078_v62 = vld [vmem:[#allocation2 + $0x68] sm:$0xff]  ;;  %v4996_v32 = vld [vmem:[#allocation2 + $0x70] sm:$0xf] }
 0x440   : > { %v17047_v61 = vor.u32 %v5097_v52, %v5094_v51  ;;  %v5106_v35 = vrot.slane %v5104_v54, 4  ;;  %v8332_v21 = vrot.slane %v7333_v55, 4  ;;  %v5110_v47 = vshrl.u32 %v4991_v16, 16  ;;  %v17089_v55 = vld [vmem:[#allocation2 + $0x110] sm:$0xff]  ;;  %v7348_v20 = vld [vmem:[#allocation2 + $0x160] sm:$0xf] }
 0x441   : > { %12846 = vmatmul.mubr.msk.bf16.gmra.mrb[24].mxu0 %vm4869_vm5, %v5082_v41  ;;  %v8331_v18 = vsel %vm364_vm0, %v8329_v56, %v8330_v58  ;;  %v5113_v42 = vshll.u32 %v4991_v16, 16  ;;  %v19012_v2 = vshrl.u32 %v17045_v7, 16  ;;  %v19011_v12 = vshll.u32 %v17045_v7, 16 }
 0x442   : > { %v5099_v49 = vsel %vm5030_vm7, %v5090_v6, %v17047_v61  ;;  %v5107_v59 = vor.u32 %v5106_v35, %v5103_v29  ;;  %v8333_v44 = vsel %vm364_vm0, %v8330_v58, %v8332_v21  ;;  %v5127_v43 = vshrl.u32 %v4993_v28, 16  ;;  %v8235_v6 = vld [vmem:[#allocation2 + $0x108] sm:$0xf0] }
 0x443   : > { %13134 = vmatmul.mubr.msk.bf16.gmra.mrb[8].mxu1 %vm4869_vm5, %v8328_v50  ;;  %12849 = vmatprep.mubr.msk.bf16.mxu0 %vm4869_vm5, %v5099_v49  ;;  %v5130_v11 = vshll.u32 %v4993_v28, 16  ;;  %v5112_v1 = vrot.slane %v5110_v47, 3  ;;  %v5115_v15 = vrot.slane %v5113_v42, 4  ;;  %v5120_v22 = vrot.slane %v19012_v2, 3  ;;  %v7339_v49 = vld [vmem:[#allocation2 + $0x118] sm:$0xf] }
 0x444   : > { %13137 = vmatprep.mubr.msk.bf16.mxu1 %vm4869_vm5, %v8331_v18  ;;  %v5108_v63 = vsel %vm5030_vm7, %v17047_v61, %v5107_v59  ;;  %v5123_v10 = vrot.slane %v19011_v12, 4  ;;  %v5129_v13 = vrot.slane %v5127_v43, 3  ;;  %v8334_v34 = vrot.slane %v8234_v5, 4  ;;  %v4997_v47 = vld [vmem:[#allocation2 + $0x78] sm:$0xf8]  ;;  %v17097_v43 = vld [vmem:[#allocation2 + $0x80] sm:$0xff] }
 0x445   : > { %v5132_v57 = vrot.slane %v5130_v11, 4  ;;  %v5116_v30 = vor.u32 %v5115_v15, %v5112_v1  ;;  %v8335_v4 = vrot.slane %v17067_v0, 4  ;;  %v8337_v38 = vrot.slane %v7336_v27, 4  ;;  %v4999_v1 = vld [vmem:[#allocation2 + $0x88] sm:$0xf] }
 0x446   : > { %v17075_v3 = vor.u32 %v5123_v10, %v5120_v22  ;;  %v5136_v40 = vshrl.u32 %v4994_v19, 16  ;;  %v5139_v39 = vshll.u32 %v4994_v19, 16  ;;  %v19010_v51 = vshrl.u32 %v17078_v62, 16 }
 0x447   : > { %v5133_v53 = vor.u32 %v5132_v57, %v5129_v13  ;;  %v8336_v50 = vsel %vm364_vm0, %v8334_v34, %v8335_v4  ;;  %v19009_v54 = vshll.u32 %v17078_v62, 16  ;;  %v5153_v29 = vshrl.u32 %v4996_v32, 16 }
 0x448   : > { %v5125_v41 = vsel %vm5030_vm7, %v5116_v30, %v17075_v3  ;;  %v5156_v56 = vshll.u32 %v4996_v32, 16  ;;  %v8338_v35 = vsel %vm364_vm0, %v8335_v4, %v8337_v38  ;;  %v5138_v58 = vrot.slane %v5136_v40, 3  ;;  %v8236_v4 = vld [vmem:[#allocation2 + $0x120] sm:$0xf0] }
 0x449   : > { %12850 = vmatmul.mubr.msk.bf16.gmra.mrb[28].mxu0 %vm4869_vm5, %v5108_v63  ;;  %v5134_v52 = vsel %vm5030_vm7, %v17075_v3, %v5133_v53  ;;  %v5141_v16 = vrot.slane %v5139_v39, 4  ;;  %v5146_v28 = vrot.slane %v19010_v51, 3  ;;  %v5149_v59 = vrot.slane %v19009_v54, 4  ;;  %v5012_v54 = vld [vmem:[#allocation2 + $0xf0] sm:$0xf8] }
 0x44a   : > { %12853 = vmatprep.mubr.msk.bf16.mxu0 %vm4869_vm5, %v5125_v41  ;;  %v5155_v18 = vrot.slane %v5153_v29, 3  ;;  %v5158_v21 = vrot.slane %v5156_v56, 4  ;;  %v8339_v63 = vrot.slane %v8235_v6, 4  ;;  %v19004_v11 = vshrl.u32 %v16968_v45, 16  ;;  %v17112_v41 = vld [vmem:[#allocation2 + $0x128] sm:$0xff] }
 0x44b   : > { %13138 = vmatmul.mubr.msk.bf16.gmra.mrb[12].mxu1 %vm4869_vm5, %v8333_v44  ;;  %v5142_v42 = vor.u32 %v5141_v16, %v5138_v58  ;;  %v8340_v44 = vrot.slane %v17089_v55, 4  ;;  %v17102_v5 = vor.u32 %v5149_v59, %v5146_v28  ;;  %v8342_v10 = vrot.slane %v7339_v49, 4  ;;  %v7342_v58 = vld [vmem:[#allocation2 + $0x130] sm:$0xf] }
 0x44c   : > { %13141 = vmatprep.mubr.msk.bf16.mxu1 %vm4869_vm5, %v8336_v50  ;;  %v5159_v15 = vor.u32 %v5158_v21, %v5155_v18  ;;  %v5162_v13 = vshrl.u32 %v4997_v47, 16  ;;  %v19003_v57 = vshll.u32 %v16968_v45, 16  ;;  %v5165_v30 = vshll.u32 %v4997_v47, 16  ;;  %v17117_v50 = vld [vmem:[%s18804_s3 + $0xc] sm:$0x3] }
 0x44d   : > { %v8341_v22 = vsel %vm364_vm0, %v8339_v63, %v8340_v44  ;;  %v5151_v27 = vsel %vm5030_vm7, %v5142_v42, %v17102_v5  ;;  %v19008_v34 = vshrl.u32 %v17097_v43, 16  ;;  %v19007_v53 = vshll.u32 %v17097_v43, 16  ;;  %14019 = vmatprep.subr.msk.bf16.mxu1 %vm5544_vm6, %v17117_v50  ;;  %v5002_v21 = vld [vmem:[#allocation2 + $0xa0] sm:$0xf] }
 0x44e   : > { %v5164_v19 = vrot.slane %v5162_v13, 3  ;;  %v5179_v32 = vshrl.u32 %v4999_v1, 16  ;;  %v5167_v38 = vrot.slane %v5165_v30, 4  ;;  %v5182_v39 = vshll.u32 %v4999_v1, 16 }
 0x44f   : > { %v5172_v40 = vrot.slane %v19008_v34, 3  ;;  %v5160_v29 = vsel %vm5030_vm7, %v17102_v5, %v5159_v15  ;;  %v8343_v56 = vsel %vm364_vm0, %v8340_v44, %v8342_v10  ;;  %v5175_v6 = vrot.slane %v19007_v53, 4  ;;  %v17141_v10 = vld [vmem:[#allocation2 + $0x138] sm:$0xf0] }
 0x450   : > { %v5168_v16 = vor.u32 %v5167_v38, %v5164_v19  ;;  %v5184_v28 = vrot.slane %v5182_v39, 4  ;;  %v8344_v49 = vrot.slane %v8236_v4, 4  ;;  %v8345_v59 = vrot.slane %v17112_v41, 4  ;;  %v17147_v4 = vld [vmem:[#allocation2 + $0x140] sm:$0xff] }
 0x451   : > { %12854 = vmatmul.mubr.msk.bf16.gmra.mrb[32].mxu0 %vm4869_vm5, %v5134_v52  ;;  %v6144_v52 = vsel %vm5544_vm6, %v17053_v31, 0  ;;  %v5000_v31 = vld [vmem:[#allocation2 + $0x90] sm:$0xf8]  ;;  %v17131_v18 = vor.u32 %v5175_v6, %v5172_v40  ;;  %v8347_v63 = vrot.slane %v7342_v58, 4  ;;  %v19002_v13 = vshrl.u32 %v16994_v60, 16 }
 0x452   : > { %12857 = vmatprep.mubr.msk.bf16.mxu0 %vm4869_vm5, %v5151_v27  ;;  %12906 = vmatpush3.bf16.msra.mxu0 %v6144_v52  ;;  %v8346_v42 = vsel %vm364_vm0, %v8344_v49, %v8345_v59  ;;  %v5188_v1 = vshrl.u32 %v5000_v31, 16  ;;  %v5191_v15 = vshll.u32 %v5000_v31, 16  ;;  %v5201_v27 = vrot.slane %v19003_v57, 4  ;;  %v5003_v6 = vld [vmem:[#allocation2 + $0xa8] sm:$0xf8] }
 0x453   : > { %13142 = vmatmul.mubr.msk.bf16.gmra.mrb[16].mxu1 %vm4869_vm5, %v8338_v35  ;;  %v5181_v35 = vrot.slane %v5179_v32, 3  ;;  %v5177_v44 = vsel %vm5030_vm7, %v5168_v16, %v17131_v18  ;;  %v5205_v30 = vshrl.u32 %v5002_v21, 16  ;;  %v18999_v19 = vshll.u32 %v16994_v60, 16  ;;  %v7345_v49 = vld [vmem:[#allocation2 + $0x148] sm:$0xf] }
 0x454   : > { %13145 = vmatprep.mubr.msk.bf16.mxu1 %vm4869_vm5, %v8341_v22  ;;  %v5198_v22 = vrot.slane %v19004_v11, 3  ;;  %v5190_v32 = vrot.slane %v5188_v1, 3  ;;  %v5193_v38 = vrot.slane %v5191_v15, 4  ;;  %v5208_v40 = vshll.u32 %v5002_v21, 16  ;;  %v5005_v31 = vld [vmem:[#allocation2 + $0xb8] sm:$0xf] }
 0x455   : > { %v5185_v47 = vor.u32 %v5184_v28, %v5181_v35  ;;  %v8348_v52 = vsel %vm364_vm0, %v8345_v59, %v8347_v63  ;;  %v5207_v58 = vrot.slane %v5205_v30, 3  ;;  %v8350_v28 = vrot.slane %v17147_v4, 4 }
 0x456   : > { %v5194_v35 = vor.u32 %v5193_v38, %v5190_v32  ;;  %v5210_v16 = vrot.slane %v5208_v40, 4  ;;  %v8352_v59 = vrot.slane %v7345_v49, 4  ;;  %v5217_v63 = vshll.u32 %v5003_v6, 16 }
 0x457   : > { %v5186_v39 = vsel %vm5030_vm7, %v17131_v18, %v5185_v47  ;;  %v5214_v47 = vshrl.u32 %v5003_v6, 16  ;;  %v5224_v1 = vrot.slane %v19002_v13, 3  ;;  %v5227_v15 = vrot.slane %v18999_v19, 4  ;;  %v17189_v19 = vld [vmem:[#allocation2 + $0x170] sm:$0xff]  ;;  %v5009_v13 = vld [vmem:[#allocation2 + $0xd8] sm:$0xf8] }
 0x458   : > { %v5231_v32 = vshrl.u32 %v5005_v31, 16  ;;  %v5234_v38 = vshll.u32 %v5005_v31, 16  ;;  %v19000_v40 = vshrl.u32 %v17014_v24, 16  ;;  %v8353_v31 = vsel %vm364_vm0, %v8350_v28, %v8352_v59 }
 0x459   : > { %12858 = vmatmul.mubr.msk.bf16.gmra.mrb[36].mxu0 %vm4869_vm5, %v5160_v29  ;;  %v17153_v29 = vor.u32 %v5201_v27, %v5198_v22  ;;  %v17168_v22 = vld [vmem:[#allocation2 + $0x150] sm:$0xf0]  ;;  %v5211_v27 = vor.u32 %v5210_v16, %v5207_v58  ;;  %v5216_v30 = vrot.slane %v5214_v47, 3  ;;  %v5008_v16 = vld [vmem:[#allocation2 + $0xd0] sm:$0xf]  ;;  %v8357_v59 = vrot.slane %v7348_v20, 4 }
 0x45a   : > { %12861 = vmatprep.mubr.msk.bf16.mxu0 %vm4869_vm5, %v5177_v44  ;;  %v17160_v44 = vld [vmem:[#allocation2 + $0x158] sm:$0xff]  ;;  %v5233_v6 = vrot.slane %v5231_v32, 3  ;;  %v8354_v49 = vrot.slane %v17168_v22, 4  ;;  %v5250_v32 = vrot.slane %v19000_v40, 3  ;;  %v19005_v40 = vshll.u32 %v17037_v46, 16 }
 0x45b   : > { %13146 = vmatmul.mubr.msk.bf16.gmra.mrb[20].mxu1 %vm4869_vm5, %v8343_v56  ;;  %19479 = vst [vmem:[#allocation95_spill] sm:$0xff] %v17153_v29  ;;  %v8349_v56 = vrot.slane %v17141_v10, 4  ;;  %v5203_v21 = vsel %vm5030_vm7, %v5194_v35, %v17153_v29  ;;  %v5236_v35 = vrot.slane %v5234_v38, 4  ;;  %v8355_v26 = vrot.slane %v17160_v44, 4 }
 0x45c   : > { %13149 = vmatprep.mubr.msk.bf16.mxu1 %vm4869_vm5, %v8346_v42  ;;  %v19006_v38 = vshrl.u32 %v17037_v46, 16  ;;  %v8360_v20 = vrot.slane %v17189_v19, 4  ;;  %v5292_v25 = vshrl.u32 %v5012_v54, 16  ;;  %v5295_v9 = vshll.u32 %v5012_v54, 16 }
 0x45d   : > { %v8351_v42 = vsel %vm364_vm0, %v8349_v56, %v8350_v28  ;;  %v17174_v56 = vor.u32 %v5227_v15, %v5224_v1  ;;  %v8356_v47 = vsel %vm364_vm0, %v8354_v49, %v8355_v26  ;;  %v17191_v28 = vld [vmem:[#allocation2 + $0x168] sm:$0xf0]  ;;  %vm6515_vm8 = vsmask.f32 3328 }
 0x45f   : > { %19480 = vst [vmem:[#allocation97_spill] sm:$0xff] %v17174_v56 }
 0x461   : > { %12862 = vmatmul.mubr.msk.bf16.gmra.mrb[40].mxu0 %vm4869_vm5, %v5186_v39  ;;  %v19001_v39 = vshll.u32 %v17014_v24, 16 }
 0x462   : > { %12865 = vmatprep.mubr.msk.bf16.mxu0 %vm4869_vm5, %v5203_v21  ;;  %v5006_v21 = vld [vmem:[#allocation2 + $0xc0] sm:$0xf8] }
 0x463   : > { %13150 = vmatmul.mubr.msk.bf16.gmra.mrb[24].mxu1 %vm4869_vm5, %v8348_v52  ;;  %v5219_v52 = vrot.slane %v5217_v63, 4  ;;  %v5240_v1 = vshrl.u32 %v5006_v21, 16  ;;  %v5243_v15 = vshll.u32 %v5006_v21, 16 }
 0x464   : > { %13153 = vmatprep.mubr.msk.bf16.mxu1 %vm4869_vm5, %v8351_v42  ;;  %v5212_v42 = vsel %vm5030_vm7, %v17153_v29, %v5211_v27  ;;  %v5257_v27 = vshrl.u32 %v5008_v16, 16 }
 0x465   : > { %v5220_v58 = vor.u32 %v5219_v52, %v5216_v30  ;;  %v5237_v30 = vor.u32 %v5236_v35, %v5233_v6  ;;  %v5253_v52 = vrot.slane %v19001_v39, 4  ;;  %v5242_v49 = vrot.slane %v5240_v1, 3  ;;  %v7351_v39 = vld [vmem:[#allocation2 + $0x178] sm:$0xf] }
 0x466   : > { %v5245_v21 = vrot.slane %v5243_v15, 4  ;;  %v5259_v35 = vrot.slane %v5257_v27, 3  ;;  %v8358_v1 = vsel %vm364_vm0, %v8355_v26, %v8357_v59  ;;  %v5266_v15 = vshrl.u32 %v5009_v13, 16  ;;  %v17218_v26 = vld [vmem:[#allocation2 + $0x180] sm:$0xf0] }
 0x467   : > { %v5229_v63 = vsel %vm5030_vm7, %v5220_v58, %v17174_v56  ;;  %v5260_v58 = vshll.u32 %v5008_v16, 16  ;;  %v17198_v6 = vor.u32 %v5253_v52, %v5250_v32  ;;  %v5238_v16 = vsel %vm5030_vm7, %v17174_v56, %v5237_v30  ;;  %v17210_v32 = vld [vmem:[%s18804_s3 + $0x4] sm:$0x3] }
 0x468   : > { %v5246_v57 = vor.u32 %v5245_v21, %v5242_v49  ;;  %v5269_v27 = vshll.u32 %v5009_v13, 16  ;;  %v5276_v49 = vrot.slane %v19006_v38, 3  ;;  %v5279_v30 = vrot.slane %v19005_v40, 4  ;;  %v17216_v21 = vld [vmem:[#allocation2 + $0x188] sm:$0xff]  ;;  %14014 = vmatprep.subr.msk.bf16.mxu0 %vm5544_vm6, %v17210_v32 }
 0x469   : > { %12866 = vmatmul.mubr.msk.bf16.gmra.mrb[44].mxu0 %vm4869_vm5, %v5212_v42  ;;  %19481 = vst [vmem:[#allocation101_spill] sm:$0xff] %v17198_v6  ;;  %v5262_v11 = vrot.slane %v5260_v58, 4  ;;  %v8359_v42 = vrot.slane %v17191_v28, 4  ;;  %19482 = vst [vmem:[#allocation98_spill] sm:$0xff] %v17216_v21  ;;  %v19016_v13 = vshll.u32 %v17067_v0, 16  ;;  %v8364_v53 = vrot.slane %v17218_v26, 4 }
 0x46a   : > { %12869 = vmatprep.mubr.msk.bf16.mxu0 %vm4869_vm5, %v5229_v63  ;;  %v8362_v63 = vrot.slane %v7351_v39, 4  ;;  %v5268_v39 = vrot.slane %v5266_v15, 3  ;;  %v8365_v34 = vrot.slane %v17216_v21, 4 }
 0x46b   : > { %13154 = vmatmul.mubr.msk.bf16.gmra.mrb[28].mxu1 %vm4869_vm5, %v8353_v31  ;;  %v5011_v31 = vld [vmem:[#allocation2 + $0xe8] sm:$0xf]  ;;  %v5263_v52 = vor.u32 %v5262_v11, %v5259_v35  ;;  %v19015_v11 = vshrl.u32 %v17067_v0, 16  ;;  %v5271_v35 = vrot.slane %v5269_v27, 4  ;;  %v17233_v27 = vor.u32 %v5279_v30, %v5276_v49 }
 0x46c   : > { %13157 = vmatprep.mubr.msk.bf16.mxu1 %vm4869_vm5, %v8356_v47  ;;  %v5255_v47 = vsel %vm5030_vm7, %v5246_v57, %v17198_v6  ;;  %v8361_v57 = vsel %vm364_vm0, %v8359_v42, %v8360_v20  ;;  %v5283_v59 = vshrl.u32 %v5011_v31, 16  ;;  %v5286_v58 = vshll.u32 %v5011_v31, 16 }
 0x46d   : > { %v19017_v42 = vshrl.u32 %v17089_v55, 16  ;;  %v5272_v15 = vor.u32 %v5271_v35, %v5268_v39  ;;  %19483 = vst [vmem:[#allocation100_spill] sm:$0xff] %v17233_v27  ;;  %v5264_v51 = vsel %vm5030_vm7, %v17198_v6, %v5263_v52  ;;  %v8363_v12 = vsel %vm364_vm0, %v8360_v20, %v8362_v63 }
 0x46e   : > { %v5285_v40 = vrot.slane %v5283_v59, 3  ;;  %v5288_v38 = vrot.slane %v5286_v58, 4  ;;  %v8366_v49 = vsel %vm364_vm0, %v8364_v53, %v8365_v34  ;;  %v5305_v39 = vrot.slane %v19016_v13, 4 }
 0x46f   : > { %v5281_v58 = vsel %vm5030_vm7, %v5272_v15, %v17233_v27  ;;  %v5294_v52 = vrot.slane %v5292_v25, 3  ;;  %v5297_v59 = vrot.slane %v5295_v9, 4  ;;  %v8848_v13 = vrot.slane %v5069_v8, 5  ;;  %v5015_v15 = vld [vmem:[#allocation2 + $0x108] sm:$0xf8] }
 0x470   : > { %v5289_v2 = vor.u32 %v5288_v38, %v5285_v40  ;;  %v8823_v40 = vld [vmem:[#allocation2 + $0x28] sm:$0x1f]  ;;  %v5017_v8 = vld [vmem:[#allocation2 + $0x118] sm:$0xf] }
 0x471   : > { %12870 = vmatmul.mubr.msk.bf16.gmra.mrb[48].mxu0 %vm4869_vm5, %v5238_v16  ;;  %v7354_v16 = vld [vmem:[#allocation2 + $0x190] sm:$0xf]  ;;  %v5298_v31 = vor.u32 %v5297_v59, %v5294_v52  ;;  %v5321_v52 = vshll.u32 %v5015_v15, 16 }
 0x472   : > { %12873 = vmatprep.mubr.msk.bf16.mxu0 %vm4869_vm5, %v5255_v47  ;;  %v5302_v47 = vrot.slane %v19015_v11, 3  ;;  %v8367_v30 = vrot.slane %v7354_v16, 4  ;;  %v8847_v16 = vrot.slane %v5066_v37, 4  ;;  %v5290_v37 = vsel %vm5030_vm7, %v17233_v27, %v5289_v2 }
 0x473   : > { %13158 = vmatmul.mubr.msk.bf16.gmra.mrb[32].mxu1 %vm4869_vm5, %v8358_v1  ;;  %v5014_v1 = vld [vmem:[#allocation2 + $0x100] sm:$0xf] }
 0x474   : > { %13161 = vmatprep.mubr.msk.bf16.mxu1 %vm4869_vm5, %v8361_v57  ;;  %v8225_v57 = vld [vmem:[#allocation2 + $0x18] sm:$0xf0]  ;;  %v5309_v35 = vshrl.u32 %v5014_v1, 16  ;;  %v5312_v20 = vshll.u32 %v5014_v1, 16  ;;  %v17247_v38 = vor.u32 %v5305_v39, %v5302_v47  ;;  %v8852_v1 = vshrl.u32 %v8823_v40, 16 }
 0x475   : > { %v8840_v63 = vshrl.u32 %v8225_v57, 16  ;;  %v8843_v11 = vshll.u32 %v8225_v57, 16  ;;  %v8855_v47 = vshll.u32 %v8823_v40, 16  ;;  %v17265_v48 = vor.u32 %v8848_v13, %v8847_v16  ;;  %v8824_v16 = vld [vmem:[#allocation2 + $0x40] sm:$0x1f] }
 0x476   : > { %19484 = vst [vmem:[#allocation96_spill] sm:$0xff] %v17247_v38  ;;  %v17249_v54 = vrot.slane %v5309_v35, 3  ;;  %v17251_v53 = vrot.slane %v5312_v20, 4  ;;  %v8226_v35 = vld [vmem:[#allocation2 + $0x30] sm:$0xf0]  ;;  %v5328_v20 = vrot.slane %v19017_v42, 3  ;;  %v8368_v2 = vsel %vm364_vm0, %v8365_v34, %v8367_v30 }
 0x477   : > { %v8842_v9 = vrot.slane %v8840_v63, 4  ;;  %v8845_v25 = vrot.slane %v8843_v11, 5  ;;  %v8857_v39 = vrot.slane %v8855_v47, 5  ;;  %v5318_v11 = vshrl.u32 %v5015_v15, 16  ;;  %v5018_v47 = vld [vmem:[#allocation2 + $0x120] sm:$0xf8] }
 0x478   : > { %v5307_v13 = vsel %vm5030_vm7, %v5298_v31, %v17247_v38  ;;  %v8861_v15 = vshrl.u32 %v8226_v35, 16  ;;  %v19486_v34 = vshrl.u32 %v17023_v17, 16 }
 0x479   : > { %12874 = vmatmul.mubr.msk.bf16.gmra.mrb[52].mxu0 %vm4869_vm5, %v5264_v51  ;;  %v8846_v51 = vor.u32 %v8845_v25, %v8842_v9  ;;  %v5320_v63 = vrot.slane %v5318_v11, 3  ;;  %v5323_v9 = vrot.slane %v5321_v52, 4  ;;  %v5335_v25 = vshrl.u32 %v5017_v8, 16 }
 0x47a   : > { %12877 = vmatprep.mubr.msk.bf16.mxu0 %vm4869_vm5, %v5281_v58  ;;  %v19485_v58 = vshll.u32 %v17089_v55, 16  ;;  %v8868_v30 = vrot.slane %v19486_v34, 4  ;;  %v8863_v27 = vrot.slane %v8861_v15, 4  ;;  %v8873_v11 = vshrl.u32 %v8824_v16, 16  ;;  %v8227_v15 = vld [vmem:[#allocation2 + $0x48] sm:$0xf0] }
 0x47b   : > { %13162 = vmatmul.mubr.msk.bf16.gmra.mrb[36].mxu1 %vm4869_vm5, %v8363_v12  ;;  %v8854_v12 = vrot.slane %v8852_v1, 4  ;;  %v5338_v1 = vshll.u32 %v5017_v8, 16  ;;  %v8850_v42 = vsel %vm6515_vm8, %v8846_v51, %v17265_v48  ;;  %v5324_v57 = vor.u32 %v5323_v9, %v5320_v63 }
 0x47c   : > { %13165 = vmatprep.mubr.msk.bf16.mxu1 %vm4869_vm5, %v8366_v49  ;;  %v5331_v40 = vrot.slane %v19485_v58, 4  ;;  %v5315_v49 = vor.u32 %v17251_v53, %v17249_v54  ;;  %v8864_v58 = vshll.u32 %v8226_v35, 16  ;;  %v19488_v54 = vshll.u32 %v17023_v17, 16 }
 0x47d   : > { %v8858_v59 = vor.u32 %v8857_v39, %v8854_v12  ;;  %v8876_v52 = vshll.u32 %v8824_v16, 16  ;;  %v5344_v51 = vshrl.u32 %v5018_v47, 16  ;;  %v5337_v12 = vrot.slane %v5335_v25, 3 }
 0x47e   : > { %v17280_v31 = vor.u32 %v5331_v40, %v5328_v20  ;;  %v8869_v53 = vrot.slane %v19488_v54, 5  ;;  %v8866_v8 = vrot.slane %v8864_v58, 5  ;;  %v5340_v39 = vrot.slane %v5338_v1, 4  ;;  %v5020_v40 = vld [vmem:[#allocation2 + $0x130] sm:$0xf] }
 0x47f   : > { %v5347_v20 = vshll.u32 %v5018_v47, 16  ;;  %v8875_v63 = vrot.slane %v8873_v11, 4  ;;  %v8878_v9 = vrot.slane %v8876_v52, 5  ;;  %v19489_v58 = vshrl.u32 %v17112_v41, 16  ;;  %v5021_v11 = vld [vmem:[#allocation2 + $0x138] sm:$0xf8] }
 0x480   : > { %19487 = vst [vmem:[#allocation99_spill] sm:$0xff] %v17280_v31  ;;  %v17288_v35 = vor.u32 %v8869_v53, %v8868_v30  ;;  %v8867_v17 = vor.u32 %v8866_v8, %v8863_v27  ;;  %v5316_v1 = vsel %vm5030_vm7, %v17247_v38, %v5315_v49  ;;  %v8859_v27 = vsel %vm6515_vm8, %v17265_v48, %v8858_v59  ;;  %v8825_v30 = vld [vmem:[#allocation2 + $0x58] sm:$0x1f] }
 0x481   : > { %12878 = vmatmul.mubr.msk.bf16.gmra.mrb[56].mxu0 %vm4869_vm5, %v5290_v37  ;;  %v5346_v37 = vrot.slane %v5344_v51, 3  ;;  %v5349_v16 = vrot.slane %v5347_v20, 4  ;;  %v5333_v47 = vsel %vm5030_vm7, %v5324_v57, %v17280_v31  ;;  %v5361_v34 = vshrl.u32 %v5020_v40, 16 }
 0x482   : > { %12881 = vmatprep.mubr.msk.bf16.mxu0 %vm4869_vm5, %v5307_v13  ;;  %v5354_v13 = vrot.slane %v19489_v58, 3  ;;  %v5341_v54 = vor.u32 %v5340_v39, %v5337_v12  ;;  %v8882_v53 = vshrl.u32 %v8227_v15, 16  ;;  %v8885_v8 = vshll.u32 %v8227_v15, 16 }
 0x483   : > { %13166 = vmatmul.mubr.msk.bf16.gmra.mrb[40].mxu1 %vm4869_vm5, %v8368_v2  ;;  %v10193_v2 = vsel %vm5544_vm6, %v17117_v50, 0  ;;  %v5364_v50 = vshll.u32 %v5020_v40, 16  ;;  %v8871_v52 = vsel %vm6515_vm8, %v8867_v17, %v17288_v35  ;;  %v8879_v51 = vor.u32 %v8878_v9, %v8875_v63  ;;  %v17315_v63 = vld [vmem:[%s18804_s3 + $0xe] sm:$0x3] }
 0x484   : > { %13171 = vmatprep.mubr.msk.bf16.mxu1 %vm4869_vm5, %v8850_v42  ;;  %v19490_v42 = vshll.u32 %v17112_v41, 16  ;;  %v5350_v20 = vor.u32 %v5349_v16, %v5346_v37  ;;  %v19491_v49 = vshrl.u32 %v17045_v7, 16  ;;  %v8884_v59 = vrot.slane %v8882_v53, 4  ;;  %v8228_v16 = vld [vmem:[#allocation2 + $0x60] sm:$0xf0] }
 0x485   : > { %v8887_v38 = vrot.slane %v8885_v8, 5  ;;  %v19493_v57 = vshll.u32 %v17045_v7, 16  ;;  %v5363_v12 = vrot.slane %v5361_v34, 3  ;;  %v8894_v39 = vshrl.u32 %v8825_v30, 16 }
 0x486   : > { %v5357_v25 = vrot.slane %v19490_v42, 4  ;;  %v8889_v58 = vrot.slane %v19491_v49, 4  ;;  %v8897_v40 = vshll.u32 %v8825_v30, 16  ;;  %v5370_v17 = vshrl.u32 %v5021_v11, 16 }
 0x487   : > { %v8890_v6 = vrot.slane %v19493_v57, 5  ;;  %v5366_v9 = vrot.slane %v5364_v50, 4  ;;  %v8888_v37 = vor.u32 %v8887_v38, %v8884_v59  ;;  %v5373_v15 = vshll.u32 %v5021_v11, 16  ;;  %v8826_v11 = vld [vmem:[#allocation2 + $0x70] sm:$0x1f] }
 0x488   : > { %v17306_v42 = vor.u32 %v5357_v25, %v5354_v13  ;;  %v5342_v13 = vsel %vm5030_vm7, %v17280_v31, %v5341_v54  ;;  %v8896_v25 = vrot.slane %v8894_v39, 4  ;;  %v8880_v50 = vsel %vm6515_vm8, %v17288_v35, %v8879_v51 }
 0x489   : > { %12882 = vmatmul.mubr.msk.bf16.gmra.mrb[60].mxu0 %vm4869_vm5, %v5316_v1  ;;  %v17318_v7 = vor.u32 %v8890_v6, %v8889_v58  ;;  %v8899_v1 = vrot.slane %v8897_v40, 5  ;;  %v5375_v34 = vrot.slane %v5373_v15, 4  ;;  %v19495_v6 = vshll.u32 %v17147_v4, 16 }
 0x48a   : > { %19492 = vst [vmem:[#allocation30_spill] sm:$0xff] %v17306_v42  ;;  %12885 = vmatprep.mubr.msk.bf16.mxu0 %vm4869_vm5, %v5333_v47  ;;  %v19494_v47 = vshrl.u32 %v17147_v4, 16  ;;  %v5359_v54 = vsel %vm5030_vm7, %v5350_v20, %v17306_v42  ;;  %v8903_v53 = vshrl.u32 %v8228_v16, 16  ;;  %v8906_v8 = vshll.u32 %v8228_v16, 16 }
 0x48b   : > { %13172 = vmatmul.mubr.msk.bf16.vlgmr.msra.gmra.mrb[44].mxu1 %vm4869_vm5, %v8859_v27  ;;  %v5023_v27 = vld [vmem:[#allocation2 + $0x148] sm:$0xf]  ;;  %v5383_v30 = vrot.slane %v19495_v6, 4  ;;  %v8892_v49 = vsel %vm6515_vm8, %v8888_v37, %v17318_v7  ;;  %v19496_v59 = vshrl.u32 %v17078_v62, 16  ;;  %v8900_v39 = vor.u32 %v8899_v1, %v8896_v25 }
 0x48c   : > { %13236 = vmatpush3.bf16.msra.mxu1 %v10193_v2  ;;  %13175 = vmatprep.mubr.msk.bf16.mxu1 %vm4869_vm5, %v8871_v52  ;;  %v5372_v2 = vrot.slane %v5370_v17, 3  ;;  %v5380_v38 = vrot.slane %v19494_v47, 3  ;;  %v5367_v52 = vor.u32 %v5366_v9, %v5363_v12  ;;  %v5387_v58 = vshrl.u32 %v5023_v27, 16  ;;  %v5024_v47 = vld [vmem:[#allocation2 + $0x150] sm:$0xf8] }
 0x48d   : > { %14020 = vmatprep.subr.msk.bf16.mxu1 %vm5544_vm6, %v17315_v63  ;;  %v8910_v57 = vrot.slane %v19496_v59, 4  ;;  %v5390_v40 = vshll.u32 %v5023_v27, 16  ;;  %v8905_v17 = vrot.slane %v8903_v53, 4  ;;  %v8908_v15 = vrot.slane %v8906_v8, 5 }
 0x48e   : > { %v5376_v51 = vor.u32 %v5375_v34, %v5372_v2  ;;  %v17337_v6 = vor.u32 %v5383_v30, %v5380_v38  ;;  %v19498_v20 = vshll.u32 %v17078_v62, 16  ;;  %v8915_v31 = vshrl.u32 %v8826_v11, 16  ;;  %v8229_v2 = vld [vmem:[#allocation2 + $0x78] sm:$0xf0] }
 0x48f   : > { %v19026_v12 = vshrl.u32 %v17160_v44, 16  ;;  %v19029_v9 = vshll.u32 %v17160_v44, 16  ;;  %v8918_v37 = vshll.u32 %v8826_v11, 16  ;;  %v8909_v25 = vor.u32 %v8908_v15, %v8905_v17  ;;  %v17357_v11 = vld [vmem:[#allocation2 + $0x160] sm:$0xf] }
 0x490   : > { %19497 = vst [vmem:[#allocation28_spill] sm:$0xff] %v17337_v6  ;;  %v8911_v16 = vrot.slane %v19498_v20, 5  ;;  %v5396_v27 = vshrl.u32 %v5024_v47, 16  ;;  %v5399_v62 = vshll.u32 %v5024_v47, 16  ;;  %v8945_v34 = vshrl.u32 %v16970_v14, 16 }
 0x491   : > { %12886 = vmatmul.mubr.msk.bf16.gmra.mrb[64].mxu0 %vm4869_vm5, %v5342_v13  ;;  %v8948_v38 = vshll.u32 %v16970_v14, 16  ;;  %v5368_v13 = vsel %vm5030_vm7, %v17306_v42, %v5367_v52  ;;  %v5389_v30 = vrot.slane %v5387_v58, 3  ;;  %v5392_v53 = vrot.slane %v5390_v40, 4  ;;  %v8827_v17 = vld [vmem:[#allocation2 + $0x88] sm:$0x1f] }
 0x492   : > { %12889 = vmatprep.mubr.msk.bf16.mxu0 %vm4869_vm5, %v5359_v54  ;;  %v17347_v1 = vor.u32 %v8911_v16, %v8910_v57  ;;  %v5385_v54 = vsel %vm5030_vm7, %v5376_v51, %v17337_v6  ;;  %v8917_v8 = vrot.slane %v8915_v31, 4  ;;  %v5406_v59 = vrot.slane %v19026_v12, 3  ;;  %v5027_v47 = vld [vmem:[#allocation2 + $0x168] sm:$0xf8] }
 0x493   : > { %13176 = vmatmul.mubr.msk.bf16.gmra.mrb[48].mxu1 %vm4869_vm5, %v8880_v50  ;;  %v8901_v50 = vsel %vm6515_vm8, %v17318_v7, %v8900_v39  ;;  %v8924_v57 = vshrl.u32 %v8229_v2, 16  ;;  %v8927_v14 = vshll.u32 %v8229_v2, 16  ;;  %v5398_v58 = vrot.slane %v5396_v27, 3 }
 0x494   : > { %13179 = vmatprep.mubr.msk.bf16.mxu1 %vm4869_vm5, %v8892_v49  ;;  %v8920_v49 = vrot.slane %v8918_v37, 5  ;;  %v8913_v52 = vsel %vm6515_vm8, %v8909_v25, %v17347_v1  ;;  %v5401_v15 = vrot.slane %v5399_v62, 4  ;;  %v5409_v39 = vrot.slane %v19029_v9, 4 }
 0x495   : > { %v8926_v40 = vrot.slane %v8924_v57, 4  ;;  %v8929_v31 = vrot.slane %v8927_v14, 5  ;;  %v19499_v51 = vshrl.u32 %v17097_v43, 16  ;;  %v19500_v16 = vshll.u32 %v17097_v43, 16 }
 0x496   : > { %v5413_v2 = vshrl.u32 %v17357_v11, 16  ;;  %v5416_v12 = vshll.u32 %v17357_v11, 16  ;;  %v8936_v42 = vshrl.u32 %v8827_v17, 16  ;;  %v8939_v25 = vshll.u32 %v8827_v17, 16 }
 0x497   : > { %v8931_v20 = vrot.slane %v19499_v51, 4  ;;  %v8932_v37 = vrot.slane %v19500_v16, 5  ;;  %v5393_v62 = vor.u32 %v5392_v53, %v5389_v30  ;;  %v8921_v57 = vor.u32 %v8920_v49, %v8917_v8 }
 0x498   : > { %v5422_v14 = vshrl.u32 %v5027_v47, 16  ;;  %v8947_v9 = vrot.slane %v8945_v34, 4  ;;  %v8950_v51 = vrot.slane %v8948_v38, 5  ;;  %v7731_v43 = vshll.u32 %v17189_v19, 16 }
 0x499   : > { %12890 = vmatmul.mubr.msk.bf16.gmra.mrb[68].mxu0 %vm4869_vm5, %v5368_v13  ;;  %v5425_v16 = vshll.u32 %v5027_v47, 16  ;;  %v5402_v56 = vor.u32 %v5401_v15, %v5398_v58  ;;  %v17377_v17 = vor.u32 %v5409_v39, %v5406_v59  ;;  %v8930_v27 = vor.u32 %v8929_v31, %v8926_v40  ;;  %v8828_v47 = vld [vmem:[#allocation2 + $0xa0] sm:$0x1f] }
 0x49a   : > { %12893 = vmatprep.mubr.msk.bf16.mxu0 %vm4869_vm5, %v5385_v54  ;;  %v17379_v29 = vor.u32 %v8932_v37, %v8931_v20  ;;  %v5415_v13 = vrot.slane %v5413_v2, 3  ;;  %v8938_v30 = vrot.slane %v8936_v42, 4  ;;  %v8941_v53 = vrot.slane %v8939_v25, 5 }
 0x49b   : > { %13180 = vmatmul.mubr.msk.bf16.gmra.mrb[52].mxu1 %vm4869_vm5, %v8901_v50  ;;  %19501 = vst [vmem:[#allocation102_spill] sm:$0xff] %v17377_v17  ;;  %v5418_v50 = vrot.slane %v5416_v12, 4  ;;  %v5394_v34 = vsel %vm5030_vm7, %v17337_v6, %v5393_v62  ;;  %v8922_v38 = vsel %vm6515_vm8, %v17347_v1, %v8921_v57  ;;  %v5424_v54 = vrot.slane %v5422_v14, 3 }
 0x49c   : > { %13183 = vmatprep.mubr.msk.bf16.mxu1 %vm4869_vm5, %v8913_v52  ;;  %v19502_v8 = vshrl.u32 %v17189_v19, 16  ;;  %v17387_v52 = vld [vmem:[#allocation2 + $0x178] sm:$0xf]  ;;  %v5427_v59 = vrot.slane %v5425_v16, 4  ;;  %v5435_v58 = vrot.slane %v7731_v43, 4  ;;  %v19503_v12 = vshrl.u32 %v16968_v45, 16 }
 0x49d   : > { %v19504_v15 = vshll.u32 %v16968_v45, 16  ;;  %v5411_v40 = vsel %vm5030_vm7, %v5402_v56, %v17377_v17  ;;  %v8934_v31 = vsel %vm6515_vm8, %v8930_v27, %v17379_v29  ;;  %v5419_v20 = vor.u32 %v5418_v50, %v5415_v13  ;;  %v14081_v16 = vld [vmem:[#allocation2 + $0xa8] sm:$0xf0] }
 0x49e   : > { %v5432_v49 = vrot.slane %v19502_v8, 3  ;;  %v8952_v42 = vrot.slane %v19503_v12, 4  ;;  %v8942_v37 = vor.u32 %v8941_v53, %v8938_v30  ;;  %v5439_v2 = vshrl.u32 %v17387_v52, 16 }
 0x49f   : > { %v8953_v39 = vrot.slane %v19504_v15, 5  ;;  %v5442_v25 = vshll.u32 %v17387_v52, 16  ;;  %v8951_v62 = vor.u32 %v8950_v51, %v8947_v9  ;;  %v8957_v45 = vshrl.u32 %v8828_v47, 16 }
 0x4a0   : > { %v8960_v57 = vshll.u32 %v8828_v47, 16  ;;  %v5428_v56 = vor.u32 %v5427_v59, %v5424_v54  ;;  %v17405_v14 = vor.u32 %v5435_v58, %v5432_v49  ;;  %v8966_v13 = vshrl.u32 %v14081_v16, 16  ;;  %v8829_v49 = vld [vmem:[#allocation2 + $0xb8] sm:$0x1f]  ;;  %v17421_v47 = vld [vmem:[#allocation2] sm:$0xf0] }
 0x4a1   : > { %12894 = vmatmul.mubr.msk.bf16.gmra.mrb[72].mxu0 %vm4869_vm5, %v5394_v34  ;;  %v17407_v27 = vor.u32 %v8953_v39, %v8952_v42  ;;  %v8969_v50 = vshll.u32 %v14081_v16, 16  ;;  %v5441_v30 = vrot.slane %v5439_v2, 3  ;;  %v5444_v53 = vrot.slane %v5442_v25, 4  ;;  %v14082_v2 = vld [vmem:[#allocation2 + $0xc0] sm:$0xf0] }
 0x4a2   : > { %12897 = vmatprep.mubr.msk.bf16.mxu0 %vm4869_vm5, %v5411_v40  ;;  %19505 = vst [vmem:[#allocation116_spill] sm:$0xff] %v17405_v14  ;;  %v8959_v34 = vrot.slane %v8957_v45, 4  ;;  %v5420_v9 = vsel %vm5030_vm7, %v17377_v17, %v5419_v20  ;;  %v8943_v51 = vsel %vm6515_vm8, %v17379_v29, %v8942_v37  ;;  %v5437_v54 = vsel %vm5030_vm7, %v5428_v56, %v17405_v14  ;;  %v14083_v45 = vld [vmem:[#allocation2 + $0x8] sm:$0xff]  ;;  %v9635_v17 = vld [vmem:[#allocation2 + $0x58] sm:$0xf] }
 0x4a3   : > { %13184 = vmatmul.mubr.msk.bf16.gmra.mrb[56].mxu1 %vm4869_vm5, %v8922_v38  ;;  %v8962_v38 = vrot.slane %v8960_v57, 5  ;;  %v8955_v8 = vsel %vm6515_vm8, %v8951_v62, %v17407_v27  ;;  %v8968_v59 = vrot.slane %v8966_v13, 4  ;;  %v8971_v58 = vrot.slane %v8969_v50, 5 }
 0x4a4   : > { %13187 = vmatprep.mubr.msk.bf16.mxu1 %vm4869_vm5, %v8934_v31  ;;  %v19506_v12 = vshrl.u32 %v16994_v60, 16  ;;  %v19507_v15 = vshll.u32 %v16994_v60, 16  ;;  %v5445_v40 = vor.u32 %v5444_v53, %v5441_v30  ;;  %v8978_v20 = vshrl.u32 %v8829_v49, 16 }
 0x4a5   : > { %v8963_v31 = vor.u32 %v8962_v38, %v8959_v34  ;;  %v8981_v37 = vshll.u32 %v8829_v49, 16  ;;  %v8987_v25 = vshrl.u32 %v14082_v2, 16  ;;  %v8990_v62 = vshll.u32 %v14082_v2, 16  ;;  %v17434_v34 = vld [vmem:[#allocation2 + $0x18] sm:$0xf0] }
 0x4a6   : > { %v8973_v42 = vrot.slane %v19506_v12, 4  ;;  %v8974_v39 = vrot.slane %v19507_v15, 5  ;;  %v5965_v60 = vrot.slane %v17421_v47, 4  ;;  %v5966_v57 = vrot.slane %v14083_v45, 4 }
 0x4a7   : > { %v8972_v56 = vor.u32 %v8971_v58, %v8968_v59  ;;  %v5446_v13 = vsel %vm5030_vm7, %v17405_v14, %v5445_v40  ;;  %v8964_v50 = vsel %vm6515_vm8, %v17407_v27, %v8963_v31  ;;  %v8980_v30 = vrot.slane %v8978_v20, 4  ;;  %v8830_v59 = vld [vmem:[#allocation2 + $0xd0] sm:$0x1f]  ;;  %v14085_v20 = vld [vmem:[#allocation2 + $0x20] sm:$0xff] }
 0x4a8   : > { %v17428_v16 = vor.u32 %v8974_v39, %v8973_v42  ;;  %v8983_v53 = vrot.slane %v8981_v37, 5  ;;  %v8989_v38 = vrot.slane %v8987_v25, 4  ;;  %v5967_v58 = vsel %vm364_vm0, %v5965_v60, %v5966_v57  ;;  %v14084_v42 = vld [vmem:[#allocation2 + $0x10] sm:$0xf] }
 0x4a9   : > { %12898 = vmatmul.mubr.msk.bf16.gmra.mrb[76].mxu0 %vm4869_vm5, %v5420_v9  ;;  %v8992_v9 = vrot.slane %v8990_v62, 5  ;;  %v5968_v15 = vrot.slane %v14084_v42, 4  ;;  %v5970_v39 = vrot.slane %v17434_v34, 4  ;;  %v8999_v40 = vshrl.u32 %v8830_v59, 16  ;;  %v14086_v62 = vld [vmem:[#allocation2 + $0xd8] sm:$0xf0] }
 0x4aa   : > { %12901 = vmatprep.mubr.msk.bf16.mxu0 %vm4869_vm5, %v5437_v54  ;;  %v8976_v12 = vsel %vm6515_vm8, %v8972_v56, %v17428_v16  ;;  %v9002_v31 = vshll.u32 %v8830_v59, 16  ;;  %v5971_v37 = vrot.slane %v14085_v20, 4  ;;  %v9008_v60 = vshrl.u32 %v14086_v62, 16  ;;  %v17456_v59 = vld [vmem:[#allocation2 + $0x30] sm:$0xf0] }
 0x4ab   : > { %13188 = vmatmul.mubr.msk.bf16.gmra.mrb[60].mxu1 %vm4869_vm5, %v8943_v51  ;;  %v19508_v51 = vshrl.u32 %v17014_v24, 16  ;;  %v8993_v2 = vor.u32 %v8992_v9, %v8989_v38  ;;  %v9011_v45 = vshll.u32 %v14086_v62, 16  ;;  %v9001_v56 = vrot.slane %v8999_v40, 4 }
 0x4ac   : > { %13191 = vmatprep.mubr.msk.bf16.mxu1 %vm4869_vm5, %v8955_v8  ;;  %v19509_v8 = vshll.u32 %v17014_v24, 16  ;;  %v8984_v24 = vor.u32 %v8983_v53, %v8980_v30  ;;  %v8831_v53 = vld [vmem:[#allocation2 + $0xe8] sm:$0x1f]  ;;  %v9010_v38 = vrot.slane %v9008_v60, 4 }
 0x4ad   : > { %v8994_v54 = vrot.slane %v19508_v51, 4  ;;  %v9013_v9 = vrot.slane %v9011_v45, 5  ;;  %v9023_v40 = vshll.u32 %v8831_v53, 16 }
 0x4ae   : > { %v8995_v49 = vrot.slane %v19509_v8, 5  ;;  %v8985_v51 = vsel %vm6515_vm8, %v17428_v16, %v8984_v24  ;;  %v5972_v8 = vsel %vm364_vm0, %v5970_v39, %v5971_v37  ;;  %v9020_v39 = vshrl.u32 %v8831_v53, 16  ;;  %v17474_v53 = vld [vmem:[#allocation2 + $0x48] sm:$0xf0] }
 0x4af   : > { %v9014_v60 = vor.u32 %v9013_v9, %v9010_v38  ;;  %v19513_v9 = vshll.u32 %v17067_v0, 16 }
 0x4b0   : > { %v17448_v25 = vor.u32 %v8995_v49, %v8994_v54  ;;  %v19510_v54 = vshrl.u32 %v17037_v46, 16 }
 0x4b1   : > { %12902 = vmatmul.mubr.msk.bf16.gmra.mrb[80].mxu0 %vm4869_vm5, %v5446_v13  ;;  %v9004_v13 = vrot.slane %v9002_v31, 5  ;;  %v14088_v31 = vld [vmem:[#allocation2 + $0xf0] sm:$0xf0] }
 0x4b2   : > { %12907 = vmatprep.mubr.msk.bf16.mxu0 %vm4869_vm5, %v5967_v58  ;;  %v8997_v30 = vsel %vm6515_vm8, %v8993_v2, %v17448_v25  ;;  %v9015_v49 = vrot.slane %v19510_v54, 4  ;;  %v19511_v58 = vshll.u32 %v17037_v46, 16  ;;  %v9029_v24 = vshrl.u32 %v14088_v31, 16  ;;  %v14089_v46 = vld [vmem:[#allocation2 + $0x38] sm:$0xff] }
 0x4b3   : > { %13192 = vmatmul.mubr.msk.bf16.gmra.mrb[0].mxu1 %vm4869_vm5, %v8964_v50  ;;  %v5969_v50 = vsel %vm364_vm0, %v5966_v57, %v5968_v15  ;;  %v14087_v57 = vld [vmem:[#allocation2 + $0x28] sm:$0xf]  ;;  %v9005_v15 = vor.u32 %v9004_v13, %v9001_v56  ;;  %v9032_v20 = vshll.u32 %v14088_v31, 16  ;;  %v5975_v2 = vrot.slane %v17456_v59, 4  ;;  %v14091_v31 = vld [vmem:[#allocation2 + $0x50] sm:$0xff] }
 0x4b4   : > { %13195 = vmatprep.mubr.msk.bf16.mxu1 %vm4869_vm5, %v8976_v12  ;;  %v9016_v12 = vrot.slane %v19511_v58, 5  ;;  %v5973_v42 = vrot.slane %v14087_v57, 4  ;;  %v5976_v62 = vrot.slane %v14089_v46, 4  ;;  %v19512_v58 = vshrl.u32 %v17067_v0, 16  ;;  %v14090_v57 = vld [vmem:[#allocation2 + $0x40] sm:$0xf] }
 0x4b5   : > { %v9006_v13 = vsel %vm6515_vm8, %v17448_v25, %v9005_v15  ;;  %v9034_v54 = vrot.slane %v9032_v20, 5  ;;  %v5980_v15 = vrot.slane %v17474_v53, 4  ;;  %v14092_v46 = vld [vmem:[#allocation2 + $0x108] sm:$0xf0] }
 0x4b6   : > { %v17467_v45 = vor.u32 %v9016_v12, %v9015_v49  ;;  %v5974_v56 = vsel %vm364_vm0, %v5971_v37, %v5973_v42  ;;  %v9036_v38 = vrot.slane %v19512_v58, 4  ;;  %v9037_v49 = vrot.slane %v19513_v9, 5  ;;  %v8832_v12 = vld [vmem:[#allocation2 + $0x100] sm:$0x1f] }
 0x4b7   : > { %v5978_v42 = vrot.slane %v14090_v57, 4  ;;  %v17500_v57 = vld [vmem:[#allocation2 + $0x60] sm:$0xf0] }
 0x4b8   : > { %v9018_v37 = vsel %vm6515_vm8, %v9014_v60, %v17467_v45  ;;  %v9050_v60 = vshrl.u32 %v14092_v46, 16 }
 0x4b9   : > { %12908 = vmatmul.mubr.msk.bf16.vlgmr.msra.gmra.mrb[20].mxu0 %vm4869_vm5, %v5969_v50  ;;  %v6951_v50 = vsel %vm5544_vm6, %v17210_v32, 0  ;;  %v5977_v32 = vsel %vm364_vm0, %v5975_v2, %v5976_v62  ;;  %v17488_v2 = vor.u32 %v9037_v49, %v9036_v38  ;;  %v5979_v58 = vsel %vm364_vm0, %v5976_v62, %v5978_v42  ;;  %v14093_v62 = vld [vmem:[#allocation2 + $0x58] sm:$0xf] }
 0x4ba   : > { %12911 = vmatprep.mubr.msk.bf16.mxu0 %vm4869_vm5, %v5972_v8  ;;  %12972 = vmatpush3.bf16.msra.mxu0 %v6951_v50  ;;  %v9025_v8 = vrot.slane %v9023_v40, 5  ;;  %v9044_v40 = vshll.u32 %v8832_v12, 16  ;;  %v9053_v50 = vshll.u32 %v14092_v46, 16  ;;  %v19515_v49 = vshll.u32 %v17089_v55, 16  ;;  %v14095_v46 = vld [vmem:[#allocation2 + $0x68] sm:$0xff] }
 0x4bb   : > { %13196 = vmatmul.mubr.msk.bf16.gmra.mrb[4].mxu1 %vm4869_vm5, %v8985_v51  ;;  %v9022_v51 = vrot.slane %v9020_v39, 4  ;;  %v9041_v39 = vshrl.u32 %v8832_v12, 16  ;;  %v5983_v42 = vrot.slane %v14093_v62, 4 }
 0x4bc   : > { %13199 = vmatprep.mubr.msk.bf16.mxu1 %vm4869_vm5, %v8997_v30  ;;  %v9031_v30 = vrot.slane %v9029_v24, 4  ;;  %v5981_v24 = vrot.slane %v14091_v31, 4 }
 0x4bd   : > { %v9026_v0 = vor.u32 %v9025_v8, %v9022_v51  ;;  %v8833_v8 = vld [vmem:[#allocation2 + $0x118] sm:$0x1f] }
 0x4be   : > { %v9035_v20 = vor.u32 %v9034_v54, %v9031_v30  ;;  %v5982_v12 = vsel %vm364_vm0, %v5980_v15, %v5981_v24  ;;  %v9055_v30 = vrot.slane %v9053_v50, 5  ;;  %v19514_v54 = vshrl.u32 %v17089_v55, 16 }
 0x4bf   : > { %v9027_v9 = vsel %vm6515_vm8, %v17467_v45, %v9026_v0  ;;  %v14094_v0 = vld [vmem:[#allocation2 + $0x120] sm:$0xf0]  ;;  %v5985_v55 = vrot.slane %v17500_v57, 4 }
 0x4c0   : > { %v9039_v51 = vsel %vm6515_vm8, %v9035_v20, %v17488_v2  ;;  %v9057_v38 = vrot.slane %v19514_v54, 4  ;;  %v9071_v31 = vshrl.u32 %v14094_v0, 16  ;;  %v9074_v20 = vshll.u32 %v14094_v0, 16  ;;  %v17512_v54 = vld [vmem:[#allocation2 + $0x78] sm:$0xf0] }
 0x4c1   : > { %12912 = vmatmul.mubr.msk.bf16.gmra.mrb[24].mxu0 %vm4869_vm5, %v5974_v56  ;;  %v9043_v56 = vrot.slane %v9041_v39, 4  ;;  %v9062_v39 = vshrl.u32 %v8833_v8, 16  ;;  %v19517_v0 = vshll.u32 %v17112_v41, 16 }
 0x4c2   : > { %12915 = vmatprep.mubr.msk.bf16.mxu0 %vm4869_vm5, %v5977_v32  ;;  %v9052_v32 = vrot.slane %v9050_v60, 4  ;;  %v5986_v60 = vrot.slane %v14095_v46, 4 }
 0x4c3   : > { %13200 = vmatmul.mubr.msk.bf16.gmra.mrb[8].mxu1 %vm4869_vm5, %v9006_v13  ;;  %v9046_v13 = vrot.slane %v9044_v40, 5  ;;  %v9065_v40 = vshll.u32 %v8833_v8, 16  ;;  %v9079_v46 = vrot.slane %v19517_v0, 5 }
 0x4c4   : > { %13203 = vmatprep.mubr.msk.bf16.mxu1 %vm4869_vm5, %v9018_v37  ;;  %v9058_v37 = vrot.slane %v19515_v49, 5  ;;  %v9056_v50 = vor.u32 %v9055_v30, %v9052_v32  ;;  %v9073_v49 = vrot.slane %v9071_v31, 4  ;;  %v8834_v32 = vld [vmem:[#allocation2 + $0x130] sm:$0x1f]  ;;  %v5987_v30 = vsel %vm364_vm0, %v5985_v55, %v5986_v60 }
 0x4c5   : > { %v9047_v15 = vor.u32 %v9046_v13, %v9043_v56  ;;  %v9064_v13 = vrot.slane %v9062_v39, 4  ;;  %v9067_v8 = vrot.slane %v9065_v40, 5  ;;  %v9086_v39 = vshll.u32 %v8834_v32, 16  ;;  %v14097_v40 = vld [vmem:[#allocation2 + $0x80] sm:$0xff] }
 0x4c6   : > { %v5991_v31 = vrot.slane %v14097_v40, 4  ;;  %v9116_v40 = vshll.u32 %v17168_v22, 16 }
 0x4c7   : > { %v9048_v56 = vsel %vm6515_vm8, %v17488_v2, %v9047_v15  ;;  %v9083_v15 = vshrl.u32 %v8834_v32, 16 }
 0x4c9   : > { %12916 = vmatmul.mubr.msk.bf16.gmra.mrb[28].mxu0 %vm4869_vm5, %v5979_v58  ;;  %v17507_v58 = vor.u32 %v9058_v37, %v9057_v38  ;;  %v14096_v38 = vld [vmem:[#allocation2 + $0x70] sm:$0xf] }
 0x4ca   : > { %12919 = vmatprep.mubr.msk.bf16.mxu0 %vm4869_vm5, %v5982_v12  ;;  %v9076_v12 = vrot.slane %v9074_v20, 5  ;;  %v5988_v37 = vrot.slane %v14096_v38, 4  ;;  %v5907_v38 = vld [vmem:[#allocation2 + $0x90] sm:$0xf0] }
 0x4cb   : > { %13204 = vmatmul.mubr.msk.bf16.gmra.mrb[12].mxu1 %vm4869_vm5, %v9027_v9  ;;  %v5984_v9 = vsel %vm364_vm0, %v5981_v24, %v5983_v42  ;;  %v9060_v24 = vsel %vm6515_vm8, %v9056_v50, %v17507_v58  ;;  %v5990_v42 = vrot.slane %v17512_v54, 4  ;;  %v9092_v50 = vshrl.u32 %v17141_v10, 16 }
 0x4cc   : > { %13207 = vmatprep.mubr.msk.bf16.mxu1 %vm4869_vm5, %v9039_v51  ;;  %v19516_v51 = vshrl.u32 %v17112_v41, 16  ;;  %v9068_v41 = vor.u32 %v9067_v8, %v9064_v13  ;;  %v9077_v20 = vor.u32 %v9076_v12, %v9073_v49  ;;  %v5989_v0 = vsel %vm364_vm0, %v5986_v60, %v5988_v37  ;;  %v8835_v8 = vld [vmem:[#allocation2 + $0x148] sm:$0x1f] }
 0x4cd   : > { %v9094_v49 = vrot.slane %v9092_v50, 4  ;;  %v14098_v60 = vld [vmem:[#allocation2 + $0x88] sm:$0xf] }
 0x4ce   : > { %v9078_v62 = vrot.slane %v19516_v51, 4  ;;  %v9088_v51 = vrot.slane %v9086_v39, 5  ;;  %v9069_v32 = vsel %vm6515_vm8, %v17507_v58, %v9068_v41  ;;  %v5993_v37 = vrot.slane %v14098_v60, 4 }
 0x4cf   : > { %v9107_v39 = vshll.u32 %v8835_v8, 16  ;;  %v9113_v41 = vshrl.u32 %v17168_v22, 16  ;;  %v9118_v22 = vrot.slane %v9116_v40, 5 }
 0x4d0   : > { %v17526_v55 = vor.u32 %v9079_v46, %v9078_v62  ;;  %v19518_v62 = vshrl.u32 %v17147_v4, 16 }
 0x4d1   : > { %12920 = vmatmul.mubr.msk.bf16.gmra.mrb[32].mxu0 %vm4869_vm5, %v5984_v9  ;;  %v9095_v9 = vshll.u32 %v17141_v10, 16  ;;  %v19519_v10 = vshll.u32 %v17147_v4, 16  ;;  %v5995_v4 = vrot.slane %v5907_v38, 4 }
 0x4d2   : > { %12923 = vmatprep.mubr.msk.bf16.mxu0 %vm4869_vm5, %v5987_v30  ;;  %v5992_v30 = vsel %vm364_vm0, %v5990_v42, %v5991_v31  ;;  %v9081_v13 = vsel %vm6515_vm8, %v9077_v20, %v17526_v55  ;;  %v9099_v46 = vrot.slane %v19518_v62, 4  ;;  %v14099_v20 = vld [vmem:[#allocation2 + $0x98] sm:$0xff]  ;;  %v5908_v62 = vld [vmem:[#allocation2 + $0xa8] sm:$0xf0] }
 0x4d3   : > { %13208 = vmatmul.mubr.msk.bf16.gmra.mrb[16].mxu1 %vm4869_vm5, %v9048_v56  ;;  %v9085_v56 = vrot.slane %v9083_v15, 4  ;;  %v9097_v12 = vrot.slane %v9095_v9, 5  ;;  %v9104_v15 = vshrl.u32 %v8835_v8, 16  ;;  %v5996_v50 = vrot.slane %v14099_v20, 4  ;;  %v8836_v20 = vld [vmem:[#allocation2 + $0x160] sm:$0x1f] }
 0x4d4   : > { %13211 = vmatprep.mubr.msk.bf16.mxu1 %vm4869_vm5, %v9060_v24  ;;  %v9100_v24 = vrot.slane %v19519_v10, 5  ;;  %v9109_v8 = vrot.slane %v9107_v39, 5  ;;  %v9115_v10 = vrot.slane %v9113_v41, 4  ;;  %v14101_v39 = vld [vmem:[#allocation2 + $0xb0] sm:$0xff] }
 0x4d5   : > { %v9089_v42 = vor.u32 %v9088_v51, %v9085_v56  ;;  %v9098_v9 = vor.u32 %v9097_v12, %v9094_v49  ;;  %v9106_v51 = vrot.slane %v9104_v15, 4  ;;  %v5997_v49 = vsel %vm364_vm0, %v5995_v4, %v5996_v50  ;;  %v14100_v12 = vld [vmem:[#allocation2 + $0xa0] sm:$0xf] }
 0x4d6   : > { %v6001_v41 = vrot.slane %v14101_v39, 4  ;;  %v9119_v40 = vor.u32 %v9118_v22, %v9115_v10  ;;  %v8837_v10 = vld [vmem:[#allocation2 + $0x178] sm:$0x1f]  ;;  %v9158_v39 = vshll.u32 %v17218_v26, 16 }
 0x4d7   : > { %v9090_v56 = vsel %vm6515_vm8, %v17526_v55, %v9089_v42  ;;  %v9128_v42 = vshll.u32 %v8836_v20, 16  ;;  %v9110_v15 = vor.u32 %v9109_v8, %v9106_v51 }
 0x4d9   : > { %12924 = vmatmul.mubr.msk.bf16.gmra.mrb[36].mxu0 %vm4869_vm5, %v5989_v0  ;;  %v17546_v0 = vor.u32 %v9100_v24, %v9099_v46  ;;  %v5998_v46 = vrot.slane %v14100_v12, 4  ;;  %v6000_v24 = vrot.slane %v5908_v62, 4  ;;  %v9130_v62 = vrot.slane %v9128_v42, 5 }
 0x4da   : > { %12927 = vmatprep.mubr.msk.bf16.mxu0 %vm4869_vm5, %v5992_v30  ;;  %v19520_v30 = vshrl.u32 %v17160_v44, 16  ;;  %v19034_v42 = vshll.u32 %v17216_v21, 16 }
 0x4db   : > { %13212 = vmatmul.mubr.msk.bf16.gmra.mrb[20].mxu1 %vm4869_vm5, %v9069_v32  ;;  %v5994_v32 = vsel %vm364_vm0, %v5991_v31, %v5993_v37  ;;  %v9102_v31 = vsel %vm6515_vm8, %v9098_v9, %v17546_v0  ;;  %v9125_v37 = vshrl.u32 %v8836_v20, 16  ;;  %v9134_v9 = vshrl.u32 %v17191_v28, 16 }
 0x4dc   : > { %13215 = vmatprep.mubr.msk.bf16.mxu1 %vm4869_vm5, %v9081_v13  ;;  %v9120_v60 = vrot.slane %v19520_v30, 4  ;;  %v19521_v13 = vshll.u32 %v17160_v44, 16  ;;  %v17563_v44 = vld [vmem:[%s18804_s3 + $0x6] sm:$0x3]  ;;  %v5999_v30 = vsel %vm364_vm0, %v5996_v50, %v5998_v46  ;;  %v6002_v51 = vsel %vm364_vm0, %v6000_v24, %v6001_v41  ;;  %v14102_v50 = vld [vmem:[#allocation2 + $0xb8] sm:$0xf] }
 0x4dd   : > { %14015 = vmatprep.subr.msk.bf16.mxu0 %vm5544_vm6, %v17563_v44  ;;  %v9136_v22 = vrot.slane %v9134_v9, 4  ;;  %v9142_v20 = vrot.slane %v7731_v43, 5  ;;  %v9146_v46 = vshrl.u32 %v8837_v10, 16  ;;  %v9149_v24 = vshll.u32 %v8837_v10, 16  ;;  %v14103_v43 = vld [vmem:[#allocation2 + $0xc8] sm:$0xff] }
 0x4de   : > { %v9121_v38 = vrot.slane %v19521_v13, 5  ;;  %v9111_v13 = vsel %vm6515_vm8, %v17546_v0, %v9110_v15  ;;  %v9155_v15 = vshrl.u32 %v17218_v26, 16  ;;  %v5910_v10 = vld [vmem:[#allocation2 + $0xd8] sm:$0xf0]  ;;  %v9160_v26 = vrot.slane %v9158_v39, 5 }
 0x4e0   : > { %v17567_v4 = vor.u32 %v9121_v38, %v9120_v60 }
 0x4e1   : > { %12928 = vmatmul.mubr.msk.bf16.gmra.mrb[40].mxu0 %vm4869_vm5, %v5994_v32  ;;  %v9137_v32 = vshll.u32 %v17191_v28, 16  ;;  %v19522_v28 = vshrl.u32 %v17189_v19, 16 }
 0x4e2   : > { %12931 = vmatprep.mubr.msk.bf16.mxu0 %vm4869_vm5, %v5997_v49  ;;  %v9123_v8 = vsel %vm6515_vm8, %v9119_v40, %v17567_v4  ;;  %v5909_v49 = vld [vmem:[#allocation2 + $0xc0] sm:$0xf0]  ;;  %v6006_v40 = vrot.slane %v14103_v43, 4 }
 0x4e3   : > { %13216 = vmatmul.mubr.msk.bf16.gmra.mrb[24].mxu1 %vm4869_vm5, %v9090_v56  ;;  %v9127_v56 = vrot.slane %v9125_v37, 4  ;;  %v9139_v60 = vrot.slane %v9137_v32, 5  ;;  %v9141_v38 = vrot.slane %v19522_v28, 4  ;;  %v19035_v37 = vshrl.u32 %v17216_v21, 16 }
 0x4e4   : > { %13219 = vmatprep.mubr.msk.bf16.mxu1 %vm4869_vm5, %v9102_v31  ;;  %v6003_v31 = vrot.slane %v14102_v50, 4  ;;  %v6005_v19 = vrot.slane %v5909_v49, 4  ;;  %v9157_v28 = vrot.slane %v9155_v15, 4  ;;  %v14104_v49 = vld [vmem:[#allocation2 + $0xd0] sm:$0xf] }
 0x4e5   : > { %v9131_v12 = vor.u32 %v9130_v62, %v9127_v56  ;;  %v9140_v9 = vor.u32 %v9139_v60, %v9136_v22  ;;  %v17591_v32 = vor.u32 %v9142_v20, %v9141_v38  ;;  %v9630_v38 = vld [vmem:[#allocation2 + $0x30] sm:$0xf8]  ;;  %v17603_v20 = vld [vmem:[#allocation2 + $0x38] sm:$0xff]  ;;  %v6008_v50 = vrot.slane %v14104_v49, 4 }
 0x4e6   : > { %v6004_v56 = vsel %vm364_vm0, %v6001_v41, %v6003_v31  ;;  %v6007_v22 = vsel %vm364_vm0, %v6005_v19, %v6006_v40  ;;  %v8838_v41 = vld [vmem:[#allocation2 + $0x190] sm:$0x1f]  ;;  %v9161_v15 = vor.u32 %v9160_v26, %v9157_v28  ;;  %v9632_v26 = vld [vmem:[#allocation2 + $0x40] sm:$0xf] }
 0x4e7   : > { %v9132_v62 = vsel %vm6515_vm8, %v17567_v4, %v9131_v12  ;;  %v9144_v60 = vsel %vm6515_vm8, %v9140_v9, %v17591_v32  ;;  %v6010_v12 = vrot.slane %v5910_v10, 4  ;;  %v9167_v19 = vshrl.u32 %v8838_v41, 16 }
 0x4e8   : > { %v9170_v43 = vshll.u32 %v8838_v41, 16  ;;  %v9679_v9 = vshrl.u32 %v9630_v38, 16  ;;  %v6009_v49 = vsel %vm364_vm0, %v6006_v40, %v6008_v50  ;;  %v9696_v40 = vshrl.u32 %v9632_v26, 16 }
 0x4e9   : > { %12932 = vmatmul.mubr.msk.bf16.gmra.mrb[44].mxu0 %vm4869_vm5, %v5999_v30  ;;  %v9148_v30 = vrot.slane %v9146_v46, 4  ;;  %v14105_v46 = vld [vmem:[#allocation2 + $0xe0] sm:$0xff]  ;;  %v9699_v50 = vshll.u32 %v9632_v26, 16 }
 0x4ea   : > { %12935 = vmatprep.mubr.msk.bf16.mxu0 %vm4869_vm5, %v6002_v51  ;;  %v9162_v51 = vrot.slane %v19035_v37, 4  ;;  %v9172_v28 = vrot.slane %v9170_v43, 5  ;;  %v14107_v43 = vld [vmem:[#allocation2 + $0xf8] sm:$0xff]  ;;  %v9698_v21 = vrot.slane %v9696_v40, 3 }
 0x4eb   : > { %13220 = vmatmul.mubr.msk.bf16.gmra.mrb[28].mxu1 %vm4869_vm5, %v9111_v13  ;;  %v9151_v13 = vrot.slane %v9149_v24, 5  ;;  %v6011_v24 = vrot.slane %v14105_v46, 4  ;;  %v14106_v46 = vld [vmem:[#allocation2 + $0xe8] sm:$0xf]  ;;  %v9701_v14 = vrot.slane %v9699_v50, 4 }
 0x4ec   : > { %13223 = vmatprep.mubr.msk.bf16.mxu1 %vm4869_vm5, %v9123_v8  ;;  %v9163_v8 = vrot.slane %v19034_v42, 5  ;;  %v9682_v42 = vshll.u32 %v9630_v38, 16  ;;  %v5911_v38 = vld [vmem:[#allocation2 + $0xf0] sm:$0xf0] }
 0x4ed   : > { %v9152_v31 = vor.u32 %v9151_v13, %v9148_v30  ;;  %v6012_v30 = vsel %vm364_vm0, %v6010_v12, %v6011_v24  ;;  %v17622_v12 = vld [vmem:[#allocation2 + $0x50] sm:$0xff]  ;;  %v9702_v50 = vor.u32 %v9701_v14, %v9698_v21 }
 0x4ee   : > { %v9164_v39 = vor.u32 %v9163_v8, %v9162_v51  ;;  %v9681_v51 = vrot.slane %v9679_v9, 3  ;;  %v9684_v8 = vrot.slane %v9682_v42, 4  ;;  %19523 = vst [vmem:[#allocation4_spill] sm:$0xff] %v17622_v12  ;;  %v6013_v42 = vrot.slane %v14106_v46, 4 }
 0x4ef   : > { %v9153_v13 = vsel %vm6515_vm8, %v17591_v32, %v9152_v31  ;;  %v9633_v31 = vld [vmem:[#allocation2 + $0x48] sm:$0xf8]  ;;  %v6016_v9 = vrot.slane %v14107_v43, 4  ;;  %v19044_v26 = vshll.u32 %v17622_v12, 16 }
 0x4f0   : > { %v9165_v10 = vsel %vm6515_vm8, %v9161_v15, %v9164_v39  ;;  %v9685_v37 = vor.u32 %v9684_v8, %v9681_v51  ;;  %v17632_v51 = vld [vmem:[#allocation2 + $0x68] sm:$0xff] }
 0x4f1   : > { %12936 = vmatmul.mubr.msk.bf16.gmra.mrb[48].mxu0 %vm4869_vm5, %v6004_v56  ;;  %v19037_v56 = vshrl.u32 %v17603_v20, 16  ;;  %19524 = vst [vmem:[#allocation41_spill] sm:$0xff] %v17632_v51  ;;  %v5912_v8 = vld [vmem:[#allocation2 + $0x108] sm:$0xf0]  ;;  %v9718_v40 = vrot.slane %v19044_v26, 4 }
 0x4f2   : > { %12939 = vmatprep.mubr.msk.bf16.mxu0 %vm4869_vm5, %v6007_v22  ;;  %v9169_v22 = vrot.slane %v9167_v19, 4  ;;  %v6015_v19 = vrot.slane %v5911_v38, 4  ;;  %v6020_v43 = vrot.slane %v5912_v8, 4 }
 0x4f3   : > { %13224 = vmatmul.mubr.msk.bf16.gmra.mrb[32].mxu1 %vm4869_vm5, %v9132_v62  ;;  %v19036_v62 = vshll.u32 %v17603_v20, 16 }
 0x4f4   : > { %13227 = vmatprep.mubr.msk.bf16.mxu1 %vm4869_vm5, %v9144_v60  ;;  %v9689_v60 = vrot.slane %v19037_v56, 3  ;;  %v9173_v15 = vor.u32 %v9172_v28, %v9169_v22  ;;  %v9708_v56 = vshll.u32 %v9633_v31, 16  ;;  %v9636_v28 = vld [vmem:[#allocation2 + $0x60] sm:$0xf8] }
 0x4f5   : > { %v9692_v41 = vrot.slane %v19036_v62, 4 }
 0x4f6   : > { %v9174_v46 = vsel %vm6515_vm8, %v9164_v39, %v9173_v15  ;;  %v19051_v15 = vshrl.u32 %v17632_v51, 16 }
 0x4f7   : > { %v9693_v62 = vor.u32 %v9692_v41, %v9689_v60  ;;  %v9710_v41 = vrot.slane %v9708_v56, 4  ;;  %v9731_v56 = vshrl.u32 %v9636_v28, 16 }
 0x4f9   : > { %12940 = vmatmul.mubr.msk.bf16.gmra.mrb[52].mxu0 %vm4869_vm5, %v6009_v49  ;;  %v9705_v49 = vshrl.u32 %v9633_v31, 16  ;;  %v9694_v22 = vsel %vm5030_vm7, %v9685_v37, %v9693_v62  ;;  %v9722_v37 = vshrl.u32 %v9635_v17, 16  ;;  %v9725_v31 = vshll.u32 %v9635_v17, 16 }
 0x4fa   : > { %12943 = vmatprep.mubr.msk.bf16.mxu0 %vm4869_vm5, %v6012_v30  ;;  %v6014_v30 = vsel %vm364_vm0, %v6011_v24, %v6013_v42  ;;  %v14108_v24 = vld [vmem:[#allocation2 + $0x100] sm:$0xf]  ;;  %v9734_v42 = vshll.u32 %v9636_v28, 16  ;;  %v9703_v21 = vsel %vm5030_vm7, %v9693_v62, %v9702_v50  ;;  %v9741_v28 = vrot.slane %v19051_v15, 3  ;;  %v14110_v50 = vld [vmem:[#allocation2 + $0x118] sm:$0xf] }
 0x4fb   : > { %13228 = vmatmul.mubr.msk.bf16.gmra.mrb[36].mxu1 %vm4869_vm5, %v9153_v13  ;;  %v19045_v13 = vshrl.u32 %v17622_v12, 16  ;;  %v9707_v60 = vrot.slane %v9705_v49, 3  ;;  %v6018_v39 = vrot.slane %v14108_v24, 4  ;;  %v14109_v49 = vld [vmem:[#allocation2 + $0x110] sm:$0xff]  ;;  %v9724_v17 = vrot.slane %v9722_v37, 3 }
 0x4fc   : > { %13231 = vmatprep.mubr.msk.bf16.mxu1 %vm4869_vm5, %v9165_v10  ;;  %v6017_v10 = vsel %vm364_vm0, %v6015_v19, %v6016_v9  ;;  %v19048_v19 = vshll.u32 %v17632_v51, 16  ;;  %v9727_v14 = vrot.slane %v9725_v31, 4  ;;  %v9736_v6 = vrot.slane %v9734_v42, 4 }
 0x4fd   : > { %v9715_v38 = vrot.slane %v19045_v13, 3  ;;  %v9711_v26 = vor.u32 %v9710_v41, %v9707_v60  ;;  %v6019_v24 = vsel %vm364_vm0, %v6016_v9, %v6018_v39  ;;  %v5913_v13 = vld [vmem:[#allocation2 + $0x120] sm:$0xf0]  ;;  %v10791_v60 = vsel %vm5544_vm6, %v17315_v63, 0  ;;  %v12472_v63 = vld [vmem:[%s18804_s3 + $0x10] sm:$0x3] }
 0x4fe   : > { %v9744_v8 = vrot.slane %v19048_v19, 4  ;;  %v17654_v39 = vld [vmem:[#allocation2 + $0x80] sm:$0xff]  ;;  %v6023_v37 = vrot.slane %v14110_v50, 4  ;;  %v6025_v31 = vrot.slane %v5913_v13, 4 }
 0x4ff   : > { %19525 = vst [vmem:[#allocation117_spill] sm:$0xff] %v17654_v39  ;;  %v19049_v13 = vshll.u32 %v17654_v39, 16 }
 0x501   : > { %12944 = vmatmul.mubr.msk.bf16.gmra.mrb[56].mxu0 %vm4869_vm5, %v6014_v30  ;;  %v6021_v30 = vrot.slane %v14109_v49, 4  ;;  %v9745_v49 = vor.u32 %v9744_v8, %v9741_v28  ;;  %v9642_v28 = vld [vmem:[#allocation2 + $0x90] sm:$0xf8] }
 0x502   : > { %12947 = vmatprep.mubr.msk.bf16.mxu0 %vm4869_vm5, %v6017_v10  ;;  %v9638_v10 = vld [vmem:[#allocation2 + $0x70] sm:$0xf] }
 0x503   : > { %13232 = vmatmul.mubr.msk.bf16.gmra.mrb[40].mxu1 %vm4869_vm5, %v9174_v46  ;;  %v9719_v46 = vor.u32 %v9718_v40, %v9715_v38  ;;  %v6022_v41 = vsel %vm364_vm0, %v6020_v43, %v6021_v30  ;;  %v9748_v62 = vshrl.u32 %v9638_v10, 16  ;;  %v9751_v38 = vshll.u32 %v9638_v10, 16  ;;  %v9639_v40 = vld [vmem:[#allocation2 + $0x78] sm:$0xf8] }
 0x504   : > { %13237 = vmatprep.mubr.msk.bf16.mxu1 %vm4869_vm5, %v9694_v22  ;;  %v9733_v22 = vrot.slane %v9731_v56, 3  ;;  %v14111_v56 = vld [vmem:[#allocation2 + $0x128] sm:$0xff]  ;;  %v9760_v10 = vshll.u32 %v9639_v40, 16 }
 0x505   : > { %v9720_v9 = vsel %vm5030_vm7, %v9711_v26, %v9719_v46  ;;  %v9728_v26 = vor.u32 %v9727_v14, %v9724_v17  ;;  %v6026_v42 = vrot.slane %v14111_v56, 4  ;;  %v9750_v50 = vrot.slane %v9748_v62, 3  ;;  %v17674_v62 = vld [vmem:[#allocation2 + $0x98] sm:$0xff] }
 0x506   : > { %v9737_v43 = vor.u32 %v9736_v6, %v9733_v22  ;;  %v9753_v19 = vrot.slane %v9751_v38, 4  ;;  %v9641_v22 = vld [vmem:[#allocation2 + $0x88] sm:$0xf]  ;;  %19526 = vst [vmem:[#allocation40_spill] sm:$0xff] %v17674_v62  ;;  %v14112_v38 = vld [vmem:[#allocation2 + $0x130] sm:$0xf] }
 0x507   : > { %v9729_v17 = vsel %vm5030_vm7, %v9719_v46, %v9728_v26  ;;  %v6027_v14 = vsel %vm364_vm0, %v6025_v31, %v6026_v42  ;;  %v5914_v46 = vld [vmem:[#allocation2 + $0x138] sm:$0xf0]  ;;  %v9774_v31 = vshrl.u32 %v9641_v22, 16  ;;  %v9783_v26 = vshrl.u32 %v9642_v28, 16 }
 0x508   : > { %v9746_v6 = vsel %vm5030_vm7, %v9737_v43, %v9745_v49  ;;  %v9786_v56 = vshll.u32 %v9642_v28, 16  ;;  %v19057_v43 = vshrl.u32 %v17674_v62, 16 }
 0x509   : > { %12948 = vmatmul.mubr.msk.bf16.gmra.mrb[60].mxu0 %vm4869_vm5, %v6019_v24  ;;  %v9757_v24 = vshrl.u32 %v9639_v40, 16  ;;  %v9770_v40 = vrot.slane %v19049_v13, 4  ;;  %v9785_v15 = vrot.slane %v9783_v26, 3 }
 0x50a   : > { %12951 = vmatprep.mubr.msk.bf16.mxu0 %vm4869_vm5, %v6022_v41  ;;  %v9762_v41 = vrot.slane %v9760_v10, 4  ;;  %v6030_v10 = vrot.slane %v5914_v46, 4 }
 0x50b   : > { %13238 = vmatmul.mubr.msk.bf16.vlgmr.msra.gmra.mrb[44].mxu1 %vm4869_vm5, %v9703_v21  ;;  %v19050_v21 = vshrl.u32 %v17654_v39, 16  ;;  %v9759_v8 = vrot.slane %v9757_v24, 3  ;;  %v19056_v24 = vshll.u32 %v17674_v62, 16  ;;  %v5915_v39 = vld [vmem:[#allocation2 + $0x150] sm:$0xf0] }
 0x50c   : > { %13302 = vmatpush3.bf16.msra.mxu1 %v10791_v60  ;;  %13241 = vmatprep.mubr.msk.bf16.mxu1 %vm4869_vm5, %v9720_v9  ;;  %v6024_v60 = vsel %vm364_vm0, %v6021_v30, %v6023_v37  ;;  %v6028_v30 = vrot.slane %v14112_v38, 4  ;;  %v9754_v37 = vor.u32 %v9753_v19, %v9750_v50  ;;  %v14113_v38 = vld [vmem:[#allocation2 + $0x140] sm:$0xff] }
 0x50d   : > { %14021 = vmatprep.subr.msk.bf16.mxu1 %vm5544_vm6, %v12472_v63  ;;  %v9767_v9 = vrot.slane %v19050_v21, 3  ;;  %v9777_v63 = vshll.u32 %v9641_v22, 16  ;;  %v6031_v19 = vrot.slane %v14113_v38, 4  ;;  %v9763_v50 = vor.u32 %v9762_v41, %v9759_v8 }
 0x50e   : > { %v9755_v22 = vsel %vm5030_vm7, %v9745_v49, %v9754_v37  ;;  %v9776_v21 = vrot.slane %v9774_v31, 3  ;;  %v9796_v46 = vrot.slane %v19056_v24, 4  ;;  %v6035_v37 = vrot.slane %v5915_v39, 4  ;;  %v14115_v31 = vld [vmem:[#allocation2 + $0x158] sm:$0xff] }
 0x50f   : > { %v9771_v13 = vor.u32 %v9770_v40, %v9767_v9  ;;  %v9779_v28 = vrot.slane %v9777_v63, 4  ;;  %v6032_v8 = vsel %vm364_vm0, %v6030_v10, %v6031_v19  ;;  %v14114_v9 = vld [vmem:[#allocation2 + $0x148] sm:$0xf]  ;;  %v17690_v40 = vld [vmem:[#allocation2 + $0xb0] sm:$0xff]  ;;  %v6036_v63 = vrot.slane %v14115_v31, 4 }
 0x510   : > { %v6033_v49 = vrot.slane %v14114_v9, 4  ;;  %19527 = vst [vmem:[#allocation118_spill] sm:$0xff] %v17690_v40  ;;  %v19059_v24 = vshrl.u32 %v17690_v40, 16 }
 0x511   : > { %12952 = vmatmul.mubr.msk.bf16.gmra.mrb[64].mxu0 %vm4869_vm5, %v6024_v60  ;;  %v9644_v60 = vld [vmem:[#allocation2 + $0xa0] sm:$0xf]  ;;  %v9772_v41 = vsel %vm5030_vm7, %v9763_v50, %v9771_v13 }
 0x512   : > { %12955 = vmatprep.mubr.msk.bf16.mxu0 %vm4869_vm5, %v6027_v14  ;;  %v9788_v14 = vrot.slane %v9786_v56, 4  ;;  %v9800_v51 = vshrl.u32 %v9644_v60, 16  ;;  %v9803_v38 = vshll.u32 %v9644_v60, 16  ;;  %v6034_v39 = vsel %vm364_vm0, %v6031_v19, %v6033_v49  ;;  %v17708_v49 = vld [vmem:[#allocation2 + $0xc8] sm:$0xff] }
 0x513   : > { %13242 = vmatmul.mubr.msk.bf16.gmra.mrb[48].mxu1 %vm4869_vm5, %v9729_v17  ;;  %v6029_v17 = vsel %vm364_vm0, %v6026_v42, %v6028_v30  ;;  %v9645_v42 = vld [vmem:[#allocation2 + $0xa8] sm:$0xf8]  ;;  %v9780_v30 = vor.u32 %v9779_v28, %v9776_v21  ;;  %v6517_v21 = vshrl.u32 %v17421_v47, 16 }
 0x514   : > { %13245 = vmatprep.mubr.msk.bf16.mxu1 %vm4869_vm5, %v9746_v6  ;;  %v9793_v6 = vrot.slane %v19057_v43, 3  ;;  %v9789_v26 = vor.u32 %v9788_v14, %v9785_v15  ;;  %v9802_v10 = vrot.slane %v9800_v51, 3  ;;  %v9805_v50 = vrot.slane %v9803_v38, 4  ;;  %v9647_v43 = vld [vmem:[#allocation2 + $0xb8] sm:$0xf] }
 0x515   : > { %v9809_v60 = vshrl.u32 %v9645_v42, 16  ;;  %v9812_v9 = vshll.u32 %v9645_v42, 16  ;;  %v6037_v15 = vsel %vm364_vm0, %v6035_v37, %v6036_v63  ;;  %v9781_v28 = vsel %vm5030_vm7, %v9771_v13, %v9780_v30  ;;  %v9648_v38 = vld [vmem:[#allocation2 + $0xc0] sm:$0xf8] }
 0x516   : > { %v9797_v56 = vor.u32 %v9796_v46, %v9793_v6  ;;  %v9806_v14 = vor.u32 %v9805_v50, %v9802_v10  ;;  %v5916_v6 = vld [vmem:[#allocation2 + $0x168] sm:$0xf0]  ;;  %v9826_v19 = vshrl.u32 %v9647_v43, 16  ;;  %v6538_v13 = vshrl.u32 %v17434_v34, 16 }
 0x517   : > { %v9811_v46 = vrot.slane %v9809_v60, 3  ;;  %v9829_v30 = vshll.u32 %v9647_v43, 16  ;;  %v6040_v31 = vrot.slane %v5916_v6, 4  ;;  %v9835_v10 = vshrl.u32 %v9648_v38, 16 }
 0x518   : > { %v9798_v51 = vsel %vm5030_vm7, %v9789_v26, %v9797_v56  ;;  %v6499_v26 = vld [vmem:[#allocation2 + $0x10] sm:$0x1f]  ;;  %v9838_v50 = vshll.u32 %v9648_v38, 16  ;;  %v9807_v60 = vsel %vm5030_vm7, %v9797_v56, %v9806_v14  ;;  %v19066_v43 = vshrl.u32 %v17708_v49, 16 }
 0x519   : > { %12956 = vmatmul.mubr.msk.bf16.gmra.mrb[68].mxu0 %vm4869_vm5, %v6029_v17  ;;  %v19058_v17 = vshll.u32 %v17690_v40, 16  ;;  %v9831_v6 = vrot.slane %v9829_v30, 4  ;;  %v6529_v38 = vshrl.u32 %v6499_v26, 16  ;;  %v6532_v62 = vshll.u32 %v6499_v26, 16 }
 0x51a   : > { %12959 = vmatprep.mubr.msk.bf16.mxu0 %vm4869_vm5, %v6032_v8  ;;  %v9814_v8 = vrot.slane %v9812_v9, 4  ;;  %v19529_v56 = vshll.u32 %v16987_v23, 16  ;;  %v9840_v12 = vrot.slane %v9838_v50, 4  ;;  %v6559_v26 = vshrl.u32 %v17456_v59, 16 }
 0x51b   : > { %13246 = vmatmul.mubr.msk.bf16.gmra.mrb[52].mxu1 %vm4869_vm5, %v9755_v22  ;;  %v6038_v22 = vrot.slane %v17357_v11, 4  ;;  %v9822_v42 = vrot.slane %v19058_v17, 4  ;;  %v6520_v11 = vshll.u32 %v17421_v47, 16  ;;  %v14116_v47 = vld [vmem:[#allocation2 + $0x170] sm:$0xff]  ;;  %v6531_v50 = vrot.slane %v6529_v38, 4 }
 0x51c   : > { %13249 = vmatprep.mubr.msk.bf16.mxu1 %vm4869_vm5, %v9772_v41  ;;  %v9819_v41 = vrot.slane %v19059_v24, 3  ;;  %v6041_v9 = vrot.slane %v14116_v47, 4  ;;  %v9815_v17 = vor.u32 %v9814_v8, %v9811_v46  ;;  %v9828_v24 = vrot.slane %v9826_v19, 3 }
 0x51d   : > { %v6039_v37 = vsel %vm364_vm0, %v6036_v63, %v6038_v22  ;;  %v6519_v63 = vrot.slane %v6517_v21, 4  ;;  %v9650_v22 = vld [vmem:[#allocation2 + $0xd0] sm:$0xf]  ;;  %v6522_v40 = vrot.slane %v6520_v11, 5  ;;  %v6525_v14 = vrot.slane %v19529_v56, 5  ;;  %v17733_v56 = vld [vmem:[#allocation2 + $0xe0] sm:$0xff] }
 0x51e   : > { %v9837_v47 = vrot.slane %v9835_v10, 3  ;;  %v19530_v46 = vshll.u32 %v17708_v49, 16  ;;  %v9852_v21 = vshrl.u32 %v9650_v22, 16  ;;  %v6042_v19 = vsel %vm364_vm0, %v6040_v31, %v6041_v9 }
 0x51f   : > { %v6043_v11 = vrot.slane %v17387_v52, 4  ;;  %v9832_v10 = vor.u32 %v9831_v6, %v9828_v24  ;;  %v6500_v6 = vld [vmem:[#allocation2 + $0x28] sm:$0x1f] }
 0x520   : > { %v9848_v8 = vrot.slane %v19530_v46, 4  ;;  %v6562_v46 = vshll.u32 %v17456_v59, 16  ;;  %v19084_v59 = vshrl.u32 %v17733_v56, 16 }
 0x521   : > { %12960 = vmatmul.mubr.msk.bf16.gmra.mrb[72].mxu0 %vm4869_vm5, %v6034_v39  ;;  %v9845_v39 = vrot.slane %v19066_v43, 3  ;;  %v6044_v38 = vsel %vm364_vm0, %v6041_v9, %v6043_v11  ;;  %v9654_v9 = vld [vmem:[#allocation2 + $0xf0] sm:$0xf8] }
 0x522   : > { %12963 = vmatprep.mubr.msk.bf16.mxu0 %vm4869_vm5, %v6037_v15  ;;  %v19528_v15 = vshrl.u32 %v16987_v23, 16  ;;  %v9651_v23 = vld [vmem:[#allocation2 + $0xd8] sm:$0xf8]  ;;  %v9871_v11 = vrot.slane %v19084_v59, 3 }
 0x523   : > { %13250 = vmatmul.mubr.msk.bf16.gmra.mrb[56].mxu1 %vm4869_vm5, %v9781_v28  ;;  %v9823_v28 = vor.u32 %v9822_v42, %v9819_v41  ;;  %v9855_v41 = vshll.u32 %v9650_v22, 16  ;;  %v6541_v42 = vshll.u32 %v17434_v34, 16  ;;  %v6523_v34 = vor.u32 %v6522_v40, %v6519_v63 }
 0x524   : > { %13253 = vmatprep.mubr.msk.bf16.mxu1 %vm4869_vm5, %v9798_v51  ;;  %v6524_v51 = vrot.slane %v19528_v15, 4  ;;  %v6534_v15 = vrot.slane %v6532_v62, 5  ;;  %v9841_v22 = vor.u32 %v9840_v12, %v9837_v47  ;;  %v9849_v52 = vor.u32 %v9848_v8, %v9845_v39 }
 0x525   : > { %v9824_v30 = vsel %vm5030_vm7, %v9815_v17, %v9823_v28  ;;  %v9854_v17 = vrot.slane %v9852_v21, 3  ;;  %v9857_v24 = vrot.slane %v9855_v41, 4  ;;  %v9861_v62 = vshrl.u32 %v9651_v23, 16 }
 0x526   : > { %v6526_v31 = vor.u32 %v6525_v14, %v6524_v51  ;;  %v9864_v43 = vshll.u32 %v9651_v23, 16  ;;  %v9833_v40 = vsel %vm5030_vm7, %v9823_v28, %v9832_v10  ;;  %v6540_v12 = vrot.slane %v6538_v13, 4  ;;  %v9653_v51 = vld [vmem:[#allocation2 + $0xe8] sm:$0xf]  ;;  %v17750_v13 = vld [vmem:[#allocation2 + $0xf8] sm:$0xff] }
 0x527   : > { %v6543_v63 = vrot.slane %v6541_v42, 5  ;;  %v6550_v39 = vshrl.u32 %v6500_v6, 16  ;;  %v9850_v47 = vsel %vm5030_vm7, %v9841_v22, %v9849_v52  ;;  %v9858_v8 = vor.u32 %v9857_v24, %v9854_v17 }
 0x528   : > { %v6527_v14 = vsel %vm6515_vm8, %v6523_v34, %v6526_v31  ;;  %v6553_v21 = vshll.u32 %v6500_v6, 16  ;;  %v9863_v41 = vrot.slane %v9861_v62, 3  ;;  %v6580_v42 = vshrl.u32 %v17474_v53, 16 }
 0x529   : > { %12964 = vmatmul.mubr.msk.bf16.gmra.mrb[76].mxu0 %vm4869_vm5, %v6039_v37  ;;  %v19067_v37 = vshll.u32 %v17733_v56, 16  ;;  %v6544_v10 = vor.u32 %v6543_v63, %v6540_v12  ;;  %v9887_v34 = vshrl.u32 %v9654_v9, 16  ;;  %v9890_v22 = vshll.u32 %v9654_v9, 16 }
 0x52a   : > { %12967 = vmatprep.mubr.msk.bf16.mxu0 %vm4869_vm5, %v6042_v19  ;;  %v9866_v19 = vrot.slane %v9864_v43, 4  ;;  %v6552_v43 = vrot.slane %v6550_v39, 4  ;;  %v9859_v17 = vsel %vm5030_vm7, %v9849_v52, %v9858_v8  ;;  %v6555_v24 = vrot.slane %v6553_v21, 5 }
 0x52b   : > { %13254 = vmatmul.mubr.msk.bf16.gmra.mrb[60].mxu1 %vm4869_vm5, %v9807_v60  ;;  %v6535_v60 = vor.u32 %v6534_v15, %v6531_v50  ;;  %v9874_v28 = vrot.slane %v19067_v37, 4  ;;  %v9881_v50 = vshll.u32 %v9653_v51, 16  ;;  %v6501_v15 = vld [vmem:[#allocation2 + $0x40] sm:$0x1f]  ;;  %v19083_v6 = vshrl.u32 %v17750_v13, 16 }
 0x52c   : > { %13257 = vmatprep.mubr.msk.bf16.mxu1 %vm4869_vm5, %v9824_v30  ;;  %v9878_v30 = vshrl.u32 %v9653_v51, 16  ;;  %v9867_v62 = vor.u32 %v9866_v19, %v9863_v41  ;;  %v6561_v12 = vrot.slane %v6559_v26, 4  ;;  %v6564_v51 = vrot.slane %v6562_v46, 5 }
 0x52d   : > { %v6536_v23 = vsel %vm6515_vm8, %v6526_v31, %v6535_v60  ;;  %v19082_v31 = vshll.u32 %v17750_v13, 16  ;;  %v9875_v60 = vor.u32 %v9874_v28, %v9871_v11  ;;  %v9883_v63 = vrot.slane %v9881_v50, 4  ;;  %v9657_v11 = vld [vmem:[#allocation2 + $0x108] sm:$0xf8] }
 0x52e   : > { %v6571_v39 = vshrl.u32 %v6501_v15, 16  ;;  %v6574_v9 = vshll.u32 %v6501_v15, 16  ;;  %v9889_v37 = vrot.slane %v9887_v34, 3  ;;  %v6583_v41 = vshll.u32 %v17474_v53, 16  ;;  %v17769_v15 = vld [vmem:[#allocation2 + $0x110] sm:$0xff] }
 0x52f   : > { %v9900_v52 = vrot.slane %v19082_v31, 4  ;;  %v6548_v26 = vsel %vm6515_vm8, %v6544_v10, %v17265_v48  ;;  %v6556_v19 = vor.u32 %v6555_v24, %v6552_v43  ;;  %v9876_v46 = vsel %vm5030_vm7, %v9867_v62, %v9875_v60  ;;  %v19541_v31 = vld [vmem:[#allocation4_spill] sm:$0xff] }
 0x530   : > { %v6576_v50 = vrot.slane %v6574_v9, 5  ;;  %v7870_v34 = vsel %vm5544_vm6, %v17563_v44, 0  ;;  %v6565_v53 = vor.u32 %v6564_v51, %v6561_v12  ;;  %v6582_v12 = vrot.slane %v6580_v42, 4  ;;  %v9659_v9 = vld [vmem:[#allocation2 + $0x118] sm:$0xf] }
 0x531   : > { %12968 = vmatmul.mubr.msk.bf16.gmra.mrb[80].mxu0 %vm4869_vm5, %v6044_v38  ;;  %v9880_v38 = vrot.slane %v9878_v30, 3  ;;  %v6573_v30 = vrot.slane %v6571_v39, 4  ;;  %v6557_v44 = vsel %vm6515_vm8, %v17265_v48, %v6556_v19  ;;  %v19081_v39 = vshrl.u32 %v17769_v15, 16 }
 0x532   : > { %12973 = vmatprep.mubr.msk.bf16.mxu0 %vm4869_vm5, %v6527_v14  ;;  %v9892_v14 = vrot.slane %v9890_v22, 4  ;;  %v6601_v22 = vshrl.u32 %v17500_v57, 16  ;;  %v6585_v51 = vrot.slane %v6583_v41, 5  ;;  %v6569_v48 = vsel %vm6515_vm8, %v6565_v53, %v17288_v35 }
 0x533   : > { %13258 = vmatmul.mubr.msk.bf16.gmra.mrb[0].mxu1 %vm4869_vm5, %v9833_v40  ;;  %v9656_v40 = vld [vmem:[#allocation2 + $0x100] sm:$0xf]  ;;  %v9884_v28 = vor.u32 %v9883_v63, %v9880_v38  ;;  %v6502_v38 = vld [vmem:[#allocation2 + $0x58] sm:$0x1f]  ;;  %v9916_v63 = vshll.u32 %v9657_v11, 16  ;;  %v9923_v42 = vrot.slane %v19081_v39, 3 }
 0x534   : > { %13261 = vmatprep.mubr.msk.bf16.mxu1 %vm4869_vm5, %v9850_v47  ;;  %v9897_v47 = vrot.slane %v19083_v6, 3  ;;  %v9904_v8 = vshrl.u32 %v9656_v40, 16  ;;  %v9907_v21 = vshll.u32 %v9656_v40, 16  ;;  %v9893_v10 = vor.u32 %v9892_v14, %v9889_v37  ;;  %v14117_v14 = vld [vmem:[%s18804_s3 + $0x8] sm:$0x3] }
 0x535   : > { %v9913_v40 = vshrl.u32 %v9657_v11, 16  ;;  %v9885_v37 = vsel %vm5030_vm7, %v9875_v60, %v9884_v28  ;;  %v9660_v60 = vld [vmem:[#allocation2 + $0x120] sm:$0xf8]  ;;  %v9918_v19 = vrot.slane %v9916_v63, 4  ;;  %v17794_v11 = vld [vmem:[#allocation2 + $0x128] sm:$0xff]  ;;  %v6604_v28 = vshll.u32 %v17500_v57, 16 }
 0x536   : > { %v9901_v43 = vor.u32 %v9900_v52, %v9897_v47  ;;  %v9906_v24 = vrot.slane %v9904_v8, 3  ;;  %v9909_v62 = vrot.slane %v9907_v21, 4  ;;  %v6592_v47 = vshrl.u32 %v6502_v38, 16 }
 0x537   : > { %v6595_v21 = vshll.u32 %v6502_v38, 16  ;;  %v19542_v6 = vshrl.u32 %v19541_v31, 16 }
 0x538   : > { %v9902_v52 = vsel %vm5030_vm7, %v9893_v10, %v9901_v43  ;;  %v9910_v8 = vor.u32 %v9909_v62, %v9906_v24  ;;  %v6594_v53 = vrot.slane %v6592_v47, 4  ;;  %v6503_v10 = vld [vmem:[#allocation2 + $0x70] sm:$0x1f]  ;;  %v9939_v24 = vshrl.u32 %v9660_v60, 16 }
 0x539   : > { %12974 = vmatmul.mubr.msk.bf16.vlgmr.msra.gmra.mrb[20].mxu0 %vm4869_vm5, %v6536_v23  ;;  %v19076_v23 = vshll.u32 %v17769_v15, 16  ;;  %v9942_v62 = vshll.u32 %v9660_v60, 16  ;;  %v6597_v57 = vrot.slane %v6595_v21, 5  ;;  %v6616_v47 = vshll.u32 %v6503_v10, 16 }
 0x53a   : > { %12977 = vmatprep.mubr.msk.bf16.mxu0 %vm4869_vm5, %v6548_v26  ;;  %13038 = vmatpush3.bf16.msra.mxu0 %v7870_v34  ;;  %v9915_v26 = vrot.slane %v9913_v40, 3  ;;  %v9933_v34 = vshll.u32 %v9659_v9, 16  ;;  %v9911_v38 = vsel %vm5030_vm7, %v9901_v43, %v9910_v8  ;;  %v19071_v40 = vshrl.u32 %v17794_v11, 16 }
 0x53b   : > { %13262 = vmatmul.mubr.msk.bf16.gmra.mrb[4].mxu1 %vm4869_vm5, %v9859_v17  ;;  %v6577_v17 = vor.u32 %v6576_v50, %v6573_v30  ;;  %14016 = vmatprep.subr.msk.bf16.mxu0 %vm5544_vm6, %v14117_v14  ;;  %v9926_v41 = vrot.slane %v19076_v23, 4  ;;  %v6586_v50 = vor.u32 %v6585_v51, %v6582_v12  ;;  %v6603_v12 = vrot.slane %v6601_v22, 4  ;;  %v17892_v23 = vld [vmem:[#allocation2 + $0x190] sm:$0xf] }
 0x53c   : > { %13265 = vmatprep.mubr.msk.bf16.mxu1 %vm4869_vm5, %v9876_v46  ;;  %v9930_v46 = vshrl.u32 %v9659_v9, 16  ;;  %v9919_v63 = vor.u32 %v9918_v19, %v9915_v26  ;;  %v9935_v51 = vrot.slane %v9933_v34, 4  ;;  %v6606_v9 = vrot.slane %v6604_v28, 5  ;;  %v9663_v34 = vld [vmem:[#allocation2 + $0x138] sm:$0xf8] }
 0x53d   : > { %v6578_v30 = vsel %vm6515_vm8, %v17288_v35, %v6577_v17  ;;  %v19070_v35 = vshll.u32 %v17794_v11, 16  ;;  %v9927_v17 = vor.u32 %v9926_v41, %v9923_v42  ;;  %v6613_v14 = vshrl.u32 %v6503_v10, 16  ;;  %v17814_v10 = vld [vmem:[#allocation2 + $0x140] sm:$0xff] }
 0x53e   : > { %v9941_v60 = vrot.slane %v9939_v24, 3  ;;  %v6622_v26 = vshrl.u32 %v17512_v54, 16  ;;  %v6590_v22 = vsel %vm6515_vm8, %v6586_v50, %v17318_v7  ;;  %v6598_v42 = vor.u32 %v6597_v57, %v6594_v53 }
 0x53f   : > { %v9952_v43 = vrot.slane %v19070_v35, 4  ;;  %v9928_v19 = vsel %vm5030_vm7, %v9919_v63, %v9927_v17  ;;  %v6618_v28 = vrot.slane %v6616_v47, 5  ;;  %v6625_v24 = vshll.u32 %v17512_v54, 16 }
 0x540   : > { %v19068_v54 = vshll.u32 %v17814_v10, 16 }
 0x541   : > { %12978 = vmatmul.mubr.msk.bf16.gmra.mrb[24].mxu0 %vm4869_vm5, %v6557_v44  ;;  %v9932_v44 = vrot.slane %v9930_v46, 3  ;;  %v6615_v46 = vrot.slane %v6613_v14, 4  ;;  %v19069_v14 = vshrl.u32 %v17814_v10, 16  ;;  %v6627_v47 = vrot.slane %v6625_v24, 5 }
 0x542   : > { %12981 = vmatprep.mubr.msk.bf16.mxu0 %vm4869_vm5, %v6569_v48  ;;  %v9944_v48 = vrot.slane %v9942_v62, 4  ;;  %v6607_v62 = vor.u32 %v6606_v9, %v6603_v12  ;;  %v6624_v9 = vrot.slane %v6622_v26, 4  ;;  %v17833_v26 = vld [vmem:[#allocation2 + $0x158] sm:$0xff] }
 0x543   : > { %13266 = vmatmul.mubr.msk.bf16.gmra.mrb[8].mxu1 %vm4869_vm5, %v9885_v37  ;;  %v9662_v37 = vld [vmem:[#allocation2 + $0x130] sm:$0xf]  ;;  %v9936_v41 = vor.u32 %v9935_v51, %v9932_v44  ;;  %v6504_v44 = vld [vmem:[#allocation2 + $0x88] sm:$0x1f]  ;;  %v9968_v51 = vshll.u32 %v9663_v34, 16  ;;  %v6619_v12 = vor.u32 %v6618_v28, %v6615_v46 }
 0x544   : > { %13269 = vmatprep.mubr.msk.bf16.mxu1 %vm4869_vm5, %v9902_v52  ;;  %v9949_v52 = vrot.slane %v19071_v40, 3  ;;  %v9956_v8 = vshrl.u32 %v9662_v37, 16  ;;  %v9959_v21 = vshll.u32 %v9662_v37, 16  ;;  %v9945_v50 = vor.u32 %v9944_v48, %v9941_v60  ;;  %v9665_v60 = vld [vmem:[#allocation2 + $0x148] sm:$0xf] }
 0x545   : > { %v9965_v37 = vshrl.u32 %v9663_v34, 16  ;;  %v6611_v48 = vsel %vm6515_vm8, %v6607_v62, %v17347_v1  ;;  %v9970_v34 = vrot.slane %v9968_v51, 4  ;;  %v9982_v28 = vshrl.u32 %v9665_v60, 16 }
 0x546   : > { %v9953_v63 = vor.u32 %v9952_v43, %v9949_v52  ;;  %v9958_v53 = vrot.slane %v9956_v8, 3  ;;  %v9961_v57 = vrot.slane %v9959_v21, 4  ;;  %v6637_v8 = vshll.u32 %v6504_v44, 16  ;;  %v9666_v21 = vld [vmem:[#allocation2 + $0x150] sm:$0xf8] }
 0x547   : > { %v9985_v24 = vshll.u32 %v9665_v60, 16  ;;  %v6620_v62 = vsel %vm6515_vm8, %v17347_v1, %v6619_v12  ;;  %v19075_v51 = vshrl.u32 %v17833_v26, 16  ;;  %v19072_v60 = vshll.u32 %v17833_v26, 16 }
 0x548   : > { %v9954_v52 = vsel %vm5030_vm7, %v9945_v50, %v9953_v63  ;;  %v9962_v43 = vor.u32 %v9961_v57, %v9958_v53  ;;  %v6628_v50 = vor.u32 %v6627_v47, %v6624_v9  ;;  %v6505_v57 = vld [vmem:[#allocation2 + $0xa0] sm:$0x1f] }
 0x549   : > { %12982 = vmatmul.mubr.msk.bf16.gmra.mrb[28].mxu0 %vm4869_vm5, %v6578_v30  ;;  %v6599_v30 = vsel %vm6515_vm8, %v17318_v7, %v6598_v42  ;;  %v9975_v7 = vrot.slane %v19069_v14, 3  ;;  %v14118_v42 = vld [vmem:[#allocation2 + $0x90] sm:$0xf0]  ;;  %v9984_v14 = vrot.slane %v9982_v28, 3  ;;  %v9987_v1 = vrot.slane %v9985_v24, 4 }
 0x54a   : > { %12985 = vmatprep.mubr.msk.bf16.mxu0 %vm4869_vm5, %v6590_v22  ;;  %v6634_v22 = vshrl.u32 %v6504_v44, 16  ;;  %v6646_v46 = vshll.u32 %v14118_v42, 16  ;;  %v9991_v44 = vshrl.u32 %v9666_v21, 16  ;;  %v6655_v47 = vshrl.u32 %v6505_v57, 16  ;;  %v9669_v28 = vld [vmem:[#allocation2 + $0x168] sm:$0xf8] }
 0x54b   : > { %13270 = vmatmul.mubr.msk.bf16.gmra.mrb[12].mxu1 %vm4869_vm5, %v9911_v38  ;;  %v9937_v38 = vsel %vm5030_vm7, %v9927_v17, %v9936_v41  ;;  %v9978_v17 = vrot.slane %v19068_v54, 4  ;;  %v6643_v41 = vshrl.u32 %v14118_v42, 16  ;;  %v6639_v42 = vrot.slane %v6637_v8, 5  ;;  %v17855_v24 = vld [vmem:[#allocation2 + $0x170] sm:$0xff] }
 0x54c   : > { %13273 = vmatprep.mubr.msk.bf16.mxu1 %vm4869_vm5, %v9928_v19  ;;  %v9967_v19 = vrot.slane %v9965_v37, 3  ;;  %v6636_v53 = vrot.slane %v6634_v22, 4  ;;  %v9994_v37 = vshll.u32 %v9666_v21, 16  ;;  %v6648_v9 = vrot.slane %v6646_v46, 5 }
 0x54d   : > { %v9979_v54 = vor.u32 %v9978_v17, %v9975_v7  ;;  %v6645_v12 = vrot.slane %v6643_v41, 4  ;;  %v6658_v22 = vshll.u32 %v6505_v57, 16  ;;  %v10001_v21 = vrot.slane %v19075_v51, 3 }
 0x54e   : > { %v9996_v35 = vrot.slane %v9994_v37, 4  ;;  %v10004_v40 = vrot.slane %v19072_v60, 4  ;;  %v6640_v7 = vor.u32 %v6639_v42, %v6636_v53  ;;  %v9988_v17 = vor.u32 %v9987_v1, %v9984_v14  ;;  %v6506_v53 = vld [vmem:[#allocation2 + $0xb8] sm:$0x1f] }
 0x54f   : > { %v6649_v57 = vor.u32 %v6648_v9, %v6645_v12  ;;  %v6660_v37 = vrot.slane %v6658_v22, 5  ;;  %v10017_v42 = vshrl.u32 %v9669_v28, 16  ;;  %v19074_v1 = vshrl.u32 %v17855_v24, 16 }
 0x550   : > { %v10005_v14 = vor.u32 %v10004_v40, %v10001_v21 }
 0x551   : > { %12986 = vmatmul.mubr.msk.bf16.gmra.mrb[32].mxu0 %vm4869_vm5, %v6599_v30  ;;  %v9963_v30 = vsel %vm5030_vm7, %v9953_v63, %v9962_v43  ;;  %v14119_v63 = vld [vmem:[#allocation2 + $0xa8] sm:$0xf0] }
 0x552   : > { %12989 = vmatprep.mubr.msk.bf16.mxu0 %vm4869_vm5, %v6611_v48  ;;  %v17844_v48 = vld [vmem:[#allocation2 + $0x160] sm:$0xf]  ;;  %v6664_v43 = vshrl.u32 %v14119_v63, 16  ;;  %v6667_v8 = vshll.u32 %v14119_v63, 16  ;;  %v19073_v63 = vshll.u32 %v17855_v24, 16 }
 0x553   : > { %13274 = vmatmul.mubr.msk.bf16.gmra.mrb[16].mxu1 %vm4869_vm5, %v9937_v38  ;;  %v9971_v38 = vor.u32 %v9970_v34, %v9967_v19  ;;  %v6632_v19 = vsel %vm6515_vm8, %v6628_v50, %v17379_v29  ;;  %v10008_v41 = vshrl.u32 %v17844_v48, 16  ;;  %v10011_v46 = vshll.u32 %v17844_v48, 16 }
 0x554   : > { %13277 = vmatprep.mubr.msk.bf16.mxu1 %vm4869_vm5, %v9954_v52  ;;  %v9993_v52 = vrot.slane %v9991_v44, 3  ;;  %v6657_v44 = vrot.slane %v6655_v47, 4  ;;  %v6653_v47 = vsel %vm6515_vm8, %v6649_v57, %v17407_v27  ;;  %v6669_v40 = vrot.slane %v6667_v8, 5 }
 0x555   : > { %v9980_v34 = vsel %vm5030_vm7, %v9971_v38, %v9979_v54  ;;  %v10020_v38 = vshll.u32 %v9669_v28, 16  ;;  %v10010_v12 = vrot.slane %v10008_v41, 3  ;;  %v10013_v9 = vrot.slane %v10011_v46, 4  ;;  %v14120_v46 = vld [vmem:[#allocation2 + $0xc0] sm:$0xf0] }
 0x556   : > { %v9997_v50 = vor.u32 %v9996_v35, %v9993_v52  ;;  %v6661_v22 = vor.u32 %v6660_v37, %v6657_v44  ;;  %v6666_v35 = vrot.slane %v6664_v43, 4  ;;  %v17868_v52 = vld [vmem:[#allocation2 + $0x178] sm:$0xf]  ;;  %v10019_v28 = vrot.slane %v10017_v42, 3 }
 0x557   : > { %v10022_v60 = vrot.slane %v10020_v38, 4  ;;  %v6679_v41 = vshll.u32 %v6506_v53, 16  ;;  %v10034_v43 = vshrl.u32 %v17868_v52, 16  ;;  %v10037_v8 = vshll.u32 %v17868_v52, 16 }
 0x558   : > { %v10006_v21 = vsel %vm5030_vm7, %v9997_v50, %v10005_v14  ;;  %v6685_v57 = vshrl.u32 %v14120_v46, 16  ;;  %v6688_v44 = vshll.u32 %v14120_v46, 16  ;;  %v6662_v37 = vsel %vm6515_vm8, %v17407_v27, %v6661_v22 }
 0x559   : > { %12990 = vmatmul.mubr.msk.bf16.gmra.mrb[36].mxu0 %vm4869_vm5, %v6620_v62  ;;  %v6641_v62 = vsel %vm6515_vm8, %v17379_v29, %v6640_v7  ;;  %v10027_v29 = vrot.slane %v19074_v1, 3  ;;  %v17875_v7 = vld [vmem:[#allocation2 + $0x188] sm:$0xff]  ;;  %v6670_v50 = vor.u32 %v6669_v40, %v6666_v35  ;;  %v10023_v46 = vor.u32 %v10022_v60, %v10019_v28  ;;  %v6507_v35 = vld [vmem:[#allocation2 + $0xd0] sm:$0x1f]  ;;  %v14121_v60 = vld [vmem:[#allocation2 + $0xd8] sm:$0xf0] }
 0x55a   : > { %12993 = vmatprep.mubr.msk.bf16.mxu0 %vm4869_vm5, %v6632_v19  ;;  %v6676_v19 = vshrl.u32 %v6506_v53, 16  ;;  %v19080_v38 = vshrl.u32 %v17875_v7, 16  ;;  %v10036_v1 = vrot.slane %v10034_v43, 3  ;;  %v10039_v51 = vrot.slane %v10037_v8, 4  ;;  %v9675_v43 = vld [vmem:[#allocation2 + $0x198] sm:$0xf8] }
 0x55b   : > { %13278 = vmatmul.mubr.msk.bf16.gmra.mrb[20].mxu1 %vm4869_vm5, %v9963_v30  ;;  %v9989_v30 = vsel %vm5030_vm7, %v9979_v54, %v9988_v17  ;;  %v10030_v54 = vrot.slane %v19073_v63, 4  ;;  %v10014_v17 = vor.u32 %v10013_v9, %v10010_v12  ;;  %v19077_v12 = vshll.u32 %v17875_v7, 16  ;;  %v17897_v8 = vld [vmem:[#allocation2 + $0x1a0] sm:$0xff] }
 0x55c   : > { %13281 = vmatprep.mubr.msk.bf16.mxu1 %vm4869_vm5, %v9980_v34  ;;  %v9672_v34 = vld [vmem:[#allocation2 + $0x180] sm:$0xf8]  ;;  %v6678_v9 = vrot.slane %v6676_v19, 4  ;;  %v6687_v27 = vrot.slane %v6685_v57, 4  ;;  %v6690_v22 = vrot.slane %v6688_v44, 5  ;;  %v6706_v19 = vshrl.u32 %v14121_v60, 16 }
 0x55d   : > { %v10043_v53 = vshrl.u32 %v9672_v34, 16  ;;  %v10046_v42 = vshll.u32 %v9672_v34, 16  ;;  %v10031_v63 = vor.u32 %v10030_v54, %v10027_v29  ;;  %v10056_v34 = vrot.slane %v19077_v12, 4  ;;  %19531 = vst [vmem:[#allocation119_spill] sm:$0xff] %v17897_v8 }
 0x55e   : > { %v10040_v54 = vor.u32 %v10039_v51, %v10036_v1  ;;  %v6709_v57 = vshll.u32 %v14121_v60, 16  ;;  %v6691_v44 = vor.u32 %v6690_v22, %v6687_v27  ;;  %v10063_v51 = vshll.u32 %v17892_v23, 16 }
 0x55f   : > { %v10048_v40 = vrot.slane %v10046_v42, 4  ;;  %v10032_v28 = vsel %vm5030_vm7, %v10023_v46, %v10031_v63  ;;  %v10069_v1 = vshrl.u32 %v9675_v43, 16  ;;  %v19079_v46 = vshrl.u32 %v17897_v8, 16 }
 0x561   : > { %12994 = vmatmul.mubr.msk.bf16.gmra.mrb[40].mxu0 %vm4869_vm5, %v6641_v62  ;;  %v10015_v62 = vsel %vm5030_vm7, %v10005_v14, %v10014_v17  ;;  %v6674_v14 = vsel %vm6515_vm8, %v6670_v50, %v17428_v16  ;;  %v6697_v17 = vshrl.u32 %v6507_v35, 16 }
 0x562   : > { %12997 = vmatprep.mubr.msk.bf16.mxu0 %vm4869_vm5, %v6653_v47  ;;  %v10045_v47 = vrot.slane %v10043_v53, 3  ;;  %v10060_v53 = vshrl.u32 %v17892_v23, 16 }
 0x563   : > { %13282 = vmatmul.mubr.msk.bf16.gmra.mrb[24].mxu1 %vm4869_vm5, %v9989_v30  ;;  %v6681_v30 = vrot.slane %v6679_v41, 5  ;;  %v6700_v41 = vshll.u32 %v6507_v35, 16  ;;  %v6699_v27 = vrot.slane %v6697_v17, 4  ;;  %v6695_v35 = vsel %vm6515_vm8, %v6691_v44, %v17448_v25 }
 0x564   : > { %13285 = vmatprep.mubr.msk.bf16.mxu1 %vm4869_vm5, %v10006_v21  ;;  %v10053_v21 = vrot.slane %v19080_v38, 3  ;;  %v10049_v50 = vor.u32 %v10048_v40, %v10045_v47  ;;  %v10062_v47 = vrot.slane %v10060_v53, 3  ;;  %v6708_v40 = vrot.slane %v6706_v19, 4  ;;  %v6509_v38 = vld [vmem:[#allocation2 + $0x100] sm:$0x1f] }
 0x565   : > { %v6682_v29 = vor.u32 %v6681_v30, %v6678_v9  ;;  %v10072_v9 = vshll.u32 %v9675_v43, 16  ;;  %v19078_v30 = vshll.u32 %v17897_v8, 16  ;;  %v6702_v22 = vrot.slane %v6700_v41, 5 }
 0x566   : > { %v10057_v42 = vor.u32 %v10056_v34, %v10053_v21  ;;  %v6711_v21 = vrot.slane %v6709_v57, 5  ;;  %v6508_v34 = vld [vmem:[#allocation2 + $0xe8] sm:$0x1f]  ;;  %v10071_v43 = vrot.slane %v10069_v1, 3  ;;  %v14122_v57 = vld [vmem:[#allocation2 + $0xf0] sm:$0xf0] }
 0x567   : > { %v10074_v12 = vrot.slane %v10072_v9, 4  ;;  %v6718_v19 = vshrl.u32 %v6508_v34, 16  ;;  %v6727_v44 = vshrl.u32 %v14122_v57, 16 }
 0x568   : > { %v10058_v60 = vsel %vm5030_vm7, %v10049_v50, %v10057_v42  ;;  %v6712_v50 = vor.u32 %v6711_v21, %v6708_v40  ;;  %v17931_v21 = vld [vmem:[#allocation2 + $0x30] sm:$0xf0] }
 0x569   : > { %12998 = vmatmul.mubr.msk.bf16.gmra.mrb[44].mxu0 %vm4869_vm5, %v6662_v37  ;;  %v6683_v37 = vsel %vm6515_vm8, %v17428_v16, %v6682_v29  ;;  %v10079_v16 = vrot.slane %v19079_v46, 3  ;;  %v6703_v29 = vor.u32 %v6702_v22, %v6699_v27  ;;  %v10075_v1 = vor.u32 %v10074_v12, %v10071_v43  ;;  %v14123_v43 = vld [vmem:[#allocation2 + $0x108] sm:$0xf0] }
 0x56a   : > { %13001 = vmatprep.mubr.msk.bf16.mxu0 %vm4869_vm5, %v6674_v14  ;;  %v10065_v14 = vrot.slane %v10063_v51, 4  ;;  %v6730_v51 = vshll.u32 %v14122_v57, 16  ;;  %v6716_v46 = vsel %vm6515_vm8, %v6712_v50, %v17467_v45 }
 0x56b   : > { %13286 = vmatmul.mubr.msk.bf16.gmra.mrb[28].mxu1 %vm4869_vm5, %v10015_v62  ;;  %v10041_v62 = vsel %vm5030_vm7, %v10031_v63, %v10040_v54  ;;  %v10082_v63 = vrot.slane %v19078_v30, 4  ;;  %v6721_v54 = vshll.u32 %v6508_v34, 16  ;;  %v6704_v34 = vsel %vm6515_vm8, %v17448_v25, %v6703_v29 }
 0x56c   : > { %13289 = vmatprep.mubr.msk.bf16.mxu1 %vm4869_vm5, %v10032_v28  ;;  %v17913_v28 = vld [vmem:[#allocation2 + $0x1a8] sm:$0xf]  ;;  %v10066_v53 = vor.u32 %v10065_v14, %v10062_v47  ;;  %v6732_v40 = vrot.slane %v6730_v51, 5  ;;  %v6739_v14 = vshrl.u32 %v6509_v38, 16  ;;  %v6742_v25 = vshll.u32 %v6509_v38, 16 }
 0x56d   : > { %v10086_v17 = vshrl.u32 %v17913_v28, 16  ;;  %v10089_v41 = vshll.u32 %v17913_v28, 16  ;;  %v10083_v9 = vor.u32 %v10082_v63, %v10079_v16  ;;  %v6723_v27 = vrot.slane %v6721_v54, 5 }
 0x56e   : > { %v10067_v30 = vsel %vm5030_vm7, %v10057_v42, %v10066_v53  ;;  %v6748_v42 = vshrl.u32 %v14123_v43, 16  ;;  %v6751_v16 = vshll.u32 %v14123_v43, 16  ;;  %v10612_v29 = vrot.slane %v17931_v21, 4  ;;  %v6510_v53 = vld [vmem:[#allocation2 + $0x118] sm:$0x1f] }
 0x56f   : > { %v10091_v22 = vrot.slane %v10089_v41, 4  ;;  %v10084_v47 = vsel %vm5030_vm7, %v10075_v1, %v10083_v9  ;;  %v6741_v41 = vrot.slane %v6739_v14, 4  ;;  %v6744_v57 = vrot.slane %v6742_v25, 5 }
 0x570   : > { %v6750_v38 = vrot.slane %v6748_v42, 4  ;;  %v6760_v51 = vshrl.u32 %v6510_v53, 16  ;;  %v6763_v1 = vshll.u32 %v6510_v53, 16  ;;  %v14128_v42 = vld [vmem:[%s18804_s3 + $0x10] sm:$0x3] }
 0x571   : > { %13002 = vmatmul.mubr.msk.bf16.gmra.mrb[48].mxu0 %vm4869_vm5, %v6683_v37  ;;  %v6720_v37 = vrot.slane %v6718_v19, 4  ;;  %v14124_v19 = vld [vmem:[#allocation2 + $0x38] sm:$0xff] }
 0x572   : > { %13005 = vmatprep.mubr.msk.bf16.mxu0 %vm4869_vm5, %v6695_v35  ;;  %v6729_v35 = vrot.slane %v6727_v44, 4  ;;  %v10613_v54 = vrot.slane %v14124_v19, 4  ;;  %v6753_v44 = vrot.slane %v6751_v16, 5  ;;  %v6765_v14 = vrot.slane %v6763_v1, 5  ;;  %v14130_v53 = vld [vmem:[#allocation2 + $0x138] sm:$0xf0] }
 0x573   : > { %13290 = vmatmul.mubr.msk.bf16.gmra.mrb[32].mxu1 %vm4869_vm5, %v10041_v62  ;;  %v10088_v62 = vrot.slane %v10086_v17, 3  ;;  %v6724_v12 = vor.u32 %v6723_v27, %v6720_v37  ;;  %v17946_v37 = vld [vmem:[#allocation2 + $0x48] sm:$0xf0]  ;;  %v11597_v16 = vsel %vm5544_vm6, %v14128_v42, 0 }
 0x574   : > { %13293 = vmatprep.mubr.msk.bf16.mxu1 %vm4869_vm5, %v10058_v60  ;;  %v6733_v63 = vor.u32 %v6732_v40, %v6729_v35  ;;  %v10614_v50 = vsel %vm364_vm0, %v10612_v29, %v10613_v54  ;;  %v14127_v40 = vld [vmem:[#allocation2 + $0x50] sm:$0xff] }
 0x575   : > { %v10092_v60 = vor.u32 %v10091_v22, %v10088_v62  ;;  %v6725_v17 = vsel %vm6515_vm8, %v17467_v45, %v6724_v12  ;;  %v6745_v45 = vor.u32 %v6744_v57, %v6741_v41  ;;  %v6754_v62 = vor.u32 %v6753_v44, %v6750_v38  ;;  %v14126_v22 = vld [vmem:[#allocation2 + $0x120] sm:$0xf0]  ;;  %v6511_v29 = vld [vmem:[#allocation2 + $0x130] sm:$0x1f] }
 0x576   : > { %v6772_v35 = vshll.u32 %v14126_v22, 16  ;;  %v10618_v12 = vrot.slane %v14127_v40, 4  ;;  %v17961_v41 = vld [vmem:[#allocation2 + $0x60] sm:$0xf0]  ;;  %v6781_v38 = vshrl.u32 %v6511_v29, 16  ;;  %v6784_v44 = vshll.u32 %v6511_v29, 16 }
 0x577   : > { %v6746_v25 = vsel %vm6515_vm8, %v17488_v2, %v6745_v45  ;;  %v10622_v1 = vrot.slane %v17961_v41, 4  ;;  %v14131_v45 = vld [vmem:[#allocation2 + $0x68] sm:$0xff] }
 0x578   : > { %v6512_v40 = vld [vmem:[#allocation2 + $0x148] sm:$0x1f] }
 0x579   : > { %13006 = vmatmul.mubr.msk.bf16.gmra.mrb[52].mxu0 %vm4869_vm5, %v6704_v34  ;;  %v6769_v34 = vshrl.u32 %v14126_v22, 16  ;;  %v6783_v22 = vrot.slane %v6781_v38, 4 }
 0x57a   : > { %13009 = vmatprep.mubr.msk.bf16.mxu0 %vm4869_vm5, %v6716_v46  ;;  %v6737_v46 = vsel %vm6515_vm8, %v6733_v63, %v17488_v2  ;;  %v6758_v63 = vsel %vm6515_vm8, %v6754_v62, %v17507_v58 }
 0x57b   : > { %13294 = vmatmul.mubr.msk.bf16.gmra.mrb[36].mxu1 %vm4869_vm5, %v10067_v30  ;;  %v10093_v30 = vsel %vm5030_vm7, %v10083_v9, %v10092_v60  ;;  %v14125_v9 = vld [vmem:[#allocation2 + $0x40] sm:$0xf]  ;;  %v6762_v60 = vrot.slane %v6760_v51, 4  ;;  %v6771_v19 = vrot.slane %v6769_v34, 4  ;;  %v6786_v34 = vrot.slane %v6784_v44, 5 }
 0x57c   : > { %13297 = vmatprep.mubr.msk.bf16.mxu1 %vm4869_vm5, %v10084_v47  ;;  %v10615_v27 = vrot.slane %v14125_v9, 4  ;;  %v10617_v47 = vrot.slane %v17946_v37, 4  ;;  %v10623_v9 = vrot.slane %v14131_v45, 4  ;;  %v6513_v45 = vld [vmem:[#allocation2 + $0x160] sm:$0x1f] }
 0x57d   : > { %v6766_v2 = vor.u32 %v6765_v14, %v6762_v60 }
 0x57e   : > { %v10616_v43 = vsel %vm364_vm0, %v10613_v54, %v10615_v27  ;;  %v14129_v54 = vld [vmem:[#allocation2 + $0x58] sm:$0xf]  ;;  %v10624_v14 = vsel %vm364_vm0, %v10622_v1, %v10623_v9 }
 0x57f   : > { %v10620_v57 = vrot.slane %v14129_v54, 4  ;;  %v6767_v27 = vsel %vm6515_vm8, %v17507_v58, %v6766_v2  ;;  %v14132_v58 = vld [vmem:[#allocation2 + $0x70] sm:$0xf] }
 0x580   : > { %v10625_v42 = vrot.slane %v14132_v58, 4 }
 0x581   : > { %13010 = vmatmul.mubr.msk.bf16.gmra.mrb[56].mxu0 %vm4869_vm5, %v6725_v17  ;;  %v6774_v17 = vrot.slane %v6772_v35, 5  ;;  %v10621_v62 = vsel %vm364_vm0, %v10618_v12, %v10620_v57 }
 0x582   : > { %13013 = vmatprep.mubr.msk.bf16.mxu0 %vm4869_vm5, %v6737_v46  ;;  %v6790_v46 = vshrl.u32 %v14130_v53, 16 }
 0x583   : > { %13298 = vmatmul.mubr.msk.bf16.gmra.mrb[40].mxu1 %vm4869_vm5, %v10093_v30  ;;  %v10619_v30 = vsel %vm364_vm0, %v10617_v47, %v10618_v12  ;;  %v6775_v51 = vor.u32 %v6774_v17, %v6771_v19  ;;  %v6802_v12 = vshrl.u32 %v6512_v40, 16  ;;  %v14133_v19 = vld [vmem:[#allocation2 + $0x80] sm:$0xff] }
 0x584   : > { %13303 = vmatprep.mubr.msk.bf16.mxu1 %vm4869_vm5, %v10614_v50  ;;  %v6793_v50 = vshll.u32 %v14130_v53, 16  ;;  %v6792_v35 = vrot.slane %v6790_v46, 4  ;;  %v10628_v17 = vrot.slane %v14133_v19, 4  ;;  %v10626_v53 = vsel %vm364_vm0, %v10623_v9, %v10625_v42 }
 0x585   : > { %v6779_v60 = vsel %vm6515_vm8, %v6775_v51, %v17526_v55  ;;  %v6804_v57 = vrot.slane %v6802_v12, 4 }
 0x586   : > { %v6795_v47 = vrot.slane %v6793_v50, 5 }
 0x589   : > { %13014 = vmatmul.mubr.msk.bf16.gmra.mrb[60].mxu0 %vm4869_vm5, %v6746_v25  ;;  %v17974_v25 = vld [vmem:[#allocation2 + $0x78] sm:$0xf0] }
 0x58a   : > { %13017 = vmatprep.mubr.msk.bf16.mxu0 %vm4869_vm5, %v6758_v63  ;;  %v6796_v63 = vor.u32 %v6795_v47, %v6792_v35  ;;  %v10627_v29 = vrot.slane %v17974_v25, 4  ;;  %v6823_v47 = vshrl.u32 %v6513_v45, 16 }
 0x58b   : > { %13304 = vmatmul.mubr.msk.bf16.vlgmr.msra.gmra.mrb[44].mxu1 %vm4869_vm5, %v10616_v43  ;;  %v6787_v43 = vor.u32 %v6786_v34, %v6783_v22  ;;  %v14135_v22 = vld [vmem:[#allocation2 + $0x88] sm:$0xf] }
 0x58c   : > { %13368 = vmatpush3.bf16.msra.mxu1 %v11597_v16  ;;  %13307 = vmatprep.mubr.msk.bf16.mxu1 %vm4869_vm5, %v10619_v30  ;;  %v6805_v16 = vshll.u32 %v6512_v40, 16  ;;  %v14134_v30 = vld [vmem:[#allocation2 + $0x150] sm:$0xf0]  ;;  %v6800_v46 = vsel %vm6515_vm8, %v6796_v63, %v17546_v0  ;;  %v10629_v50 = vsel %vm364_vm0, %v10627_v29, %v10628_v17  ;;  %v10630_v34 = vrot.slane %v14135_v22, 4 }
 0x58d   : > { %v6811_v2 = vshrl.u32 %v14134_v30, 16  ;;  %v6814_v54 = vshll.u32 %v14134_v30, 16  ;;  %v6788_v44 = vsel %vm6515_vm8, %v17526_v55, %v6787_v43  ;;  %v14136_v55 = vld [vmem:[#allocation2 + $0x168] sm:$0xf0]  ;;  %v6826_v40 = vshll.u32 %v6513_v45, 16  ;;  %v14137_v43 = vld [vmem:[#allocation2 + $0x98] sm:$0xff] }
 0x58e   : > { %v6807_v38 = vrot.slane %v6805_v16, 5  ;;  %v6832_v35 = vshrl.u32 %v14136_v55, 16  ;;  %v6835_v9 = vshll.u32 %v14136_v55, 16  ;;  %v10633_v58 = vrot.slane %v14137_v43, 4  ;;  %v6514_v30 = vld [vmem:[#allocation2 + $0x178] sm:$0x1f] }
 0x58f   : > { %v6813_v51 = vrot.slane %v6811_v2, 4  ;;  %v6816_v1 = vrot.slane %v6814_v54, 5  ;;  %v10631_v12 = vsel %vm364_vm0, %v10628_v17, %v10630_v34  ;;  %v6825_v16 = vrot.slane %v6823_v47, 4  ;;  %v18013_v43 = vld [vmem:[#allocation2 + $0x28] sm:$0xf] }
 0x590   : > { %v6828_v63 = vrot.slane %v6826_v40, 5  ;;  %v6834_v29 = vrot.slane %v6832_v35, 4  ;;  %v6837_v19 = vrot.slane %v6835_v9, 5 }
 0x591   : > { %13018 = vmatmul.mubr.msk.bf16.gmra.mrb[64].mxu0 %vm4869_vm5, %v6767_v27  ;;  %v17987_v27 = vld [vmem:[#allocation2 + $0x90] sm:$0xf0] }
 0x592   : > { %13021 = vmatprep.mubr.msk.bf16.mxu0 %vm4869_vm5, %v6779_v60  ;;  %v6817_v60 = vor.u32 %v6816_v1, %v6813_v51  ;;  %v6829_v17 = vor.u32 %v6828_v63, %v6825_v16  ;;  %v14139_v1 = vld [vmem:[#allocation2 + $0xb0] sm:$0xff] }
 0x593   : > { %13308 = vmatmul.mubr.msk.bf16.gmra.mrb[48].mxu1 %vm4869_vm5, %v10621_v62  ;;  %v6808_v62 = vor.u32 %v6807_v38, %v6804_v57  ;;  %v18000_v57 = vld [vmem:[#allocation2 + $0xa8] sm:$0xf0]  ;;  %v7307_v38 = vld [vmem:[#allocation2 + $0x18] sm:$0xf8]  ;;  %v10638_v45 = vrot.slane %v14139_v1, 4 }
 0x594   : > { %13311 = vmatprep.mubr.msk.bf16.mxu1 %vm4869_vm5, %v10624_v14  ;;  %v10632_v14 = vrot.slane %v17987_v27, 4  ;;  %v6821_v2 = vsel %vm6515_vm8, %v6817_v60, %v17567_v4  ;;  %v10637_v51 = vrot.slane %v18000_v57, 4  ;;  %v7359_v22 = vshll.u32 %v7307_v38, 16 }
 0x595   : > { %v6809_v42 = vsel %vm6515_vm8, %v17546_v0, %v6808_v62  ;;  %v6844_v0 = vshrl.u32 %v6514_v30, 16  ;;  %v7356_v62 = vshrl.u32 %v7307_v38, 16  ;;  %v6830_v35 = vsel %vm6515_vm8, %v17567_v4, %v6829_v17  ;;  %v14140_v4 = vld [vmem:[#allocation2 + $0xb8] sm:$0xf] }
 0x596   : > { %v10634_v54 = vsel %vm364_vm0, %v10632_v14, %v10633_v58  ;;  %v10639_v40 = vsel %vm364_vm0, %v10637_v51, %v10638_v45  ;;  %v7361_v14 = vrot.slane %v7359_v22, 4  ;;  %v10640_v63 = vrot.slane %v14140_v4, 4 }
 0x597   : > { %v6846_v34 = vrot.slane %v6844_v0, 4  ;;  %v7358_v60 = vrot.slane %v7356_v62, 3 }
 0x598   : > { %v10641_v17 = vsel %vm364_vm0, %v10638_v45, %v10640_v63 }
 0x599   : > { %13022 = vmatmul.mubr.msk.bf16.gmra.mrb[68].mxu0 %vm4869_vm5, %v6788_v44  ;;  %v6847_v44 = vshll.u32 %v6514_v30, 16  ;;  %v7362_v30 = vor.u32 %v7361_v14, %v7358_v60  ;;  %v14143_v14 = vld [vmem:[#allocation2 + $0xe0] sm:$0xff] }
 0x59a   : > { %13025 = vmatprep.mubr.msk.bf16.mxu0 %vm4869_vm5, %v6800_v46 }
 0x59b   : > { %13312 = vmatmul.mubr.msk.bf16.gmra.mrb[52].mxu1 %vm4869_vm5, %v10626_v53  ;;  %v14138_v53 = vld [vmem:[#allocation2 + $0xa0] sm:$0xf]  ;;  %v6849_v55 = vrot.slane %v6847_v44, 5  ;;  %v7371_v51 = vsel %vm5030_vm7, %v7362_v30, %v17025_v36 }
 0x59c   : > { %13315 = vmatprep.mubr.msk.bf16.mxu1 %vm4869_vm5, %v10629_v50  ;;  %v10635_v46 = vrot.slane %v14138_v53, 4  ;;  %v6838_v50 = vor.u32 %v6837_v19, %v6834_v29  ;;  %v7376_v29 = vshll.u32 %v18013_v43, 16 }
 0x59d   : > { %v6850_v16 = vor.u32 %v6849_v55, %v6846_v34  ;;  %v18032_v34 = vld [vmem:[#allocation2 + $0xd8] sm:$0xf0]  ;;  %v7313_v55 = vld [vmem:[#allocation2 + $0x48] sm:$0xf8] }
 0x59e   : > { %v10636_v9 = vsel %vm364_vm0, %v10633_v58, %v10635_v46  ;;  %v6842_v47 = vsel %vm6515_vm8, %v6838_v50, %v17591_v32  ;;  %v7373_v58 = vshrl.u32 %v18013_v43, 16  ;;  %v7378_v46 = vrot.slane %v7376_v29, 4  ;;  %v18027_v50 = vld [vmem:[#allocation2 + $0x40] sm:$0xf] }
 0x59f   : > { %v6851_v44 = vsel %vm6515_vm8, %v17591_v32, %v6850_v16  ;;  %v7399_v32 = vshrl.u32 %v18027_v50, 16  ;;  %v7402_v45 = vshll.u32 %v18027_v50, 16  ;;  %v7408_v16 = vshrl.u32 %v7313_v55, 16 }
 0x5a0   : > { %v7375_v53 = vrot.slane %v7373_v58, 3  ;;  %v7411_v4 = vshll.u32 %v7313_v55, 16  ;;  %v14145_v55 = vld [vmem:[#allocation2 + $0xf8] sm:$0xff] }
 0x5a1   : > { %13026 = vmatmul.mubr.msk.bf16.gmra.mrb[72].mxu0 %vm4869_vm5, %v6809_v42  ;;  %v18015_v42 = vld [vmem:[#allocation2 + $0xc0] sm:$0xf0]  ;;  %v7401_v63 = vrot.slane %v7399_v32, 3  ;;  %v7404_v58 = vrot.slane %v7402_v45, 4  ;;  %v10653_v32 = vrot.slane %v14145_v55, 4 }
 0x5a2   : > { %13029 = vmatprep.mubr.msk.bf16.mxu0 %vm4869_vm5, %v6821_v2  ;;  %v10642_v19 = vrot.slane %v18015_v42, 4  ;;  %v14141_v2 = vld [vmem:[#allocation2 + $0xc8] sm:$0xff] }
 0x5a3   : > { %13316 = vmatmul.mubr.msk.bf16.gmra.mrb[56].mxu1 %vm4869_vm5, %v10631_v12  ;;  %v7310_v12 = vld [vmem:[#allocation2 + $0x30] sm:$0xf8] }
 0x5a4   : > { %13319 = vmatprep.mubr.msk.bf16.mxu1 %vm4869_vm5, %v10634_v54  ;;  %v10643_v54 = vrot.slane %v14141_v2, 4  ;;  %v7382_v38 = vshrl.u32 %v7310_v12, 16  ;;  %v7385_v0 = vshll.u32 %v7310_v12, 16  ;;  %v10648_v12 = vrot.slane %v14143_v14, 4  ;;  %v18062_v14 = vld [vmem:[#allocation2 + $0x70] sm:$0xf] }
 0x5a6   : > { %v10644_v1 = vsel %vm364_vm0, %v10642_v19, %v10643_v54  ;;  %v7384_v62 = vrot.slane %v7382_v38, 3  ;;  %v7387_v22 = vrot.slane %v7385_v0, 4  ;;  %v7410_v38 = vrot.slane %v7408_v16, 3 }
 0x5a7   : > { %v7413_v0 = vrot.slane %v7411_v4, 4 }
 0x5a8   : > { %v7388_v60 = vor.u32 %v7387_v22, %v7384_v62 }
 0x5a9   : > { %13030 = vmatmul.mubr.msk.bf16.gmra.mrb[76].mxu0 %vm4869_vm5, %v6830_v35  ;;  %v7379_v35 = vor.u32 %v7378_v46, %v7375_v53  ;;  %v7316_v53 = vld [vmem:[#allocation2 + $0x60] sm:$0xf8]  ;;  %v7405_v46 = vor.u32 %v7404_v58, %v7401_v63  ;;  %v7414_v22 = vor.u32 %v7413_v0, %v7410_v38 }
 0x5aa   : > { %13033 = vmatprep.mubr.msk.bf16.mxu0 %vm4869_vm5, %v6842_v47  ;;  %v7397_v30 = vsel %vm5030_vm7, %v7388_v60, %v17047_v61  ;;  %v7434_v45 = vshrl.u32 %v7316_v53, 16 }
 0x5ab   : > { %13320 = vmatmul.mubr.msk.bf16.gmra.mrb[60].mxu1 %vm4869_vm5, %v10636_v9  ;;  %v14142_v9 = vld [vmem:[#allocation2 + $0xd0] sm:$0xf]  ;;  %v7380_v29 = vsel %vm5030_vm7, %v17025_v36, %v7379_v35  ;;  %v14144_v36 = vld [vmem:[#allocation2 + $0xe8] sm:$0xf]  ;;  %v7437_v35 = vshll.u32 %v7316_v53, 16  ;;  %v7423_v16 = vsel %vm5030_vm7, %v7414_v22, %v17075_v3 }
 0x5ac   : > { %13323 = vmatprep.mubr.msk.bf16.mxu1 %vm4869_vm5, %v10639_v40  ;;  %v10645_v47 = vrot.slane %v14142_v9, 4  ;;  %v10647_v40 = vrot.slane %v18032_v34, 4  ;;  %v7406_v9 = vsel %vm5030_vm7, %v17047_v61, %v7405_v46  ;;  %v7436_v63 = vrot.slane %v7434_v45, 3  ;;  %v14147_v53 = vld [vmem:[#allocation2 + $0x110] sm:$0xff] }
 0x5ad   : > { %v7439_v58 = vrot.slane %v7437_v35, 4  ;;  %v7454_v61 = vshll.u32 %v18062_v14, 16  ;;  %v10658_v46 = vrot.slane %v14147_v53, 4 }
 0x5ae   : > { %v10646_v19 = vsel %vm364_vm0, %v10643_v54, %v10645_v47  ;;  %v10649_v2 = vsel %vm364_vm0, %v10647_v40, %v10648_v12 }
 0x5af   : > { %v7440_v0 = vor.u32 %v7439_v58, %v7436_v63 }
 0x5b1   : > { %13034 = vmatmul.mubr.msk.bf16.gmra.mrb[80].mxu0 %vm4869_vm5, %v6851_v44  ;;  %v18047_v44 = vld [vmem:[#allocation2 + $0x58] sm:$0xf]  ;;  %v7449_v55 = vsel %vm5030_vm7, %v7440_v0, %v17102_v5 }
 0x5b2   : > { %13039 = vmatprep.mubr.msk.bf16.mxu0 %vm4869_vm5, %v7371_v51  ;;  %v10650_v51 = vrot.slane %v14144_v36, 4  ;;  %v7425_v54 = vshrl.u32 %v18047_v44, 16 }
 0x5b3   : > { %13324 = vmatmul.mubr.msk.bf16.gmra.mrb[0].mxu1 %vm4869_vm5, %v10641_v17  ;;  %v18049_v17 = vld [vmem:[#allocation2 + $0xf0] sm:$0xf0] }
 0x5b4   : > { %13327 = vmatprep.mubr.msk.bf16.mxu1 %vm4869_vm5, %v10644_v1  ;;  %v7428_v1 = vshll.u32 %v18047_v44, 16  ;;  %v10652_v62 = vrot.slane %v18049_v17, 4  ;;  %v10651_v47 = vsel %vm364_vm0, %v10648_v12, %v10650_v51  ;;  %v7427_v40 = vrot.slane %v7425_v54, 3 }
 0x5b6   : > { %v7430_v60 = vrot.slane %v7428_v1, 4  ;;  %v10654_v4 = vsel %vm364_vm0, %v10652_v62, %v10653_v32  ;;  %v7456_v1 = vrot.slane %v7454_v61, 4 }
 0x5b8   : > { %v7431_v12 = vor.u32 %v7430_v60, %v7427_v40  ;;  %v18084_v40 = vld [vmem:[#allocation2 + $0x120] sm:$0xf0]  ;;  %v7322_v60 = vld [vmem:[#allocation2 + $0x90] sm:$0xf8] }
 0x5b9   : > { %13040 = vmatmul.mubr.msk.bf16.vlgmr.msra.gmra.mrb[20].mxu0 %vm4869_vm5, %v7380_v29  ;;  %v18067_v29 = vld [vmem:[#allocation2 + $0x108] sm:$0xf0]  ;;  %v10662_v58 = vrot.slane %v18084_v40, 4 }
 0x5ba   : > { %13043 = vmatprep.mubr.msk.bf16.mxu0 %vm4869_vm5, %v7397_v30  ;;  %13104 = vmatpush3.bf16.msra.mxu0 %v16974_v33  ;;  %v7451_v33 = vshrl.u32 %v18062_v14, 16  ;;  %v14146_v30 = vld [vmem:[#allocation2 + $0x100] sm:$0xf]  ;;  %v10657_v38 = vrot.slane %v18067_v29, 4  ;;  %v7432_v62 = vsel %vm5030_vm7, %v17075_v3, %v7431_v12  ;;  %v14148_v3 = vld [vmem:[#allocation2 + $0x118] sm:$0xf] }
 0x5bb   : > { %13328 = vmatmul.mubr.msk.bf16.gmra.mrb[4].mxu1 %vm4869_vm5, %v10646_v19  ;;  %v7319_v19 = vld [vmem:[#allocation2 + $0x78] sm:$0xf8]  ;;  %v7486_v12 = vshrl.u32 %v7322_v60, 16 }
 0x5bc   : > { %13331 = vmatprep.mubr.msk.bf16.mxu1 %vm4869_vm5, %v10649_v2  ;;  %v10655_v2 = vrot.slane %v14146_v30, 4  ;;  %v7460_v36 = vshrl.u32 %v7319_v19, 16  ;;  %v7463_v51 = vshll.u32 %v7319_v19, 16  ;;  %v7453_v54 = vrot.slane %v7451_v33, 3  ;;  %v14149_v33 = vld [vmem:[#allocation2 + $0x128] sm:$0xff] }
 0x5bd   : > { %v10659_v45 = vsel %vm364_vm0, %v10657_v38, %v10658_v46  ;;  %v10663_v61 = vrot.slane %v14149_v33, 4  ;;  %v7489_v30 = vshll.u32 %v7322_v60, 16 }
 0x5be   : > { %v10656_v22 = vsel %vm364_vm0, %v10653_v32, %v10655_v2  ;;  %v7462_v35 = vrot.slane %v7460_v36, 3 }
 0x5c1   : > { %13044 = vmatmul.mubr.msk.bf16.gmra.mrb[24].mxu0 %vm4869_vm5, %v7406_v9  ;;  %v7465_v9 = vrot.slane %v7463_v51, 4  ;;  %v10664_v51 = vsel %vm364_vm0, %v10662_v58, %v10663_v61 }
 0x5c2   : > { %13047 = vmatprep.mubr.msk.bf16.mxu0 %vm4869_vm5, %v7423_v16  ;;  %v7457_v16 = vor.u32 %v7456_v1, %v7453_v54  ;;  %v7488_v54 = vrot.slane %v7486_v12, 3  ;;  %v7491_v1 = vrot.slane %v7489_v30, 4  ;;  %v19532_v30 = vld [vmem:[#allocation95_spill] sm:$0xff] }
 0x5c3   : > { %13332 = vmatmul.mubr.msk.bf16.gmra.mrb[8].mxu1 %vm4869_vm5, %v10651_v47  ;;  %v18082_v47 = vld [vmem:[#allocation2 + $0x88] sm:$0xf]  ;;  %v7466_v19 = vor.u32 %v7465_v9, %v7462_v35 }
 0x5c4   : > { %13335 = vmatprep.mubr.msk.bf16.mxu1 %vm4869_vm5, %v10654_v4  ;;  %v10660_v4 = vrot.slane %v14148_v3, 4  ;;  %v7477_v32 = vshrl.u32 %v18082_v47, 16  ;;  %v7480_v63 = vshll.u32 %v18082_v47, 16  ;;  %v7458_v2 = vsel %vm5030_vm7, %v17102_v5, %v7457_v16  ;;  %v14152_v3 = vld [vmem:[#allocation2 + $0x140] sm:$0xff] }
 0x5c5   : > { %v7475_v36 = vsel %vm5030_vm7, %v7466_v19, %v17131_v18  ;;  %v7492_v16 = vor.u32 %v7491_v1, %v7488_v54  ;;  %v14153_v1 = vld [vmem:[#allocation2 + $0x148] sm:$0xf] }
 0x5c6   : > { %v10661_v38 = vsel %vm364_vm0, %v10658_v46, %v10660_v4  ;;  %v7479_v0 = vrot.slane %v7477_v32, 3  ;;  %v7482_v53 = vrot.slane %v7480_v63, 4  ;;  %v14151_v46 = vld [vmem:[#allocation2 + $0x130] sm:$0xf]  ;;  %v10668_v4 = vrot.slane %v14152_v3, 4 }
 0x5c7   : > { %v10665_v9 = vrot.slane %v14151_v46, 4 }
 0x5c8   : > { %v7483_v5 = vor.u32 %v7482_v53, %v7479_v0 }
 0x5c9   : > { %13048 = vmatmul.mubr.msk.bf16.gmra.mrb[28].mxu0 %vm4869_vm5, %v7432_v62  ;;  %v18099_v62 = vld [vmem:[#allocation2 + $0x138] sm:$0xf0]  ;;  %v10666_v12 = vsel %vm364_vm0, %v10663_v61, %v10665_v9 }
 0x5ca   : > { %13051 = vmatprep.mubr.msk.bf16.mxu0 %vm4869_vm5, %v7449_v55  ;;  %v14150_v55 = vld [vmem:[#allocation2 + $0xa0] sm:$0xf]  ;;  %v10667_v60 = vrot.slane %v18099_v62, 4  ;;  %v7484_v33 = vsel %vm5030_vm7, %v17131_v18, %v7483_v5  ;;  %v14154_v18 = vld [vmem:[#allocation2 + $0xb8] sm:$0xf] }
 0x5cb   : > { %13336 = vmatmul.mubr.msk.bf16.gmra.mrb[12].mxu1 %vm4869_vm5, %v10656_v22  ;;  %v7325_v22 = vld [vmem:[#allocation2 + $0xa8] sm:$0xf8]  ;;  %v7506_v35 = vshll.u32 %v14150_v55, 16  ;;  %v7532_v61 = vshll.u32 %v14154_v18, 16  ;;  %v14155_v5 = vld [vmem:[#allocation2 + $0x158] sm:$0xff] }
 0x5cc   : > { %13339 = vmatprep.mubr.msk.bf16.mxu1 %vm4869_vm5, %v10659_v45  ;;  %v7503_v45 = vshrl.u32 %v14150_v55, 16  ;;  %v7512_v32 = vshrl.u32 %v7325_v22, 16  ;;  %v7515_v63 = vshll.u32 %v7325_v22, 16  ;;  %v10670_v22 = vrot.slane %v14153_v1, 4 }
 0x5cd   : > { %v7508_v19 = vrot.slane %v7506_v35, 4  ;;  %v7529_v55 = vshrl.u32 %v14154_v18, 16  ;;  %v10673_v46 = vrot.slane %v14155_v5, 4  ;;  %v10678_v18 = vrot.slane %v17855_v24, 4 }
 0x5ce   : > { %v7505_v58 = vrot.slane %v7503_v45, 3  ;;  %v7514_v0 = vrot.slane %v7512_v32, 3  ;;  %v7517_v53 = vrot.slane %v7515_v63, 4  ;;  %v10671_v3 = vsel %vm364_vm0, %v10668_v4, %v10670_v22 }
 0x5cf   : > { %v7531_v32 = vrot.slane %v7529_v55, 3  ;;  %v7534_v63 = vrot.slane %v7532_v61, 4 }
 0x5d0   : > { %v7509_v54 = vor.u32 %v7508_v19, %v7505_v58  ;;  %v7518_v35 = vor.u32 %v7517_v53, %v7514_v0  ;;  %v19533_v58 = vld [vmem:[#allocation97_spill] sm:$0xff]  ;;  %v7331_v0 = vld [vmem:[#allocation2 + $0xd8] sm:$0xf8]  ;;  %v14156_v53 = vld [vmem:[#allocation2 + $0xd0] sm:$0xf] }
 0x5d1   : > { %13052 = vmatmul.mubr.msk.bf16.gmra.mrb[32].mxu0 %vm4869_vm5, %v7458_v2  ;;  %v7501_v2 = vsel %vm5030_vm7, %v7492_v16, %v19532_v30  ;;  %v7555_v1 = vshrl.u32 %v14156_v53, 16  ;;  %v7564_v55 = vshrl.u32 %v7331_v0, 16  ;;  %v7567_v61 = vshll.u32 %v7331_v0, 16 }
 0x5d2   : > { %13055 = vmatprep.mubr.msk.bf16.mxu0 %vm4869_vm5, %v7475_v36  ;;  %v18112_v36 = vld [vmem:[#allocation2 + $0x150] sm:$0xf0]  ;;  %v7510_v16 = vsel %vm5030_vm7, %v19532_v30, %v7509_v54  ;;  %v7527_v19 = vsel %vm5030_vm7, %v7518_v35, %v19533_v58  ;;  %v10675_v30 = vrot.slane %v17844_v48, 4 }
 0x5d3   : > { %13340 = vmatmul.mubr.msk.bf16.gmra.mrb[16].mxu1 %vm4869_vm5, %v10661_v38  ;;  %v10669_v38 = vsel %vm364_vm0, %v10667_v60, %v10668_v4  ;;  %v10672_v45 = vrot.slane %v18112_v36, 4  ;;  %v7535_v4 = vor.u32 %v7534_v63, %v7531_v32  ;;  %v7566_v48 = vrot.slane %v7564_v55, 3  ;;  %v18140_v63 = vld [vmem:[#allocation2 + $0x180] sm:$0xf0] }
 0x5d4   : > { %13343 = vmatprep.mubr.msk.bf16.mxu1 %vm4869_vm5, %v10664_v51  ;;  %v7328_v51 = vld [vmem:[#allocation2 + $0xc0] sm:$0xf8]  ;;  %v7569_v32 = vrot.slane %v7567_v61, 4  ;;  %v10682_v0 = vrot.slane %v18140_v63, 4  ;;  %v7337_v61 = vld [vmem:[#allocation2 + $0x108] sm:$0xf8] }
 0x5d5   : > { %v7538_v9 = vshrl.u32 %v7328_v51, 16  ;;  %v7541_v60 = vshll.u32 %v7328_v51, 16  ;;  %v7558_v51 = vshll.u32 %v14156_v53, 16  ;;  %v7536_v5 = vsel %vm5030_vm7, %v19533_v58, %v7535_v4  ;;  %v14157_v58 = vld [vmem:[#allocation2 + $0xe8] sm:$0xf] }
 0x5d6   : > { %v7570_v53 = vor.u32 %v7569_v32, %v7566_v48  ;;  %v18155_v32 = vld [vmem:[#allocation2 + $0x198] sm:$0xf0] }
 0x5d7   : > { %v7560_v35 = vrot.slane %v7558_v51, 4  ;;  %19536 = vst [vmem:[#allocation120_spill] sm:$0xff] %v18155_v32 }
 0x5d9   : > { %13056 = vmatmul.mubr.msk.bf16.gmra.mrb[36].mxu0 %vm4869_vm5, %v7484_v33  ;;  %v10674_v33 = vsel %vm364_vm0, %v10672_v45, %v10673_v46  ;;  %v7557_v45 = vrot.slane %v7555_v1, 3  ;;  %v10683_v1 = vrot.slane %v17875_v7, 4 }
 0x5da   : > { %13059 = vmatprep.mubr.msk.bf16.mxu0 %vm4869_vm5, %v7501_v2  ;;  %v7543_v2 = vrot.slane %v7541_v60, 4  ;;  %v19534_v60 = vld [vmem:[#allocation101_spill] sm:$0xff] }
 0x5db   : > { %13344 = vmatmul.mubr.msk.bf16.gmra.mrb[20].mxu1 %vm4869_vm5, %v10666_v12  ;;  %v7540_v12 = vrot.slane %v7538_v9, 3  ;;  %v10676_v9 = vsel %vm364_vm0, %v10673_v46, %v10675_v30  ;;  %v7584_v46 = vshll.u32 %v14157_v58, 16  ;;  %v14158_v30 = vld [vmem:[#allocation2 + $0x100] sm:$0xf] }
 0x5dc   : > { %13347 = vmatprep.mubr.msk.bf16.mxu1 %vm4869_vm5, %v10669_v38  ;;  %v18125_v38 = vld [vmem:[#allocation2 + $0x168] sm:$0xf0] }
 0x5dd   : > { %v10677_v54 = vrot.slane %v18125_v38, 4  ;;  %v7544_v22 = vor.u32 %v7543_v2, %v7540_v12  ;;  %v10680_v12 = vrot.slane %v17868_v52, 4  ;;  %v7581_v2 = vshrl.u32 %v14157_v58, 16 }
 0x5de   : > { %v7619_v58 = vshll.u32 %v7337_v61, 16 }
 0x5df   : > { %v10681_v55 = vsel %vm364_vm0, %v10678_v18, %v10680_v12 }
 0x5e1   : > { %13060 = vmatmul.mubr.msk.bf16.gmra.mrb[40].mxu0 %vm4869_vm5, %v7510_v16  ;;  %v7553_v16 = vsel %vm5030_vm7, %v7544_v22, %v19534_v60  ;;  %v7610_v22 = vshll.u32 %v14158_v30, 16 }
 0x5e2   : > { %13063 = vmatprep.mubr.msk.bf16.mxu0 %vm4869_vm5, %v7527_v19  ;;  %v7334_v19 = vld [vmem:[#allocation2 + $0xf0] sm:$0xf8] }
 0x5e3   : > { %13348 = vmatmul.mubr.msk.bf16.gmra.mrb[24].mxu1 %vm4869_vm5, %v10671_v3  ;;  %v10679_v3 = vsel %vm364_vm0, %v10677_v54, %v10678_v18  ;;  %v7590_v51 = vshrl.u32 %v7334_v19, 16  ;;  %v7593_v4 = vshll.u32 %v7334_v19, 16  ;;  %v7607_v54 = vshrl.u32 %v14158_v30, 16 }
 0x5e4   : > { %13351 = vmatprep.mubr.msk.bf16.mxu1 %vm4869_vm5, %v10674_v33  ;;  %v7561_v33 = vor.u32 %v7560_v35, %v7557_v45  ;;  %v7583_v45 = vrot.slane %v7581_v2, 3  ;;  %v7586_v35 = vrot.slane %v7584_v46, 4  ;;  %v7616_v19 = vshrl.u32 %v7337_v61, 16 }
 0x5e5   : > { %v7595_v48 = vrot.slane %v7593_v4, 4  ;;  %v11163_v30 = vshrl.u32 %v17931_v21, 16  ;;  %v7609_v12 = vrot.slane %v7607_v54, 3  ;;  %v7612_v46 = vrot.slane %v7610_v22, 4 }
 0x5e6   : > { %v7562_v52 = vsel %vm5030_vm7, %v19534_v60, %v7561_v33  ;;  %v11166_v60 = vshll.u32 %v17931_v21, 16  ;;  %v7587_v18 = vor.u32 %v7586_v35, %v7583_v45  ;;  %v10685_v33 = vrot.slane %v17892_v23, 4 }
 0x5e7   : > { %v7621_v21 = vrot.slane %v7619_v58, 4  ;;  %v11165_v4 = vrot.slane %v11163_v30, 4  ;;  %v19538_v45 = vshll.u32 %v17603_v20, 16  ;;  %v7613_v30 = vor.u32 %v7612_v46, %v7609_v12 }
 0x5e9   : > { %13064 = vmatmul.mubr.msk.bf16.gmra.mrb[44].mxu0 %vm4869_vm5, %v7536_v5  ;;  %v19535_v5 = vld [vmem:[#allocation100_spill] sm:$0xff]  ;;  %v11171_v35 = vrot.slane %v19538_v45, 5 }
 0x5ea   : > { %13067 = vmatprep.mubr.msk.bf16.mxu0 %vm4869_vm5, %v7553_v16  ;;  %v10684_v16 = vsel %vm364_vm0, %v10682_v0, %v10683_v1  ;;  %v10687_v0 = vrot.slane %v18155_v32, 4  ;;  %v7588_v22 = vsel %vm5030_vm7, %v19535_v5, %v7587_v18 }
 0x5eb   : > { %13352 = vmatmul.mubr.msk.bf16.gmra.mrb[28].mxu1 %vm4869_vm5, %v10676_v9  ;;  %v7579_v9 = vsel %vm5030_vm7, %v7570_v53, %v19535_v5  ;;  %v10688_v53 = vrot.slane %v17897_v8, 4 }
 0x5ec   : > { %13355 = vmatprep.mubr.msk.bf16.mxu1 %vm4869_vm5, %v10679_v3  ;;  %v7592_v3 = vrot.slane %v7590_v51, 3  ;;  %v7618_v51 = vrot.slane %v7616_v19, 3  ;;  %v19539_v19 = vld [vmem:[#allocation96_spill] sm:$0xff] }
 0x5ee   : > { %v7596_v2 = vor.u32 %v7595_v48, %v7592_v3  ;;  %v10686_v3 = vsel %vm364_vm0, %v10683_v1, %v10685_v33  ;;  %v7340_v48 = vld [vmem:[#allocation2 + $0x120] sm:$0xf8]  ;;  %v11184_v33 = vshrl.u32 %v17946_v37, 16 }
 0x5ef   : > { %v7642_v18 = vshrl.u32 %v7340_v48, 16  ;;  %v7645_v1 = vshll.u32 %v7340_v48, 16 }
 0x5f0   : > { %v7605_v58 = vsel %vm5030_vm7, %v7596_v2, %v19539_v19  ;;  %v11187_v2 = vshll.u32 %v17946_v37, 16 }
 0x5f1   : > { %13068 = vmatmul.mubr.msk.bf16.gmra.mrb[48].mxu0 %vm4869_vm5, %v7562_v52  ;;  %v11168_v52 = vrot.slane %v11166_v60, 5  ;;  %v10689_v60 = vsel %vm364_vm0, %v10687_v0, %v10688_v53  ;;  %v7614_v0 = vsel %vm5030_vm7, %v19539_v19, %v7613_v30  ;;  %v7647_v48 = vrot.slane %v7645_v1, 4 }
 0x5f2   : > { %13071 = vmatprep.mubr.msk.bf16.mxu0 %vm4869_vm5, %v7579_v9  ;;  %v11146_v9 = vld [vmem:[#allocation2 + $0x40] sm:$0x1f]  ;;  %v11191_v19 = vrot.slane %v19542_v6, 4 }
 0x5f3   : > { %13356 = vmatmul.mubr.msk.bf16.gmra.mrb[32].mxu1 %vm4869_vm5, %v10681_v55  ;;  %v19537_v55 = vshrl.u32 %v17603_v20, 16  ;;  %v7622_v20 = vor.u32 %v7621_v21, %v7618_v51  ;;  %v11175_v45 = vshrl.u32 %v11146_v9, 16  ;;  %v11178_v39 = vshll.u32 %v11146_v9, 16  ;;  %v19540_v21 = vld [vmem:[#allocation99_spill] sm:$0xff]  ;;  %v11147_v9 = vld [vmem:[#allocation2 + $0x58] sm:$0x1f] }
 0x5f4   : > { %13359 = vmatprep.mubr.msk.bf16.mxu1 %vm4869_vm5, %v10684_v16  ;;  %v14159_v16 = vld [vmem:[#allocation2 + $0x118] sm:$0xf] }
 0x5f5   : > { %v11170_v61 = vrot.slane %v19537_v55, 4  ;;  %v7633_v23 = vshrl.u32 %v14159_v16, 16  ;;  %v7636_v54 = vshll.u32 %v14159_v16, 16  ;;  %v10690_v55 = vrot.slane %v17913_v28, 4  ;;  %v14160_v28 = vld [vmem:[#allocation2 + $0x130] sm:$0xf] }
 0x5f6   : > { %v11169_v16 = vor.u32 %v11168_v52, %v11165_v4  ;;  %v7659_v12 = vshrl.u32 %v14160_v28, 16  ;;  %v7662_v46 = vshll.u32 %v14160_v28, 16  ;;  %v7631_v4 = vsel %vm5030_vm7, %v7622_v20, %v19540_v21 }
 0x5f7   : > { %v11172_v5 = vor.u32 %v11171_v35, %v11170_v61  ;;  %v10691_v51 = vsel %vm364_vm0, %v10688_v53, %v10690_v55  ;;  %v7635_v52 = vrot.slane %v7633_v23, 3  ;;  %v7638_v61 = vrot.slane %v7636_v54, 4 }
 0x5f8   : > { %v11177_v35 = vrot.slane %v11175_v45, 4  ;;  %v11189_v28 = vrot.slane %v11187_v2, 5  ;;  %v19543_v53 = vshll.u32 %v19541_v31, 16  ;;  %v11196_v55 = vshrl.u32 %v11147_v9, 16 }
 0x5f9   : > { %13072 = vmatmul.mubr.msk.bf16.gmra.mrb[52].mxu0 %vm4869_vm5, %v7588_v22  ;;  %v11173_v37 = vsel %vm6515_vm8, %v11169_v16, %v11172_v5  ;;  %v11180_v22 = vrot.slane %v11178_v39, 5  ;;  %v11199_v20 = vshll.u32 %v11147_v9, 16  ;;  %v11205_v45 = vshrl.u32 %v17961_v41, 16 }
 0x5fa   : > { %13075 = vmatprep.mubr.msk.bf16.mxu0 %vm4869_vm5, %v7605_v58  ;;  %v7343_v58 = vld [vmem:[#allocation2 + $0x138] sm:$0xf8]  ;;  %v11192_v30 = vrot.slane %v19543_v53, 5  ;;  %v11208_v16 = vshll.u32 %v17961_v41, 16  ;;  %v7639_v39 = vor.u32 %v7638_v61, %v7635_v52  ;;  %v7661_v31 = vrot.slane %v7659_v12, 3 }
 0x5fb   : > { %13360 = vmatmul.mubr.msk.bf16.gmra.mrb[36].mxu1 %vm4869_vm5, %v10686_v3  ;;  %v7644_v3 = vrot.slane %v7642_v18, 3  ;;  %v7668_v23 = vshrl.u32 %v7343_v58, 16  ;;  %v7671_v54 = vshll.u32 %v7343_v58, 16  ;;  %v11181_v18 = vor.u32 %v11180_v22, %v11177_v35  ;;  %v14161_v35 = vld [vmem:[#allocation2 + $0x148] sm:$0xf] }
 0x5fc   : > { %13363 = vmatprep.mubr.msk.bf16.mxu1 %vm4869_vm5, %v10689_v60  ;;  %v11186_v60 = vrot.slane %v11184_v33, 4  ;;  %v7664_v1 = vrot.slane %v7662_v46, 4  ;;  %v11193_v2 = vor.u32 %v11192_v30, %v11191_v19  ;;  %v11198_v9 = vrot.slane %v11196_v55, 4  ;;  %v7346_v22 = vld [vmem:[#allocation2 + $0x150] sm:$0xf8] }
 0x5fd   : > { %v7648_v6 = vor.u32 %v7647_v48, %v7644_v3  ;;  %v11201_v58 = vrot.slane %v11199_v20, 5  ;;  %v7670_v53 = vrot.slane %v7668_v23, 3  ;;  %v7673_v59 = vrot.slane %v7671_v54, 4  ;;  %v19547_v48 = vld [vmem:[#allocation30_spill] sm:$0xff] }
 0x5fe   : > { %v11190_v33 = vor.u32 %v11189_v28, %v11186_v60  ;;  %v11207_v41 = vrot.slane %v11205_v45, 4  ;;  %v11210_v8 = vrot.slane %v11208_v16, 5  ;;  %v7640_v12 = vsel %vm5030_vm7, %v19540_v21, %v7639_v39  ;;  %v14162_v39 = vld [vmem:[#allocation2 + $0x160] sm:$0xf] }
 0x5ff   : > { %v11182_v46 = vsel %vm6515_vm8, %v11172_v5, %v11181_v18  ;;  %v7688_v3 = vshll.u32 %v14161_v35, 16  ;;  %v7657_v60 = vsel %vm5030_vm7, %v7648_v6, %v19547_v48  ;;  %v7665_v28 = vor.u32 %v7664_v1, %v7661_v31  ;;  %v19548_v1 = vld [vmem:[#allocation28_spill] sm:$0xff] }
 0x600   : > { %v11194_v19 = vsel %vm6515_vm8, %v11190_v33, %v11193_v2  ;;  %v7674_v30 = vor.u32 %v7673_v59, %v7670_v53  ;;  %v11211_v20 = vor.u32 %v11210_v8, %v11207_v41  ;;  %v7694_v54 = vshrl.u32 %v7346_v22, 16 }
 0x601   : > { %13076 = vmatmul.mubr.msk.bf16.gmra.mrb[56].mxu0 %vm4869_vm5, %v7614_v0  ;;  %v19544_v0 = vld [vmem:[#allocation41_spill] sm:$0xff]  ;;  %v11226_v5 = vshrl.u32 %v17974_v25, 16  ;;  %v11229_v45 = vshll.u32 %v17974_v25, 16  ;;  %v7697_v16 = vshll.u32 %v7346_v22, 16  ;;  %v7711_v59 = vshrl.u32 %v14162_v39, 16 }
 0x602   : > { %13079 = vmatprep.mubr.msk.bf16.mxu0 %vm4869_vm5, %v7631_v4  ;;  %v19545_v32 = vshrl.u32 %v19544_v0, 16  ;;  %v19546_v52 = vshll.u32 %v19544_v0, 16  ;;  %v11148_v4 = vld [vmem:[#allocation2 + $0x70] sm:$0x1f]  ;;  %v7714_v18 = vshll.u32 %v14162_v39, 16  ;;  %v7666_v6 = vsel %vm5030_vm7, %v19547_v48, %v7665_v28 }
 0x603   : > { %13364 = vmatmul.mubr.msk.bf16.gmra.mrb[40].mxu1 %vm4869_vm5, %v10691_v51  ;;  %v11217_v55 = vshrl.u32 %v11148_v4, 16  ;;  %v11220_v21 = vshll.u32 %v11148_v4, 16  ;;  %v7683_v33 = vsel %vm5030_vm7, %v7674_v30, %v19548_v1  ;;  %v11149_v25 = vld [vmem:[#allocation2 + $0x88] sm:$0x1f]  ;;  %v7696_v0 = vrot.slane %v7694_v54, 3 }
 0x604   : > { %13369 = vmatprep.mubr.msk.bf16.mxu1 %vm4869_vm5, %v11173_v37  ;;  %v11212_v51 = vrot.slane %v19545_v32, 4  ;;  %v11213_v61 = vrot.slane %v19546_v52, 5  ;;  %v7685_v37 = vshrl.u32 %v14161_v35, 16  ;;  %v11202_v32 = vor.u32 %v11201_v58, %v11198_v9  ;;  %v19549_v35 = vld [vmem:[#allocation117_spill] sm:$0xff] }
 0x605   : > { %v7690_v9 = vrot.slane %v7688_v3, 4  ;;  %v11219_v58 = vrot.slane %v11217_v55, 4  ;;  %v11222_v41 = vrot.slane %v11220_v21, 5  ;;  %v7699_v52 = vrot.slane %v7697_v16, 4 }
 0x606   : > { %v11214_v23 = vor.u32 %v11213_v61, %v11212_v51  ;;  %v7687_v31 = vrot.slane %v7685_v37, 3  ;;  %v11203_v8 = vsel %vm6515_vm8, %v11193_v2, %v11202_v32  ;;  %v7349_v51 = vld [vmem:[#allocation2 + $0x168] sm:$0xf8]  ;;  %v11228_v61 = vrot.slane %v11226_v5, 4 }
 0x607   : > { %v11231_v4 = vrot.slane %v11229_v45, 5  ;;  %v19551_v37 = vshll.u32 %v19549_v35, 16  ;;  %v11238_v22 = vshrl.u32 %v11149_v25, 16  ;;  %v11241_v48 = vshll.u32 %v11149_v25, 16 }
 0x608   : > { %v11215_v53 = vsel %vm6515_vm8, %v11211_v20, %v11214_v23  ;;  %v7723_v3 = vshll.u32 %v7349_v51, 16  ;;  %v11247_v28 = vshrl.u32 %v17987_v27, 16  ;;  %v7691_v32 = vor.u32 %v7690_v9, %v7687_v31 }
 0x609   : > { %13080 = vmatmul.mubr.msk.bf16.gmra.mrb[60].mxu0 %vm4869_vm5, %v7640_v12  ;;  %v19550_v12 = vshrl.u32 %v19549_v35, 16  ;;  %v11234_v2 = vrot.slane %v19551_v37, 5  ;;  %v7713_v30 = vrot.slane %v7711_v59, 3  ;;  %v11223_v55 = vor.u32 %v11222_v41, %v11219_v58  ;;  %v14163_v58 = vld [vmem:[#allocation2 + $0x178] sm:$0xf]  ;;  %v19555_v41 = vld [vmem:[#allocation102_spill] sm:$0xff] }
 0x60a   : > { %13083 = vmatprep.mubr.msk.bf16.mxu0 %vm4869_vm5, %v7657_v60  ;;  %v7720_v60 = vshrl.u32 %v7349_v51, 16  ;;  %v7700_v20 = vor.u32 %v7699_v52, %v7696_v0  ;;  %v7716_v21 = vrot.slane %v7714_v18, 4  ;;  %v11232_v54 = vor.u32 %v11231_v4, %v11228_v61  ;;  %v11150_v18 = vld [vmem:[#allocation2 + $0xa0] sm:$0x1f] }
 0x60b   : > { %13370 = vmatmul.mubr.msk.bf16.vlgmr.msra.gmra.mrb[44].mxu1 %vm4869_vm5, %v11182_v46  ;;  %v11233_v46 = vrot.slane %v19550_v12, 4  ;;  %v11240_v45 = vrot.slane %v11238_v22, 4  ;;  %v11243_v16 = vrot.slane %v11241_v48, 5  ;;  %v7725_v25 = vrot.slane %v7723_v3, 4  ;;  %v7352_v61 = vld [vmem:[#allocation2 + $0x180] sm:$0xf8] }
 0x60c   : > { %13373 = vmatprep.mubr.msk.bf16.mxu1 %vm4869_vm5, %v11194_v19  ;;  %v11250_v19 = vshll.u32 %v17987_v27, 16  ;;  %v7722_v39 = vrot.slane %v7720_v60, 3  ;;  %v11249_v27 = vrot.slane %v11247_v28, 4  ;;  %v11224_v9 = vsel %vm6515_vm8, %v11214_v23, %v11223_v55 }
 0x60d   : > { %v11235_v5 = vor.u32 %v11234_v2, %v11233_v46  ;;  %v7709_v0 = vsel %vm5030_vm7, %v7700_v20, %v19555_v41  ;;  %v7740_v4 = vshll.u32 %v14163_v58, 16  ;;  %v7717_v12 = vor.u32 %v7716_v21, %v7713_v30  ;;  %v19556_v20 = vld [vmem:[#allocation116_spill] sm:$0xff] }
 0x60e   : > { %v11252_v51 = vrot.slane %v11250_v19, 5  ;;  %v11244_v46 = vor.u32 %v11243_v16, %v11240_v45  ;;  %v7726_v37 = vor.u32 %v7725_v25, %v7722_v39  ;;  %v11259_v23 = vshrl.u32 %v11150_v18, 16  ;;  %v19557_v16 = vld [vmem:[#allocation98_spill] sm:$0xff] }
 0x60f   : > { %v11236_v52 = vsel %vm6515_vm8, %v11232_v54, %v11235_v5  ;;  %v11262_v22 = vshll.u32 %v11150_v18, 16  ;;  %v7746_v48 = vshrl.u32 %v7352_v61, 16  ;;  %v7749_v60 = vshll.u32 %v7352_v61, 16 }
 0x610   : > { %v11268_v3 = vshrl.u32 %v18000_v57, 16  ;;  %v11271_v28 = vshll.u32 %v18000_v57, 16  ;;  %v7718_v19 = vsel %vm5030_vm7, %v19555_v41, %v7717_v12  ;;  %v7742_v55 = vrot.slane %v7740_v4, 4 }
 0x611   : > { %13084 = vmatmul.mubr.msk.bf16.gmra.mrb[64].mxu0 %vm4869_vm5, %v7666_v6  ;;  %v19552_v6 = vld [vmem:[#allocation40_spill] sm:$0xff]  ;;  %v7735_v21 = vsel %vm5030_vm7, %v7726_v37, %v19556_v20  ;;  %v11261_v45 = vrot.slane %v11259_v23, 4  ;;  %v19558_v39 = vshrl.u32 %v19557_v16, 16  ;;  %v19559_v57 = vshll.u32 %v19557_v16, 16 }
 0x612   : > { %13087 = vmatprep.mubr.msk.bf16.mxu0 %vm4869_vm5, %v7683_v33  ;;  %v19553_v35 = vshrl.u32 %v19552_v6, 16  ;;  %v19554_v59 = vshll.u32 %v19552_v6, 16  ;;  %v7692_v33 = vsel %vm5030_vm7, %v19548_v1, %v7691_v32  ;;  %v11253_v1 = vor.u32 %v11252_v51, %v11249_v27 }
 0x613   : > { %13374 = vmatmul.mubr.msk.bf16.gmra.mrb[48].mxu1 %vm4869_vm5, %v11203_v8  ;;  %v11245_v32 = vsel %vm6515_vm8, %v11235_v5, %v11244_v46  ;;  %v7756_v25 = vrot.slane %v19558_v39, 3  ;;  %v11264_v27 = vrot.slane %v11262_v22, 5  ;;  %v7748_v51 = vrot.slane %v7746_v48, 3 }
 0x614   : > { %13377 = vmatprep.mubr.msk.bf16.mxu1 %vm4869_vm5, %v11215_v53  ;;  %v11254_v8 = vrot.slane %v19553_v35, 4  ;;  %v11255_v31 = vrot.slane %v19554_v59, 5  ;;  %v7737_v53 = vshrl.u32 %v14163_v58, 16  ;;  %v7751_v6 = vrot.slane %v7749_v60, 4 }
 0x615   : > { %v7759_v35 = vrot.slane %v19559_v57, 4  ;;  %v11270_v59 = vrot.slane %v11268_v3, 4  ;;  %v11273_v5 = vrot.slane %v11271_v28, 5  ;;  %v11289_v12 = vshrl.u32 %v18015_v42, 16 }
 0x616   : > { %v11256_v2 = vor.u32 %v11255_v31, %v11254_v8  ;;  %v7739_v30 = vrot.slane %v7737_v53, 3  ;;  %v11151_v8 = vld [vmem:[#allocation2 + $0xb8] sm:$0x1f]  ;;  %v19560_v31 = vld [vmem:[#allocation118_spill] sm:$0xff]  ;;  %v14164_v53 = vld [vmem:[#allocation2 + $0x190] sm:$0xf]  ;;  %v11265_v46 = vor.u32 %v11264_v27, %v11261_v45  ;;  %v7752_v37 = vor.u32 %v7751_v6, %v7748_v51 }
 0x617   : > { %v19562_v18 = vshll.u32 %v19560_v31, 16  ;;  %v7763_v41 = vshrl.u32 %v14164_v53, 16  ;;  %v11280_v61 = vshrl.u32 %v11151_v8, 16  ;;  %v11283_v4 = vshll.u32 %v11151_v8, 16  ;;  %v14165_v8 = vld [vmem:[#allocation2 + $0x18] sm:$0xf0] }
 0x618   : > { %v11257_v54 = vsel %vm6515_vm8, %v11253_v1, %v11256_v2  ;;  %v7760_v1 = vor.u32 %v7759_v35, %v7756_v25  ;;  %v11292_v23 = vshll.u32 %v18015_v42, 16  ;;  %v11274_v22 = vor.u32 %v11273_v5, %v11270_v59 }
 0x619   : > { %13088 = vmatmul.mubr.msk.bf16.gmra.mrb[68].mxu0 %vm4869_vm5, %v7692_v33  ;;  %v19561_v33 = vshrl.u32 %v19560_v31, 16  ;;  %v11276_v58 = vrot.slane %v19562_v18, 5  ;;  %v7765_v60 = vrot.slane %v7763_v41, 3  ;;  %v11282_v28 = vrot.slane %v11280_v61, 4 }
 0x61a   : > { %13091 = vmatprep.mubr.msk.bf16.mxu0 %vm4869_vm5, %v7709_v0  ;;  %v7766_v0 = vshll.u32 %v14164_v53, 16  ;;  %v11294_v16 = vrot.slane %v11292_v23, 5  ;;  %v19563_v42 = vshrl.u32 %v17708_v49, 16  ;;  %v19564_v25 = vshll.u32 %v17708_v49, 16  ;;  %v14166_v49 = vld [vmem:[#allocation2 + $0x20] sm:$0xff] }
 0x61b   : > { %13378 = vmatmul.mubr.msk.bf16.gmra.mrb[52].mxu1 %vm4869_vm5, %v11224_v9  ;;  %v11275_v9 = vrot.slane %v19561_v33, 4  ;;  %v11310_v57 = vshrl.u32 %v18032_v34, 16  ;;  %v11313_v35 = vshll.u32 %v18032_v34, 16  ;;  %v8289_v59 = vrot.slane %v14165_v8, 4  ;;  %v14167_v23 = vld [vmem:[#allocation2 + $0x30] sm:$0xf0] }
 0x61c   : > { %13381 = vmatprep.mubr.msk.bf16.mxu1 %vm4869_vm5, %v11236_v52  ;;  %v7743_v52 = vor.u32 %v7742_v55, %v7739_v30  ;;  %v7768_v3 = vrot.slane %v7766_v0, 4  ;;  %v11266_v30 = vsel %vm6515_vm8, %v11256_v2, %v11265_v46  ;;  %v7761_v55 = vsel %vm5030_vm7, %v7752_v37, %v7760_v1 }
 0x61d   : > { %v11277_v48 = vor.u32 %v11276_v58, %v11275_v9  ;;  %v11296_v39 = vrot.slane %v19563_v42, 4  ;;  %v11297_v27 = vrot.slane %v19564_v25, 5  ;;  %v8290_v5 = vrot.slane %v14166_v49, 4 }
 0x61e   : > { %v11312_v41 = vrot.slane %v11310_v57, 4  ;;  %v11315_v0 = vrot.slane %v11313_v35, 5  ;;  %v19565_v34 = vshrl.u32 %v17733_v56, 16  ;;  %v19566_v61 = vshll.u32 %v17733_v56, 16 }
 0x61f   : > { %v11278_v45 = vsel %vm6515_vm8, %v11274_v22, %v11277_v48  ;;  %v11298_v33 = vor.u32 %v11297_v27, %v11296_v39  ;;  %v8291_v46 = vsel %vm364_vm0, %v8289_v59, %v8290_v5  ;;  %v8294_v22 = vrot.slane %v14167_v23, 4  ;;  %v11154_v39 = vld [vmem:[#allocation2 + $0x100] sm:$0x1f] }
 0x620   : > { %v11343_v35 = vshrl.u32 %v11154_v39, 16  ;;  %v11346_v8 = vshll.u32 %v11154_v39, 16  ;;  %v11352_v59 = vshrl.u32 %v18067_v29, 16  ;;  %v11355_v49 = vshll.u32 %v18067_v29, 16 }
 0x621   : > { %13092 = vmatmul.mubr.msk.bf16.gmra.mrb[72].mxu0 %vm4869_vm5, %v7718_v19  ;;  %v11285_v19 = vrot.slane %v11283_v4, 5  ;;  %v11318_v4 = vrot.slane %v19566_v61, 5  ;;  %v19569_v29 = vshrl.u32 %v17769_v15, 16  ;;  %v19570_v61 = vshll.u32 %v17769_v15, 16 }
 0x622   : > { %13095 = vmatprep.mubr.msk.bf16.mxu0 %vm4869_vm5, %v7735_v21  ;;  %v11291_v21 = vrot.slane %v11289_v12, 4  ;;  %v11153_v12 = vld [vmem:[#allocation2 + $0xe8] sm:$0x1f] }
 0x623   : > { %13382 = vmatmul.mubr.msk.bf16.gmra.mrb[56].mxu1 %vm4869_vm5, %v11245_v32  ;;  %v7744_v32 = vsel %vm5030_vm7, %v19556_v20, %v7743_v52  ;;  %v7769_v20 = vor.u32 %v7768_v3, %v7765_v60  ;;  %v11286_v51 = vor.u32 %v11285_v19, %v11282_v28  ;;  %v11317_v52 = vrot.slane %v19565_v34, 4  ;;  %v14168_v3 = vld [vmem:[#allocation2 + $0x38] sm:$0xff] }
 0x624   : > { %13385 = vmatprep.mubr.msk.bf16.mxu1 %vm4869_vm5, %v11257_v54  ;;  %v11152_v54 = vld [vmem:[#allocation2 + $0xd0] sm:$0x1f]  ;;  %v11295_v31 = vor.u32 %v11294_v16, %v11291_v21  ;;  %v11325_v60 = vshll.u32 %v11153_v12, 16  ;;  %v8295_v28 = vrot.slane %v14168_v3, 4  ;;  %v11316_v19 = vor.u32 %v11315_v0, %v11312_v41 }
 0x625   : > { %v11301_v2 = vshrl.u32 %v11152_v54, 16  ;;  %v11304_v6 = vshll.u32 %v11152_v54, 16  ;;  %v7770_v9 = vsel %vm5030_vm7, %v7760_v1, %v7769_v20  ;;  %v11287_v18 = vsel %vm6515_vm8, %v11277_v48, %v11286_v51 }
 0x626   : > { %v11299_v37 = vsel %vm6515_vm8, %v11295_v31, %v11298_v33  ;;  %v8292_v1 = vrot.slane %v18013_v43, 4  ;;  %v11322_v48 = vshrl.u32 %v11153_v12, 16  ;;  %v11327_v54 = vrot.slane %v11325_v60, 5  ;;  %v14170_v31 = vld [vmem:[#allocation2 + $0x50] sm:$0xff]  ;;  %v14172_v60 = vld [vmem:[#allocation2 + $0x68] sm:$0xff] }
 0x627   : > { %v11303_v58 = vrot.slane %v11301_v2, 4  ;;  %v11306_v53 = vrot.slane %v11304_v6, 5  ;;  %v8296_v16 = vsel %vm364_vm0, %v8294_v22, %v8295_v28  ;;  %v19567_v20 = vshrl.u32 %v17750_v13, 16  ;;  %v14171_v22 = vld [vmem:[#allocation2 + $0x60] sm:$0xf0] }
 0x628   : > { %v11324_v21 = vrot.slane %v11322_v48, 4  ;;  %v8293_v43 = vsel %vm364_vm0, %v8290_v5, %v8292_v1  ;;  %v19568_v2 = vshll.u32 %v17750_v13, 16  ;;  %v14169_v5 = vld [vmem:[#allocation2 + $0x48] sm:$0xf0]  ;;  %v11348_v41 = vrot.slane %v11346_v8, 5 }
 0x629   : > { %13096 = vmatmul.mubr.msk.bf16.gmra.mrb[76].mxu0 %vm4869_vm5, %v7744_v32  ;;  %v11307_v56 = vor.u32 %v11306_v53, %v11303_v58  ;;  %v11319_v32 = vor.u32 %v11318_v4, %v11317_v52  ;;  %v11338_v51 = vrot.slane %v19567_v20, 4  ;;  %v8299_v13 = vrot.slane %v14169_v5, 4 }
 0x62a   : > { %13099 = vmatprep.mubr.msk.bf16.mxu0 %vm4869_vm5, %v7761_v55  ;;  %v11334_v55 = vshll.u32 %v18049_v17, 16  ;;  %v11339_v6 = vrot.slane %v19568_v2, 5  ;;  %v11328_v57 = vor.u32 %v11327_v54, %v11324_v21  ;;  %v11345_v53 = vrot.slane %v11343_v35, 4  ;;  %v14173_v35 = vld [vmem:[#allocation2 + $0x78] sm:$0xf0] }
 0x62b   : > { %13386 = vmatmul.mubr.msk.bf16.gmra.mrb[60].mxu1 %vm4869_vm5, %v11266_v30  ;;  %v11331_v30 = vshrl.u32 %v18049_v17, 16  ;;  %v11320_v42 = vsel %vm6515_vm8, %v11316_v19, %v11319_v32  ;;  %v8297_v17 = vrot.slane %v18027_v50, 4  ;;  %v11354_v0 = vrot.slane %v11352_v59, 4  ;;  %v14174_v59 = vld [vmem:[#allocation2 + $0x80] sm:$0xff] }
 0x62c   : > { %13389 = vmatprep.mubr.msk.bf16.mxu1 %vm4869_vm5, %v11278_v45  ;;  %v11308_v45 = vsel %vm6515_vm8, %v11298_v33, %v11307_v56  ;;  %v11336_v27 = vrot.slane %v11334_v55, 5  ;;  %v8300_v33 = vrot.slane %v14170_v31, 4  ;;  %v11329_v50 = vsel %vm6515_vm8, %v11319_v32, %v11328_v57 }
 0x62d   : > { %v11333_v25 = vrot.slane %v11331_v30, 4  ;;  %v8298_v58 = vsel %vm364_vm0, %v8295_v28, %v8297_v17  ;;  %v11357_v34 = vrot.slane %v11355_v49, 5  ;;  %v11359_v52 = vrot.slane %v19569_v29, 4 }
 0x62e   : > { %v11360_v4 = vrot.slane %v19570_v61, 5  ;;  %v8301_v12 = vsel %vm364_vm0, %v8299_v13, %v8300_v33  ;;  %v8302_v1 = vrot.slane %v18047_v44, 4  ;;  %v11349_v23 = vor.u32 %v11348_v41, %v11345_v53 }
 0x62f   : > { %v8304_v48 = vrot.slane %v14171_v22, 4  ;;  %v8305_v56 = vrot.slane %v14172_v60, 4  ;;  %v11358_v15 = vor.u32 %v11357_v34, %v11354_v0  ;;  %v11373_v32 = vshrl.u32 %v18084_v40, 16 }
 0x630   : > { %v11361_v3 = vor.u32 %v11360_v4, %v11359_v52  ;;  %v11376_v30 = vshll.u32 %v18084_v40, 16  ;;  %v8303_v55 = vsel %vm364_vm0, %v8300_v33, %v8302_v1  ;;  %v19572_v20 = vshll.u32 %v17794_v11, 16 }
 0x631   : > { %13100 = vmatmul.mubr.msk.bf16.gmra.mrb[80].mxu0 %vm4869_vm5, %v7770_v9  ;;  %v11337_v9 = vor.u32 %v11336_v27, %v11333_v25  ;;  %v8306_v44 = vsel %vm364_vm0, %v8304_v48, %v8305_v56  ;;  %v19571_v25 = vshrl.u32 %v17794_v11, 16  ;;  %v11394_v40 = vshrl.u32 %v18099_v62, 16 }
 0x632   : > { %13105 = vmatprep.mubr.msk.bf16.mxu0 %vm4869_vm5, %v8291_v46  ;;  %v11362_v54 = vsel %vm6515_vm8, %v11358_v15, %v11361_v3  ;;  %v11378_v39 = vrot.slane %v11376_v30, 5  ;;  %v8307_v17 = vrot.slane %v18062_v14, 4  ;;  %v8309_v8 = vrot.slane %v14173_v35, 4 }
 0x633   : > { %13390 = vmatmul.mubr.msk.bf16.gmra.mrb[0].mxu1 %vm4869_vm5, %v11287_v18  ;;  %v11340_v18 = vor.u32 %v11339_v6, %v11338_v51  ;;  %v11380_v27 = vrot.slane %v19571_v25, 4  ;;  %v11381_v51 = vrot.slane %v19572_v20, 5  ;;  %v8310_v11 = vrot.slane %v14174_v59, 4  ;;  %v11159_v25 = vld [vmem:[#allocation2 + $0x178] sm:$0x1f] }
 0x634   : > { %13393 = vmatprep.mubr.msk.bf16.mxu1 %vm4869_vm5, %v11299_v37  ;;  %v11155_v37 = vld [vmem:[#allocation2 + $0x118] sm:$0x1f]  ;;  %v11397_v49 = vshll.u32 %v18099_v62, 16  ;;  %v11396_v14 = vrot.slane %v11394_v40, 4  ;;  %v19573_v0 = vshrl.u32 %v17814_v10, 16  ;;  %v19574_v62 = vshll.u32 %v17814_v10, 16 }
 0x635   : > { %v11341_v46 = vsel %vm6515_vm8, %v11337_v9, %v11340_v18  ;;  %v11364_v28 = vshrl.u32 %v11155_v37, 16  ;;  %v11367_v19 = vshll.u32 %v11155_v37, 16  ;;  %v11350_v21 = vsel %vm6515_vm8, %v11340_v18, %v11349_v23 }
 0x636   : > { %v11382_v13 = vor.u32 %v11381_v51, %v11380_v27  ;;  %v8308_v9 = vsel %vm364_vm0, %v8305_v56, %v8307_v17  ;;  %v11399_v41 = vrot.slane %v11397_v49, 5  ;;  %v11401_v34 = vrot.slane %v19573_v0, 4 }
 0x637   : > { %v11402_v29 = vrot.slane %v19574_v62, 5  ;;  %v8312_v52 = vrot.slane %v18082_v47, 4  ;;  %v11418_v37 = vshll.u32 %v18112_v36, 16  ;;  %v19575_v15 = vshrl.u32 %v17833_v26, 16  ;;  %v19581_v62 = vld [vmem:[#allocation120_spill] sm:$0xff] }
 0x638   : > { %v11400_v1 = vor.u32 %v11399_v41, %v11396_v14  ;;  %v19577_v51 = vshrl.u32 %v17855_v24, 16  ;;  %v11457_v35 = vshrl.u32 %v18140_v63, 16 }
 0x639   : > { %13106 = vmatmul.mubr.msk.bf16.vlgmr.msra.gmra.mrb[20].mxu0 %vm4869_vm5, %v8293_v43  ;;  %v11366_v43 = vrot.slane %v11364_v28, 4  ;;  %v11403_v10 = vor.u32 %v11402_v29, %v11401_v34  ;;  %v8313_v23 = vsel %vm364_vm0, %v8310_v11, %v8312_v52  ;;  %v11420_v56 = vrot.slane %v11418_v37, 5 }
 0x63a   : > { %13109 = vmatprep.mubr.msk.bf16.mxu0 %vm4869_vm5, %v8296_v16  ;;  %v11156_v16 = vld [vmem:[#allocation2 + $0x130] sm:$0x1f]  ;;  %v19576_v28 = vshll.u32 %v17833_v26, 16  ;;  %v11443_v40 = vrot.slane %v19577_v51, 4  ;;  %v11478_v29 = vshrl.u32 %v19581_v62, 16  ;;  %v11481_v52 = vshll.u32 %v19581_v62, 16 }
 0x63b   : > { %13394 = vmatmul.mubr.msk.bf16.gmra.mrb[4].mxu1 %vm4869_vm5, %v11308_v45  ;;  %v11369_v45 = vrot.slane %v11367_v19, 5  ;;  %v11385_v2 = vshrl.u32 %v11156_v16, 16  ;;  %v11388_v6 = vshll.u32 %v11156_v16, 16  ;;  %v11158_v19 = vld [vmem:[#allocation2 + $0x160] sm:$0x1f] }
 0x63c   : > { %13397 = vmatprep.mubr.msk.bf16.mxu1 %vm4869_vm5, %v11320_v42  ;;  %v11375_v42 = vrot.slane %v11373_v32, 4  ;;  %v11404_v32 = vsel %vm6515_vm8, %v11400_v1, %v11403_v10  ;;  %v11427_v30 = vshrl.u32 %v11158_v19, 16  ;;  %v11483_v37 = vrot.slane %v11481_v52, 5  ;;  %v19582_v1 = vld [vmem:[#allocation119_spill] sm:$0xff] }
 0x63d   : > { %v11370_v57 = vor.u32 %v11369_v45, %v11366_v43  ;;  %v11387_v31 = vrot.slane %v11385_v2, 4  ;;  %v11390_v33 = vrot.slane %v11388_v6, 5  ;;  %v11436_v43 = vshrl.u32 %v18125_v38, 16 }
 0x63e   : > { %v11379_v5 = vor.u32 %v11378_v39, %v11375_v42  ;;  %v11439_v45 = vshll.u32 %v18125_v38, 16  ;;  %v11429_v26 = vrot.slane %v11427_v30, 4  ;;  %v19578_v2 = vshll.u32 %v17855_v24, 16 }
 0x63f   : > { %v11371_v18 = vsel %vm6515_vm8, %v11361_v3, %v11370_v57  ;;  %v11391_v61 = vor.u32 %v11390_v33, %v11387_v31  ;;  %v11422_v3 = vrot.slane %v19575_v15, 4  ;;  %v11438_v27 = vrot.slane %v11436_v43, 4 }
 0x640   : > { %v11383_v53 = vsel %vm6515_vm8, %v11379_v5, %v11382_v13  ;;  %v11441_v20 = vrot.slane %v11439_v45, 5  ;;  %v11444_v6 = vrot.slane %v19578_v2, 5  ;;  %v11448_v57 = vshrl.u32 %v11159_v25, 16 }
 0x641   : > { %13110 = vmatmul.mubr.msk.bf16.gmra.mrb[24].mxu0 %vm4869_vm5, %v8298_v58  ;;  %v8311_v58 = vsel %vm364_vm0, %v8309_v8, %v8310_v11  ;;  %v11392_v22 = vsel %vm6515_vm8, %v11382_v13, %v11391_v61  ;;  %v11451_v38 = vshll.u32 %v11159_v25, 16  ;;  %v11460_v8 = vshll.u32 %v18140_v63, 16 }
 0x642   : > { %13113 = vmatprep.mubr.msk.bf16.mxu0 %vm4869_vm5, %v8301_v12  ;;  %v11442_v59 = vor.u32 %v11441_v20, %v11438_v27  ;;  %v11445_v11 = vor.u32 %v11444_v6, %v11443_v40  ;;  %v11450_v5 = vrot.slane %v11448_v57, 4  ;;  %v11459_v31 = vrot.slane %v11457_v35, 4 }
 0x643   : > { %13398 = vmatmul.mubr.msk.bf16.gmra.mrb[8].mxu1 %vm4869_vm5, %v11329_v50  ;;  %v11157_v50 = vld [vmem:[#allocation2 + $0x148] sm:$0x1f]  ;;  %v11453_v13 = vrot.slane %v11451_v38, 5  ;;  %v11462_v24 = vrot.slane %v11460_v8, 5  ;;  %v19579_v33 = vshrl.u32 %v17875_v7, 16 }
 0x644   : > { %13401 = vmatprep.mubr.msk.bf16.mxu1 %vm4869_vm5, %v11341_v46  ;;  %v11406_v4 = vshrl.u32 %v11157_v50, 16  ;;  %v11409_v12 = vshll.u32 %v11157_v50, 16  ;;  %v11415_v46 = vshrl.u32 %v18112_v36, 16  ;;  %v11423_v36 = vrot.slane %v19576_v28, 5  ;;  %v11160_v50 = vld [vmem:[#allocation2 + $0x190] sm:$0x1f] }
 0x645   : > { %v11446_v14 = vsel %vm6515_vm8, %v11442_v59, %v11445_v11  ;;  %v11454_v63 = vor.u32 %v11453_v13, %v11450_v5  ;;  %v11469_v0 = vshrl.u32 %v11160_v50, 16  ;;  %v11472_v34 = vshll.u32 %v11160_v50, 16 }
 0x646   : > { %v11408_v48 = vrot.slane %v11406_v4, 4  ;;  %v11411_v60 = vrot.slane %v11409_v12, 5  ;;  %v11417_v47 = vrot.slane %v11415_v46, 4  ;;  %v11480_v46 = vrot.slane %v11478_v29, 4 }
 0x647   : > { %v11455_v61 = vsel %vm6515_vm8, %v11445_v11, %v11454_v63  ;;  %v11471_v4 = vrot.slane %v11469_v0, 4  ;;  %v11474_v12 = vrot.slane %v11472_v34, 5 }
 0x649   : > { %13114 = vmatmul.mubr.msk.bf16.gmra.mrb[28].mxu0 %vm4869_vm5, %v8303_v55  ;;  %v11430_v55 = vshll.u32 %v11158_v19, 16 }
 0x64a   : > { %13117 = vmatprep.mubr.msk.bf16.mxu0 %vm4869_vm5, %v8306_v44  ;;  %v11412_v44 = vor.u32 %v11411_v60, %v11408_v48  ;;  %v11161_v60 = vld [vmem:[#allocation2 + $0x1a8] sm:$0x1f] }
 0x64b   : > { %13402 = vmatmul.mubr.msk.bf16.gmra.mrb[12].mxu1 %vm4869_vm5, %v11350_v21  ;;  %v11421_v21 = vor.u32 %v11420_v56, %v11417_v47  ;;  %v11432_v16 = vrot.slane %v11430_v55, 5  ;;  %v11475_v47 = vor.u32 %v11474_v12, %v11471_v4  ;;  %v11490_v56 = vshrl.u32 %v11161_v60, 16 }
 0x64c   : > { %13405 = vmatprep.mubr.msk.bf16.mxu1 %vm4869_vm5, %v11362_v54  ;;  %v11424_v54 = vor.u32 %v11423_v36, %v11422_v3  ;;  %v11413_v42 = vsel %vm6515_vm8, %v11403_v10, %v11412_v44  ;;  %v19583_v10 = vshrl.u32 %v19582_v1, 16  ;;  %v11493_v15 = vshll.u32 %v11161_v60, 16 }
 0x64d   : > { %v11433_v17 = vor.u32 %v11432_v16, %v11429_v26  ;;  %v11484_v3 = vor.u32 %v11483_v37, %v11480_v46  ;;  %v11492_v19 = vrot.slane %v11490_v56, 4 }
 0x64e   : > { %v11425_v39 = vsel %vm6515_vm8, %v11421_v21, %v11424_v54 }
 0x64f   : > { %v11434_v49 = vsel %vm6515_vm8, %v11424_v54, %v11433_v17 }
 0x651   : > { %13118 = vmatmul.mubr.msk.bf16.gmra.mrb[32].mxu0 %vm4869_vm5, %v8308_v9  ;;  %v11464_v9 = vrot.slane %v19579_v33, 4 }
 0x652   : > { %13121 = vmatprep.mubr.msk.bf16.mxu0 %vm4869_vm5, %v8311_v58 }
 0x653   : > { %13406 = vmatmul.mubr.msk.bf16.gmra.mrb[16].mxu1 %vm4869_vm5, %v11371_v18  ;;  %v19580_v18 = vshll.u32 %v17875_v7, 16 }
 0x654   : > { %13409 = vmatprep.mubr.msk.bf16.mxu1 %vm4869_vm5, %v11383_v53  ;;  %v11463_v53 = vor.u32 %v11462_v24, %v11459_v31 }
 0x655   : > { %v11465_v58 = vrot.slane %v19580_v18, 5 }
 0x657   : > { %v11466_v41 = vor.u32 %v11465_v58, %v11464_v9 }
 0x659   : > { %13122 = vmatmul.mubr.msk.bf16.gmra.mrb[36].mxu0 %vm4869_vm5, %v8313_v23  ;;  %v11467_v7 = vsel %vm6515_vm8, %v11463_v53, %v11466_v41  ;;  %v11485_v23 = vrot.slane %v19583_v10, 4  ;;  %v11476_v36 = vsel %vm6515_vm8, %v11466_v41, %v11475_v47 }
 0x65b   : > { %13410 = vmatmul.mubr.msk.bf16.gmra.mrb[20].mxu1 %vm4869_vm5, %v11392_v22  ;;  %v19584_v22 = vshll.u32 %v19582_v1, 16 }
 0x65c   : > { %13413 = vmatprep.mubr.msk.bf16.mxu1 %vm4869_vm5, %v11404_v32  ;;  %v11495_v32 = vrot.slane %v11493_v15, 5 }
 0x65d   : > { %v11486_v48 = vrot.slane %v19584_v22, 5 }
 0x65e   : > { %v11496_v55 = vor.u32 %v11495_v32, %v11492_v19  ;;  %v18522_v32 = vld [vmem:[%s18805_s4] ss:$0 sm:$0xff] }
 0x65f   : > { %v11487_v28 = vor.u32 %v11486_v48, %v11485_v23 }
 0x661   : > { %v11488_v30 = vsel %vm6515_vm8, %v11484_v3, %v11487_v28  ;;  %v11497_v44 = vsel %vm6515_vm8, %v11487_v28, %v11496_v55 }
 0x663   : > { %13414 = vmatmul.mubr.msk.bf16.gmra.mrb[24].mxu1 %vm4869_vm5, %v11413_v42 }
 0x664   : > { %13417 = vmatprep.mubr.msk.bf16.mxu1 %vm4869_vm5, %v11425_v39 }
 0x66b   : > { %13418 = vmatmul.mubr.msk.bf16.gmra.mrb[28].mxu1 %vm4869_vm5, %v11434_v49 }
 0x66c   : > { %13421 = vmatprep.mubr.msk.bf16.mxu1 %vm4869_vm5, %v11446_v14 }
 0x673   : > { %13422 = vmatmul.mubr.msk.bf16.gmra.mrb[32].mxu1 %vm4869_vm5, %v11455_v61 }
 0x674   : > { %13425 = vmatprep.mubr.msk.bf16.mxu1 %vm4869_vm5, %v11467_v7 }
 0x67b   : > { %13426 = vmatmul.mubr.msk.bf16.gmra.mrb[36].mxu1 %vm4869_vm5, %v11476_v36 }
 0x67c   : > { %13429 = vmatprep.mubr.msk.bf16.mxu1 %vm4869_vm5, %v11488_v30 }
 0x683   : > { %13430 = vmatmul.mubr.msk.bf16.gmra.mrb[40].mxu1 %vm4869_vm5, %v11497_v44 }
 0x6b4   : > { %v13061_v21 = vpop.f32.mrb[40].mxu0 }
 0x6b5   : > { %v7986_v54 = vpop.f32.mrb[41].mxu0  ;;  %v13475_v30 = vadd.f32 %v13061_v21, %v18522_v32 }
 0x6b6   : > { %v18403_v43 = vpop.f32.mrb[42].mxu0  ;;  %v13477_v55 = vadd.f32 %v18522_v32, %v7986_v54 }
 0x6b7   : > { %v18405_v45 = vpop.f32.mrb[43].mxu0 }
 0x6bc   : > { %v18407_v26 = vpop.f32.mrb[44].mxu0 }
 0x6bd   : > { %v18409_v16 = vpop.f32.mrb[45].mxu0 }
 0x6be   : > { %v18411_v42 = vpop.f32.mrb[46].mxu0 }
 0x6bf   : > { %v18413_v39 = vpop.f32.mrb[47].mxu0 }
 0x6c4   : > { %v18415_v25 = vpop.f32.mrb[48].mxu0 }
 0x6c5   : > { %v18417_v27 = vpop.f32.mrb[49].mxu0 }
 0x6c6   : > { %v18419_v20 = vpop.f32.mrb[50].mxu0 }
 0x6c7   : > { %v18421_v51 = vpop.f32.mrb[51].mxu0 }
 0x6cc   : > { %v18423_v40 = vpop.f32.mrb[52].mxu0 }
 0x6cd   : > { %v18425_v2 = vpop.f32.mrb[53].mxu0 }
 0x6ce   : > { %v18427_v6 = vpop.f32.mrb[54].mxu0 }
 0x6cf   : > { %v18429_v17 = vpop.f32.mrb[55].mxu0 }
 0x6d4   : > { %v18431_v57 = vpop.f32.mrb[56].mxu0 }
 0x6d5   : > { %v18433_v38 = vpop.f32.mrb[57].mxu0 }
 0x6d6   : > { %v18435_v35 = vpop.f32.mrb[58].mxu0 }
 0x6d7   : > { %v18437_v8 = vpop.f32.mrb[59].mxu0 }
 0x6dc   : > { %v18439_v59 = vpop.f32.mrb[60].mxu0 }
 0x6dd   : > { %v18443_v49 = vpop.f32.mrb[61].mxu0 }
 0x6de   : > { %v18441_v11 = vpop.f32.mrb[44].mxu1  ;;  %v18447_v13 = vpop.f32.mrb[62].mxu0 }
 0x6df   : > { %v18445_v5 = vpop.f32.mrb[45].mxu1  ;;  %v18451_v24 = vpop.f32.mrb[63].mxu0 }
 0x6e0   : > { %v18449_v31 = vpop.f32.mrb[46].mxu1 }
 0x6e1   : > { %v18453_v33 = vpop.f32.mrb[47].mxu1 }
 0x6e4   : > { %v18455_v9 = vpop.f32.mrb[64].mxu0 }
 0x6e5   : > { %v18459_v58 = vpop.f32.mrb[65].mxu0 }
 0x6e6   : > { %v18457_v18 = vpop.f32.mrb[48].mxu1  ;;  %v18463_v50 = vpop.f32.mrb[66].mxu0 }
 0x6e7   : > { %v18461_v14 = vpop.f32.mrb[49].mxu1  ;;  %v18467_v53 = vpop.f32.mrb[67].mxu0 }
 0x6e8   : > { %v18465_v63 = vpop.f32.mrb[50].mxu1 }
 0x6e9   : > { %v18469_v41 = vpop.f32.mrb[51].mxu1 }
 0x6ec   : > { %v18471_v0 = vpop.f32.mrb[68].mxu0 }
 0x6ed   : > { %v18475_v62 = vpop.f32.mrb[69].mxu0 }
 0x6ee   : > { %v18473_v34 = vpop.f32.mrb[52].mxu1  ;;  %19585 = vst [vmem:[#allocation123_spill] sm:$0xff] %v18475_v62  ;;  %v18479_v52 = vpop.f32.mrb[70].mxu0 }
 0x6ef   : > { %v18477_v29 = vpop.f32.mrb[53].mxu1  ;;  %19586 = vst [vmem:[#allocation124_spill] sm:$0xff] %v18479_v52  ;;  %v18483_v7 = vpop.f32.mrb[71].mxu0 }
 0x6f0   : > { %v18481_v61 = vpop.f32.mrb[54].mxu1  ;;  %19587 = vst [vmem:[#allocation121_spill] sm:$0xff] %v18483_v7 }
 0x6f1   : > { %v18485_v4 = vpop.f32.mrb[55].mxu1 }
 0x6f4   : > { %v18487_v12 = vpop.f32.mrb[72].mxu0 }
 0x6f5   : > { %19588 = vst [vmem:[#allocation122_spill] sm:$0xff] %v18487_v12  ;;  %v18491_v37 = vpop.f32.mrb[73].mxu0 }
 0x6f6   : > { %v18489_v46 = vpop.f32.mrb[56].mxu1  ;;  %19589 = vst [vmem:[#allocation45_spill] sm:$0xff] %v18491_v37  ;;  %v18495_v10 = vpop.f32.mrb[74].mxu0 }
 0x6f7   : > { %v18493_v1 = vpop.f32.mrb[57].mxu1  ;;  %19590 = vst [vmem:[#allocation43_spill] sm:$0xff] %v18495_v10  ;;  %v18499_v22 = vpop.f32.mrb[75].mxu0  ;;  %v13481_v10 = vadd.f32 %v18522_v32, %v18405_v45  ;;  %v13483_v45 = vadd.f32 %v18407_v26, %v18522_v32  ;;  %v13489_v26 = vadd.f32 %v18522_v32, %v18413_v39 }
 0x6f8   : > { %v18497_v23 = vpop.f32.mrb[58].mxu1  ;;  %19591 = vst [vmem:[#allocation46_spill] sm:$0xff] %v18499_v22 }
 0x6f9   : > { %v18501_v48 = vpop.f32.mrb[59].mxu1 }
 0x6fc   : > { %v18503_v60 = vpop.f32.mrb[76].mxu0 }
 0x6fd   : > { %19592 = vst [vmem:[#allocation47_spill] sm:$0xff] %v18503_v60  ;;  %v18507_v56 = vpop.f32.mrb[77].mxu0 }
 0x6fe   : > { %v18505_v47 = vpop.f32.mrb[60].mxu1  ;;  %19593 = vst [vmem:[#allocation53_spill] sm:$0xff] %v18507_v56  ;;  %v18511_v3 = vpop.f32.mrb[78].mxu0 }
 0x6ff   : > { %v18509_v15 = vpop.f32.mrb[61].mxu1  ;;  %19594 = vst [vmem:[#allocation50_spill] sm:$0xff] %v18511_v3  ;;  %v18515_v36 = vpop.f32.mrb[79].mxu0  ;;  %v13479_v3 = vadd.f32 %v18403_v43, %v18522_v32 }
 0x700   : > { %v18513_v28 = vpop.f32.mrb[62].mxu1  ;;  %19595 = vst [vmem:[#allocation51_spill] sm:$0xff] %v18515_v36 }
 0x701   : > { %v18517_v19 = vpop.f32.mrb[63].mxu1 }
 0x704   : > { %v18526_v44 = vpop.f32.mrb[80].mxu0 }
 0x705   : > { %19596 = vst [vmem:[#allocation48_spill] sm:$0xff] %v18526_v44  ;;  %v18530_v36 = vpop.f32.mrb[81].mxu0 }
 0x706   : > { %v13391_v56 = vpop.f32.mrb[0].mxu1  ;;  %v18534_v37 = vpop.f32.mrb[82].mxu0 }
 0x707   : > { %v13476_v60 = vadd.f32 %v13475_v30, %v13391_v56  ;;  %v11713_v22 = vpop.f32.mrb[1].mxu1  ;;  %v18536_v44 = vpop.f32.mrb[83].mxu0 }
 0x708   : > { %v13478_v21 = vadd.f32 %v13477_v55, %v11713_v22  ;;  %v13392_v54 = vpop.f32.mrb[2].mxu1  ;;  %19597 = vst [vmem:[#allocation54_spill] sm:$0xff] %v18536_v44  ;;  %v13485_v22 = vadd.f32 %v18522_v32, %v18409_v16 }
 0x709   : > { %v11974_v12 = vmax.f32 %v13476_v60, 0.0  ;;  %v13480_v7 = vadd.f32 %v13479_v3, %v13392_v54  ;;  %v11716_v52 = vpop.f32.mrb[3].mxu1 }
 0x70a   : > { %v11972_v43 = vmax.f32 %v13478_v21, 0.0  ;;  %v13482_v62 = vadd.f32 %v13481_v10, %v11716_v52  ;;  %v13487_v52 = vadd.f32 %v18411_v42, %v18522_v32 }
 0x70b   : > { %12038 = vst.msk [vmem:[%s14297_s15 + $0xb0] sm:$0xff] %vm4869_vm5, %v11974_v12  ;;  %v11975_v56 = vmax.f32 %v13480_v7, 0.0 }
 0x70c   : > { %12036 = vst.msk [vmem:[%s14297_s15 + $0xa0] sm:$0xff] %vm4869_vm5, %v11972_v43  ;;  %v11973_v30 = vmax.f32 %v13482_v62, 0.0  ;;  %v13107_v60 = vpop.f32.mrb[20].mxu0 }
 0x70d   : > { %12039 = vst.msk [vmem:[%s14297_s15 + $0xb8] sm:$0xff] %vm4869_vm5, %v11975_v56  ;;  %v13435_v7 = vadd.f32 %v13107_v60, %v18522_v32  ;;  %v8504_v12 = vpop.f32.mrb[21].mxu0 }
 0x70e   : > { %12037 = vst.msk [vmem:[%s14297_s15 + $0xa8] sm:$0xff] %vm4869_vm5, %v11973_v30  ;;  %v13395_v3 = vpop.f32.mrb[4].mxu1  ;;  %v13437_v55 = vadd.f32 %v18522_v32, %v8504_v12  ;;  %v13108_v21 = vpop.f32.mrb[22].mxu0 }
 0x70f   : > { %v13484_v10 = vadd.f32 %v13483_v45, %v13395_v3  ;;  %v11729_v62 = vpop.f32.mrb[5].mxu1  ;;  %v13436_v43 = vadd.f32 %v13435_v7, %v18441_v11  ;;  %v13439_v56 = vadd.f32 %v13108_v21, %v18522_v32  ;;  %v8507_v42 = vpop.f32.mrb[23].mxu0 }
 0x710   : > { %v13486_v16 = vadd.f32 %v13485_v22, %v11729_v62  ;;  %v13396_v54 = vpop.f32.mrb[6].mxu1  ;;  %v13438_v3 = vadd.f32 %v13437_v55, %v18445_v5  ;;  %v13441_v39 = vadd.f32 %v18522_v32, %v8507_v42  ;;  %v13491_v5 = vadd.f32 %v18415_v25, %v18522_v32 }
 0x711   : > { %v11978_v30 = vmax.f32 %v13484_v10, 0.0  ;;  %v13488_v60 = vadd.f32 %v13487_v52, %v13396_v54  ;;  %v11732_v45 = vpop.f32.mrb[7].mxu1  ;;  %v11954_v22 = vmax.f32 %v13436_v43, 0.0  ;;  %v13440_v11 = vadd.f32 %v13439_v56, %v18449_v31 }
 0x712   : > { %v11976_v12 = vmax.f32 %v13486_v16, 0.0  ;;  %v13490_v44 = vadd.f32 %v13489_v26, %v11732_v45  ;;  %v11952_v10 = vmax.f32 %v13438_v3, 0.0  ;;  %v13442_v52 = vadd.f32 %v13441_v39, %v18453_v33 }
 0x713   : > { %12042 = vst.msk [vmem:[%s14297_s15 + $0xd0] sm:$0xff] %vm4869_vm5, %v11978_v30  ;;  %v11979_v7 = vmax.f32 %v13488_v60, 0.0  ;;  %12018 = vst.msk [vmem:[%s14297_s15 + $0x10] sm:$0xff] %vm4869_vm5, %v11954_v22  ;;  %v11955_v26 = vmax.f32 %v13440_v11, 0.0  ;;  %v13493_v31 = vadd.f32 %v18522_v32, %v18417_v27  ;;  %v13497_v27 = vadd.f32 %v18522_v32, %v18421_v51 }
 0x714   : > { %12040 = vst.msk [vmem:[%s14297_s15 + $0xc0] sm:$0xff] %vm4869_vm5, %v11976_v12  ;;  %v11977_v62 = vmax.f32 %v13490_v44, 0.0  ;;  %12016 = vst.msk [vmem:[%s14297_s15] sm:$0xff] %vm4869_vm5, %v11952_v10  ;;  %v11953_v55 = vmax.f32 %v13442_v52, 0.0  ;;  %v13111_v33 = vpop.f32.mrb[24].mxu0  ;;  %v13495_v44 = vadd.f32 %v18419_v20, %v18522_v32 }
 0x715   : > { %12043 = vst.msk [vmem:[%s14297_s15 + $0xd8] sm:$0xff] %vm4869_vm5, %v11979_v7  ;;  %12019 = vst.msk [vmem:[%s14297_s15 + $0x18] sm:$0xff] %vm4869_vm5, %v11955_v26  ;;  %v13443_v25 = vadd.f32 %v13111_v33, %v18522_v32  ;;  %v8520_v16 = vpop.f32.mrb[25].mxu0 }
 0x716   : > { %12041 = vst.msk [vmem:[%s14297_s15 + $0xc8] sm:$0xff] %vm4869_vm5, %v11977_v62  ;;  %v13399_v21 = vpop.f32.mrb[8].mxu1  ;;  %12017 = vst.msk [vmem:[%s14297_s15 + $0x8] sm:$0xff] %vm4869_vm5, %v11953_v55  ;;  %v13445_v56 = vadd.f32 %v18522_v32, %v8520_v16  ;;  %v13112_v42 = vpop.f32.mrb[26].mxu0 }
 0x717   : > { %v13492_v54 = vadd.f32 %v13491_v5, %v13399_v21  ;;  %v11745_v43 = vpop.f32.mrb[9].mxu1  ;;  %v13444_v20 = vadd.f32 %v13443_v25, %v18457_v18  ;;  %v13447_v45 = vadd.f32 %v13112_v42, %v18522_v32  ;;  %v8523_v3 = vpop.f32.mrb[27].mxu0 }
 0x718   : > { %v13494_v30 = vadd.f32 %v13493_v31, %v11745_v43  ;;  %v13400_v60 = vpop.f32.mrb[10].mxu1  ;;  %v13446_v51 = vadd.f32 %v13445_v56, %v18461_v14  ;;  %v13449_v11 = vadd.f32 %v18522_v32, %v8523_v3  ;;  %v13499_v14 = vadd.f32 %v18423_v40, %v18522_v32 }
 0x719   : > { %v11982_v39 = vmax.f32 %v13492_v54, 0.0  ;;  %v13496_v12 = vadd.f32 %v13495_v44, %v13400_v60  ;;  %v11748_v22 = vpop.f32.mrb[11].mxu1  ;;  %v11958_v52 = vmax.f32 %v13444_v20, 0.0  ;;  %v13448_v18 = vadd.f32 %v13447_v45, %v18465_v63 }
 0x71a   : > { %v11980_v7 = vmax.f32 %v13494_v30, 0.0  ;;  %v13498_v10 = vadd.f32 %v13497_v27, %v11748_v22  ;;  %v11956_v5 = vmax.f32 %v13446_v51, 0.0  ;;  %v13450_v26 = vadd.f32 %v13449_v11, %v18469_v41 }
 0x71b   : > { %12046 = vst.msk [vmem:[%s14297_s15 + $0xf0] sm:$0xff] %vm4869_vm5, %v11982_v39  ;;  %v11983_v62 = vmax.f32 %v13496_v12, 0.0  ;;  %12022 = vst.msk [vmem:[%s14297_s15 + $0x30] sm:$0xff] %vm4869_vm5, %v11958_v52  ;;  %v11959_v55 = vmax.f32 %v13448_v18, 0.0  ;;  %v13501_v63 = vadd.f32 %v18522_v32, %v18425_v2  ;;  %v13503_v44 = vadd.f32 %v18427_v6, %v18522_v32 }
 0x71c   : > { %12044 = vst.msk [vmem:[%s14297_s15 + $0xe0] sm:$0xff] %vm4869_vm5, %v11980_v7  ;;  %v11981_v31 = vmax.f32 %v13498_v10, 0.0  ;;  %12020 = vst.msk [vmem:[%s14297_s15 + $0x20] sm:$0xff] %vm4869_vm5, %v11956_v5  ;;  %v11957_v33 = vmax.f32 %v13450_v26, 0.0  ;;  %v13115_v41 = vpop.f32.mrb[28].mxu0  ;;  %v13505_v2 = vadd.f32 %v18522_v32, %v18429_v17  ;;  %v13511_v26 = vadd.f32 %v18435_v35, %v18522_v32 }
 0x71d   : > { %12047 = vst.msk [vmem:[%s14297_s15 + $0xf8] sm:$0xff] %vm4869_vm5, %v11983_v62  ;;  %12023 = vst.msk [vmem:[%s14297_s15 + $0x38] sm:$0xff] %vm4869_vm5, %v11959_v55  ;;  %v13451_v40 = vadd.f32 %v13115_v41, %v18522_v32  ;;  %v8536_v25 = vpop.f32.mrb[29].mxu0 }
 0x71e   : > { %12045 = vst.msk [vmem:[%s14297_s15 + $0xe8] sm:$0xff] %vm4869_vm5, %v11981_v31  ;;  %v13403_v21 = vpop.f32.mrb[12].mxu1  ;;  %12021 = vst.msk [vmem:[%s14297_s15 + $0x28] sm:$0xff] %vm4869_vm5, %v11957_v33  ;;  %v13453_v43 = vadd.f32 %v18522_v32, %v8536_v25  ;;  %v13116_v27 = vpop.f32.mrb[30].mxu0 }
 0x71f   : > { %v13500_v16 = vadd.f32 %v13499_v14, %v13403_v21  ;;  %v11761_v54 = vpop.f32.mrb[13].mxu1  ;;  %v13452_v6 = vadd.f32 %v13451_v40, %v18473_v34  ;;  %v13455_v30 = vadd.f32 %v13116_v27, %v18522_v32  ;;  %v8539_v60 = vpop.f32.mrb[31].mxu0 }
 0x720   : > { %v13502_v56 = vadd.f32 %v13501_v63, %v11761_v54  ;;  %v13404_v42 = vpop.f32.mrb[14].mxu1  ;;  %v13454_v17 = vadd.f32 %v13453_v43, %v18477_v29  ;;  %v13457_v39 = vadd.f32 %v18522_v32, %v8539_v60  ;;  %v13507_v29 = vadd.f32 %v18431_v57, %v18522_v32 }
 0x721   : > { %v11986_v20 = vmax.f32 %v13500_v16, 0.0  ;;  %v13504_v45 = vadd.f32 %v13503_v44, %v13404_v42  ;;  %v11764_v3 = vpop.f32.mrb[15].mxu1  ;;  %v11962_v51 = vmax.f32 %v13452_v6, 0.0  ;;  %v13456_v34 = vadd.f32 %v13455_v30, %v18481_v61 }
 0x722   : > { %v11984_v12 = vmax.f32 %v13502_v56, 0.0  ;;  %v13506_v22 = vadd.f32 %v13505_v2, %v11764_v3  ;;  %v11960_v7 = vmax.f32 %v13454_v17, 0.0  ;;  %v13458_v10 = vadd.f32 %v13457_v39, %v18485_v4 }
 0x723   : > { %12050 = vst.msk [vmem:[%s14297_s15 + $0x110] sm:$0xff] %vm4869_vm5, %v11986_v20  ;;  %v11987_v11 = vmax.f32 %v13504_v45, 0.0  ;;  %12026 = vst.msk [vmem:[%s14297_s15 + $0x50] sm:$0xff] %vm4869_vm5, %v11962_v51  ;;  %v11963_v18 = vmax.f32 %v13456_v34, 0.0  ;;  %v13509_v61 = vadd.f32 %v18522_v32, %v18433_v38  ;;  %v13513_v38 = vadd.f32 %v18522_v32, %v18437_v8 }
 0x724   : > { %12048 = vst.msk [vmem:[%s14297_s15 + $0x100] sm:$0xff] %vm4869_vm5, %v11984_v12  ;;  %v11985_v52 = vmax.f32 %v13506_v22, 0.0  ;;  %12024 = vst.msk [vmem:[%s14297_s15 + $0x40] sm:$0xff] %vm4869_vm5, %v11960_v7  ;;  %v11961_v62 = vmax.f32 %v13458_v10, 0.0  ;;  %v13119_v4 = vpop.f32.mrb[32].mxu0  ;;  %v13519_v17 = vadd.f32 %v18447_v13, %v18522_v32 }
 0x725   : > { %12051 = vst.msk [vmem:[%s14297_s15 + $0x118] sm:$0xff] %vm4869_vm5, %v11987_v11  ;;  %12027 = vst.msk [vmem:[%s14297_s15 + $0x58] sm:$0xff] %vm4869_vm5, %v11963_v18  ;;  %v13459_v57 = vadd.f32 %v13119_v4, %v18522_v32  ;;  %v8552_v31 = vpop.f32.mrb[33].mxu0 }
 0x726   : > { %12049 = vst.msk [vmem:[%s14297_s15 + $0x108] sm:$0xff] %vm4869_vm5, %v11985_v52  ;;  %v13407_v5 = vpop.f32.mrb[16].mxu1  ;;  %12025 = vst.msk [vmem:[%s14297_s15 + $0x48] sm:$0xff] %vm4869_vm5, %v11961_v62  ;;  %v13461_v63 = vadd.f32 %v18522_v32, %v8552_v31  ;;  %v13120_v33 = vpop.f32.mrb[34].mxu0 }
 0x727   : > { %v13508_v14 = vadd.f32 %v13507_v29, %v13407_v5  ;;  %v11777_v55 = vpop.f32.mrb[17].mxu1  ;;  %v13460_v35 = vadd.f32 %v13459_v57, %v18489_v46  ;;  %v13463_v44 = vadd.f32 %v13120_v33, %v18522_v32  ;;  %v8555_v40 = vpop.f32.mrb[35].mxu0  ;;  %v13527_v33 = vadd.f32 %v18463_v50, %v18522_v32 }
 0x728   : > { %v13510_v41 = vadd.f32 %v13509_v61, %v11777_v55  ;;  %v13408_v21 = vpop.f32.mrb[18].mxu1  ;;  %v13462_v8 = vadd.f32 %v13461_v63, %v18493_v1  ;;  %v13465_v2 = vadd.f32 %v18522_v32, %v8555_v40  ;;  %v13515_v1 = vadd.f32 %v18439_v59, %v18522_v32 }
 0x729   : > { %v11990_v25 = vmax.f32 %v13508_v14, 0.0  ;;  %v13512_v16 = vadd.f32 %v13511_v26, %v13408_v21  ;;  %v11780_v54 = vpop.f32.mrb[19].mxu1  ;;  %v11966_v56 = vmax.f32 %v13460_v35, 0.0  ;;  %v13464_v46 = vadd.f32 %v13463_v44, %v18497_v23 }
 0x72a   : > { %v11988_v43 = vmax.f32 %v13510_v41, 0.0  ;;  %v13514_v27 = vadd.f32 %v13513_v38, %v11780_v54  ;;  %v11964_v6 = vmax.f32 %v13462_v8, 0.0  ;;  %v13466_v30 = vadd.f32 %v13465_v2, %v18501_v48 }
 0x72b   : > { %12054 = vst.msk [vmem:[%s14297_s15 + $0x130] sm:$0xff] %vm4869_vm5, %v11990_v25  ;;  %v11991_v42 = vmax.f32 %v13512_v16, 0.0  ;;  %12030 = vst.msk [vmem:[%s14297_s15 + $0x70] sm:$0xff] %vm4869_vm5, %v11966_v56  ;;  %v11967_v20 = vmax.f32 %v13464_v46, 0.0  ;;  %v13517_v23 = vadd.f32 %v18522_v32, %v18443_v49  ;;  %v13521_v49 = vadd.f32 %v18522_v32, %v18451_v24  ;;  %v19599_v56 = vld [vmem:[#allocation124_spill] sm:$0xff] }
 0x72c   : > { %12052 = vst.msk [vmem:[%s14297_s15 + $0x120] sm:$0xff] %vm4869_vm5, %v11988_v43  ;;  %v11989_v60 = vmax.f32 %v13514_v27, 0.0  ;;  %12028 = vst.msk [vmem:[%s14297_s15 + $0x60] sm:$0xff] %vm4869_vm5, %v11964_v6  ;;  %v11965_v45 = vmax.f32 %v13466_v30, 0.0  ;;  %v13123_v48 = vpop.f32.mrb[36].mxu0  ;;  %v13523_v55 = vadd.f32 %v18455_v9, %v18522_v32  ;;  %v13529_v21 = vadd.f32 %v18522_v32, %v18467_v53  ;;  %v19598_v53 = vld [vmem:[#allocation123_spill] sm:$0xff] }
 0x72d   : > { %12055 = vst.msk [vmem:[%s14297_s15 + $0x138] sm:$0xff] %vm4869_vm5, %v11991_v42  ;;  %12031 = vst.msk [vmem:[%s14297_s15 + $0x78] sm:$0xff] %vm4869_vm5, %v11967_v20  ;;  %v13467_v59 = vadd.f32 %v13123_v48, %v18522_v32  ;;  %v8568_v39 = vpop.f32.mrb[37].mxu0  ;;  %v13531_v2 = vadd.f32 %v18471_v0, %v18522_v32  ;;  %v13533_v43 = vadd.f32 %v18522_v32, %v19598_v53  ;;  %v19600_v30 = vld [vmem:[#allocation121_spill] sm:$0xff] }
 0x72e   : > { %12053 = vst.msk [vmem:[%s14297_s15 + $0x128] sm:$0xff] %vm4869_vm5, %v11989_v60  ;;  %v13411_v3 = vpop.f32.mrb[20].mxu1  ;;  %12029 = vst.msk [vmem:[%s14297_s15 + $0x68] sm:$0xff] %vm4869_vm5, %v11965_v45  ;;  %v13469_v51 = vadd.f32 %v18522_v32, %v8568_v39  ;;  %v13124_v34 = vpop.f32.mrb[38].mxu0  ;;  %v13535_v46 = vadd.f32 %v19599_v56, %v18522_v32  ;;  %v13537_v0 = vadd.f32 %v18522_v32, %v19600_v30  ;;  %v19601_v39 = vld [vmem:[#allocation122_spill] sm:$0xff] }
 0x72f   : > { %v13516_v12 = vadd.f32 %v13515_v1, %v13411_v3  ;;  %v11793_v22 = vpop.f32.mrb[21].mxu1  ;;  %v13468_v13 = vadd.f32 %v13467_v59, %v18505_v47  ;;  %v13471_v10 = vadd.f32 %v13124_v34, %v18522_v32  ;;  %v8571_v52 = vpop.f32.mrb[39].mxu0  ;;  %v19603_v34 = vld [vmem:[#allocation43_spill] sm:$0xff] }
 0x730   : > { %v13518_v11 = vadd.f32 %v13517_v23, %v11793_v22  ;;  %v13412_v7 = vpop.f32.mrb[22].mxu1  ;;  %v13470_v24 = vadd.f32 %v13469_v51, %v18509_v15  ;;  %v13473_v62 = vadd.f32 %v18522_v32, %v8571_v52  ;;  %v19602_v22 = vld [vmem:[#allocation45_spill] sm:$0xff] }
 0x731   : > { %v11994_v29 = vmax.f32 %v13516_v12, 0.0  ;;  %v13520_v18 = vadd.f32 %v13519_v17, %v13412_v7  ;;  %v11796_v61 = vpop.f32.mrb[23].mxu1  ;;  %v11970_v26 = vmax.f32 %v13468_v13, 0.0  ;;  %v13472_v47 = vadd.f32 %v13471_v10, %v18513_v28  ;;  %v19604_v10 = vld [vmem:[#allocation46_spill] sm:$0xff] }
 0x732   : > { %v11992_v4 = vmax.f32 %v13518_v11, 0.0  ;;  %v13522_v5 = vadd.f32 %v13521_v49, %v11796_v61  ;;  %v11968_v31 = vmax.f32 %v13470_v24, 0.0  ;;  %v13474_v14 = vadd.f32 %v13473_v62, %v18517_v19 }
 0x733   : > { %12058 = vst.msk [vmem:[%s14297_s15 + $0x150] sm:$0xff] %vm4869_vm5, %v11994_v29  ;;  %v11995_v57 = vmax.f32 %v13520_v18, 0.0  ;;  %12034 = vst.msk [vmem:[%s14297_s15 + $0x90] sm:$0xff] %vm4869_vm5, %v11970_v26  ;;  %v11971_v38 = vmax.f32 %v13472_v47, 0.0  ;;  %v13525_v28 = vadd.f32 %v18522_v32, %v18459_v58  ;;  %v13539_v12 = vadd.f32 %v19601_v39, %v18522_v32 }
 0x734   : > { %12056 = vst.msk [vmem:[%s14297_s15 + $0x140] sm:$0xff] %vm4869_vm5, %v11992_v4  ;;  %v11993_v15 = vmax.f32 %v13522_v5, 0.0  ;;  %12032 = vst.msk [vmem:[%s14297_s15 + $0x80] sm:$0xff] %vm4869_vm5, %v11968_v31  ;;  %v11969_v63 = vmax.f32 %v13474_v14, 0.0  ;;  %v13541_v49 = vadd.f32 %v18522_v32, %v19602_v22  ;;  %v13543_v11 = vadd.f32 %v19603_v34, %v18522_v32  ;;  %v19606_v14 = vld [vmem:[#allocation53_spill] sm:$0xff] }
 0x735   : > { %12059 = vst.msk [vmem:[%s14297_s15 + $0x158] sm:$0xff] %vm4869_vm5, %v11995_v57  ;;  %12035 = vst.msk [vmem:[%s14297_s15 + $0x98] sm:$0xff] %vm4869_vm5, %v11971_v38  ;;  %v13545_v52 = vadd.f32 %v18522_v32, %v19604_v10  ;;  %v19605_v57 = vld [vmem:[#allocation47_spill] sm:$0xff]  ;;  %v19607_v38 = vld [vmem:[#allocation50_spill] sm:$0xff] }
 0x736   : > { %12057 = vst.msk [vmem:[%s14297_s15 + $0x148] sm:$0xff] %vm4869_vm5, %v11993_v15  ;;  %v13415_v19 = vpop.f32.mrb[24].mxu1  ;;  %12033 = vst.msk [vmem:[%s14297_s15 + $0x88] sm:$0xff] %vm4869_vm5, %v11969_v63  ;;  %v13547_v31 = vadd.f32 %v19605_v57, %v18522_v32  ;;  %v13549_v15 = vadd.f32 %v18522_v32, %v19606_v14 }
 0x737   : > { %v13524_v9 = vadd.f32 %v13523_v55, %v13415_v19  ;;  %v11809_v41 = vpop.f32.mrb[25].mxu1 }
 0x738   : > { %v13526_v58 = vadd.f32 %v13525_v28, %v11809_v41  ;;  %v13416_v35 = vpop.f32.mrb[26].mxu1  ;;  %v13551_v28 = vadd.f32 %v19607_v38, %v18522_v32 }
 0x739   : > { %v11998_v44 = vmax.f32 %v13524_v9, 0.0  ;;  %v13528_v40 = vadd.f32 %v13527_v33, %v13416_v35  ;;  %v11812_v25 = vpop.f32.mrb[27].mxu1  ;;  %v19608_v33 = vld [vmem:[#allocation51_spill] sm:$0xff] }
 0x73a   : > { %v11996_v16 = vmax.f32 %v13526_v58, 0.0  ;;  %v13530_v54 = vadd.f32 %v13529_v21, %v11812_v25  ;;  %v13553_v9 = vadd.f32 %v18522_v32, %v19608_v33 }
 0x73b   : > { %12062 = vst.msk [vmem:[%s14297_s15 + $0x170] sm:$0xff] %vm4869_vm5, %v11998_v44  ;;  %v11999_v50 = vmax.f32 %v13528_v40, 0.0 }
 0x73c   : > { %12060 = vst.msk [vmem:[%s14297_s15 + $0x160] sm:$0xff] %vm4869_vm5, %v11996_v16  ;;  %v11997_v8 = vmax.f32 %v13530_v54, 0.0 }
 0x73d   : > { %12063 = vst.msk [vmem:[%s14297_s15 + $0x178] sm:$0xff] %vm4869_vm5, %v11999_v50  ;;  %v19609_v50 = vld [vmem:[#allocation48_spill] sm:$0xff] }
 0x73e   : > { %12061 = vst.msk [vmem:[%s14297_s15 + $0x168] sm:$0xff] %vm4869_vm5, %v11997_v8  ;;  %v13419_v27 = vpop.f32.mrb[28].mxu1  ;;  %v13555_v8 = vadd.f32 %v19609_v50, %v18522_v32 }
 0x73f   : > { %v13532_v42 = vadd.f32 %v13531_v2, %v13419_v27  ;;  %v11825_v6 = vpop.f32.mrb[29].mxu1  ;;  %v13557_v2 = vadd.f32 %v18522_v32, %v18530_v36 }
 0x740   : > { %v13534_v60 = vadd.f32 %v13533_v43, %v11825_v6  ;;  %v13420_v1 = vpop.f32.mrb[30].mxu1  ;;  %v13559_v43 = vadd.f32 %v18534_v37, %v18522_v32 }
 0x741   : > { %v12002_v20 = vmax.f32 %v13532_v42, 0.0  ;;  %v13536_v23 = vadd.f32 %v13535_v46, %v13420_v1  ;;  %v11828_v45 = vpop.f32.mrb[31].mxu1  ;;  %v19610_v46 = vld [vmem:[#allocation54_spill] sm:$0xff] }
 0x742   : > { %v12000_v48 = vmax.f32 %v13534_v60, 0.0  ;;  %v13538_v3 = vadd.f32 %v13537_v0, %v11828_v45  ;;  %v13561_v42 = vadd.f32 %v18522_v32, %v19610_v46 }
 0x743   : > { %12066 = vst.msk [vmem:[%s14297_s15 + $0x190] sm:$0xff] %vm4869_vm5, %v12002_v20  ;;  %v12003_v17 = vmax.f32 %v13536_v23, 0.0 }
 0x744   : > { %12064 = vst.msk [vmem:[%s14297_s15 + $0x180] sm:$0xff] %vm4869_vm5, %v12000_v48  ;;  %v12001_v59 = vmax.f32 %v13538_v3, 0.0 }
 0x745   : > { %12067 = vst.msk [vmem:[%s14297_s15 + $0x198] sm:$0xff] %vm4869_vm5, %v12003_v17 }
 0x746   : > { %12065 = vst.msk [vmem:[%s14297_s15 + $0x188] sm:$0xff] %vm4869_vm5, %v12001_v59  ;;  %v13423_v51 = vpop.f32.mrb[32].mxu1 }
 0x747   : > { %v13540_v7 = vadd.f32 %v13539_v12, %v13423_v51  ;;  %v11841_v13 = vpop.f32.mrb[33].mxu1 }
 0x748   : > { %v13542_v29 = vadd.f32 %v13541_v49, %v11841_v13  ;;  %v13424_v18 = vpop.f32.mrb[34].mxu1 }
 0x749   : > { %v12006_v61 = vmax.f32 %v13540_v7, 0.0  ;;  %v13544_v24 = vadd.f32 %v13543_v11, %v13424_v18  ;;  %v11844_v62 = vpop.f32.mrb[35].mxu1 }
 0x74a   : > { %v12004_v4 = vmax.f32 %v13542_v29, 0.0  ;;  %v13546_v5 = vadd.f32 %v13545_v52, %v11844_v62 }
 0x74b   : > { %12070 = vst.msk [vmem:[%s14297_s15 + $0x1b0] sm:$0xff] %vm4869_vm5, %v12006_v61  ;;  %v12007_v26 = vmax.f32 %v13544_v24, 0.0 }
 0x74c   : > { %12068 = vst.msk [vmem:[%s14297_s15 + $0x1a0] sm:$0xff] %vm4869_vm5, %v12004_v4  ;;  %v12005_v47 = vmax.f32 %v13546_v5, 0.0 }
 0x74d   : > { %12071 = vst.msk [vmem:[%s14297_s15 + $0x1b8] sm:$0xff] %vm4869_vm5, %v12007_v26 }
 0x74e   : > { %12069 = vst.msk [vmem:[%s14297_s15 + $0x1a8] sm:$0xff] %vm4869_vm5, %v12005_v47  ;;  %v13427_v55 = vpop.f32.mrb[36].mxu1 }
 0x74f   : > { %v13548_v63 = vadd.f32 %v13547_v31, %v13427_v55  ;;  %v11857_v19 = vpop.f32.mrb[37].mxu1 }
 0x750   : > { %v13550_v41 = vadd.f32 %v13549_v15, %v11857_v19  ;;  %v13428_v21 = vpop.f32.mrb[38].mxu1 }
 0x751   : > { %v12010_v58 = vmax.f32 %v13548_v63, 0.0  ;;  %v13552_v35 = vadd.f32 %v13551_v28, %v13428_v21  ;;  %v11860_v44 = vpop.f32.mrb[39].mxu1 }
 0x752   : > { %v12008_v40 = vmax.f32 %v13550_v41, 0.0  ;;  %v13554_v25 = vadd.f32 %v13553_v9, %v11860_v44 }
 0x753   : > { %12074 = vst.msk [vmem:[%s14297_s15 + $0x1d0] sm:$0xff] %vm4869_vm5, %v12010_v58  ;;  %v12011_v16 = vmax.f32 %v13552_v35, 0.0 }
 0x754   : > { %12072 = vst.msk [vmem:[%s14297_s15 + $0x1c0] sm:$0xff] %vm4869_vm5, %v12008_v40  ;;  %v12009_v54 = vmax.f32 %v13554_v25, 0.0 }
 0x755   : > { %12075 = vst.msk [vmem:[%s14297_s15 + $0x1d8] sm:$0xff] %vm4869_vm5, %v12011_v16 }
 0x756   : > { %12073 = vst.msk [vmem:[%s14297_s15 + $0x1c8] sm:$0xff] %vm4869_vm5, %v12009_v54  ;;  %v13431_v53 = vpop.f32.mrb[40].mxu1 }
 0x757   : > { %v13556_v27 = vadd.f32 %v13555_v8, %v13431_v53  ;;  %v11873_v56 = vpop.f32.mrb[41].mxu1 }
 0x758   : > { %v13558_v6 = vadd.f32 %v13557_v2, %v11873_v56  ;;  %v13432_v30 = vpop.f32.mrb[42].mxu1 }
 0x759   : > { %v12014_v0 = vmax.f32 %v13556_v27, 0.0  ;;  %v13560_v60 = vadd.f32 %v13559_v43, %v13432_v30  ;;  %v11876_v1 = vpop.f32.mrb[43].mxu1 }
 0x75a   : > { %v12012_v36 = vmax.f32 %v13558_v6, 0.0  ;;  %v13562_v20 = vadd.f32 %v13561_v42, %v11876_v1 }
 0x75b   : > { %12078 = vst.msk [vmem:[%s14297_s15 + $0x1f0] sm:$0xff] %vm4869_vm5, %v12014_v0  ;;  %v12015_v23 = vmax.f32 %v13560_v60, 0.0 }
 0x75c   : > { %12076 = vst.msk [vmem:[%s14297_s15 + $0x1e0] sm:$0xff] %vm4869_vm5, %v12012_v36  ;;  %v12013_v45 = vmax.f32 %v13562_v20, 0.0 }
 0x75d   : > { %12079 = vst.msk [vmem:[%s14297_s15 + $0x1f8] sm:$0xff] %vm4869_vm5, %v12015_v23 }
 0x75e   : > { %12077 = vst.msk [vmem:[%s14297_s15 + $0x1e8] sm:$0xff] %vm4869_vm5, %v12013_v45 }
 0x75f PF: > { %s15_s22 = sadd.s32 1, %s14213_s22   ;;  %s19611_s18 = smov %s14205_s20 }
 0x760   : > { %p12_p9 = scmp.ge.s32.totalorder %s15_s22, 6   ;;  %s19612_s19 = smov %s14209_s21 }
 0x761   : > { %s19613_s20 = smov %s19616_s23  ;;  %s19614_s21 = smov %s19620_s24 }
 0x762   :  { %14 = sbr.rel (!%p12_p9) target bundleno = 3 (0x3), region = 90 }

</bundles_post_ra>
